<compile_context>
chip_gen: v7x
topology: tpu7x:2x2x1
jax: 0.10.0
libtpu: 0.0.40
codegen_flags: <defaults>
</compile_context>

<pallas_src>
import functools

import jax
import jax.numpy as jnp
from jax import lax
from jax.experimental import pallas as pl
from jax.experimental.pallas import tpu as pltpu


def _round_up(x, m):
    return ((x + m - 1) // m) * m


def _block_vmem_bytes(bb, L, E, H, store_per_step):
    """Rough per-block VMEM footprint (bytes) used to size block_b / vmem limit."""
    f4 = 4
    io_in = bb * (L * E + E + 2 * H + L * H) * f4          # emb, dec, h0, c0, ctx
    io_out = (L * bb * L + bb * L + 2 * bb * H) * f4       # alphas, ptrs, hT, cT
    weights = ((E + H) * 4 * H + 4 * H + 2 * H * H + H
               + H * H + H + H * H + H + H) * f4
    live = 3 * bb * L * H * f4                              # projected ctx, V bcast, tanh temp
    live += bb * (E + 8 * H + L) * f4                       # carries + gates
    if not store_per_step:
        live += 2 * L * bb * L * f4                          # outs_acc carry + step_iota
    return 2 * (io_in + io_out) + weights + live             # inputs/outputs double-buffered


def _choose_block_b(B, L, E, H, store_per_step, budget_bytes):
    B8 = _round_up(max(B, 1), 8)
    if B8 < 16:
        bb = B8                                   # tiny batch: single block, no grid overhead
    else:
        # >= 2 blocks for megacore, up to 128 rows to fill the MXU M dimension.
        bb = max(8, min(128, (B8 // 2) // 8 * 8))
    while bb > 8 and _block_vmem_bytes(bb, L, E, H, store_per_step) > budget_bytes:
        bb = max(8, (bb // 2) // 8 * 8)
    return bb


def decoder_kernel(
    emb_ref, dec_ref, h0_ref, c0_ref, ctx_in_ref,
    w_x_ref, w_h_ref, b_g_ref,                    # LSTM weights (E,4H), (H,4H), fused bias (1,4H)
    w_out_a_ref, w_out_b_ref, b_out_ref,          # hidden_out split (H,H), (H,H), (1,H)
    w_in_ref, b_in_ref, w_ctx_ref, b_ctx_ref, v_ref,
    out_ref, ptr_ref, hT_ref, cT_ref,
    *, store_per_step, use_mxu_reduce, use_bf16, unroll,
):
    Bt, L, E = emb_ref.shape
    H = h0_ref.shape[1]
    mm_dt = jnp.bfloat16 if use_bf16 else jnp.float32
    attn_dt = jnp.bfloat16 if use_bf16 else jnp.float32

    emb = emb_ref[...]                            # (Bt, L, E)
    context = ctx_in_ref[...]                     # (Bt, L, H)
    W_x, W_h = w_x_ref[...], w_h_ref[...]
    W_out_a, W_out_b = w_out_a_ref[...], w_out_b_ref[...]
    W_in = w_in_ref[...]
    W_ctx = w_ctx_ref[...]

    # Hoisted broadcasts (JAX does not CSE broadcast_in_dim; with unroll they would be
    # re-emitted per unrolled iteration on the serial critical path).
    b_g = jnp.broadcast_to(b_g_ref[...], (Bt, 4 * H))
    b_in = jnp.broadcast_to(b_in_ref[...], (Bt, H))
    b_out = jnp.broadcast_to(b_out_ref[...], (Bt, H))
    V_b = jnp.broadcast_to(v_ref[...].reshape(1, 1, H), (Bt, L, H)).astype(attn_dt)

    # Conv1d(kernel_size=1) over the context == per-position linear projection (once).
    ctx = (jnp.dot(context.reshape(Bt * L, H).astype(mm_dt), W_ctx,
                   preferred_element_type=jnp.float32)
           + b_ctx_ref[...]).reshape(Bt, L, H)

    if use_mxu_reduce:
        ctx_mm = ctx.astype(mm_dt)
        emb_mm = emb.astype(mm_dt)

    lane_iota = lax.broadcasted_iota(jnp.int32, (Bt, L), 1)          # position ids
    if not store_per_step:
        step_iota = lax.broadcasted_iota(jnp.int32, (L, Bt, L), 0)   # step ids (step-major)

    def body(i, carry):
        if store_per_step:
            x, h, c, mask, ptrs_acc = carry
        else:
            x, h, c, mask, ptrs_acc, outs_acc = carry

        # --- LSTM-style cell: two accumulating dots (no per-step lane concat). ---
        gates = (jnp.dot(x.astype(mm_dt), W_x, preferred_element_type=jnp.float32)
                 + jnp.dot(h.astype(mm_dt), W_h, preferred_element_type=jnp.float32)
                 + b_g)
        i_g = jax.nn.sigmoid(gates[:, 0:H])
        f_g = jax.nn.sigmoid(gates[:, H:2 * H])
        g_g = jnp.tanh(gates[:, 2 * H:3 * H])
        o_g = jax.nn.sigmoid(gates[:, 3 * H:4 * H])
        c_t = f_g * c + i_g * g_g
        h_lstm = jnp.tanh(c_t) * o_g

        # --- Attention ---
        inp = (jnp.dot(h_lstm.astype(mm_dt), W_in, preferred_element_type=jnp.float32)
               + b_in)
        t = jnp.tanh((inp[:, None, :] + ctx).astype(attn_dt))        # (Bt, L, H)
        # t.V stays VPU multiply + XLU lane reduce: an (*,H)x(H,1) matvec would waste
        # the MXU on a lane-1 output.
        att = jnp.sum((t * V_b).astype(jnp.float32), axis=-1)        # (Bt, L)
        att = jnp.where(mask == 0.0, -jnp.inf, att)                  # att[mask==0] = -inf
        att_max = jnp.max(att, axis=1, keepdims=True)
        e = jnp.exp(att - att_max)
        alpha = e / jnp.sum(e, axis=1, keepdims=True)                # softmax, (Bt, L)

        # --- Pointer selection (masked argmax, first index on ties) ---
        masked_outs = alpha * mask
        mval = jnp.max(masked_outs, axis=1, keepdims=True)
        idx = jnp.min(jnp.where(masked_outs == mval, lane_iota, L), axis=1)   # (Bt,)
        one_hot = (lane_iota == idx[:, None]).astype(jnp.float32)
        new_mask = mask * (1.0 - one_hot)

        if use_mxu_reduce:
            # Large L,H: axis-1 reductions go to the MXU (only 2 XLU units and they sit
            # on the serial critical path).
            hidden_state = jnp.einsum(
                'bql,blh->bqh', alpha[:, None, :].astype(mm_dt), ctx_mm,
                preferred_element_type=jnp.float32)[:, 0, :]
            x_next = jnp.einsum(
                'bql,ble->bqe', one_hot[:, None, :].astype(mm_dt), emb_mm,
                preferred_element_type=jnp.float32)[:, 0, :]
        else:
            hidden_state = jnp.sum(ctx * alpha[:, :, None], axis=1)  # (Bt, H)
            x_next = jnp.sum(emb * one_hot[:, :, None], axis=1)      # (Bt, E)

        # hidden_out(cat(hidden_state, h_lstm)) as two dots on the pre-split weight.
        h_t = jnp.tanh(
            jnp.dot(hidden_state.astype(mm_dt), W_out_a, preferred_element_type=jnp.float32)
            + jnp.dot(h_lstm.astype(mm_dt), W_out_b, preferred_element_type=jnp.float32)
            + b_out)

        ptrs_acc = jnp.where(lane_iota == i, idx[:, None], ptrs_acc)
        if store_per_step:
            # Direct per-step store: dynamic index on the major (step) axis of the
            # step-major output. One narrow store per step hides under the recurrence
            # latency and removes the O(L^3) select accumulation.
            out_ref[i] = alpha
            return (x_next, h_t, c_t, new_mask, ptrs_acc)
        outs_acc = jnp.where(step_iota == i, alpha[None, :, :], outs_acc)
        return (x_next, h_t, c_t, new_mask, ptrs_acc, outs_acc)

    init = (dec_ref[...], h0_ref[...], c0_ref[...],
            jnp.ones((Bt, L), jnp.float32),
            jnp.zeros((Bt, L), jnp.int32))
    if not store_per_step:
        init = init + (jnp.zeros((L, Bt, L), jnp.float32),)

    carry = lax.fori_loop(0, L, body, init, unroll=unroll)

    if store_per_step:
        _, h_fin, c_fin, _, ptrs_acc = carry
    else:
        _, h_fin, c_fin, _, ptrs_acc, outs_acc = carry
        out_ref[...] = outs_acc          # single flush (step-major (L, Bt, L))

    ptr_ref[...] = ptrs_acc              # (Bt, L)
    hT_ref[...] = h_fin                  # (Bt, H)
    cT_ref[...] = c_fin                  # (Bt, H)


def decoder_forward(params, embedded_inputs, decoder_input, h0, c0, context,
                    *, block_b=None, use_bf16=False,
                    vmem_budget_bytes=40 * 1024 * 1024):
    B, L, E = embedded_inputs.shape
    H = h0.shape[1]

    store_per_step = L > 16                 # carry-accumulate only for tiny L
    use_mxu_reduce = (L >= 64) and (H >= 64)

    if block_b is None:
        block_b = _choose_block_b(B, L, E, H, store_per_step, vmem_budget_bytes)
    Bp = _round_up(B, block_b)
    nb = Bp // block_b

    def pad_b(a):
        if Bp == B:
            return a
        return jnp.pad(a, [(0, Bp - B)] + [(0, 0)] * (a.ndim - 1))

    emb_p, dec_p = pad_b(embedded_inputs), pad_b(decoder_input)
    h0_p, c0_p, ctx_p = pad_b(h0), pad_b(c0), pad_b(context)

    w_dt = jnp.bfloat16 if use_bf16 else jnp.float32
    W_x = params["W_ih"].astype(w_dt)
    W_h = params["W_hh"].astype(w_dt)
    b_g = params["b_ih"] + params["b_hh"]               # fused LSTM bias (f32)
    W_out_a = params["W_out"][:H, :].astype(w_dt)       # hidden_state half
    W_out_b = params["W_out"][H:, :].astype(w_dt)       # h_lstm half
    W_in = params["W_in"].astype(w_dt)
    W_ctx = params["W_ctx"].astype(w_dt)

    inputs = (emb_p, dec_p, h0_p, c0_p, ctx_p,
              W_x, W_h, b_g, W_out_a, W_out_b, params["b_out"],
              W_in, params["b_in"], W_ctx, params["b_ctx"], params["V"])

    def batch_spec(shape, batch_axis=0):
        blk = list(shape)
        blk[batch_axis] = block_b
        n = len(shape)

        def imap(b, batch_axis=batch_axis, n=n):
            idx = [0] * n
            idx[batch_axis] = b
            return tuple(idx)

        return pl.BlockSpec(tuple(blk), imap)

    def const_spec(shape):
        n = len(shape)
        return pl.BlockSpec(tuple(shape), lambda b, n=n: (0,) * n)

    in_specs = ([batch_spec(emb_p.shape), batch_spec(dec_p.shape),
                 batch_spec(h0_p.shape), batch_spec(c0_p.shape),
                 batch_spec(ctx_p.shape)]
                + [const_spec(w.shape) for w in inputs[5:]])

    out_shapes = (
        jax.ShapeDtypeStruct((L, Bp, L), jnp.float32),   # per-step alphas, step-major
        jax.ShapeDtypeStruct((Bp, L), jnp.int32),        # per-step pointers
        jax.ShapeDtypeStruct((Bp, H), jnp.float32),      # final h
        jax.ShapeDtypeStruct((Bp, H), jnp.float32),      # final c
    )
    out_specs = [batch_spec(out_shapes[0].shape, batch_axis=1),
                 batch_spec(out_shapes[1].shape),
                 batch_spec(out_shapes[2].shape),
                 batch_spec(out_shapes[3].shape)]

    kernel = functools.partial(decoder_kernel,
                               store_per_step=store_per_step,
                               use_mxu_reduce=use_mxu_reduce,
                               use_bf16=use_bf16,
                               unroll=max(1, min(L, 8)))   # cap unroll (spill cliff)

    est = _block_vmem_bytes(block_b, L, E, H, store_per_step)
    vmem_limit = int(min(max(int(est * 1.3), 32 * 1024 * 1024), 64 * 1024 * 1024))

    grid_spec = pl.GridSpec(grid=(nb,), in_specs=in_specs, out_specs=out_specs)

    outs_sm, ptrs, hT, cT = pl.pallas_call(
        kernel,
        out_shape=out_shapes,
        grid_spec=grid_spec,
        compiler_params=pltpu.CompilerParams(
            dimension_semantics=("parallel",),   # batch blocks -> 2nd TC on v7x
            vmem_limit_bytes=vmem_limit),
    )(*inputs)

    outputs = jnp.transpose(outs_sm, (1, 0, 2))[:B]   # back to torch (B, L, L) layout
    return (outputs, ptrs[:B]), (hT[:B], cT[:B])


def init_params(key, embedding_dim, hidden_dim):
    E, H = embedding_dim, hidden_dim
    ks = jax.random.split(key, 11)

    def lin(kw, kb, fan_in, shape_w, shape_b):
        bound = 1.0 / (fan_in ** 0.5)
        w = jax.random.uniform(kw, shape_w, jnp.float32, -bound, bound)
        b = jax.random.uniform(kb, shape_b, jnp.float32, -bound, bound)
        return w, b

    W_ih, b_ih = lin(ks[0], ks[1], E, (E, 4 * H), (1, 4 * H))       # input_to_hidden
    W_hh, b_hh = lin(ks[2], ks[3], H, (H, 4 * H), (1, 4 * H))       # hiddden_to_hidden
    W_out, b_out = lin(ks[4], ks[5], 2 * H, (2 * H, H), (1, H))     # hidden_out
    W_in, b_in = lin(ks[6], ks[7], H, (H, H), (1, H))               # att.input_linear
    W_ctx, b_ctx = lin(ks[8], ks[9], H, (H, H), (1, H))             # att.context_linear (1x1 conv)
    V = jax.random.uniform(ks[10], (1, H), jnp.float32, -1.0, 1.0)  # att.V
    return dict(W_ih=W_ih, b_ih=b_ih, W_hh=W_hh, b_hh=b_hh,
                W_out=W_out, b_out=b_out, W_in=W_in, b_in=b_in,
                W_ctx=W_ctx, b_ctx=b_ctx, V=V)


def decoder_reference(params, emb, dec, h0, c0, context):
    """Pure-JAX mirror of the PyTorch forward (same layout/weights, unfused)."""
    B, L, E = emb.shape
    H = h0.shape[1]
    W_ih, b_ih = params["W_ih"], params["b_ih"]
    W_hh, b_hh = params["W_hh"], params["b_hh"]
    W_out, b_out = params["W_out"], params["b_out"]
    W_in, b_in = params["W_in"], params["b_in"]
    W_ctx, b_ctx = params["W_ctx"], params["b_ctx"]
    V = params["V"]

    ctx = (context.reshape(B * L, H) @ W_ctx + b_ctx).reshape(B, L, H)
    iota = jnp.broadcast_to(jnp.arange(L, dtype=jnp.int32)[None, :], (B, L))
    mask = jnp.ones((B, L), jnp.float32)
    x, h, c = dec, h0, c0
    outs_list, ptr_list = [], []
    for _ in range(L):
        gates = x @ W_ih + b_ih + h @ W_hh + b_hh
        i_g = jax.nn.sigmoid(gates[:, 0:H])
        f_g = jax.nn.sigmoid(gates[:, H:2 * H])
        g_g = jnp.tanh(gates[:, 2 * H:3 * H])
        o_g = jax.nn.sigmoid(gates[:, 3 * H:4 * H])
        c_t = f_g * c + i_g * g_g
        h_lstm = jnp.tanh(c_t) * o_g

        inp = h_lstm @ W_in + b_in
        t = jnp.tanh(inp[:, None, :] + ctx)
        att = jnp.sum(t * V[None, :, :], axis=-1)
        att = jnp.where(mask == 0.0, -jnp.inf, att)
        att_max = jnp.max(att, axis=1, keepdims=True)
        e = jnp.exp(att - att_max)
        alpha = e / jnp.sum(e, axis=1, keepdims=True)
        hidden_state = jnp.sum(ctx * alpha[:, :, None], axis=1)
        h_t = jnp.tanh(hidden_state @ W_out[:H, :] + h_lstm @ W_out[H:, :] + b_out)

        masked_outs = alpha * mask
        mval = jnp.max(masked_outs, axis=1, keepdims=True)
        idx = jnp.min(jnp.where(masked_outs == mval, iota, L), axis=1)
        one_hot = (iota == idx[:, None]).astype(jnp.float32)
        mask = mask * (1.0 - one_hot)
        x = jnp.sum(emb * one_hot[:, :, None], axis=1)
        h, c = h_t, c_t
        outs_list.append(alpha)
        ptr_list.append(idx)
    outputs = jnp.stack(outs_list, axis=1)          # (B, L, L)
    pointers = jnp.stack(ptr_list, axis=1)          # (B, L)
    return (outputs, pointers), (h, c)


if __name__ == "__main__":
    B, L, E, H = 2, 8, 16, 32     # batch, seq len, embedding_dim, hidden_dim
    key = jax.random.PRNGKey(0)
    k1, k2, k3, k4, k5, kp = jax.random.split(key, 6)

    embedded_inputs = jax.random.normal(k1, (B, L, E), jnp.float32)
    decoder_input = jax.random.normal(k2, (B, E), jnp.float32)
    h0 = jax.random.normal(k3, (B, H), jnp.float32)
    c0 = jax.random.normal(k4, (B, H), jnp.float32)
    context = jax.random.normal(k5, (B, L, H), jnp.float32)
    params = init_params(kp, E, H)

    (outs, ptrs), (hT, cT) = decoder_forward(
        params, embedded_inputs, decoder_input, h0, c0, context)
    jax.block_until_ready((outs, ptrs, hT, cT))

    (r_outs, r_ptrs), (r_hT, r_cT) = decoder_reference(
        params, embedded_inputs, decoder_input, h0, c0, context)

    assert outs.shape == (B, L, L) and ptrs.shape == (B, L)
    assert jnp.allclose(outs, r_outs, atol=1e-4, rtol=1e-4)
    assert bool(jnp.all(ptrs == r_ptrs))
    assert jnp.allclose(hT, r_hT, atol=1e-4, rtol=1e-4)
    assert jnp.allclose(cT, r_cT, atol=1e-4, rtol=1e-4)
    print("KERNEL_OK")
</pallas_src>

<mosaic_0001>
module attributes {stable_mosaic.version = 11 : i64} {
  func.func @decoder_kernel(%arg0: i32, %arg1: memref<8x8x16xf32, #tpu.memory_space<vmem>>, %arg2: memref<8x16xf32, #tpu.memory_space<vmem>>, %arg3: memref<8x32xf32, #tpu.memory_space<vmem>>, %arg4: memref<8x32xf32, #tpu.memory_space<vmem>>, %arg5: memref<8x8x32xf32, #tpu.memory_space<vmem>>, %arg6: memref<16x128xf32, #tpu.memory_space<vmem>>, %arg7: memref<32x128xf32, #tpu.memory_space<vmem>>, %arg8: memref<1x128xf32, #tpu.memory_space<vmem>>, %arg9: memref<32x32xf32, #tpu.memory_space<vmem>>, %arg10: memref<32x32xf32, #tpu.memory_space<vmem>>, %arg11: memref<1x32xf32, #tpu.memory_space<vmem>>, %arg12: memref<32x32xf32, #tpu.memory_space<vmem>>, %arg13: memref<1x32xf32, #tpu.memory_space<vmem>>, %arg14: memref<32x32xf32, #tpu.memory_space<vmem>>, %arg15: memref<1x32xf32, #tpu.memory_space<vmem>>, %arg16: memref<1x32xf32, #tpu.memory_space<vmem>>, %arg17: memref<8x8x8xf32, #tpu.memory_space<vmem>>, %arg18: memref<8x8xi32, #tpu.memory_space<vmem>>, %arg19: memref<8x32xf32, #tpu.memory_space<vmem>>, %arg20: memref<8x32xf32, #tpu.memory_space<vmem>>) attributes {dimension_semantics = [#tpu.dimension_semantics<parallel>], iteration_bounds = array<i64: 1>, scalar_prefetch = 0 : i64, scratch_operands = 0 : i64, tpu.core_type = #tpu.core_type<tc>, window_params = [{transform_indices = @transform_0, window_bounds = array<i64: 8, 8, 16>}, {transform_indices = @transform_1, window_bounds = array<i64: 8, 16>}, {transform_indices = @transform_2, window_bounds = array<i64: 8, 32>}, {transform_indices = @transform_3, window_bounds = array<i64: 8, 32>}, {transform_indices = @transform_4, window_bounds = array<i64: 8, 8, 32>}, {pipeline_mode = #tpu.pipeline_mode<synchronous>, transform_indices = @transform_5, window_bounds = array<i64: 16, 128>}, {pipeline_mode = #tpu.pipeline_mode<synchronous>, transform_indices = @transform_6, window_bounds = array<i64: 32, 128>}, {pipeline_mode = #tpu.pipeline_mode<synchronous>, transform_indices = @transform_7, window_bounds = array<i64: 1, 128>}, {pipeline_mode = #tpu.pipeline_mode<synchronous>, transform_indices = @transform_8, window_bounds = array<i64: 32, 32>}, {pipeline_mode = #tpu.pipeline_mode<synchronous>, transform_indices = @transform_9, window_bounds = array<i64: 32, 32>}, {pipeline_mode = #tpu.pipeline_mode<synchronous>, transform_indices = @transform_10, window_bounds = array<i64: 1, 32>}, {pipeline_mode = #tpu.pipeline_mode<synchronous>, transform_indices = @transform_11, window_bounds = array<i64: 32, 32>}, {pipeline_mode = #tpu.pipeline_mode<synchronous>, transform_indices = @transform_12, window_bounds = array<i64: 1, 32>}, {pipeline_mode = #tpu.pipeline_mode<synchronous>, transform_indices = @transform_13, window_bounds = array<i64: 32, 32>}, {pipeline_mode = #tpu.pipeline_mode<synchronous>, transform_indices = @transform_14, window_bounds = array<i64: 1, 32>}, {pipeline_mode = #tpu.pipeline_mode<synchronous>, transform_indices = @transform_15, window_bounds = array<i64: 1, 32>}, {transform_indices = @transform_16, window_bounds = array<i64: 8, 8, 8>}, {transform_indices = @transform_17, window_bounds = array<i64: 8, 8>}, {transform_indices = @transform_18, window_bounds = array<i64: 8, 32>}, {transform_indices = @transform_19, window_bounds = array<i64: 8, 32>}]} {
    %c0 = arith.constant 0 : index
    %c0_0 = arith.constant 0 : index
    %c0_1 = arith.constant 0 : index
    %0 = vector.load %arg1[%c0, %c0_0, %c0_1] : memref<8x8x16xf32, #tpu.memory_space<vmem>>, vector<8x8x16xf32>
    %c0_2 = arith.constant 0 : index
    %c0_3 = arith.constant 0 : index
    %c0_4 = arith.constant 0 : index
    %1 = vector.load %arg5[%c0_2, %c0_3, %c0_4] : memref<8x8x32xf32, #tpu.memory_space<vmem>>, vector<8x8x32xf32>
    %c0_5 = arith.constant 0 : index
    %c0_6 = arith.constant 0 : index
    %2 = vector.load %arg6[%c0_5, %c0_6] : memref<16x128xf32, #tpu.memory_space<vmem>>, vector<16x128xf32>
    %c0_7 = arith.constant 0 : index
    %c0_8 = arith.constant 0 : index
    %3 = vector.load %arg7[%c0_7, %c0_8] : memref<32x128xf32, #tpu.memory_space<vmem>>, vector<32x128xf32>
    %c0_9 = arith.constant 0 : index
    %c0_10 = arith.constant 0 : index
    %4 = vector.load %arg9[%c0_9, %c0_10] : memref<32x32xf32, #tpu.memory_space<vmem>>, vector<32x32xf32>
    %c0_11 = arith.constant 0 : index
    %c0_12 = arith.constant 0 : index
    %5 = vector.load %arg10[%c0_11, %c0_12] : memref<32x32xf32, #tpu.memory_space<vmem>>, vector<32x32xf32>
    %c0_13 = arith.constant 0 : index
    %c0_14 = arith.constant 0 : index
    %6 = vector.load %arg12[%c0_13, %c0_14] : memref<32x32xf32, #tpu.memory_space<vmem>>, vector<32x32xf32>
    %c0_15 = arith.constant 0 : index
    %c0_16 = arith.constant 0 : index
    %7 = vector.load %arg14[%c0_15, %c0_16] : memref<32x32xf32, #tpu.memory_space<vmem>>, vector<32x32xf32>
    %c0_17 = arith.constant 0 : index
    %c0_18 = arith.constant 0 : index
    %8 = vector.load %arg8[%c0_17, %c0_18] : memref<1x128xf32, #tpu.memory_space<vmem>>, vector<1x128xf32>
    %9 = vector.shape_cast %8 : vector<1x128xf32> to vector<1x128xf32>
    %10 = vector.broadcast %9 : vector<1x128xf32> to vector<8x128xf32>
    %c0_19 = arith.constant 0 : index
    %c0_20 = arith.constant 0 : index
    %11 = vector.load %arg13[%c0_19, %c0_20] : memref<1x32xf32, #tpu.memory_space<vmem>>, vector<1x32xf32>
    %12 = vector.shape_cast %11 : vector<1x32xf32> to vector<1x32xf32>
    %13 = vector.broadcast %12 : vector<1x32xf32> to vector<8x32xf32>
    %c0_21 = arith.constant 0 : index
    %c0_22 = arith.constant 0 : index
    %14 = vector.load %arg11[%c0_21, %c0_22] : memref<1x32xf32, #tpu.memory_space<vmem>>, vector<1x32xf32>
    %15 = vector.shape_cast %14 : vector<1x32xf32> to vector<1x32xf32>
    %16 = vector.broadcast %15 : vector<1x32xf32> to vector<8x32xf32>
    %c0_23 = arith.constant 0 : index
    %c0_24 = arith.constant 0 : index
    %17 = vector.load %arg16[%c0_23, %c0_24] : memref<1x32xf32, #tpu.memory_space<vmem>>, vector<1x32xf32>
    %18 = vector.shape_cast %17 : vector<1x32xf32> to vector<1x1x32xf32>
    %19 = vector.shape_cast %18 : vector<1x1x32xf32> to vector<1x1x32xf32>
    %20 = vector.broadcast %19 : vector<1x1x32xf32> to vector<8x8x32xf32>
    %21 = vector.shape_cast %1 : vector<8x8x32xf32> to vector<64x32xf32>
    %cst = arith.constant dense<0.000000e+00> : vector<64x32xf32>
    %22 = tpu.matmul %21, %7, %cst {dimension_numbers = #tpu.dot_dimension_numbers<[1], [0], [0], [1], [0, 0, 1, 1], [], []>} : vector<64x32xf32>, vector<32x32xf32>, vector<64x32xf32> -> vector<64x32xf32>
    %c0_25 = arith.constant 0 : index
    %c0_26 = arith.constant 0 : index
    %23 = vector.load %arg15[%c0_25, %c0_26] : memref<1x32xf32, #tpu.memory_space<vmem>>, vector<1x32xf32>
    %24 = vector.broadcast %23 : vector<1x32xf32> to vector<64x32xf32>
    %25 = arith.addf %22, %24 : vector<64x32xf32>
    %26 = vector.shape_cast %25 : vector<64x32xf32> to vector<8x8x32xf32>
    %27 = tpu.iota {dimensions = array<i32: 1>} : vector<8x8xi32>
    %28 = tpu.iota {dimensions = array<i32: 0>} : vector<8x8x8xi32>
    %c0_27 = arith.constant 0 : index
    %c0_28 = arith.constant 0 : index
    %29 = vector.load %arg2[%c0_27, %c0_28] : memref<8x16xf32, #tpu.memory_space<vmem>>, vector<8x16xf32>
    %c0_29 = arith.constant 0 : index
    %c0_30 = arith.constant 0 : index
    %30 = vector.load %arg3[%c0_29, %c0_30] : memref<8x32xf32, #tpu.memory_space<vmem>>, vector<8x32xf32>
    %c0_31 = arith.constant 0 : index
    %c0_32 = arith.constant 0 : index
    %31 = vector.load %arg4[%c0_31, %c0_32] : memref<8x32xf32, #tpu.memory_space<vmem>>, vector<8x32xf32>
    %cst_33 = arith.constant 1.000000e+00 : f32
    %32 = vector.broadcast %cst_33 : f32 to vector<8x8xf32>
    %c0_i32 = arith.constant 0 : i32
    %33 = vector.broadcast %c0_i32 : i32 to vector<8x8xi32>
    %cst_34 = arith.constant 0.000000e+00 : f32
    %34 = vector.broadcast %cst_34 : f32 to vector<8x8x8xf32>
    %c0_i32_35 = arith.constant 0 : i32
    %cst_36 = arith.constant dense<0.000000e+00> : vector<8x128xf32>
    %35 = tpu.matmul %29, %2, %cst_36 {dimension_numbers = #tpu.dot_dimension_numbers<[1], [0], [0], [1], [0, 0, 1, 1], [], []>} : vector<8x16xf32>, vector<16x128xf32>, vector<8x128xf32> -> vector<8x128xf32>
    %cst_37 = arith.constant dense<0.000000e+00> : vector<8x128xf32>
    %36 = tpu.matmul %30, %3, %cst_37 {dimension_numbers = #tpu.dot_dimension_numbers<[1], [0], [0], [1], [0, 0, 1, 1], [], []>} : vector<8x32xf32>, vector<32x128xf32>, vector<8x128xf32> -> vector<8x128xf32>
    %37 = arith.addf %35, %36 : vector<8x128xf32>
    %38 = arith.addf %37, %10 : vector<8x128xf32>
    %39 = vector.extract_strided_slice %38 {offsets = [0, 0], sizes = [8, 32], strides = [1, 1]} : vector<8x128xf32> to vector<8x32xf32>
    %40 = arith.negf %39 : vector<8x32xf32>
    %41 = math.exp %40 : vector<8x32xf32>
    %cst_38 = arith.constant 1.000000e+00 : f32
    %42 = vector.broadcast %cst_38 : f32 to vector<8x32xf32>
    %43 = arith.addf %42, %41 : vector<8x32xf32>
    %44 = arith.divf %42, %43 : vector<8x32xf32>
    %45 = vector.extract_strided_slice %38 {offsets = [0, 32], sizes = [8, 32], strides = [1, 1]} : vector<8x128xf32> to vector<8x32xf32>
    %46 = arith.negf %45 : vector<8x32xf32>
    %47 = math.exp %46 : vector<8x32xf32>
    %cst_39 = arith.constant 1.000000e+00 : f32
    %48 = vector.broadcast %cst_39 : f32 to vector<8x32xf32>
    %49 = arith.addf %48, %47 : vector<8x32xf32>
    %50 = arith.divf %48, %49 : vector<8x32xf32>
    %51 = vector.extract_strided_slice %38 {offsets = [0, 64], sizes = [8, 32], strides = [1, 1]} : vector<8x128xf32> to vector<8x32xf32>
    %52 = math.tanh %51 : vector<8x32xf32>
    %53 = vector.extract_strided_slice %38 {offsets = [0, 96], sizes = [8, 32], strides = [1, 1]} : vector<8x128xf32> to vector<8x32xf32>
    %54 = arith.negf %53 : vector<8x32xf32>
    %55 = math.exp %54 : vector<8x32xf32>
    %cst_40 = arith.constant 1.000000e+00 : f32
    %56 = vector.broadcast %cst_40 : f32 to vector<8x32xf32>
    %57 = arith.addf %56, %55 : vector<8x32xf32>
    %58 = arith.divf %56, %57 : vector<8x32xf32>
    %59 = arith.mulf %50, %31 : vector<8x32xf32>
    %60 = arith.mulf %44, %52 : vector<8x32xf32>
    %61 = arith.addf %59, %60 : vector<8x32xf32>
    %62 = math.tanh %61 : vector<8x32xf32>
    %63 = arith.mulf %62, %58 : vector<8x32xf32>
    %cst_41 = arith.constant dense<0.000000e+00> : vector<8x32xf32>
    %64 = tpu.matmul %63, %6, %cst_41 {dimension_numbers = #tpu.dot_dimension_numbers<[1], [0], [0], [1], [0, 0, 1, 1], [], []>} : vector<8x32xf32>, vector<32x32xf32>, vector<8x32xf32> -> vector<8x32xf32>
    %65 = arith.addf %64, %13 : vector<8x32xf32>
    %66 = vector.shape_cast %65 : vector<8x32xf32> to vector<8x1x32xf32>
    %67 = vector.broadcast %66 : vector<8x1x32xf32> to vector<8x8x32xf32>
    %68 = arith.addf %67, %26 : vector<8x8x32xf32>
    %69 = math.tanh %68 : vector<8x8x32xf32>
    %70 = arith.mulf %69, %20 : vector<8x8x32xf32>
    %cst_42 = arith.constant dense<0.000000e+00> : vector<8x8xf32>
    %71 = vector.multi_reduction <add>, %70, %cst_42 [2] : vector<8x8x32xf32> to vector<8x8xf32>
    %cst_43 = arith.constant 0.000000e+00 : f32
    %72 = vector.broadcast %cst_43 : f32 to vector<8x8xf32>
    %73 = arith.cmpf oeq, %32, %72 : vector<8x8xf32>
    %cst_44 = arith.constant 0xFF800000 : f32
    %74 = vector.broadcast %cst_44 : f32 to vector<8x8xf32>
    %75 = arith.select %73, %74, %71 : vector<8x8xi1>, vector<8x8xf32>
    %cst_45 = arith.constant dense<0xFF800000> : vector<8xf32>
    %76 = vector.multi_reduction <maximumf>, %75, %cst_45 [1] : vector<8x8xf32> to vector<8xf32>
    %77 = vector.shape_cast %76 : vector<8xf32> to vector<8x1xf32>
    %78 = vector.broadcast %77 : vector<8x1xf32> to vector<8x8xf32>
    %79 = arith.subf %75, %78 : vector<8x8xf32>
    %80 = math.exp %79 : vector<8x8xf32>
    %cst_46 = arith.constant dense<0.000000e+00> : vector<8xf32>
    %81 = vector.multi_reduction <add>, %80, %cst_46 [1] : vector<8x8xf32> to vector<8xf32>
    %82 = vector.shape_cast %81 : vector<8xf32> to vector<8x1xf32>
    %83 = vector.broadcast %82 : vector<8x1xf32> to vector<8x8xf32>
    %84 = arith.divf %80, %83 : vector<8x8xf32>
    %85 = arith.mulf %84, %32 : vector<8x8xf32>
    %cst_47 = arith.constant dense<0xFF800000> : vector<8xf32>
    %86 = vector.multi_reduction <maximumf>, %85, %cst_47 [1] : vector<8x8xf32> to vector<8xf32>
    %87 = vector.shape_cast %86 : vector<8xf32> to vector<8x1xf32>
    %88 = vector.broadcast %87 : vector<8x1xf32> to vector<8x8xf32>
    %89 = arith.cmpf oeq, %85, %88 : vector<8x8xf32>
    %c8_i32 = arith.constant 8 : i32
    %90 = vector.broadcast %c8_i32 : i32 to vector<8x8xi32>
    %91 = arith.select %89, %27, %90 : vector<8x8xi1>, vector<8x8xi32>
    %cst_48 = arith.constant dense<2147483647> : vector<8xi32>
    %92 = vector.multi_reduction <minsi>, %91, %cst_48 [1] : vector<8x8xi32> to vector<8xi32>
    %93 = vector.shape_cast %92 : vector<8xi32> to vector<8x1xi32>
    %94 = vector.broadcast %93 : vector<8x1xi32> to vector<8x8xi32>
    %95 = arith.cmpi eq, %27, %94 : vector<8x8xi32>
    %96 = arith.extui %95 : vector<8x8xi1> to vector<8x8xi32>
    %97 = arith.sitofp %96 : vector<8x8xi32> to vector<8x8xf32>
    %cst_49 = arith.constant 1.000000e+00 : f32
    %98 = vector.broadcast %cst_49 : f32 to vector<8x8xf32>
    %99 = arith.subf %98, %97 : vector<8x8xf32>
    %100 = arith.mulf %32, %99 : vector<8x8xf32>
    %101 = vector.shape_cast %84 : vector<8x8xf32> to vector<8x8x1xf32>
    %102 = vector.broadcast %101 : vector<8x8x1xf32> to vector<8x8x32xf32>
    %103 = arith.mulf %26, %102 : vector<8x8x32xf32>
    %cst_50 = arith.constant dense<0.000000e+00> : vector<8x32xf32>
    %104 = vector.multi_reduction <add>, %103, %cst_50 [1] : vector<8x8x32xf32> to vector<8x32xf32>
    %105 = vector.shape_cast %97 : vector<8x8xf32> to vector<8x8x1xf32>
    %106 = vector.broadcast %105 : vector<8x8x1xf32> to vector<8x8x16xf32>
    %107 = arith.mulf %0, %106 : vector<8x8x16xf32>
    %cst_51 = arith.constant dense<0.000000e+00> : vector<8x16xf32>
    %108 = vector.multi_reduction <add>, %107, %cst_51 [1] : vector<8x8x16xf32> to vector<8x16xf32>
    %cst_52 = arith.constant dense<0.000000e+00> : vector<8x32xf32>
    %109 = tpu.matmul %104, %4, %cst_52 {dimension_numbers = #tpu.dot_dimension_numbers<[1], [0], [0], [1], [0, 0, 1, 1], [], []>} : vector<8x32xf32>, vector<32x32xf32>, vector<8x32xf32> -> vector<8x32xf32>
    %cst_53 = arith.constant dense<0.000000e+00> : vector<8x32xf32>
    %110 = tpu.matmul %63, %5, %cst_53 {dimension_numbers = #tpu.dot_dimension_numbers<[1], [0], [0], [1], [0, 0, 1, 1], [], []>} : vector<8x32xf32>, vector<32x32xf32>, vector<8x32xf32> -> vector<8x32xf32>
    %111 = arith.addf %109, %110 : vector<8x32xf32>
    %112 = arith.addf %111, %16 : vector<8x32xf32>
    %113 = math.tanh %112 : vector<8x32xf32>
    %114 = vector.broadcast %c0_i32_35 : i32 to vector<8x8xi32>
    %115 = arith.cmpi eq, %27, %114 : vector<8x8xi32>
    %116 = vector.shape_cast %92 : vector<8xi32> to vector<8x1xi32>
    %117 = vector.shape_cast %116 : vector<8x1xi32> to vector<8x1xi32>
    %118 = vector.broadcast %117 : vector<8x1xi32> to vector<8x8xi32>
    %119 = arith.select %115, %118, %33 : vector<8x8xi1>, vector<8x8xi32>
    %120 = vector.broadcast %c0_i32_35 : i32 to vector<8x8x8xi32>
    %121 = arith.cmpi eq, %28, %120 : vector<8x8x8xi32>
    %122 = vector.shape_cast %84 : vector<8x8xf32> to vector<1x8x8xf32>
    %123 = vector.shape_cast %122 : vector<1x8x8xf32> to vector<1x8x8xf32>
    %124 = vector.broadcast %123 : vector<1x8x8xf32> to vector<8x8x8xf32>
    %125 = arith.select %121, %124, %34 : vector<8x8x8xi1>, vector<8x8x8xf32>
    %c1_i32 = arith.constant 1 : i32
    %cst_54 = arith.constant dense<0.000000e+00> : vector<8x128xf32>
    %126 = tpu.matmul %108, %2, %cst_54 {dimension_numbers = #tpu.dot_dimension_numbers<[1], [0], [0], [1], [0, 0, 1, 1], [], []>} : vector<8x16xf32>, vector<16x128xf32>, vector<8x128xf32> -> vector<8x128xf32>
    %cst_55 = arith.constant dense<0.000000e+00> : vector<8x128xf32>
    %127 = tpu.matmul %113, %3, %cst_55 {dimension_numbers = #tpu.dot_dimension_numbers<[1], [0], [0], [1], [0, 0, 1, 1], [], []>} : vector<8x32xf32>, vector<32x128xf32>, vector<8x128xf32> -> vector<8x128xf32>
    %128 = arith.addf %126, %127 : vector<8x128xf32>
    %129 = arith.addf %128, %10 : vector<8x128xf32>
    %130 = vector.extract_strided_slice %129 {offsets = [0, 0], sizes = [8, 32], strides = [1, 1]} : vector<8x128xf32> to vector<8x32xf32>
    %131 = arith.negf %130 : vector<8x32xf32>
    %132 = math.exp %131 : vector<8x32xf32>
    %cst_56 = arith.constant 1.000000e+00 : f32
    %133 = vector.broadcast %cst_56 : f32 to vector<8x32xf32>
    %134 = arith.addf %133, %132 : vector<8x32xf32>
    %135 = arith.divf %133, %134 : vector<8x32xf32>
    %136 = vector.extract_strided_slice %129 {offsets = [0, 32], sizes = [8, 32], strides = [1, 1]} : vector<8x128xf32> to vector<8x32xf32>
    %137 = arith.negf %136 : vector<8x32xf32>
    %138 = math.exp %137 : vector<8x32xf32>
    %cst_57 = arith.constant 1.000000e+00 : f32
    %139 = vector.broadcast %cst_57 : f32 to vector<8x32xf32>
    %140 = arith.addf %139, %138 : vector<8x32xf32>
    %141 = arith.divf %139, %140 : vector<8x32xf32>
    %142 = vector.extract_strided_slice %129 {offsets = [0, 64], sizes = [8, 32], strides = [1, 1]} : vector<8x128xf32> to vector<8x32xf32>
    %143 = math.tanh %142 : vector<8x32xf32>
    %144 = vector.extract_strided_slice %129 {offsets = [0, 96], sizes = [8, 32], strides = [1, 1]} : vector<8x128xf32> to vector<8x32xf32>
    %145 = arith.negf %144 : vector<8x32xf32>
    %146 = math.exp %145 : vector<8x32xf32>
    %cst_58 = arith.constant 1.000000e+00 : f32
    %147 = vector.broadcast %cst_58 : f32 to vector<8x32xf32>
    %148 = arith.addf %147, %146 : vector<8x32xf32>
    %149 = arith.divf %147, %148 : vector<8x32xf32>
    %150 = arith.mulf %141, %61 : vector<8x32xf32>
    %151 = arith.mulf %135, %143 : vector<8x32xf32>
    %152 = arith.addf %150, %151 : vector<8x32xf32>
    %153 = math.tanh %152 : vector<8x32xf32>
    %154 = arith.mulf %153, %149 : vector<8x32xf32>
    %cst_59 = arith.constant dense<0.000000e+00> : vector<8x32xf32>
    %155 = tpu.matmul %154, %6, %cst_59 {dimension_numbers = #tpu.dot_dimension_numbers<[1], [0], [0], [1], [0, 0, 1, 1], [], []>} : vector<8x32xf32>, vector<32x32xf32>, vector<8x32xf32> -> vector<8x32xf32>
    %156 = arith.addf %155, %13 : vector<8x32xf32>
    %157 = vector.shape_cast %156 : vector<8x32xf32> to vector<8x1x32xf32>
    %158 = vector.broadcast %157 : vector<8x1x32xf32> to vector<8x8x32xf32>
    %159 = arith.addf %158, %26 : vector<8x8x32xf32>
    %160 = math.tanh %159 : vector<8x8x32xf32>
    %161 = arith.mulf %160, %20 : vector<8x8x32xf32>
    %cst_60 = arith.constant dense<0.000000e+00> : vector<8x8xf32>
    %162 = vector.multi_reduction <add>, %161, %cst_60 [2] : vector<8x8x32xf32> to vector<8x8xf32>
    %cst_61 = arith.constant 0.000000e+00 : f32
    %163 = vector.broadcast %cst_61 : f32 to vector<8x8xf32>
    %164 = arith.cmpf oeq, %100, %163 : vector<8x8xf32>
    %cst_62 = arith.constant 0xFF800000 : f32
    %165 = vector.broadcast %cst_62 : f32 to vector<8x8xf32>
    %166 = arith.select %164, %165, %162 : vector<8x8xi1>, vector<8x8xf32>
    %cst_63 = arith.constant dense<0xFF800000> : vector<8xf32>
    %167 = vector.multi_reduction <maximumf>, %166, %cst_63 [1] : vector<8x8xf32> to vector<8xf32>
    %168 = vector.shape_cast %167 : vector<8xf32> to vector<8x1xf32>
    %169 = vector.broadcast %168 : vector<8x1xf32> to vector<8x8xf32>
    %170 = arith.subf %166, %169 : vector<8x8xf32>
    %171 = math.exp %170 : vector<8x8xf32>
    %cst_64 = arith.constant dense<0.000000e+00> : vector<8xf32>
    %172 = vector.multi_reduction <add>, %171, %cst_64 [1] : vector<8x8xf32> to vector<8xf32>
    %173 = vector.shape_cast %172 : vector<8xf32> to vector<8x1xf32>
    %174 = vector.broadcast %173 : vector<8x1xf32> to vector<8x8xf32>
    %175 = arith.divf %171, %174 : vector<8x8xf32>
    %176 = arith.mulf %175, %100 : vector<8x8xf32>
    %cst_65 = arith.constant dense<0xFF800000> : vector<8xf32>
    %177 = vector.multi_reduction <maximumf>, %176, %cst_65 [1] : vector<8x8xf32> to vector<8xf32>
    %178 = vector.shape_cast %177 : vector<8xf32> to vector<8x1xf32>
    %179 = vector.broadcast %178 : vector<8x1xf32> to vector<8x8xf32>
    %180 = arith.cmpf oeq, %176, %179 : vector<8x8xf32>
    %c8_i32_66 = arith.constant 8 : i32
    %181 = vector.broadcast %c8_i32_66 : i32 to vector<8x8xi32>
    %182 = arith.select %180, %27, %181 : vector<8x8xi1>, vector<8x8xi32>
    %cst_67 = arith.constant dense<2147483647> : vector<8xi32>
    %183 = vector.multi_reduction <minsi>, %182, %cst_67 [1] : vector<8x8xi32> to vector<8xi32>
    %184 = vector.shape_cast %183 : vector<8xi32> to vector<8x1xi32>
    %185 = vector.broadcast %184 : vector<8x1xi32> to vector<8x8xi32>
    %186 = arith.cmpi eq, %27, %185 : vector<8x8xi32>
    %187 = arith.extui %186 : vector<8x8xi1> to vector<8x8xi32>
    %188 = arith.sitofp %187 : vector<8x8xi32> to vector<8x8xf32>
    %cst_68 = arith.constant 1.000000e+00 : f32
    %189 = vector.broadcast %cst_68 : f32 to vector<8x8xf32>
    %190 = arith.subf %189, %188 : vector<8x8xf32>
    %191 = arith.mulf %100, %190 : vector<8x8xf32>
    %192 = vector.shape_cast %175 : vector<8x8xf32> to vector<8x8x1xf32>
    %193 = vector.broadcast %192 : vector<8x8x1xf32> to vector<8x8x32xf32>
    %194 = arith.mulf %26, %193 : vector<8x8x32xf32>
    %cst_69 = arith.constant dense<0.000000e+00> : vector<8x32xf32>
    %195 = vector.multi_reduction <add>, %194, %cst_69 [1] : vector<8x8x32xf32> to vector<8x32xf32>
    %196 = vector.shape_cast %188 : vector<8x8xf32> to vector<8x8x1xf32>
    %197 = vector.broadcast %196 : vector<8x8x1xf32> to vector<8x8x16xf32>
    %198 = arith.mulf %0, %197 : vector<8x8x16xf32>
    %cst_70 = arith.constant dense<0.000000e+00> : vector<8x16xf32>
    %199 = vector.multi_reduction <add>, %198, %cst_70 [1] : vector<8x8x16xf32> to vector<8x16xf32>
    %cst_71 = arith.constant dense<0.000000e+00> : vector<8x32xf32>
    %200 = tpu.matmul %195, %4, %cst_71 {dimension_numbers = #tpu.dot_dimension_numbers<[1], [0], [0], [1], [0, 0, 1, 1], [], []>} : vector<8x32xf32>, vector<32x32xf32>, vector<8x32xf32> -> vector<8x32xf32>
    %cst_72 = arith.constant dense<0.000000e+00> : vector<8x32xf32>
    %201 = tpu.matmul %154, %5, %cst_72 {dimension_numbers = #tpu.dot_dimension_numbers<[1], [0], [0], [1], [0, 0, 1, 1], [], []>} : vector<8x32xf32>, vector<32x32xf32>, vector<8x32xf32> -> vector<8x32xf32>
    %202 = arith.addf %200, %201 : vector<8x32xf32>
    %203 = arith.addf %202, %16 : vector<8x32xf32>
    %204 = math.tanh %203 : vector<8x32xf32>
    %205 = vector.broadcast %c1_i32 : i32 to vector<8x8xi32>
    %206 = arith.cmpi eq, %27, %205 : vector<8x8xi32>
    %207 = vector.shape_cast %183 : vector<8xi32> to vector<8x1xi32>
    %208 = vector.shape_cast %207 : vector<8x1xi32> to vector<8x1xi32>
    %209 = vector.broadcast %208 : vector<8x1xi32> to vector<8x8xi32>
    %210 = arith.select %206, %209, %119 : vector<8x8xi1>, vector<8x8xi32>
    %211 = vector.broadcast %c1_i32 : i32 to vector<8x8x8xi32>
    %212 = arith.cmpi eq, %28, %211 : vector<8x8x8xi32>
    %213 = vector.shape_cast %175 : vector<8x8xf32> to vector<1x8x8xf32>
    %214 = vector.shape_cast %213 : vector<1x8x8xf32> to vector<1x8x8xf32>
    %215 = vector.broadcast %214 : vector<1x8x8xf32> to vector<8x8x8xf32>
    %216 = arith.select %212, %215, %125 : vector<8x8x8xi1>, vector<8x8x8xf32>
    %c2_i32 = arith.constant 2 : i32
    %cst_73 = arith.constant dense<0.000000e+00> : vector<8x128xf32>
    %217 = tpu.matmul %199, %2, %cst_73 {dimension_numbers = #tpu.dot_dimension_numbers<[1], [0], [0], [1], [0, 0, 1, 1], [], []>} : vector<8x16xf32>, vector<16x128xf32>, vector<8x128xf32> -> vector<8x128xf32>
    %cst_74 = arith.constant dense<0.000000e+00> : vector<8x128xf32>
    %218 = tpu.matmul %204, %3, %cst_74 {dimension_numbers = #tpu.dot_dimension_numbers<[1], [0], [0], [1], [0, 0, 1, 1], [], []>} : vector<8x32xf32>, vector<32x128xf32>, vector<8x128xf32> -> vector<8x128xf32>
    %219 = arith.addf %217, %218 : vector<8x128xf32>
    %220 = arith.addf %219, %10 : vector<8x128xf32>
    %221 = vector.extract_strided_slice %220 {offsets = [0, 0], sizes = [8, 32], strides = [1, 1]} : vector<8x128xf32> to vector<8x32xf32>
    %222 = arith.negf %221 : vector<8x32xf32>
    %223 = math.exp %222 : vector<8x32xf32>
    %cst_75 = arith.constant 1.000000e+00 : f32
    %224 = vector.broadcast %cst_75 : f32 to vector<8x32xf32>
    %225 = arith.addf %224, %223 : vector<8x32xf32>
    %226 = arith.divf %224, %225 : vector<8x32xf32>
    %227 = vector.extract_strided_slice %220 {offsets = [0, 32], sizes = [8, 32], strides = [1, 1]} : vector<8x128xf32> to vector<8x32xf32>
    %228 = arith.negf %227 : vector<8x32xf32>
    %229 = math.exp %228 : vector<8x32xf32>
    %cst_76 = arith.constant 1.000000e+00 : f32
    %230 = vector.broadcast %cst_76 : f32 to vector<8x32xf32>
    %231 = arith.addf %230, %229 : vector<8x32xf32>
    %232 = arith.divf %230, %231 : vector<8x32xf32>
    %233 = vector.extract_strided_slice %220 {offsets = [0, 64], sizes = [8, 32], strides = [1, 1]} : vector<8x128xf32> to vector<8x32xf32>
    %234 = math.tanh %233 : vector<8x32xf32>
    %235 = vector.extract_strided_slice %220 {offsets = [0, 96], sizes = [8, 32], strides = [1, 1]} : vector<8x128xf32> to vector<8x32xf32>
    %236 = arith.negf %235 : vector<8x32xf32>
    %237 = math.exp %236 : vector<8x32xf32>
    %cst_77 = arith.constant 1.000000e+00 : f32
    %238 = vector.broadcast %cst_77 : f32 to vector<8x32xf32>
    %239 = arith.addf %238, %237 : vector<8x32xf32>
    %240 = arith.divf %238, %239 : vector<8x32xf32>
    %241 = arith.mulf %232, %152 : vector<8x32xf32>
    %242 = arith.mulf %226, %234 : vector<8x32xf32>
    %243 = arith.addf %241, %242 : vector<8x32xf32>
    %244 = math.tanh %243 : vector<8x32xf32>
    %245 = arith.mulf %244, %240 : vector<8x32xf32>
    %cst_78 = arith.constant dense<0.000000e+00> : vector<8x32xf32>
    %246 = tpu.matmul %245, %6, %cst_78 {dimension_numbers = #tpu.dot_dimension_numbers<[1], [0], [0], [1], [0, 0, 1, 1], [], []>} : vector<8x32xf32>, vector<32x32xf32>, vector<8x32xf32> -> vector<8x32xf32>
    %247 = arith.addf %246, %13 : vector<8x32xf32>
    %248 = vector.shape_cast %247 : vector<8x32xf32> to vector<8x1x32xf32>
    %249 = vector.broadcast %248 : vector<8x1x32xf32> to vector<8x8x32xf32>
    %250 = arith.addf %249, %26 : vector<8x8x32xf32>
    %251 = math.tanh %250 : vector<8x8x32xf32>
    %252 = arith.mulf %251, %20 : vector<8x8x32xf32>
    %cst_79 = arith.constant dense<0.000000e+00> : vector<8x8xf32>
    %253 = vector.multi_reduction <add>, %252, %cst_79 [2] : vector<8x8x32xf32> to vector<8x8xf32>
    %cst_80 = arith.constant 0.000000e+00 : f32
    %254 = vector.broadcast %cst_80 : f32 to vector<8x8xf32>
    %255 = arith.cmpf oeq, %191, %254 : vector<8x8xf32>
    %cst_81 = arith.constant 0xFF800000 : f32
    %256 = vector.broadcast %cst_81 : f32 to vector<8x8xf32>
    %257 = arith.select %255, %256, %253 : vector<8x8xi1>, vector<8x8xf32>
    %cst_82 = arith.constant dense<0xFF800000> : vector<8xf32>
    %258 = vector.multi_reduction <maximumf>, %257, %cst_82 [1] : vector<8x8xf32> to vector<8xf32>
    %259 = vector.shape_cast %258 : vector<8xf32> to vector<8x1xf32>
    %260 = vector.broadcast %259 : vector<8x1xf32> to vector<8x8xf32>
    %261 = arith.subf %257, %260 : vector<8x8xf32>
    %262 = math.exp %261 : vector<8x8xf32>
    %cst_83 = arith.constant dense<0.000000e+00> : vector<8xf32>
    %263 = vector.multi_reduction <add>, %262, %cst_83 [1] : vector<8x8xf32> to vector<8xf32>
    %264 = vector.shape_cast %263 : vector<8xf32> to vector<8x1xf32>
    %265 = vector.broadcast %264 : vector<8x1xf32> to vector<8x8xf32>
    %266 = arith.divf %262, %265 : vector<8x8xf32>
    %267 = arith.mulf %266, %191 : vector<8x8xf32>
    %cst_84 = arith.constant dense<0xFF800000> : vector<8xf32>
    %268 = vector.multi_reduction <maximumf>, %267, %cst_84 [1] : vector<8x8xf32> to vector<8xf32>
    %269 = vector.shape_cast %268 : vector<8xf32> to vector<8x1xf32>
    %270 = vector.broadcast %269 : vector<8x1xf32> to vector<8x8xf32>
    %271 = arith.cmpf oeq, %267, %270 : vector<8x8xf32>
    %c8_i32_85 = arith.constant 8 : i32
    %272 = vector.broadcast %c8_i32_85 : i32 to vector<8x8xi32>
    %273 = arith.select %271, %27, %272 : vector<8x8xi1>, vector<8x8xi32>
    %cst_86 = arith.constant dense<2147483647> : vector<8xi32>
    %274 = vector.multi_reduction <minsi>, %273, %cst_86 [1] : vector<8x8xi32> to vector<8xi32>
    %275 = vector.shape_cast %274 : vector<8xi32> to vector<8x1xi32>
    %276 = vector.broadcast %275 : vector<8x1xi32> to vector<8x8xi32>
    %277 = arith.cmpi eq, %27, %276 : vector<8x8xi32>
    %278 = arith.extui %277 : vector<8x8xi1> to vector<8x8xi32>
    %279 = arith.sitofp %278 : vector<8x8xi32> to vector<8x8xf32>
    %cst_87 = arith.constant 1.000000e+00 : f32
    %280 = vector.broadcast %cst_87 : f32 to vector<8x8xf32>
    %281 = arith.subf %280, %279 : vector<8x8xf32>
    %282 = arith.mulf %191, %281 : vector<8x8xf32>
    %283 = vector.shape_cast %266 : vector<8x8xf32> to vector<8x8x1xf32>
    %284 = vector.broadcast %283 : vector<8x8x1xf32> to vector<8x8x32xf32>
    %285 = arith.mulf %26, %284 : vector<8x8x32xf32>
    %cst_88 = arith.constant dense<0.000000e+00> : vector<8x32xf32>
    %286 = vector.multi_reduction <add>, %285, %cst_88 [1] : vector<8x8x32xf32> to vector<8x32xf32>
    %287 = vector.shape_cast %279 : vector<8x8xf32> to vector<8x8x1xf32>
    %288 = vector.broadcast %287 : vector<8x8x1xf32> to vector<8x8x16xf32>
    %289 = arith.mulf %0, %288 : vector<8x8x16xf32>
    %cst_89 = arith.constant dense<0.000000e+00> : vector<8x16xf32>
    %290 = vector.multi_reduction <add>, %289, %cst_89 [1] : vector<8x8x16xf32> to vector<8x16xf32>
    %cst_90 = arith.constant dense<0.000000e+00> : vector<8x32xf32>
    %291 = tpu.matmul %286, %4, %cst_90 {dimension_numbers = #tpu.dot_dimension_numbers<[1], [0], [0], [1], [0, 0, 1, 1], [], []>} : vector<8x32xf32>, vector<32x32xf32>, vector<8x32xf32> -> vector<8x32xf32>
    %cst_91 = arith.constant dense<0.000000e+00> : vector<8x32xf32>
    %292 = tpu.matmul %245, %5, %cst_91 {dimension_numbers = #tpu.dot_dimension_numbers<[1], [0], [0], [1], [0, 0, 1, 1], [], []>} : vector<8x32xf32>, vector<32x32xf32>, vector<8x32xf32> -> vector<8x32xf32>
    %293 = arith.addf %291, %292 : vector<8x32xf32>
    %294 = arith.addf %293, %16 : vector<8x32xf32>
    %295 = math.tanh %294 : vector<8x32xf32>
    %296 = vector.broadcast %c2_i32 : i32 to vector<8x8xi32>
    %297 = arith.cmpi eq, %27, %296 : vector<8x8xi32>
    %298 = vector.shape_cast %274 : vector<8xi32> to vector<8x1xi32>
    %299 = vector.shape_cast %298 : vector<8x1xi32> to vector<8x1xi32>
    %300 = vector.broadcast %299 : vector<8x1xi32> to vector<8x8xi32>
    %301 = arith.select %297, %300, %210 : vector<8x8xi1>, vector<8x8xi32>
    %302 = vector.broadcast %c2_i32 : i32 to vector<8x8x8xi32>
    %303 = arith.cmpi eq, %28, %302 : vector<8x8x8xi32>
    %304 = vector.shape_cast %266 : vector<8x8xf32> to vector<1x8x8xf32>
    %305 = vector.shape_cast %304 : vector<1x8x8xf32> to vector<1x8x8xf32>
    %306 = vector.broadcast %305 : vector<1x8x8xf32> to vector<8x8x8xf32>
    %307 = arith.select %303, %306, %216 : vector<8x8x8xi1>, vector<8x8x8xf32>
    %c3_i32 = arith.constant 3 : i32
    %cst_92 = arith.constant dense<0.000000e+00> : vector<8x128xf32>
    %308 = tpu.matmul %290, %2, %cst_92 {dimension_numbers = #tpu.dot_dimension_numbers<[1], [0], [0], [1], [0, 0, 1, 1], [], []>} : vector<8x16xf32>, vector<16x128xf32>, vector<8x128xf32> -> vector<8x128xf32>
    %cst_93 = arith.constant dense<0.000000e+00> : vector<8x128xf32>
    %309 = tpu.matmul %295, %3, %cst_93 {dimension_numbers = #tpu.dot_dimension_numbers<[1], [0], [0], [1], [0, 0, 1, 1], [], []>} : vector<8x32xf32>, vector<32x128xf32>, vector<8x128xf32> -> vector<8x128xf32>
    %310 = arith.addf %308, %309 : vector<8x128xf32>
    %311 = arith.addf %310, %10 : vector<8x128xf32>
    %312 = vector.extract_strided_slice %311 {offsets = [0, 0], sizes = [8, 32], strides = [1, 1]} : vector<8x128xf32> to vector<8x32xf32>
    %313 = arith.negf %312 : vector<8x32xf32>
    %314 = math.exp %313 : vector<8x32xf32>
    %cst_94 = arith.constant 1.000000e+00 : f32
    %315 = vector.broadcast %cst_94 : f32 to vector<8x32xf32>
    %316 = arith.addf %315, %314 : vector<8x32xf32>
    %317 = arith.divf %315, %316 : vector<8x32xf32>
    %318 = vector.extract_strided_slice %311 {offsets = [0, 32], sizes = [8, 32], strides = [1, 1]} : vector<8x128xf32> to vector<8x32xf32>
    %319 = arith.negf %318 : vector<8x32xf32>
    %320 = math.exp %319 : vector<8x32xf32>
    %cst_95 = arith.constant 1.000000e+00 : f32
    %321 = vector.broadcast %cst_95 : f32 to vector<8x32xf32>
    %322 = arith.addf %321, %320 : vector<8x32xf32>
    %323 = arith.divf %321, %322 : vector<8x32xf32>
    %324 = vector.extract_strided_slice %311 {offsets = [0, 64], sizes = [8, 32], strides = [1, 1]} : vector<8x128xf32> to vector<8x32xf32>
    %325 = math.tanh %324 : vector<8x32xf32>
    %326 = vector.extract_strided_slice %311 {offsets = [0, 96], sizes = [8, 32], strides = [1, 1]} : vector<8x128xf32> to vector<8x32xf32>
    %327 = arith.negf %326 : vector<8x32xf32>
    %328 = math.exp %327 : vector<8x32xf32>
    %cst_96 = arith.constant 1.000000e+00 : f32
    %329 = vector.broadcast %cst_96 : f32 to vector<8x32xf32>
    %330 = arith.addf %329, %328 : vector<8x32xf32>
    %331 = arith.divf %329, %330 : vector<8x32xf32>
    %332 = arith.mulf %323, %243 : vector<8x32xf32>
    %333 = arith.mulf %317, %325 : vector<8x32xf32>
    %334 = arith.addf %332, %333 : vector<8x32xf32>
    %335 = math.tanh %334 : vector<8x32xf32>
    %336 = arith.mulf %335, %331 : vector<8x32xf32>
    %cst_97 = arith.constant dense<0.000000e+00> : vector<8x32xf32>
    %337 = tpu.matmul %336, %6, %cst_97 {dimension_numbers = #tpu.dot_dimension_numbers<[1], [0], [0], [1], [0, 0, 1, 1], [], []>} : vector<8x32xf32>, vector<32x32xf32>, vector<8x32xf32> -> vector<8x32xf32>
    %338 = arith.addf %337, %13 : vector<8x32xf32>
    %339 = vector.shape_cast %338 : vector<8x32xf32> to vector<8x1x32xf32>
    %340 = vector.broadcast %339 : vector<8x1x32xf32> to vector<8x8x32xf32>
    %341 = arith.addf %340, %26 : vector<8x8x32xf32>
    %342 = math.tanh %341 : vector<8x8x32xf32>
    %343 = arith.mulf %342, %20 : vector<8x8x32xf32>
    %cst_98 = arith.constant dense<0.000000e+00> : vector<8x8xf32>
    %344 = vector.multi_reduction <add>, %343, %cst_98 [2] : vector<8x8x32xf32> to vector<8x8xf32>
    %cst_99 = arith.constant 0.000000e+00 : f32
    %345 = vector.broadcast %cst_99 : f32 to vector<8x8xf32>
    %346 = arith.cmpf oeq, %282, %345 : vector<8x8xf32>
    %cst_100 = arith.constant 0xFF800000 : f32
    %347 = vector.broadcast %cst_100 : f32 to vector<8x8xf32>
    %348 = arith.select %346, %347, %344 : vector<8x8xi1>, vector<8x8xf32>
    %cst_101 = arith.constant dense<0xFF800000> : vector<8xf32>
    %349 = vector.multi_reduction <maximumf>, %348, %cst_101 [1] : vector<8x8xf32> to vector<8xf32>
    %350 = vector.shape_cast %349 : vector<8xf32> to vector<8x1xf32>
    %351 = vector.broadcast %350 : vector<8x1xf32> to vector<8x8xf32>
    %352 = arith.subf %348, %351 : vector<8x8xf32>
    %353 = math.exp %352 : vector<8x8xf32>
    %cst_102 = arith.constant dense<0.000000e+00> : vector<8xf32>
    %354 = vector.multi_reduction <add>, %353, %cst_102 [1] : vector<8x8xf32> to vector<8xf32>
    %355 = vector.shape_cast %354 : vector<8xf32> to vector<8x1xf32>
    %356 = vector.broadcast %355 : vector<8x1xf32> to vector<8x8xf32>
    %357 = arith.divf %353, %356 : vector<8x8xf32>
    %358 = arith.mulf %357, %282 : vector<8x8xf32>
    %cst_103 = arith.constant dense<0xFF800000> : vector<8xf32>
    %359 = vector.multi_reduction <maximumf>, %358, %cst_103 [1] : vector<8x8xf32> to vector<8xf32>
    %360 = vector.shape_cast %359 : vector<8xf32> to vector<8x1xf32>
    %361 = vector.broadcast %360 : vector<8x1xf32> to vector<8x8xf32>
    %362 = arith.cmpf oeq, %358, %361 : vector<8x8xf32>
    %c8_i32_104 = arith.constant 8 : i32
    %363 = vector.broadcast %c8_i32_104 : i32 to vector<8x8xi32>
    %364 = arith.select %362, %27, %363 : vector<8x8xi1>, vector<8x8xi32>
    %cst_105 = arith.constant dense<2147483647> : vector<8xi32>
    %365 = vector.multi_reduction <minsi>, %364, %cst_105 [1] : vector<8x8xi32> to vector<8xi32>
    %366 = vector.shape_cast %365 : vector<8xi32> to vector<8x1xi32>
    %367 = vector.broadcast %366 : vector<8x1xi32> to vector<8x8xi32>
    %368 = arith.cmpi eq, %27, %367 : vector<8x8xi32>
    %369 = arith.extui %368 : vector<8x8xi1> to vector<8x8xi32>
    %370 = arith.sitofp %369 : vector<8x8xi32> to vector<8x8xf32>
    %cst_106 = arith.constant 1.000000e+00 : f32
    %371 = vector.broadcast %cst_106 : f32 to vector<8x8xf32>
    %372 = arith.subf %371, %370 : vector<8x8xf32>
    %373 = arith.mulf %282, %372 : vector<8x8xf32>
    %374 = vector.shape_cast %357 : vector<8x8xf32> to vector<8x8x1xf32>
    %375 = vector.broadcast %374 : vector<8x8x1xf32> to vector<8x8x32xf32>
    %376 = arith.mulf %26, %375 : vector<8x8x32xf32>
    %cst_107 = arith.constant dense<0.000000e+00> : vector<8x32xf32>
    %377 = vector.multi_reduction <add>, %376, %cst_107 [1] : vector<8x8x32xf32> to vector<8x32xf32>
    %378 = vector.shape_cast %370 : vector<8x8xf32> to vector<8x8x1xf32>
    %379 = vector.broadcast %378 : vector<8x8x1xf32> to vector<8x8x16xf32>
    %380 = arith.mulf %0, %379 : vector<8x8x16xf32>
    %cst_108 = arith.constant dense<0.000000e+00> : vector<8x16xf32>
    %381 = vector.multi_reduction <add>, %380, %cst_108 [1] : vector<8x8x16xf32> to vector<8x16xf32>
    %cst_109 = arith.constant dense<0.000000e+00> : vector<8x32xf32>
    %382 = tpu.matmul %377, %4, %cst_109 {dimension_numbers = #tpu.dot_dimension_numbers<[1], [0], [0], [1], [0, 0, 1, 1], [], []>} : vector<8x32xf32>, vector<32x32xf32>, vector<8x32xf32> -> vector<8x32xf32>
    %cst_110 = arith.constant dense<0.000000e+00> : vector<8x32xf32>
    %383 = tpu.matmul %336, %5, %cst_110 {dimension_numbers = #tpu.dot_dimension_numbers<[1], [0], [0], [1], [0, 0, 1, 1], [], []>} : vector<8x32xf32>, vector<32x32xf32>, vector<8x32xf32> -> vector<8x32xf32>
    %384 = arith.addf %382, %383 : vector<8x32xf32>
    %385 = arith.addf %384, %16 : vector<8x32xf32>
    %386 = math.tanh %385 : vector<8x32xf32>
    %387 = vector.broadcast %c3_i32 : i32 to vector<8x8xi32>
    %388 = arith.cmpi eq, %27, %387 : vector<8x8xi32>
    %389 = vector.shape_cast %365 : vector<8xi32> to vector<8x1xi32>
    %390 = vector.shape_cast %389 : vector<8x1xi32> to vector<8x1xi32>
    %391 = vector.broadcast %390 : vector<8x1xi32> to vector<8x8xi32>
    %392 = arith.select %388, %391, %301 : vector<8x8xi1>, vector<8x8xi32>
    %393 = vector.broadcast %c3_i32 : i32 to vector<8x8x8xi32>
    %394 = arith.cmpi eq, %28, %393 : vector<8x8x8xi32>
    %395 = vector.shape_cast %357 : vector<8x8xf32> to vector<1x8x8xf32>
    %396 = vector.shape_cast %395 : vector<1x8x8xf32> to vector<1x8x8xf32>
    %397 = vector.broadcast %396 : vector<1x8x8xf32> to vector<8x8x8xf32>
    %398 = arith.select %394, %397, %307 : vector<8x8x8xi1>, vector<8x8x8xf32>
    %c4_i32 = arith.constant 4 : i32
    %cst_111 = arith.constant dense<0.000000e+00> : vector<8x128xf32>
    %399 = tpu.matmul %381, %2, %cst_111 {dimension_numbers = #tpu.dot_dimension_numbers<[1], [0], [0], [1], [0, 0, 1, 1], [], []>} : vector<8x16xf32>, vector<16x128xf32>, vector<8x128xf32> -> vector<8x128xf32>
    %cst_112 = arith.constant dense<0.000000e+00> : vector<8x128xf32>
    %400 = tpu.matmul %386, %3, %cst_112 {dimension_numbers = #tpu.dot_dimension_numbers<[1], [0], [0], [1], [0, 0, 1, 1], [], []>} : vector<8x32xf32>, vector<32x128xf32>, vector<8x128xf32> -> vector<8x128xf32>
    %401 = arith.addf %399, %400 : vector<8x128xf32>
    %402 = arith.addf %401, %10 : vector<8x128xf32>
    %403 = vector.extract_strided_slice %402 {offsets = [0, 0], sizes = [8, 32], strides = [1, 1]} : vector<8x128xf32> to vector<8x32xf32>
    %404 = arith.negf %403 : vector<8x32xf32>
    %405 = math.exp %404 : vector<8x32xf32>
    %cst_113 = arith.constant 1.000000e+00 : f32
    %406 = vector.broadcast %cst_113 : f32 to vector<8x32xf32>
    %407 = arith.addf %406, %405 : vector<8x32xf32>
    %408 = arith.divf %406, %407 : vector<8x32xf32>
    %409 = vector.extract_strided_slice %402 {offsets = [0, 32], sizes = [8, 32], strides = [1, 1]} : vector<8x128xf32> to vector<8x32xf32>
    %410 = arith.negf %409 : vector<8x32xf32>
    %411 = math.exp %410 : vector<8x32xf32>
    %cst_114 = arith.constant 1.000000e+00 : f32
    %412 = vector.broadcast %cst_114 : f32 to vector<8x32xf32>
    %413 = arith.addf %412, %411 : vector<8x32xf32>
    %414 = arith.divf %412, %413 : vector<8x32xf32>
    %415 = vector.extract_strided_slice %402 {offsets = [0, 64], sizes = [8, 32], strides = [1, 1]} : vector<8x128xf32> to vector<8x32xf32>
    %416 = math.tanh %415 : vector<8x32xf32>
    %417 = vector.extract_strided_slice %402 {offsets = [0, 96], sizes = [8, 32], strides = [1, 1]} : vector<8x128xf32> to vector<8x32xf32>
    %418 = arith.negf %417 : vector<8x32xf32>
    %419 = math.exp %418 : vector<8x32xf32>
    %cst_115 = arith.constant 1.000000e+00 : f32
    %420 = vector.broadcast %cst_115 : f32 to vector<8x32xf32>
    %421 = arith.addf %420, %419 : vector<8x32xf32>
    %422 = arith.divf %420, %421 : vector<8x32xf32>
    %423 = arith.mulf %414, %334 : vector<8x32xf32>
    %424 = arith.mulf %408, %416 : vector<8x32xf32>
    %425 = arith.addf %423, %424 : vector<8x32xf32>
    %426 = math.tanh %425 : vector<8x32xf32>
    %427 = arith.mulf %426, %422 : vector<8x32xf32>
    %cst_116 = arith.constant dense<0.000000e+00> : vector<8x32xf32>
    %428 = tpu.matmul %427, %6, %cst_116 {dimension_numbers = #tpu.dot_dimension_numbers<[1], [0], [0], [1], [0, 0, 1, 1], [], []>} : vector<8x32xf32>, vector<32x32xf32>, vector<8x32xf32> -> vector<8x32xf32>
    %429 = arith.addf %428, %13 : vector<8x32xf32>
    %430 = vector.shape_cast %429 : vector<8x32xf32> to vector<8x1x32xf32>
    %431 = vector.broadcast %430 : vector<8x1x32xf32> to vector<8x8x32xf32>
    %432 = arith.addf %431, %26 : vector<8x8x32xf32>
    %433 = math.tanh %432 : vector<8x8x32xf32>
    %434 = arith.mulf %433, %20 : vector<8x8x32xf32>
    %cst_117 = arith.constant dense<0.000000e+00> : vector<8x8xf32>
    %435 = vector.multi_reduction <add>, %434, %cst_117 [2] : vector<8x8x32xf32> to vector<8x8xf32>
    %cst_118 = arith.constant 0.000000e+00 : f32
    %436 = vector.broadcast %cst_118 : f32 to vector<8x8xf32>
    %437 = arith.cmpf oeq, %373, %436 : vector<8x8xf32>
    %cst_119 = arith.constant 0xFF800000 : f32
    %438 = vector.broadcast %cst_119 : f32 to vector<8x8xf32>
    %439 = arith.select %437, %438, %435 : vector<8x8xi1>, vector<8x8xf32>
    %cst_120 = arith.constant dense<0xFF800000> : vector<8xf32>
    %440 = vector.multi_reduction <maximumf>, %439, %cst_120 [1] : vector<8x8xf32> to vector<8xf32>
    %441 = vector.shape_cast %440 : vector<8xf32> to vector<8x1xf32>
    %442 = vector.broadcast %441 : vector<8x1xf32> to vector<8x8xf32>
    %443 = arith.subf %439, %442 : vector<8x8xf32>
    %444 = math.exp %443 : vector<8x8xf32>
    %cst_121 = arith.constant dense<0.000000e+00> : vector<8xf32>
    %445 = vector.multi_reduction <add>, %444, %cst_121 [1] : vector<8x8xf32> to vector<8xf32>
    %446 = vector.shape_cast %445 : vector<8xf32> to vector<8x1xf32>
    %447 = vector.broadcast %446 : vector<8x1xf32> to vector<8x8xf32>
    %448 = arith.divf %444, %447 : vector<8x8xf32>
    %449 = arith.mulf %448, %373 : vector<8x8xf32>
    %cst_122 = arith.constant dense<0xFF800000> : vector<8xf32>
    %450 = vector.multi_reduction <maximumf>, %449, %cst_122 [1] : vector<8x8xf32> to vector<8xf32>
    %451 = vector.shape_cast %450 : vector<8xf32> to vector<8x1xf32>
    %452 = vector.broadcast %451 : vector<8x1xf32> to vector<8x8xf32>
    %453 = arith.cmpf oeq, %449, %452 : vector<8x8xf32>
    %c8_i32_123 = arith.constant 8 : i32
    %454 = vector.broadcast %c8_i32_123 : i32 to vector<8x8xi32>
    %455 = arith.select %453, %27, %454 : vector<8x8xi1>, vector<8x8xi32>
    %cst_124 = arith.constant dense<2147483647> : vector<8xi32>
    %456 = vector.multi_reduction <minsi>, %455, %cst_124 [1] : vector<8x8xi32> to vector<8xi32>
    %457 = vector.shape_cast %456 : vector<8xi32> to vector<8x1xi32>
    %458 = vector.broadcast %457 : vector<8x1xi32> to vector<8x8xi32>
    %459 = arith.cmpi eq, %27, %458 : vector<8x8xi32>
    %460 = arith.extui %459 : vector<8x8xi1> to vector<8x8xi32>
    %461 = arith.sitofp %460 : vector<8x8xi32> to vector<8x8xf32>
    %cst_125 = arith.constant 1.000000e+00 : f32
    %462 = vector.broadcast %cst_125 : f32 to vector<8x8xf32>
    %463 = arith.subf %462, %461 : vector<8x8xf32>
    %464 = arith.mulf %373, %463 : vector<8x8xf32>
    %465 = vector.shape_cast %448 : vector<8x8xf32> to vector<8x8x1xf32>
    %466 = vector.broadcast %465 : vector<8x8x1xf32> to vector<8x8x32xf32>
    %467 = arith.mulf %26, %466 : vector<8x8x32xf32>
    %cst_126 = arith.constant dense<0.000000e+00> : vector<8x32xf32>
    %468 = vector.multi_reduction <add>, %467, %cst_126 [1] : vector<8x8x32xf32> to vector<8x32xf32>
    %469 = vector.shape_cast %461 : vector<8x8xf32> to vector<8x8x1xf32>
    %470 = vector.broadcast %469 : vector<8x8x1xf32> to vector<8x8x16xf32>
    %471 = arith.mulf %0, %470 : vector<8x8x16xf32>
    %cst_127 = arith.constant dense<0.000000e+00> : vector<8x16xf32>
    %472 = vector.multi_reduction <add>, %471, %cst_127 [1] : vector<8x8x16xf32> to vector<8x16xf32>
    %cst_128 = arith.constant dense<0.000000e+00> : vector<8x32xf32>
    %473 = tpu.matmul %468, %4, %cst_128 {dimension_numbers = #tpu.dot_dimension_numbers<[1], [0], [0], [1], [0, 0, 1, 1], [], []>} : vector<8x32xf32>, vector<32x32xf32>, vector<8x32xf32> -> vector<8x32xf32>
    %cst_129 = arith.constant dense<0.000000e+00> : vector<8x32xf32>
    %474 = tpu.matmul %427, %5, %cst_129 {dimension_numbers = #tpu.dot_dimension_numbers<[1], [0], [0], [1], [0, 0, 1, 1], [], []>} : vector<8x32xf32>, vector<32x32xf32>, vector<8x32xf32> -> vector<8x32xf32>
    %475 = arith.addf %473, %474 : vector<8x32xf32>
    %476 = arith.addf %475, %16 : vector<8x32xf32>
    %477 = math.tanh %476 : vector<8x32xf32>
    %478 = vector.broadcast %c4_i32 : i32 to vector<8x8xi32>
    %479 = arith.cmpi eq, %27, %478 : vector<8x8xi32>
    %480 = vector.shape_cast %456 : vector<8xi32> to vector<8x1xi32>
    %481 = vector.shape_cast %480 : vector<8x1xi32> to vector<8x1xi32>
    %482 = vector.broadcast %481 : vector<8x1xi32> to vector<8x8xi32>
    %483 = arith.select %479, %482, %392 : vector<8x8xi1>, vector<8x8xi32>
    %484 = vector.broadcast %c4_i32 : i32 to vector<8x8x8xi32>
    %485 = arith.cmpi eq, %28, %484 : vector<8x8x8xi32>
    %486 = vector.shape_cast %448 : vector<8x8xf32> to vector<1x8x8xf32>
    %487 = vector.shape_cast %486 : vector<1x8x8xf32> to vector<1x8x8xf32>
    %488 = vector.broadcast %487 : vector<1x8x8xf32> to vector<8x8x8xf32>
    %489 = arith.select %485, %488, %398 : vector<8x8x8xi1>, vector<8x8x8xf32>
    %c5_i32 = arith.constant 5 : i32
    %cst_130 = arith.constant dense<0.000000e+00> : vector<8x128xf32>
    %490 = tpu.matmul %472, %2, %cst_130 {dimension_numbers = #tpu.dot_dimension_numbers<[1], [0], [0], [1], [0, 0, 1, 1], [], []>} : vector<8x16xf32>, vector<16x128xf32>, vector<8x128xf32> -> vector<8x128xf32>
    %cst_131 = arith.constant dense<0.000000e+00> : vector<8x128xf32>
    %491 = tpu.matmul %477, %3, %cst_131 {dimension_numbers = #tpu.dot_dimension_numbers<[1], [0], [0], [1], [0, 0, 1, 1], [], []>} : vector<8x32xf32>, vector<32x128xf32>, vector<8x128xf32> -> vector<8x128xf32>
    %492 = arith.addf %490, %491 : vector<8x128xf32>
    %493 = arith.addf %492, %10 : vector<8x128xf32>
    %494 = vector.extract_strided_slice %493 {offsets = [0, 0], sizes = [8, 32], strides = [1, 1]} : vector<8x128xf32> to vector<8x32xf32>
    %495 = arith.negf %494 : vector<8x32xf32>
    %496 = math.exp %495 : vector<8x32xf32>
    %cst_132 = arith.constant 1.000000e+00 : f32
    %497 = vector.broadcast %cst_132 : f32 to vector<8x32xf32>
    %498 = arith.addf %497, %496 : vector<8x32xf32>
    %499 = arith.divf %497, %498 : vector<8x32xf32>
    %500 = vector.extract_strided_slice %493 {offsets = [0, 32], sizes = [8, 32], strides = [1, 1]} : vector<8x128xf32> to vector<8x32xf32>
    %501 = arith.negf %500 : vector<8x32xf32>
    %502 = math.exp %501 : vector<8x32xf32>
    %cst_133 = arith.constant 1.000000e+00 : f32
    %503 = vector.broadcast %cst_133 : f32 to vector<8x32xf32>
    %504 = arith.addf %503, %502 : vector<8x32xf32>
    %505 = arith.divf %503, %504 : vector<8x32xf32>
    %506 = vector.extract_strided_slice %493 {offsets = [0, 64], sizes = [8, 32], strides = [1, 1]} : vector<8x128xf32> to vector<8x32xf32>
    %507 = math.tanh %506 : vector<8x32xf32>
    %508 = vector.extract_strided_slice %493 {offsets = [0, 96], sizes = [8, 32], strides = [1, 1]} : vector<8x128xf32> to vector<8x32xf32>
    %509 = arith.negf %508 : vector<8x32xf32>
    %510 = math.exp %509 : vector<8x32xf32>
    %cst_134 = arith.constant 1.000000e+00 : f32
    %511 = vector.broadcast %cst_134 : f32 to vector<8x32xf32>
    %512 = arith.addf %511, %510 : vector<8x32xf32>
    %513 = arith.divf %511, %512 : vector<8x32xf32>
    %514 = arith.mulf %505, %425 : vector<8x32xf32>
    %515 = arith.mulf %499, %507 : vector<8x32xf32>
    %516 = arith.addf %514, %515 : vector<8x32xf32>
    %517 = math.tanh %516 : vector<8x32xf32>
    %518 = arith.mulf %517, %513 : vector<8x32xf32>
    %cst_135 = arith.constant dense<0.000000e+00> : vector<8x32xf32>
    %519 = tpu.matmul %518, %6, %cst_135 {dimension_numbers = #tpu.dot_dimension_numbers<[1], [0], [0], [1], [0, 0, 1, 1], [], []>} : vector<8x32xf32>, vector<32x32xf32>, vector<8x32xf32> -> vector<8x32xf32>
    %520 = arith.addf %519, %13 : vector<8x32xf32>
    %521 = vector.shape_cast %520 : vector<8x32xf32> to vector<8x1x32xf32>
    %522 = vector.broadcast %521 : vector<8x1x32xf32> to vector<8x8x32xf32>
    %523 = arith.addf %522, %26 : vector<8x8x32xf32>
    %524 = math.tanh %523 : vector<8x8x32xf32>
    %525 = arith.mulf %524, %20 : vector<8x8x32xf32>
    %cst_136 = arith.constant dense<0.000000e+00> : vector<8x8xf32>
    %526 = vector.multi_reduction <add>, %525, %cst_136 [2] : vector<8x8x32xf32> to vector<8x8xf32>
    %cst_137 = arith.constant 0.000000e+00 : f32
    %527 = vector.broadcast %cst_137 : f32 to vector<8x8xf32>
    %528 = arith.cmpf oeq, %464, %527 : vector<8x8xf32>
    %cst_138 = arith.constant 0xFF800000 : f32
    %529 = vector.broadcast %cst_138 : f32 to vector<8x8xf32>
    %530 = arith.select %528, %529, %526 : vector<8x8xi1>, vector<8x8xf32>
    %cst_139 = arith.constant dense<0xFF800000> : vector<8xf32>
    %531 = vector.multi_reduction <maximumf>, %530, %cst_139 [1] : vector<8x8xf32> to vector<8xf32>
    %532 = vector.shape_cast %531 : vector<8xf32> to vector<8x1xf32>
    %533 = vector.broadcast %532 : vector<8x1xf32> to vector<8x8xf32>
    %534 = arith.subf %530, %533 : vector<8x8xf32>
    %535 = math.exp %534 : vector<8x8xf32>
    %cst_140 = arith.constant dense<0.000000e+00> : vector<8xf32>
    %536 = vector.multi_reduction <add>, %535, %cst_140 [1] : vector<8x8xf32> to vector<8xf32>
    %537 = vector.shape_cast %536 : vector<8xf32> to vector<8x1xf32>
    %538 = vector.broadcast %537 : vector<8x1xf32> to vector<8x8xf32>
    %539 = arith.divf %535, %538 : vector<8x8xf32>
    %540 = arith.mulf %539, %464 : vector<8x8xf32>
    %cst_141 = arith.constant dense<0xFF800000> : vector<8xf32>
    %541 = vector.multi_reduction <maximumf>, %540, %cst_141 [1] : vector<8x8xf32> to vector<8xf32>
    %542 = vector.shape_cast %541 : vector<8xf32> to vector<8x1xf32>
    %543 = vector.broadcast %542 : vector<8x1xf32> to vector<8x8xf32>
    %544 = arith.cmpf oeq, %540, %543 : vector<8x8xf32>
    %c8_i32_142 = arith.constant 8 : i32
    %545 = vector.broadcast %c8_i32_142 : i32 to vector<8x8xi32>
    %546 = arith.select %544, %27, %545 : vector<8x8xi1>, vector<8x8xi32>
    %cst_143 = arith.constant dense<2147483647> : vector<8xi32>
    %547 = vector.multi_reduction <minsi>, %546, %cst_143 [1] : vector<8x8xi32> to vector<8xi32>
    %548 = vector.shape_cast %547 : vector<8xi32> to vector<8x1xi32>
    %549 = vector.broadcast %548 : vector<8x1xi32> to vector<8x8xi32>
    %550 = arith.cmpi eq, %27, %549 : vector<8x8xi32>
    %551 = arith.extui %550 : vector<8x8xi1> to vector<8x8xi32>
    %552 = arith.sitofp %551 : vector<8x8xi32> to vector<8x8xf32>
    %cst_144 = arith.constant 1.000000e+00 : f32
    %553 = vector.broadcast %cst_144 : f32 to vector<8x8xf32>
    %554 = arith.subf %553, %552 : vector<8x8xf32>
    %555 = arith.mulf %464, %554 : vector<8x8xf32>
    %556 = vector.shape_cast %539 : vector<8x8xf32> to vector<8x8x1xf32>
    %557 = vector.broadcast %556 : vector<8x8x1xf32> to vector<8x8x32xf32>
    %558 = arith.mulf %26, %557 : vector<8x8x32xf32>
    %cst_145 = arith.constant dense<0.000000e+00> : vector<8x32xf32>
    %559 = vector.multi_reduction <add>, %558, %cst_145 [1] : vector<8x8x32xf32> to vector<8x32xf32>
    %560 = vector.shape_cast %552 : vector<8x8xf32> to vector<8x8x1xf32>
    %561 = vector.broadcast %560 : vector<8x8x1xf32> to vector<8x8x16xf32>
    %562 = arith.mulf %0, %561 : vector<8x8x16xf32>
    %cst_146 = arith.constant dense<0.000000e+00> : vector<8x16xf32>
    %563 = vector.multi_reduction <add>, %562, %cst_146 [1] : vector<8x8x16xf32> to vector<8x16xf32>
    %cst_147 = arith.constant dense<0.000000e+00> : vector<8x32xf32>
    %564 = tpu.matmul %559, %4, %cst_147 {dimension_numbers = #tpu.dot_dimension_numbers<[1], [0], [0], [1], [0, 0, 1, 1], [], []>} : vector<8x32xf32>, vector<32x32xf32>, vector<8x32xf32> -> vector<8x32xf32>
    %cst_148 = arith.constant dense<0.000000e+00> : vector<8x32xf32>
    %565 = tpu.matmul %518, %5, %cst_148 {dimension_numbers = #tpu.dot_dimension_numbers<[1], [0], [0], [1], [0, 0, 1, 1], [], []>} : vector<8x32xf32>, vector<32x32xf32>, vector<8x32xf32> -> vector<8x32xf32>
    %566 = arith.addf %564, %565 : vector<8x32xf32>
    %567 = arith.addf %566, %16 : vector<8x32xf32>
    %568 = math.tanh %567 : vector<8x32xf32>
    %569 = vector.broadcast %c5_i32 : i32 to vector<8x8xi32>
    %570 = arith.cmpi eq, %27, %569 : vector<8x8xi32>
    %571 = vector.shape_cast %547 : vector<8xi32> to vector<8x1xi32>
    %572 = vector.shape_cast %571 : vector<8x1xi32> to vector<8x1xi32>
    %573 = vector.broadcast %572 : vector<8x1xi32> to vector<8x8xi32>
    %574 = arith.select %570, %573, %483 : vector<8x8xi1>, vector<8x8xi32>
    %575 = vector.broadcast %c5_i32 : i32 to vector<8x8x8xi32>
    %576 = arith.cmpi eq, %28, %575 : vector<8x8x8xi32>
    %577 = vector.shape_cast %539 : vector<8x8xf32> to vector<1x8x8xf32>
    %578 = vector.shape_cast %577 : vector<1x8x8xf32> to vector<1x8x8xf32>
    %579 = vector.broadcast %578 : vector<1x8x8xf32> to vector<8x8x8xf32>
    %580 = arith.select %576, %579, %489 : vector<8x8x8xi1>, vector<8x8x8xf32>
    %c6_i32 = arith.constant 6 : i32
    %cst_149 = arith.constant dense<0.000000e+00> : vector<8x128xf32>
    %581 = tpu.matmul %563, %2, %cst_149 {dimension_numbers = #tpu.dot_dimension_numbers<[1], [0], [0], [1], [0, 0, 1, 1], [], []>} : vector<8x16xf32>, vector<16x128xf32>, vector<8x128xf32> -> vector<8x128xf32>
    %cst_150 = arith.constant dense<0.000000e+00> : vector<8x128xf32>
    %582 = tpu.matmul %568, %3, %cst_150 {dimension_numbers = #tpu.dot_dimension_numbers<[1], [0], [0], [1], [0, 0, 1, 1], [], []>} : vector<8x32xf32>, vector<32x128xf32>, vector<8x128xf32> -> vector<8x128xf32>
    %583 = arith.addf %581, %582 : vector<8x128xf32>
    %584 = arith.addf %583, %10 : vector<8x128xf32>
    %585 = vector.extract_strided_slice %584 {offsets = [0, 0], sizes = [8, 32], strides = [1, 1]} : vector<8x128xf32> to vector<8x32xf32>
    %586 = arith.negf %585 : vector<8x32xf32>
    %587 = math.exp %586 : vector<8x32xf32>
    %cst_151 = arith.constant 1.000000e+00 : f32
    %588 = vector.broadcast %cst_151 : f32 to vector<8x32xf32>
    %589 = arith.addf %588, %587 : vector<8x32xf32>
    %590 = arith.divf %588, %589 : vector<8x32xf32>
    %591 = vector.extract_strided_slice %584 {offsets = [0, 32], sizes = [8, 32], strides = [1, 1]} : vector<8x128xf32> to vector<8x32xf32>
    %592 = arith.negf %591 : vector<8x32xf32>
    %593 = math.exp %592 : vector<8x32xf32>
    %cst_152 = arith.constant 1.000000e+00 : f32
    %594 = vector.broadcast %cst_152 : f32 to vector<8x32xf32>
    %595 = arith.addf %594, %593 : vector<8x32xf32>
    %596 = arith.divf %594, %595 : vector<8x32xf32>
    %597 = vector.extract_strided_slice %584 {offsets = [0, 64], sizes = [8, 32], strides = [1, 1]} : vector<8x128xf32> to vector<8x32xf32>
    %598 = math.tanh %597 : vector<8x32xf32>
    %599 = vector.extract_strided_slice %584 {offsets = [0, 96], sizes = [8, 32], strides = [1, 1]} : vector<8x128xf32> to vector<8x32xf32>
    %600 = arith.negf %599 : vector<8x32xf32>
    %601 = math.exp %600 : vector<8x32xf32>
    %cst_153 = arith.constant 1.000000e+00 : f32
    %602 = vector.broadcast %cst_153 : f32 to vector<8x32xf32>
    %603 = arith.addf %602, %601 : vector<8x32xf32>
    %604 = arith.divf %602, %603 : vector<8x32xf32>
    %605 = arith.mulf %596, %516 : vector<8x32xf32>
    %606 = arith.mulf %590, %598 : vector<8x32xf32>
    %607 = arith.addf %605, %606 : vector<8x32xf32>
    %608 = math.tanh %607 : vector<8x32xf32>
    %609 = arith.mulf %608, %604 : vector<8x32xf32>
    %cst_154 = arith.constant dense<0.000000e+00> : vector<8x32xf32>
    %610 = tpu.matmul %609, %6, %cst_154 {dimension_numbers = #tpu.dot_dimension_numbers<[1], [0], [0], [1], [0, 0, 1, 1], [], []>} : vector<8x32xf32>, vector<32x32xf32>, vector<8x32xf32> -> vector<8x32xf32>
    %611 = arith.addf %610, %13 : vector<8x32xf32>
    %612 = vector.shape_cast %611 : vector<8x32xf32> to vector<8x1x32xf32>
    %613 = vector.broadcast %612 : vector<8x1x32xf32> to vector<8x8x32xf32>
    %614 = arith.addf %613, %26 : vector<8x8x32xf32>
    %615 = math.tanh %614 : vector<8x8x32xf32>
    %616 = arith.mulf %615, %20 : vector<8x8x32xf32>
    %cst_155 = arith.constant dense<0.000000e+00> : vector<8x8xf32>
    %617 = vector.multi_reduction <add>, %616, %cst_155 [2] : vector<8x8x32xf32> to vector<8x8xf32>
    %cst_156 = arith.constant 0.000000e+00 : f32
    %618 = vector.broadcast %cst_156 : f32 to vector<8x8xf32>
    %619 = arith.cmpf oeq, %555, %618 : vector<8x8xf32>
    %cst_157 = arith.constant 0xFF800000 : f32
    %620 = vector.broadcast %cst_157 : f32 to vector<8x8xf32>
    %621 = arith.select %619, %620, %617 : vector<8x8xi1>, vector<8x8xf32>
    %cst_158 = arith.constant dense<0xFF800000> : vector<8xf32>
    %622 = vector.multi_reduction <maximumf>, %621, %cst_158 [1] : vector<8x8xf32> to vector<8xf32>
    %623 = vector.shape_cast %622 : vector<8xf32> to vector<8x1xf32>
    %624 = vector.broadcast %623 : vector<8x1xf32> to vector<8x8xf32>
    %625 = arith.subf %621, %624 : vector<8x8xf32>
    %626 = math.exp %625 : vector<8x8xf32>
    %cst_159 = arith.constant dense<0.000000e+00> : vector<8xf32>
    %627 = vector.multi_reduction <add>, %626, %cst_159 [1] : vector<8x8xf32> to vector<8xf32>
    %628 = vector.shape_cast %627 : vector<8xf32> to vector<8x1xf32>
    %629 = vector.broadcast %628 : vector<8x1xf32> to vector<8x8xf32>
    %630 = arith.divf %626, %629 : vector<8x8xf32>
    %631 = arith.mulf %630, %555 : vector<8x8xf32>
    %cst_160 = arith.constant dense<0xFF800000> : vector<8xf32>
    %632 = vector.multi_reduction <maximumf>, %631, %cst_160 [1] : vector<8x8xf32> to vector<8xf32>
    %633 = vector.shape_cast %632 : vector<8xf32> to vector<8x1xf32>
    %634 = vector.broadcast %633 : vector<8x1xf32> to vector<8x8xf32>
    %635 = arith.cmpf oeq, %631, %634 : vector<8x8xf32>
    %c8_i32_161 = arith.constant 8 : i32
    %636 = vector.broadcast %c8_i32_161 : i32 to vector<8x8xi32>
    %637 = arith.select %635, %27, %636 : vector<8x8xi1>, vector<8x8xi32>
    %cst_162 = arith.constant dense<2147483647> : vector<8xi32>
    %638 = vector.multi_reduction <minsi>, %637, %cst_162 [1] : vector<8x8xi32> to vector<8xi32>
    %639 = vector.shape_cast %638 : vector<8xi32> to vector<8x1xi32>
    %640 = vector.broadcast %639 : vector<8x1xi32> to vector<8x8xi32>
    %641 = arith.cmpi eq, %27, %640 : vector<8x8xi32>
    %642 = arith.extui %641 : vector<8x8xi1> to vector<8x8xi32>
    %643 = arith.sitofp %642 : vector<8x8xi32> to vector<8x8xf32>
    %cst_163 = arith.constant 1.000000e+00 : f32
    %644 = vector.broadcast %cst_163 : f32 to vector<8x8xf32>
    %645 = arith.subf %644, %643 : vector<8x8xf32>
    %646 = arith.mulf %555, %645 : vector<8x8xf32>
    %647 = vector.shape_cast %630 : vector<8x8xf32> to vector<8x8x1xf32>
    %648 = vector.broadcast %647 : vector<8x8x1xf32> to vector<8x8x32xf32>
    %649 = arith.mulf %26, %648 : vector<8x8x32xf32>
    %cst_164 = arith.constant dense<0.000000e+00> : vector<8x32xf32>
    %650 = vector.multi_reduction <add>, %649, %cst_164 [1] : vector<8x8x32xf32> to vector<8x32xf32>
    %651 = vector.shape_cast %643 : vector<8x8xf32> to vector<8x8x1xf32>
    %652 = vector.broadcast %651 : vector<8x8x1xf32> to vector<8x8x16xf32>
    %653 = arith.mulf %0, %652 : vector<8x8x16xf32>
    %cst_165 = arith.constant dense<0.000000e+00> : vector<8x16xf32>
    %654 = vector.multi_reduction <add>, %653, %cst_165 [1] : vector<8x8x16xf32> to vector<8x16xf32>
    %cst_166 = arith.constant dense<0.000000e+00> : vector<8x32xf32>
    %655 = tpu.matmul %650, %4, %cst_166 {dimension_numbers = #tpu.dot_dimension_numbers<[1], [0], [0], [1], [0, 0, 1, 1], [], []>} : vector<8x32xf32>, vector<32x32xf32>, vector<8x32xf32> -> vector<8x32xf32>
    %cst_167 = arith.constant dense<0.000000e+00> : vector<8x32xf32>
    %656 = tpu.matmul %609, %5, %cst_167 {dimension_numbers = #tpu.dot_dimension_numbers<[1], [0], [0], [1], [0, 0, 1, 1], [], []>} : vector<8x32xf32>, vector<32x32xf32>, vector<8x32xf32> -> vector<8x32xf32>
    %657 = arith.addf %655, %656 : vector<8x32xf32>
    %658 = arith.addf %657, %16 : vector<8x32xf32>
    %659 = math.tanh %658 : vector<8x32xf32>
    %660 = vector.broadcast %c6_i32 : i32 to vector<8x8xi32>
    %661 = arith.cmpi eq, %27, %660 : vector<8x8xi32>
    %662 = vector.shape_cast %638 : vector<8xi32> to vector<8x1xi32>
    %663 = vector.shape_cast %662 : vector<8x1xi32> to vector<8x1xi32>
    %664 = vector.broadcast %663 : vector<8x1xi32> to vector<8x8xi32>
    %665 = arith.select %661, %664, %574 : vector<8x8xi1>, vector<8x8xi32>
    %666 = vector.broadcast %c6_i32 : i32 to vector<8x8x8xi32>
    %667 = arith.cmpi eq, %28, %666 : vector<8x8x8xi32>
    %668 = vector.shape_cast %630 : vector<8x8xf32> to vector<1x8x8xf32>
    %669 = vector.shape_cast %668 : vector<1x8x8xf32> to vector<1x8x8xf32>
    %670 = vector.broadcast %669 : vector<1x8x8xf32> to vector<8x8x8xf32>
    %671 = arith.select %667, %670, %580 : vector<8x8x8xi1>, vector<8x8x8xf32>
    %c7_i32 = arith.constant 7 : i32
    %cst_168 = arith.constant dense<0.000000e+00> : vector<8x128xf32>
    %672 = tpu.matmul %654, %2, %cst_168 {dimension_numbers = #tpu.dot_dimension_numbers<[1], [0], [0], [1], [0, 0, 1, 1], [], []>} : vector<8x16xf32>, vector<16x128xf32>, vector<8x128xf32> -> vector<8x128xf32>
    %cst_169 = arith.constant dense<0.000000e+00> : vector<8x128xf32>
    %673 = tpu.matmul %659, %3, %cst_169 {dimension_numbers = #tpu.dot_dimension_numbers<[1], [0], [0], [1], [0, 0, 1, 1], [], []>} : vector<8x32xf32>, vector<32x128xf32>, vector<8x128xf32> -> vector<8x128xf32>
    %674 = arith.addf %672, %673 : vector<8x128xf32>
    %675 = arith.addf %674, %10 : vector<8x128xf32>
    %676 = vector.extract_strided_slice %675 {offsets = [0, 0], sizes = [8, 32], strides = [1, 1]} : vector<8x128xf32> to vector<8x32xf32>
    %677 = arith.negf %676 : vector<8x32xf32>
    %678 = math.exp %677 : vector<8x32xf32>
    %cst_170 = arith.constant 1.000000e+00 : f32
    %679 = vector.broadcast %cst_170 : f32 to vector<8x32xf32>
    %680 = arith.addf %679, %678 : vector<8x32xf32>
    %681 = arith.divf %679, %680 : vector<8x32xf32>
    %682 = vector.extract_strided_slice %675 {offsets = [0, 32], sizes = [8, 32], strides = [1, 1]} : vector<8x128xf32> to vector<8x32xf32>
    %683 = arith.negf %682 : vector<8x32xf32>
    %684 = math.exp %683 : vector<8x32xf32>
    %cst_171 = arith.constant 1.000000e+00 : f32
    %685 = vector.broadcast %cst_171 : f32 to vector<8x32xf32>
    %686 = arith.addf %685, %684 : vector<8x32xf32>
    %687 = arith.divf %685, %686 : vector<8x32xf32>
    %688 = vector.extract_strided_slice %675 {offsets = [0, 64], sizes = [8, 32], strides = [1, 1]} : vector<8x128xf32> to vector<8x32xf32>
    %689 = math.tanh %688 : vector<8x32xf32>
    %690 = vector.extract_strided_slice %675 {offsets = [0, 96], sizes = [8, 32], strides = [1, 1]} : vector<8x128xf32> to vector<8x32xf32>
    %691 = arith.negf %690 : vector<8x32xf32>
    %692 = math.exp %691 : vector<8x32xf32>
    %cst_172 = arith.constant 1.000000e+00 : f32
    %693 = vector.broadcast %cst_172 : f32 to vector<8x32xf32>
    %694 = arith.addf %693, %692 : vector<8x32xf32>
    %695 = arith.divf %693, %694 : vector<8x32xf32>
    %696 = arith.mulf %687, %607 : vector<8x32xf32>
    %697 = arith.mulf %681, %689 : vector<8x32xf32>
    %698 = arith.addf %696, %697 : vector<8x32xf32>
    %699 = math.tanh %698 : vector<8x32xf32>
    %700 = arith.mulf %699, %695 : vector<8x32xf32>
    %cst_173 = arith.constant dense<0.000000e+00> : vector<8x32xf32>
    %701 = tpu.matmul %700, %6, %cst_173 {dimension_numbers = #tpu.dot_dimension_numbers<[1], [0], [0], [1], [0, 0, 1, 1], [], []>} : vector<8x32xf32>, vector<32x32xf32>, vector<8x32xf32> -> vector<8x32xf32>
    %702 = arith.addf %701, %13 : vector<8x32xf32>
    %703 = vector.shape_cast %702 : vector<8x32xf32> to vector<8x1x32xf32>
    %704 = vector.broadcast %703 : vector<8x1x32xf32> to vector<8x8x32xf32>
    %705 = arith.addf %704, %26 : vector<8x8x32xf32>
    %706 = math.tanh %705 : vector<8x8x32xf32>
    %707 = arith.mulf %706, %20 : vector<8x8x32xf32>
    %cst_174 = arith.constant dense<0.000000e+00> : vector<8x8xf32>
    %708 = vector.multi_reduction <add>, %707, %cst_174 [2] : vector<8x8x32xf32> to vector<8x8xf32>
    %cst_175 = arith.constant 0.000000e+00 : f32
    %709 = vector.broadcast %cst_175 : f32 to vector<8x8xf32>
    %710 = arith.cmpf oeq, %646, %709 : vector<8x8xf32>
    %cst_176 = arith.constant 0xFF800000 : f32
    %711 = vector.broadcast %cst_176 : f32 to vector<8x8xf32>
    %712 = arith.select %710, %711, %708 : vector<8x8xi1>, vector<8x8xf32>
    %cst_177 = arith.constant dense<0xFF800000> : vector<8xf32>
    %713 = vector.multi_reduction <maximumf>, %712, %cst_177 [1] : vector<8x8xf32> to vector<8xf32>
    %714 = vector.shape_cast %713 : vector<8xf32> to vector<8x1xf32>
    %715 = vector.broadcast %714 : vector<8x1xf32> to vector<8x8xf32>
    %716 = arith.subf %712, %715 : vector<8x8xf32>
    %717 = math.exp %716 : vector<8x8xf32>
    %cst_178 = arith.constant dense<0.000000e+00> : vector<8xf32>
    %718 = vector.multi_reduction <add>, %717, %cst_178 [1] : vector<8x8xf32> to vector<8xf32>
    %719 = vector.shape_cast %718 : vector<8xf32> to vector<8x1xf32>
    %720 = vector.broadcast %719 : vector<8x1xf32> to vector<8x8xf32>
    %721 = arith.divf %717, %720 : vector<8x8xf32>
    %722 = arith.mulf %721, %646 : vector<8x8xf32>
    %cst_179 = arith.constant dense<0xFF800000> : vector<8xf32>
    %723 = vector.multi_reduction <maximumf>, %722, %cst_179 [1] : vector<8x8xf32> to vector<8xf32>
    %724 = vector.shape_cast %723 : vector<8xf32> to vector<8x1xf32>
    %725 = vector.broadcast %724 : vector<8x1xf32> to vector<8x8xf32>
    %726 = arith.cmpf oeq, %722, %725 : vector<8x8xf32>
    %c8_i32_180 = arith.constant 8 : i32
    %727 = vector.broadcast %c8_i32_180 : i32 to vector<8x8xi32>
    %728 = arith.select %726, %27, %727 : vector<8x8xi1>, vector<8x8xi32>
    %cst_181 = arith.constant dense<2147483647> : vector<8xi32>
    %729 = vector.multi_reduction <minsi>, %728, %cst_181 [1] : vector<8x8xi32> to vector<8xi32>
    %730 = vector.shape_cast %729 : vector<8xi32> to vector<8x1xi32>
    %731 = vector.broadcast %730 : vector<8x1xi32> to vector<8x8xi32>
    %732 = arith.cmpi eq, %27, %731 : vector<8x8xi32>
    %733 = arith.extui %732 : vector<8x8xi1> to vector<8x8xi32>
    %734 = arith.sitofp %733 : vector<8x8xi32> to vector<8x8xf32>
    %cst_182 = arith.constant 1.000000e+00 : f32
    %735 = vector.broadcast %cst_182 : f32 to vector<8x8xf32>
    %736 = arith.subf %735, %734 : vector<8x8xf32>
    %737 = arith.mulf %646, %736 : vector<8x8xf32>
    %738 = vector.shape_cast %721 : vector<8x8xf32> to vector<8x8x1xf32>
    %739 = vector.broadcast %738 : vector<8x8x1xf32> to vector<8x8x32xf32>
    %740 = arith.mulf %26, %739 : vector<8x8x32xf32>
    %cst_183 = arith.constant dense<0.000000e+00> : vector<8x32xf32>
    %741 = vector.multi_reduction <add>, %740, %cst_183 [1] : vector<8x8x32xf32> to vector<8x32xf32>
    %742 = vector.shape_cast %734 : vector<8x8xf32> to vector<8x8x1xf32>
    %743 = vector.broadcast %742 : vector<8x8x1xf32> to vector<8x8x16xf32>
    %744 = arith.mulf %0, %743 : vector<8x8x16xf32>
    %cst_184 = arith.constant dense<0.000000e+00> : vector<8x16xf32>
    %745 = vector.multi_reduction <add>, %744, %cst_184 [1] : vector<8x8x16xf32> to vector<8x16xf32>
    %cst_185 = arith.constant dense<0.000000e+00> : vector<8x32xf32>
    %746 = tpu.matmul %741, %4, %cst_185 {dimension_numbers = #tpu.dot_dimension_numbers<[1], [0], [0], [1], [0, 0, 1, 1], [], []>} : vector<8x32xf32>, vector<32x32xf32>, vector<8x32xf32> -> vector<8x32xf32>
    %cst_186 = arith.constant dense<0.000000e+00> : vector<8x32xf32>
    %747 = tpu.matmul %700, %5, %cst_186 {dimension_numbers = #tpu.dot_dimension_numbers<[1], [0], [0], [1], [0, 0, 1, 1], [], []>} : vector<8x32xf32>, vector<32x32xf32>, vector<8x32xf32> -> vector<8x32xf32>
    %748 = arith.addf %746, %747 : vector<8x32xf32>
    %749 = arith.addf %748, %16 : vector<8x32xf32>
    %750 = math.tanh %749 : vector<8x32xf32>
    %751 = vector.broadcast %c7_i32 : i32 to vector<8x8xi32>
    %752 = arith.cmpi eq, %27, %751 : vector<8x8xi32>
    %753 = vector.shape_cast %729 : vector<8xi32> to vector<8x1xi32>
    %754 = vector.shape_cast %753 : vector<8x1xi32> to vector<8x1xi32>
    %755 = vector.broadcast %754 : vector<8x1xi32> to vector<8x8xi32>
    %756 = arith.select %752, %755, %665 : vector<8x8xi1>, vector<8x8xi32>
    %757 = vector.broadcast %c7_i32 : i32 to vector<8x8x8xi32>
    %758 = arith.cmpi eq, %28, %757 : vector<8x8x8xi32>
    %759 = vector.shape_cast %721 : vector<8x8xf32> to vector<1x8x8xf32>
    %760 = vector.shape_cast %759 : vector<1x8x8xf32> to vector<1x8x8xf32>
    %761 = vector.broadcast %760 : vector<1x8x8xf32> to vector<8x8x8xf32>
    %762 = arith.select %758, %761, %671 : vector<8x8x8xi1>, vector<8x8x8xf32>
    %c8_i32_187 = arith.constant 8 : i32
    %c0_188 = arith.constant 0 : index
    %c0_189 = arith.constant 0 : index
    %c0_190 = arith.constant 0 : index
    %763 = vector.load %arg17[%c0_188, %c0_189, %c0_190] : memref<8x8x8xf32, #tpu.memory_space<vmem>>, vector<8x8x8xf32>
    tpu.vector_store %arg17[%c0_188, %c0_189, %c0_190], %762 {strides = array<i32>} : memref<8x8x8xf32, #tpu.memory_space<vmem>>, vector<8x8x8xf32>,
    %c0_191 = arith.constant 0 : index
    %c0_192 = arith.constant 0 : index
    %764 = vector.load %arg18[%c0_191, %c0_192] : memref<8x8xi32, #tpu.memory_space<vmem>>, vector<8x8xi32>
    tpu.vector_store %arg18[%c0_191, %c0_192], %756 {strides = array<i32>} : memref<8x8xi32, #tpu.memory_space<vmem>>, vector<8x8xi32>,
    %c0_193 = arith.constant 0 : index
    %c0_194 = arith.constant 0 : index
    %765 = vector.load %arg19[%c0_193, %c0_194] : memref<8x32xf32, #tpu.memory_space<vmem>>, vector<8x32xf32>
    tpu.vector_store %arg19[%c0_193, %c0_194], %750 {strides = array<i32>} : memref<8x32xf32, #tpu.memory_space<vmem>>, vector<8x32xf32>,
    %c0_195 = arith.constant 0 : index
    %c0_196 = arith.constant 0 : index
    %766 = vector.load %arg20[%c0_195, %c0_196] : memref<8x32xf32, #tpu.memory_space<vmem>>, vector<8x32xf32>
    tpu.vector_store %arg20[%c0_195, %c0_196], %698 {strides = array<i32>} : memref<8x32xf32, #tpu.memory_space<vmem>>, vector<8x32xf32>,
    return
  }
  func.func @transform_0(%arg0: i32) -> (i32, i32, i32) {
    %c0_i32 = arith.constant 0 : i32
    %c0_i32_0 = arith.constant 0 : i32
    %c0_i32_1 = arith.constant 0 : i32
    return %arg0, %c0_i32, %c0_i32_0 : i32, i32, i32
  }
  func.func @transform_1(%arg0: i32) -> (i32, i32) {
    %c0_i32 = arith.constant 0 : i32
    %c0_i32_0 = arith.constant 0 : i32
    return %arg0, %c0_i32 : i32, i32
  }
  func.func @transform_2(%arg0: i32) -> (i32, i32) {
    %c0_i32 = arith.constant 0 : i32
    %c0_i32_0 = arith.constant 0 : i32
    return %arg0, %c0_i32 : i32, i32
  }
  func.func @transform_3(%arg0: i32) -> (i32, i32) {
    %c0_i32 = arith.constant 0 : i32
    %c0_i32_0 = arith.constant 0 : i32
    return %arg0, %c0_i32 : i32, i32
  }
  func.func @transform_4(%arg0: i32) -> (i32, i32, i32) {
    %c0_i32 = arith.constant 0 : i32
    %c0_i32_0 = arith.constant 0 : i32
    %c0_i32_1 = arith.constant 0 : i32
    return %arg0, %c0_i32, %c0_i32_0 : i32, i32, i32
  }
  func.func @transform_5(%arg0: i32) -> (i32, i32) {
    %c0_i32 = arith.constant 0 : i32
    %c0_i32_0 = arith.constant 0 : i32
    %c0_i32_1 = arith.constant 0 : i32
    return %c0_i32, %c0_i32_0 : i32, i32
  }
  func.func @transform_6(%arg0: i32) -> (i32, i32) {
    %c0_i32 = arith.constant 0 : i32
    %c0_i32_0 = arith.constant 0 : i32
    %c0_i32_1 = arith.constant 0 : i32
    return %c0_i32, %c0_i32_0 : i32, i32
  }
  func.func @transform_7(%arg0: i32) -> (i32, i32) {
    %c0_i32 = arith.constant 0 : i32
    %c0_i32_0 = arith.constant 0 : i32
    %c0_i32_1 = arith.constant 0 : i32
    return %c0_i32, %c0_i32_0 : i32, i32
  }
  func.func @transform_8(%arg0: i32) -> (i32, i32) {
    %c0_i32 = arith.constant 0 : i32
    %c0_i32_0 = arith.constant 0 : i32
    %c0_i32_1 = arith.constant 0 : i32
    return %c0_i32, %c0_i32_0 : i32, i32
  }
  func.func @transform_9(%arg0: i32) -> (i32, i32) {
    %c0_i32 = arith.constant 0 : i32
    %c0_i32_0 = arith.constant 0 : i32
    %c0_i32_1 = arith.constant 0 : i32
    return %c0_i32, %c0_i32_0 : i32, i32
  }
  func.func @transform_10(%arg0: i32) -> (i32, i32) {
    %c0_i32 = arith.constant 0 : i32
    %c0_i32_0 = arith.constant 0 : i32
    %c0_i32_1 = arith.constant 0 : i32
    return %c0_i32, %c0_i32_0 : i32, i32
  }
  func.func @transform_11(%arg0: i32) -> (i32, i32) {
    %c0_i32 = arith.constant 0 : i32
    %c0_i32_0 = arith.constant 0 : i32
    %c0_i32_1 = arith.constant 0 : i32
    return %c0_i32, %c0_i32_0 : i32, i32
  }
  func.func @transform_12(%arg0: i32) -> (i32, i32) {
    %c0_i32 = arith.constant 0 : i32
    %c0_i32_0 = arith.constant 0 : i32
    %c0_i32_1 = arith.constant 0 : i32
    return %c0_i32, %c0_i32_0 : i32, i32
  }
  func.func @transform_13(%arg0: i32) -> (i32, i32) {
    %c0_i32 = arith.constant 0 : i32
    %c0_i32_0 = arith.constant 0 : i32
    %c0_i32_1 = arith.constant 0 : i32
    return %c0_i32, %c0_i32_0 : i32, i32
  }
  func.func @transform_14(%arg0: i32) -> (i32, i32) {
    %c0_i32 = arith.constant 0 : i32
    %c0_i32_0 = arith.constant 0 : i32
    %c0_i32_1 = arith.constant 0 : i32
    return %c0_i32, %c0_i32_0 : i32, i32
  }
  func.func @transform_15(%arg0: i32) -> (i32, i32) {
    %c0_i32 = arith.constant 0 : i32
    %c0_i32_0 = arith.constant 0 : i32
    %c0_i32_1 = arith.constant 0 : i32
    return %c0_i32, %c0_i32_0 : i32, i32
  }
  func.func @transform_16(%arg0: i32) -> (i32, i32, i32) {
    %c0_i32 = arith.constant 0 : i32
    %c0_i32_0 = arith.constant 0 : i32
    %c0_i32_1 = arith.constant 0 : i32
    return %c0_i32, %arg0, %c0_i32_0 : i32, i32, i32
  }
  func.func @transform_17(%arg0: i32) -> (i32, i32) {
    %c0_i32 = arith.constant 0 : i32
    %c0_i32_0 = arith.constant 0 : i32
    return %arg0, %c0_i32 : i32, i32
  }
  func.func @transform_18(%arg0: i32) -> (i32, i32) {
    %c0_i32 = arith.constant 0 : i32
    %c0_i32_0 = arith.constant 0 : i32
    return %arg0, %c0_i32 : i32, i32
  }
  func.func @transform_19(%arg0: i32) -> (i32, i32) {
    %c0_i32 = arith.constant 0 : i32
    %c0_i32_0 = arith.constant 0 : i32
    return %arg0, %c0_i32 : i32, i32
  }
}

</mosaic_0001>

<bundles_post_ra>
// kernel: tpu_custom_call.1
= control target key start
LH: loop header
LB: loop body
LE: loop exit
PB: predicated region body
PF: predicated region fallthrough
CT: control target
= control target key end

     0   :  { %s11717_s0 = inlined_call_operand.hbm [shape: f32[8,8,16], index: 0, kind: input, shape index: {}]   ;;  %s11718_s1 = inlined_call_operand.hbm [shape: f32[8,16], index: 1, kind: input, shape index: {}]   ;;  %s11719_s2 = inlined_call_operand.hbm [shape: f32[8,32], index: 2, kind: input, shape index: {}]   ;;  %s11720_s3 = inlined_call_operand.hbm [shape: f32[8,32], index: 3, kind: input, shape index: {}]   ;;  %s11721_s4 = inlined_call_operand.hbm [shape: f32[8,8,32], index: 4, kind: input, shape index: {}]   ;;  %s11722_s5 = inlined_call_operand.hbm [shape: f32[16,128], index: 5, kind: input, shape index: {}]   ;;  %s11723_s6 = inlined_call_operand.hbm [shape: f32[32,128], index: 6, kind: input, shape index: {}]   ;;  %s11724_s7 = inlined_call_operand.vmem [shape: f32[1,128], index: 7, kind: input, shape index: {}]   ;;  %s11725_s8 = inlined_call_operand.hbm [shape: f32[32,32], index: 8, kind: input, shape index: {}]   ;;  %s11726_s9 = inlined_call_operand.vmem [shape: f32[32,32], index: 9, kind: input, shape index: {}]   ;;  %s11727_s10 = inlined_call_operand.vmem [shape: f32[1,32], index: 10, kind: input, shape index: {}]   ;;  %s11728_s11 = inlined_call_operand.hbm [shape: f32[32,32], index: 11, kind: input, shape index: {}]   ;;  %s11729_s12 = inlined_call_operand.vmem [shape: f32[1,32], index: 12, kind: input, shape index: {}]   ;;  %s11730_s13 = inlined_call_operand.hbm [shape: f32[32,32], index: 13, kind: input, shape index: {}]   ;;  %s11731_s14 = inlined_call_operand.vmem [shape: f32[1,32], index: 14, kind: input, shape index: {}]   ;;  %s11732_s15 = inlined_call_operand.vmem [shape: f32[1,32], index: 15, kind: input, shape index: {}]   ;;  %s11733_s16 = inlined_call_operand.hbm [shape: f32[8,8,8], index: 16, kind: output, shape index: {0}]   ;;  %s11734_s17 = inlined_call_operand.hbm [shape: s32[8,8], index: 17, kind: output, shape index: {1}]   ;;  %s11735_s18 = inlined_call_operand.hbm [shape: f32[8,32], index: 18, kind: output, shape index: {2}]   ;;  %s11736_s19 = inlined_call_operand.hbm [shape: f32[8,32], index: 19, kind: output, shape index: {3}]  }
   0x1   :  { %11816 = sst [smem:[#allocation56_spill]] %s11717_s0 }
   0x2   :  { %11817 = sst [smem:[#allocation57_spill]] %s11718_s1 }
   0x3   :  { %11818 = sst [smem:[#allocation58_spill]] %s11719_s2 }
   0x4   :  { %11819 = sst [smem:[#allocation59_spill]] %s11720_s3 }
   0x5   :  { %11820 = sst [smem:[#allocation60_spill]] %s11733_s16 }
   0x6   :  { %25 = vsyncpa [#allocation3], 0 }
   0x7   :  { %26 = vsyncpa [#allocation6], 0 }
   0x8   :  { %27 = vsyncpa [#allocation9], 0 }
   0x9   :  { %28 = vsyncpa [#allocation12], 0 }
   0xa   :  { %29 = vsyncpa [#allocation15], 0 }
   0xb   :  { %30 = vsyncpa [#allocation18], 0 }
   0xc   :  { %31 = vsyncpa [#allocation4], 0 }
   0xd   :  { %32 = vsyncpa [#allocation21], 0 }
   0xe   :  { %33 = vsyncpa [#allocation24], 0  ;;  %s9553_s0 = smov [#allocation5]   ;;  %s9554_s20 = smov [#allocation8]  }
   0xf   :  { %s52_s30 = sshll.u32 %s9553_s0, 4  ;;  %s72_s21 = sshll.u32 %s9554_s20, 4  ;;  %s53_s30 = int_to_ptr.vmem [resolvable:$true] %s52_s30  ;;  %s73_s21 = int_to_ptr.vmem [resolvable:$true] %s72_s21 }
  0x10   :  { %s11821_s2 = sld [smem:[#allocation57_spill]] }
  0x16   :  { %s9227_s23 = scalar_lea.hbm %s11821_s2, 128 }
  0x17   :  { %p9228_p0 = scmp.ne.s32.totalorder %s11821_s2, %s9227_s23  ;;  %p9231_p1 = scmp.lt.u32.totalorder %s9227_s23, %s11821_s2 }
  0x19   :  { %p9233_p2 = pnand %p9231_p1, %p9228_p0 }
  0x1b   :  { %9236 = shalt.err (!%p9233_p2)
}
  0x1c   :  { %s9237_s27 = scalar_lea.vmem %s53_s30, 128  ;;  %p9242_p4 = scmp.lt.s32.totalorder %s53_s30, %s53_s30 }
  0x1d   :  { %p9238_p3 = scmp.ne.s32.totalorder %s53_s30, %s9237_s27  ;;  %p9243_p5 = scmp.lt.s32.totalorder %s9237_s27, %s9237_s27 }
  0x1f   :  { %p9244_p6 = por %p9243_p5, %p9242_p4 }
  0x21   :  { %p9245_p7 = pnand %p9244_p6, %p9238_p3 }
  0x23   :  { %9248 = shalt.err (!%p9245_p7)
}
  0x24   :  { %55 = dma.hbm_to_vmem [thread:$0]  %s11821_s2, 128, %s53_s30, [#allocation6]  }
  0x25   :  { %s11822_s1 = sld [smem:[#allocation59_spill]] }
  0x2b   :  { %s9249_s22 = scalar_lea.hbm %s11822_s1, 128 }
  0x2c   :  { %p9250_p8 = scmp.ne.s32.totalorder %s11822_s1, %s9249_s22  ;;  %p9253_p9 = scmp.lt.u32.totalorder %s9249_s22, %s11822_s1 }
  0x2e   :  { %p9255_p10 = pnand %p9253_p9, %p9250_p8 }
  0x30   :  { %9258 = shalt.err (!%p9255_p10)
}
  0x31   :  { %s9259_s26 = scalar_lea.vmem %s73_s21, 128  ;;  %p9264_p12 = scmp.lt.s32.totalorder %s73_s21, %s73_s21 }
  0x32   :  { %p9260_p11 = scmp.ne.s32.totalorder %s73_s21, %s9259_s26  ;;  %p9265_p13 = scmp.lt.s32.totalorder %s9259_s26, %s9259_s26 }
  0x34   :  { %p9266_p0 = por %p9265_p13, %p9264_p12 }
  0x36   :  { %p9267_p1 = pnand %p9266_p0, %p9260_p11 }
  0x38   :  { %9270 = shalt.err (!%p9267_p1)
}
  0x39   :  { %75 = dma.hbm_to_vmem [thread:$0]  %s11822_s1, 128, %s73_s21, [#allocation9]  }
  0x3a   :  { %s9555_s27 = smov [#allocation11]   ;;  %s9556_s29 = smov [#allocation14]  }
  0x3b   :  { %s93_s28 = sshll.u32 %s9555_s27, 4  ;;  %s119_s0 = sshll.u32 %s9556_s29, 4  ;;  %s94_s28 = int_to_ptr.vmem [resolvable:$true] %s93_s28  ;;  %s9701_s0 = int_to_ptr.vmem [resolvable:$true] %s119_s0 }
  0x3c   :  { %s9271_s24 = scalar_lea.hbm %s11722_s5, 256 }
  0x3d   :  { %p9272_p2 = scmp.ne.s32.totalorder %s11722_s5, %s9271_s24  ;;  %p9275_p3 = scmp.lt.u32.totalorder %s9271_s24, %s11722_s5 }
  0x3f   :  { %p9277_p4 = pnand %p9275_p3, %p9272_p2 }
  0x41   :  { %9280 = shalt.err (!%p9277_p4)
}
  0x42   :  { %s9281_s21 = scalar_lea.vmem %s94_s28, 256  ;;  %p9286_p6 = scmp.lt.s32.totalorder %s94_s28, %s94_s28 }
  0x43   :  { %p9282_p5 = scmp.ne.s32.totalorder %s94_s28, %s9281_s21  ;;  %p9287_p7 = scmp.lt.s32.totalorder %s9281_s21, %s9281_s21 }
  0x45   :  { %p9288_p8 = por %p9287_p7, %p9286_p6 }
  0x47   :  { %p9289_p9 = pnand %p9288_p8, %p9282_p5 }
  0x49   :  { %9292 = shalt.err (!%p9289_p9)
}
  0x4a   :  { %s9557_s1 = smov 128   ;;  %s9558_s30 = smov 8  }
  0x4b   :  { %99 = dma.hbm_to_vmem [thread:$0]  %s11722_s5, 256, %s94_s28, [#allocation12], %s9557_s1, %s9557_s1, %s9558_s30  }
  0x4c   :  { %s9293_s22 = scalar_lea.hbm %s11725_s8, 512 }
  0x4d   :  { %p9294_p10 = scmp.ne.s32.totalorder %s11725_s8, %s9293_s22  ;;  %p9297_p11 = scmp.lt.u32.totalorder %s9293_s22, %s11725_s8 }
  0x4f   :  { %p9299_p12 = pnand %p9297_p11, %p9294_p10 }
  0x51   :  { %9302 = shalt.err (!%p9299_p12)
}
  0x52   :  { %s9303_s26 = scalar_lea.vmem %s9701_s0, 512  ;;  %p9308_p0 = scmp.lt.s32.totalorder %s9701_s0, %s9701_s0 }
  0x53   :  { %p9304_p13 = scmp.ne.s32.totalorder %s9701_s0, %s9303_s26  ;;  %p9309_p1 = scmp.lt.s32.totalorder %s9303_s26, %s9303_s26 }
  0x55   :  { %p9310_p2 = por %p9309_p1, %p9308_p0 }
  0x57   :  { %p9311_p3 = pnand %p9310_p2, %p9304_p13 }
  0x59   :  { %9314 = shalt.err (!%p9311_p3)
}
  0x5a   :  { %125 = dma.hbm_to_vmem [thread:$0]  %s11725_s8, 512, %s9701_s0, [#allocation15], %s9557_s1, %s9557_s1, %s9558_s30  }
  0x5b   :  { %s9559_s21 = smov [#allocation2]   ;;  %s9560_s27 = smov [#allocation7]  }
  0x5c   :  { %s39_s2 = sshll.u32 %s9559_s21, 4  ;;  %s62_s29 = sshll.u32 %s9560_s27, 4  ;;  %s40_s2 = int_to_ptr.vmem [resolvable:$true] %s39_s2  ;;  %s63_s29 = int_to_ptr.vmem [resolvable:$true] %s62_s29 }
  0x5d   :  { %s11823_s24 = sld [smem:[#allocation56_spill]] }
  0x63   :  { %s9315_s25 = scalar_lea.hbm %s11823_s24, 1024 }
  0x64   :  { %p9316_p4 = scmp.ne.s32.totalorder %s11823_s24, %s9315_s25  ;;  %p9319_p5 = scmp.lt.u32.totalorder %s9315_s25, %s11823_s24 }
  0x66   :  { %p9321_p6 = pnand %p9319_p5, %p9316_p4 }
  0x68   :  { %9324 = shalt.err (!%p9321_p6)
}
  0x69   :  { %s9325_s8 = scalar_lea.vmem %s40_s2, 1024  ;;  %p9330_p8 = scmp.lt.s32.totalorder %s40_s2, %s40_s2 }
  0x6a   :  { %p9326_p7 = scmp.ne.s32.totalorder %s40_s2, %s9325_s8  ;;  %p9331_p9 = scmp.lt.s32.totalorder %s9325_s8, %s9325_s8 }
  0x6c   :  { %p9332_p10 = por %p9331_p9, %p9330_p8 }
  0x6e   :  { %p9333_p11 = pnand %p9332_p10, %p9326_p7 }
  0x70   :  { %9336 = shalt.err (!%p9333_p11)
}
  0x71   :  { %45 = dma.hbm_to_vmem [thread:$0]  %s11823_s24, 1024, %s40_s2, [#allocation3], %s9557_s1, %s9557_s1, %s9558_s30  }
  0x72   :  { %s11824_s16 = sld [smem:[#allocation58_spill]] }
  0x78   :  { %s9337_s27 = scalar_lea.hbm %s11824_s16, 128 }
  0x79   :  { %p9338_p12 = scmp.ne.s32.totalorder %s11824_s16, %s9337_s27  ;;  %p9341_p13 = scmp.lt.u32.totalorder %s9337_s27, %s11824_s16 }
  0x7b   :  { %p9343_p0 = pnand %p9341_p13, %p9338_p12 }
  0x7d   :  { %9346 = shalt.err (!%p9343_p0)
}
  0x7e   :  { %s9347_s3 = scalar_lea.vmem %s63_s29, 128  ;;  %p9352_p2 = scmp.lt.s32.totalorder %s63_s29, %s63_s29 }
  0x7f   :  { %p9348_p1 = scmp.ne.s32.totalorder %s63_s29, %s9347_s3  ;;  %p9353_p3 = scmp.lt.s32.totalorder %s9347_s3, %s9347_s3 }
  0x81   :  { %p9354_p4 = por %p9353_p3, %p9352_p2 }
  0x83   :  { %p9355_p5 = pnand %p9354_p4, %p9348_p1 }
  0x85   :  { %9358 = shalt.err (!%p9355_p5)
}
  0x86   :  { %65 = dma.hbm_to_vmem [thread:$0]  %s11824_s16, 128, %s63_s29, [#allocation6]  }
  0x87   :  { %s9561_s26 = smov [#allocation10]   ;;  %s9562_s0 = smov [#allocation13]  }
  0x88   :  { %s81_s8 = sshll.u32 %s9561_s26, 4  ;;  %s105_s5 = sshll.u32 %s9562_s0, 4  ;;  %s82_s8 = int_to_ptr.vmem [resolvable:$true] %s81_s8  ;;  %s9765_s5 = int_to_ptr.vmem [resolvable:$true] %s105_s5 }
  0x89   :  { %s9359_s27 = scalar_lea.hbm %s11721_s4, 1024 }
  0x8a   :  { %p9360_p6 = scmp.ne.s32.totalorder %s11721_s4, %s9359_s27  ;;  %p9363_p7 = scmp.lt.u32.totalorder %s9359_s27, %s11721_s4 }
  0x8c   :  { %p9365_p8 = pnand %p9363_p7, %p9360_p6 }
  0x8e   :  { %9368 = shalt.err (!%p9365_p8)
}
  0x8f   :  { %s9369_s29 = scalar_lea.vmem %s82_s8, 1024  ;;  %p9374_p10 = scmp.lt.s32.totalorder %s82_s8, %s82_s8 }
  0x90   :  { %p9370_p9 = scmp.ne.s32.totalorder %s82_s8, %s9369_s29  ;;  %p9375_p11 = scmp.lt.s32.totalorder %s9369_s29, %s9369_s29 }
  0x92   :  { %p9376_p12 = por %p9375_p11, %p9374_p10 }
  0x94   :  { %p9377_p13 = pnand %p9376_p12, %p9370_p9 }
  0x96   :  { %9380 = shalt.err (!%p9377_p13)
}
  0x97   :  { %87 = dma.hbm_to_vmem [thread:$0]  %s11721_s4, 1024, %s82_s8, [#allocation9], %s9557_s1, %s9557_s1, %s9558_s30  }
  0x98   :  { %s9381_s26 = scalar_lea.hbm %s11723_s6, 512 }
  0x99   :  { %p9382_p0 = scmp.ne.s32.totalorder %s11723_s6, %s9381_s26  ;;  %p9385_p1 = scmp.lt.u32.totalorder %s9381_s26, %s11723_s6 }
  0x9b   :  { %p9387_p2 = pnand %p9385_p1, %p9382_p0 }
  0x9d   :  { %9390 = shalt.err (!%p9387_p2)
}
  0x9e   :  { %s9391_s20 = scalar_lea.vmem %s9765_s5, 512  ;;  %p9396_p4 = scmp.lt.s32.totalorder %s9765_s5, %s9765_s5 }
  0x9f   :  { %p9392_p3 = scmp.ne.s32.totalorder %s9765_s5, %s9391_s20  ;;  %p9397_p5 = scmp.lt.s32.totalorder %s9391_s20, %s9391_s20 }
  0xa1   :  { %p9398_p6 = por %p9397_p5, %p9396_p4 }
  0xa3   :  { %p9399_p7 = pnand %p9398_p6, %p9392_p3 }
  0xa5   :  { %9402 = shalt.err (!%p9399_p7)
}
  0xa6   :  { %111 = dma.hbm_to_vmem [thread:$0]  %s11723_s6, 512, %s9765_s5, [#allocation12], %s9557_s1, %s9557_s1, %s9558_s30  }
  0xa7   :  { %s9563_s22 = smov [#allocation16]   ;;  %s9564_s23 = smov [#allocation17]  }
  0xa8   :  { %s135_s25 = sshll.u32 %s9563_s22, 4  ;;  %s149_s29 = sshll.u32 %s9564_s23, 4  ;;  %s136_s25 = int_to_ptr.vmem [resolvable:$true] %s135_s25  ;;  %s9802_s29 = int_to_ptr.vmem [resolvable:$true] %s149_s29 }
  0xa9   :  { %s9403_s2 = scalar_lea.hbm %s11728_s11, 512 }
  0xaa   :  { %p9404_p8 = scmp.ne.s32.totalorder %s11728_s11, %s9403_s2  ;;  %p9407_p9 = scmp.lt.u32.totalorder %s9403_s2, %s11728_s11 }
  0xac   :  { %p9409_p10 = pnand %p9407_p9, %p9404_p8 }
  0xae   :  { %9412 = shalt.err (!%p9409_p10)
}
  0xaf   :  { %s9413_s6 = scalar_lea.vmem %s136_s25, 512  ;;  %p9418_p12 = scmp.lt.s32.totalorder %s136_s25, %s136_s25 }
  0xb0   :  { %p9414_p11 = scmp.ne.s32.totalorder %s136_s25, %s9413_s6  ;;  %p9419_p13 = scmp.lt.s32.totalorder %s9413_s6, %s9413_s6 }
  0xb2   :  { %p9420_p0 = por %p9419_p13, %p9418_p12 }
  0xb4   :  { %p9421_p1 = pnand %p9420_p0, %p9414_p11 }
  0xb6   :  { %9424 = shalt.err (!%p9421_p1)
}
  0xb7   :  { %141 = dma.hbm_to_vmem [thread:$0]  %s11728_s11, 512, %s136_s25, [#allocation15], %s9557_s1, %s9557_s1, %s9558_s30  }
  0xb8   :  { %s9425_s4 = scalar_lea.hbm %s11730_s13, 512 }
  0xb9   :  { %p9426_p2 = scmp.ne.s32.totalorder %s11730_s13, %s9425_s4  ;;  %p9429_p3 = scmp.lt.u32.totalorder %s9425_s4, %s11730_s13 }
  0xbb   :  { %p9431_p4 = pnand %p9429_p3, %p9426_p2 }
  0xbd   :  { %9434 = shalt.err (!%p9431_p4)
}
  0xbe   :  { %s9435_s3 = scalar_lea.vmem %s9802_s29, 512  ;;  %p9440_p6 = scmp.lt.s32.totalorder %s9802_s29, %s9802_s29 }
  0xbf   :  { %p9436_p5 = scmp.ne.s32.totalorder %s9802_s29, %s9435_s3  ;;  %p9441_p7 = scmp.lt.s32.totalorder %s9435_s3, %s9435_s3 }
  0xc1   :  { %p9442_p8 = por %p9441_p7, %p9440_p6 }
  0xc3   :  { %p9443_p9 = pnand %p9442_p8, %p9436_p5 }
  0xc5   :  { %9446 = shalt.err (!%p9443_p9)
}
  0xc6   :  { %155 = dma.hbm_to_vmem [thread:$0]  %s11730_s13, 512, %s9802_s29, [#allocation18], %s9557_s1, %s9557_s1, %s9558_s30  }
  0xc7   :  { %9535 = dma.done.wait [#allocation3], 1024  }
  0xc8   :  { %9536 = vsyncadd [#allocation3], 4294966272 }
  0xc9   :  { %9537 = dma.done.wait [#allocation6], 256  }
  0xca   :  { %9538 = vsyncadd [#allocation6], 4294967040 }
  0xcb   :  { %9539 = dma.done.wait [#allocation9], 1152  }
  0xcc   :  { %9540 = vsyncadd [#allocation9], 4294966144 }
  0xcd   :  { %9541 = dma.done.wait [#allocation12], 768  }
  0xce   :  { %9542 = vsyncadd [#allocation12], 4294966528 }
  0xcf   :  { %9543 = dma.done.wait [#allocation15], 1024  }
  0xd0   :  { %9544 = vsyncadd [#allocation15], 4294966272 }
  0xd1   :  { %9545 = dma.done.wait [#allocation18], 512  }
  0xd2   :  { %9546 = vsyncadd [#allocation18], 4294966784  ;;  %v11742_v0 = vmov 0.0|0.0   ;;  %vm9566_vm0 = vmmov 0   ;;  %v11744_v1 = vmov 0.0   ;;  %v208_v2 = vld [vmem:[#allocation13] sm:$0xff] }
  0xd3   :  { %8678 = vmatprep.subr.bf16.mxu1 %v11742_v0  ;;  %8270 = vmatprep.mubr.msk.f32.mxu1 %vm9566_vm0, %v11744_v1  ;;  %v209_v3 = vld [vmem:[#allocation13 + $0x8] sm:$0xff]  ;;  %v210_v4 = vld [vmem:[#allocation13 + $0x10] sm:$0xff]  ;;  %v211_v6 = vld [vmem:[#allocation13 + $0x18] sm:$0xff]  ;;  %vm263_vm1 = vcmask 261120   ;;  %vm11760_vm2 = vcmask 130048   ;;  %s9568_s2 = smov 64  }
  0xd4   :  { %v9842_v5 = vpack.c.bf16 %v209_v3, %v208_v2  ;;  %v9845_v7 = vpack.c.bf16 %v211_v6, %v210_v4  ;;  %v206_v8 = vld [vmem:[#allocation11] sm:$0xff]  ;;  %v207_v9 = vld [vmem:[#allocation11 + $0x8] sm:$0xff]  ;;  %v396_v10 = vld [vmem:[#allocation7] sm:$0xff]  ;;  %s9569_s24 = smov 32   ;;  %vm836_vm3 = vcmask 1041409   ;;  %vm838_vm4 = vcmask 1042434  }
  0xd5   :  { %v9849_v11 = vpack.c.bf16 %v207_v9, %v206_v8  ;;  %v395_v12 = vld [vmem:[#allocation5] sm:$0xff]  ;;  %v397_v21 = vld [vmem:[#allocation8] sm:$0xff]  ;;  %v224_v28 = vld [vmem:[#allocation17] sm:$0xff]  ;;  %vm840_vm5 = vcmask 1043459   ;;  %vm842_vm6 = vcmask 1044484   ;;  %vm844_vm7 = vcmask 1045509  }
  0xd6   :  { %8680 = vmatpush3.bf16.msra.mxu1 %v9842_v5  ;;  %v7978_v15 = vld [vmem:[%s11724_s7] ss:$0 sm:$0xff]  ;;  %v225_v29 = vld [vmem:[#allocation17 + $0x8] sm:$0xff]  ;;  %v226_v30 = vld [vmem:[#allocation17 + $0x10] sm:$0xff]  ;;  %vm846_vm8 = vcmask 1046534   ;;  %vm848_vm9 = vcmask 1047559  }
  0xd7   :  { %8681 = vmatprep.subr.bf16.mxu1 %v11742_v0  ;;  %v8670_v31 = vpack.c.bf16 %v225_v29, %v224_v28  ;;  %v227_v32 = vld [vmem:[#allocation17 + $0x18] sm:$0xff]  ;;  %v198_v33 = vld [vmem:[#allocation10] sm:$0xff]  ;;  %v220_v35 = vld [vmem:[#allocation16] sm:$0xff]  ;;  %vm851_vm10 = vcmask 64512  }
  0xd8   :  { %v8674_v34 = vpack.c.bf16 %v227_v32, %v226_v30  ;;  %8250 = vmatprep.mubr.msk.f32.mxu0 %vm263_vm1, %v198_v33  ;;  %v221_v36 = vld [vmem:[#allocation16 + $0x8] sm:$0xff]  ;;  %v216_v38 = vld [vmem:[%s11726_s9] sm:$0xff]  ;;  %v217_v39 = vld [vmem:[%s11726_s9 + $0x8] sm:$0xff] }
  0xd9   :  { %8671 = vmatprep.subr.bf16.mxu0 %v8670_v31  ;;  %v9868_v37 = vpack.c.bf16 %v221_v36, %v220_v35  ;;  %v222_v40 = vld [vmem:[#allocation16 + $0x10] sm:$0xff]  ;;  %v223_v41 = vld [vmem:[#allocation16 + $0x18] sm:$0xff]  ;;  %v9880_v44 = vpack.c.bf16 %v217_v39, %v216_v38  ;;  %v200_v45 = vld [vmem:[#allocation10 + $0x10] sm:$0xff] }
  0xda   :  { %8683 = vmatpush3.bf16.msra.mxu1 %v9845_v7  ;;  %8673 = vmatpush3.bf16.msra.mxu0 %v8670_v31  ;;  %v9877_v42 = vpack.c.bf16 %v223_v41, %v222_v40  ;;  %v199_v43 = vld [vmem:[#allocation10 + $0x8] sm:$0xff]  ;;  %v218_v46 = vld [vmem:[%s11726_s9 + $0x10] sm:$0xff]  ;;  %v219_v47 = vld [vmem:[%s11726_s9 + $0x18] sm:$0xff]  ;;  %s9570_s9 = smov 96  }
  0xdb   :  { %8684 = vmatprep.subr.bf16.mxu1 %v11742_v0  ;;  %11825 = vst [vmem:[#allocation34_spill] sm:$0xff] %v9868_v37  ;;  %8675 = vmatprep.subr.bf16.mxu0 %v8674_v34  ;;  %v201_v48 = vld [vmem:[#allocation10 + $0x18] sm:$0xff]  ;;  %v9894_v49 = vpack.c.bf16 %v219_v47, %v218_v46  ;;  %v202_v50 = vld [vmem:[#allocation10 + $0x20] sm:$0xff]  ;;  %v203_v51 = vld [vmem:[#allocation10 + $0x28] sm:$0xff] }
  0xdc   :  { %11826 = vst [vmem:[#allocation35_spill] sm:$0xff] %v9877_v42  ;;  %v204_v52 = vld [vmem:[#allocation10 + $0x30] sm:$0xff]  ;;  %v205_v53 = vld [vmem:[#allocation10 + $0x38] sm:$0xff] }
  0xdd   :  { %8271 = vmatmul.mubr.msk.f32.vlgmr.msra.gmra.mrb[0].mxu1 %vm263_vm1, %v396_v10  ;;  %v393_v10 = vlaneseq }
  0xde   :  { %8686 = vmatpush3.bf16.msra.mxu1 %v9849_v11  ;;  %8277 = vmatprep.mubr.msk.f32.mxu1 %vm9566_vm0, %v11744_v1 }
  0xdf   :  { %8687 = vmatprep.subr.bf16.mxu1 %v11742_v0  ;;  %8677 = vmatpush3.bf16.msra.mxu0 %v8674_v34 }
  0xe0   :  { %8693 = vmatprep.subr.bf16.mxu0 %v11742_v0 }
  0xe1   :  { %8278 = vmatmul.mubr.msk.f32.vlgmr.msra.gmra.mrb[2].mxu1 %vm11760_vm2, %v395_v12  ;;  %v9571_v12 = vmov 1966171168  }
  0xe2   :  { %8288 = vmatprep.mubr.msk.f32.mxu1 %vm9566_vm0, %v11744_v1  ;;  %8689 = vmatpush3.bf16.msra.mxu1 %v9868_v37 }
  0xe3   :  { %8690 = vmatprep.subr.bf16.mxu1 %v11742_v0  ;;  %8251 = vmatmul.mubr.msk.f32.vlgmr.msra.gmra.mrb[0].mxu0 %vm263_vm1, %v199_v43 }
  0xe4   :  { %8253 = vmatprep.mubr.msk.f32.mxu0 %vm263_vm1, %v200_v45  ;;  %8695 = vmatpush3.bf16.msra.mxu0 %v9880_v44 }
  0xe5   :  { %8696 = vmatprep.subr.bf16.mxu0 %v11742_v0 }
  0xe6   :  { %8692 = vmatpush3.bf16.msra.mxu1 %v9877_v42 }
  0xe7   :  { %8699 = vmatprep.subr.bf16.mxu1 %v11742_v0  ;;  %8254 = vmatmul.mubr.msk.f32.gmra.mrb[2].mxu0 %vm263_vm1, %v201_v48 }
  0xe8   :  { %8256 = vmatprep.mubr.msk.f32.mxu0 %vm263_vm1, %v202_v50  ;;  %8698 = vmatpush3.bf16.msra.mxu0 %v9894_v49 }
  0xe9   :  { %8705 = vmatprep.subr.bf16.mxu0 %v11742_v0 }
  0xeb   :  { %8257 = vmatmul.mubr.msk.f32.gmra.mrb[4].mxu0 %vm263_vm1, %v203_v51 }
  0xec   :  { %8259 = vmatprep.mubr.msk.f32.mxu0 %vm263_vm1, %v204_v52 }
  0xef   :  { %8260 = vmatmul.mubr.msk.f32.gmra.mrb[6].mxu0 %vm263_vm1, %v205_v53 }
  0xf0   :  { %8299 = vmatprep.mubr.msk.f32.mxu0 %vm9566_vm0, %v11744_v1 }
 0x1b0   :  { %v467_v13 = vpop.f32.mrb[0].mxu1 }
 0x1b1   :  { %v8272_v14 = vpop.f32.mrb[1].mxu1 }
 0x1b4   :  { %v541_v16 = vpop.f32.mrb[2].mxu1 }
 0x1b5   :  { %v542_v17 = vadd.f32 %v541_v16, %v467_v13  ;;  %v8279_v18 = vpop.f32.mrb[3].mxu1  ;;  %v652_v13 = vunpack.c.l.s4 %v9571_v12  ;;  %v7979_v16 = vld [vmem:[%s11729_s12] ss:$0 sm:$0xff] }
 0x1b6   :  { %v8252_v61 = vpop.f32.mrb[0].mxu0 }
 0x1b7   :  { %v545_v19 = vadd.f32 %v7978_v15, %v542_v17  ;;  %v354_v62 = vpop.f32.mrb[1].mxu0  ;;  %v653_v14 = vunpack.c.0.s8 %v652_v13  ;;  %v9921_v15 = vshrl.u32 %v393_v10, 7 }
 0x1b9   :  { %8920 = vtanh.f32 %v545_v19  ;;  %v7993_v22 = vmul.f32 -1.442695, %v545_v19  ;;  %v9927_v17 = vsub.s32 %v653_v14, %v9921_v15 }
 0x1ba   :  { %v8255_v63 = vpop.f32.mrb[2].mxu0 }
 0x1bb   :  { %8922 = vpow2.f32 %v7993_v22  ;;  %v364_v2 = vpop.f32.mrb[3].mxu0  ;;  %11827 = vst [vmem:[#allocation36_spill] sm:$0xff] %v9927_v17 }
 0x1be   :  { %v8258_v3 = vpop.f32.mrb[4].mxu0 }
 0x1bf   :  { %v374_v4 = vpop.f32.mrb[5].mxu0 }
 0x1c2   :  { %v8261_v6 = vpop.f32.mrb[6].mxu0 }
 0x1c3   :  { %v8921_v20 = vpop.eup %8920  ;;  %v384_v8 = vpop.f32.mrb[7].mxu0 }
 0x1c4   :  { %559 = vrot.lane.b32.xlu0 %v8921_v20, %s9568_s2 }
 0x1c5   :  { %v8923_v23 = vpop.eup %8922 }
 0x1c6   :  { %v549_v24 = vadd.f32 1.0, %v8923_v23  ;;  %v7982_v23 = vld [vmem:[%s11731_s14] ss:$0 sm:$0xff] }
 0x1c7   :  { %v9940_v30 = vadd.f32 %v8252_v61, %v7982_v23  ;;  %v9942_v31 = vadd.f32 %v7982_v23, %v354_v62  ;;  %v9946_v36 = vadd.f32 %v8255_v63, %v7982_v23  ;;  %v9948_v38 = vadd.f32 %v7982_v23, %v364_v2 }
 0x1c8   :  { %554 = vrot.lane.b32.xlu0 %v397_v21, %s9569_s24  ;;  %8924 = vrcp.f32 %v549_v24  ;;  %v9950_v39 = vadd.f32 %v8258_v3, %v7982_v23  ;;  %v9953_v41 = vadd.f32 %v7982_v23, %v374_v4  ;;  %v9969_v62 = vadd.f32 %v7982_v23, %v384_v8 }
 0x1c9   :  { %11828 = vst [vmem:[#allocation37_spill] sm:$0xff] %v9940_v30  ;;  %11829 = vst [vmem:[#allocation38_spill] sm:$0xff] %v9942_v31 }
 0x1ca   :  { %11830 = vst [vmem:[#allocation39_spill] sm:$0xff] %v9946_v36  ;;  %11831 = vst [vmem:[#allocation40_spill] sm:$0xff] %v9948_v38 }
 0x1cb   :  { %11832 = vst [vmem:[#allocation41_spill] sm:$0xff] %v9950_v39  ;;  %11833 = vst [vmem:[#allocation42_spill] sm:$0xff] %v9953_v41 }
 0x1cc   :  { %11834 = vst [vmem:[#allocation43_spill] sm:$0xff] %v9969_v62 }
 0x1d2   :  { %v8925_v25 = vpop.eup %8924 }
 0x236   :  { %v560_v26 = vpop.permute.xlu0 %559 }
 0x237   :  { %v562_v27 = vmul.f32 %v8925_v25, %v560_v26  ;;  %v9936_v26 = vsub.s32 0, %v9921_v15 }
 0x239   :  { %564 = vrot.lane.b32.xlu1 %v562_v27, %s9569_s24 }
 0x23a   :  { %v555_v54 = vpop.permute.xlu0 %554 }
 0x23b   :  { %v557_v55 = vmul.f32 %v8925_v25, %v555_v54 }
 0x23d   :  { %570 = vrot.lane.b32.xlu1 %v8925_v25, %s9568_s2 }
 0x2ab   :  { %v565_v56 = vpop.permute.xlu1 %564 }
 0x2ac   :  { %v9906_v57 = vadd.f32 %v565_v56, %v557_v55  ;;  %v9962_v55 = vadd.f32 %v8261_v6, %v7982_v23  ;;  %v7981_v6 = vld [vmem:[%s11732_s15] ss:$0 sm:$0xff] }
 0x2ae   :  { %8926 = vtanh.f32 %v9906_v57 }
 0x2af   :  { %v571_v59 = vpop.permute.xlu1 %570 }
 0x2b8   :  { %v8927_v58 = vpop.eup %8926 }
 0x2b9   :  { %v573_v60 = vmul.f32 %v8927_v58, %v571_v59 }
 0x2bb   :  { %575 = vrot.lane.b32.xlu0 %v573_v60, %s9570_s9 }
 0x32d   :  { %v576_v9 = vpop.permute.xlu0 %575 }
 0x32e   :  { %8289 = vmatmul.mubr.msk.f32.vlgmr.msra.gmra.mrb[4].mxu1 %vm263_vm1, %v576_v9  ;;  %8300 = vmatmul.mubr.msk.f32.vlgmr.msra.gmra.mrb[8].mxu0 %vm263_vm1, %v576_v9 }
 0x32f   :  { %8310 = vmatprep.mubr.msk.f32.mxu1 %vm9566_vm0, %v11744_v1  ;;  %8707 = vmatpush3.bf16.msra.mxu0 %v9842_v5 }
 0x330   :  { %8708 = vmatprep.subr.bf16.mxu0 %v11742_v0  ;;  %8321 = vmatprep.mubr.msk.f32.mxu0 %vm9566_vm0, %v11744_v1 }
 0x333   :  { %8710 = vmatpush3.bf16.msra.mxu0 %v9845_v7 }
 0x334   :  { %8714 = vmatprep.subr.bf16.mxu0 %v11742_v0 }
 0x401   :  { %v645_v18 = vpop.f32.mrb[4].mxu1  ;;  %v9929_v19 = vpop.f32.mrb[8].mxu0 }
 0x402   :  { %v646_v20 = vadd.f32 %v7979_v16, %v645_v18  ;;  %v8290_v21 = vpop.f32.mrb[5].mxu1  ;;  %v8301_v22 = vpop.f32.mrb[9].mxu0 }
 0x404   :  { %v650_v24 = vcombine.high %v646_v20, %v646_v20  ;;  %v657_v25 = vrot.slane %v646_v20, %v9927_v17 }
 0x406   :  { %v664_v27 = vrot.slane %v650_v24, %v9927_v17  ;;  %v665_v28 = vcombine.high %v657_v25, %v657_v25  ;;  %v673_v29 = vrot.slane %v657_v25, %v9927_v17 }
 0x408   :  { %v666_v32 = vcombine.high %v664_v27, %v664_v27  ;;  %v680_v33 = vrot.slane %v664_v27, %v9927_v17  ;;  %v687_v34 = vrot.slane %v665_v28, %v9927_v17  ;;  %v695_v35 = vcombine.high %v673_v29, %v673_v29 }
 0x409   :  { %v702_v40 = vrot.slane %v673_v29, %v9936_v26 }
 0x40a   :  { %v694_v43 = vrot.slane %v666_v32, %v9927_v17  ;;  %v697_v45 = vcombine.high %v687_v34, %v687_v34  ;;  %v706_v46 = vrot.slane %v687_v34, %v9936_v26  ;;  %v696_v47 = vcombine.high %v680_v33, %v680_v33 }
 0x40b   :  { %v710_v48 = vrot.slane %v695_v35, %v9936_v26  ;;  %v718_v50 = vrot.slane %v680_v33, %v9936_v26  ;;  %v739_v51 = vadd.f32 %v702_v40, %v9942_v31 }
 0x40c   :  { %v698_v52 = vcombine.high %v694_v43, %v694_v43  ;;  %v714_v53 = vrot.slane %v697_v45, %v9936_v26  ;;  %v722_v54 = vrot.slane %v694_v43, %v9936_v26  ;;  %v740_v56 = vadd.f32 %v706_v46, %v9940_v30 }
 0x40d   :  { %v741_v58 = vadd.f32 %v710_v48, %v9948_v38  ;;  %8928 = vtanh.f32 %v739_v51  ;;  %v743_v61 = vadd.f32 %v718_v50, %v9953_v41  ;;  %v726_v63 = vrot.slane %v696_v47, %v9936_v26 }
 0x40e   :  { %v730_v59 = vrot.slane %v698_v52, %v9936_v26  ;;  %v742_v60 = vadd.f32 %v714_v53, %v9946_v36  ;;  %v744_v2 = vadd.f32 %v722_v54, %v9950_v39  ;;  %8930 = vtanh.f32 %v740_v56 }
 0x40f   :  { %8932 = vtanh.f32 %v741_v58  ;;  %v745_v4 = vadd.f32 %v726_v63, %v9969_v62  ;;  %v9987_v47 = vand.u32 127, %v393_v10 }
 0x410   :  { %8934 = vtanh.f32 %v742_v60  ;;  %v746_v3 = vadd.f32 %v730_v59, %v9962_v55 }
 0x411   :  { %8936 = vtanh.f32 %v743_v61  ;;  %v9991_v50 = vsub.s32 %v9987_v47, %v9921_v15 }
 0x412   :  { %8938 = vtanh.f32 %v744_v2 }
 0x413   :  { %8940 = vtanh.f32 %v746_v3  ;;  %11835 = vst [vmem:[#allocation44_spill] sm:$0xff] %v9991_v50 }
 0x414   :  { %8942 = vtanh.f32 %v745_v4 }
 0x417   :  { %v8929_v8 = vpop.eup %8928 }
 0x418   :  { %v755_v9 = vmul.f32 %v8929_v8, %v7981_v6  ;;  %v8931_v12 = vpop.eup %8930 }
 0x419   :  { %v8933_v13 = vpop.eup %8932  ;;  %v756_v16 = vmul.f32 %v8931_v12, %v7981_v6 }
 0x41a   :  { %v763_v14 = vsel %vm263_vm1, %v755_v9, 0.0  ;;  %v8935_v18 = vpop.eup %8934  ;;  %v757_v23 = vmul.f32 %v8933_v13, %v7981_v6 }
 0x41b   :  { %764 = vadd.xlane.f32.xlu1 %v763_v14  ;;  %v8937_v20 = vpop.eup %8936  ;;  %v766_v21 = vsel %vm263_vm1, %v756_v16, 0.0  ;;  %v758_v22 = vmul.f32 %v8935_v18, %v7981_v6 }
 0x41c   :  { %v8939_v24 = vpop.eup %8938  ;;  %767 = vadd.xlane.f32.xlu0 %v766_v21  ;;  %v769_v29 = vsel %vm263_vm1, %v757_v23, 0.0  ;;  %v759_v32 = vmul.f32 %v8937_v20, %v7981_v6  ;;  %v9572_v21 = vmov 0   ;;  %v10013_v23 = vsub.s32 2, %v9921_v15 }
 0x41d   :  { %v772_v25 = vsel %vm263_vm1, %v758_v22, 0.0  ;;  %v760_v27 = vmul.f32 %v8939_v24, %v7981_v6  ;;  %v8941_v28 = vpop.eup %8940  ;;  %8919 = vset.pattern.permute.xlu0 %v9572_v21  ;;  %8918 = vset.pattern.permute.xlu1 %v9572_v21  ;;  %v10010_v22 = vsub.s32 1, %v9921_v15  ;;  %v10016_v24 = vsub.s32 3, %v9921_v15 }
 0x41e   :  { %v8943_v33 = vpop.eup %8942  ;;  %v762_v35 = vmul.f32 %v8941_v28, %v7981_v6  ;;  %v775_v40 = vsel %vm263_vm1, %v759_v32, 0.0 }
 0x41f   :  { %773 = vadd.xlane.f32.xlu1 %v772_v25  ;;  %v778_v34 = vsel %vm263_vm1, %v760_v27, 0.0  ;;  %v761_v43 = vmul.f32 %v8943_v33, %v7981_v6 }
 0x420   :  { %770 = vadd.xlane.f32.xlu0 %v769_v29  ;;  %v784_v45 = vsel %vm263_vm1, %v762_v35, 0.0 }
 0x421   :  { %v781_v46 = vsel %vm263_vm1, %v761_v43, 0.0 }
 0x423   :  { %779 = vadd.xlane.f32.xlu1 %v778_v34  ;;  %v10022_v34 = vsub.s32 4, %v9921_v15 }
 0x424   :  { %776 = vadd.xlane.f32.xlu0 %v775_v40 }
 0x427   :  { %785 = vadd.xlane.f32.xlu1 %v784_v45 }
 0x428   :  { %782 = vadd.xlane.f32.xlu0 %v781_v46  ;;  %v10026_v46 = vsub.s32 5, %v9921_v15 }
 0x4a8   :  { %v765_v48 = vpop.xlane.xlu1 %764 }
 0x4a9   :  { %v768_v51 = vpop.xlane.xlu0 %767  ;;  %v807_v54 = vrot.slane %v765_v48, %v9991_v50 }
 0x4aa   :  { %v811_v52 = vrot.slane %v768_v51, %v9991_v50 }
 0x4ac   :  { %v774_v53 = vpop.xlane.xlu1 %773  ;;  %v837_v59 = vsel %vm836_vm3, %v811_v52, %v807_v54 }
 0x4ad   :  { %v771_v56 = vpop.xlane.xlu0 %770  ;;  %v819_v61 = vrot.slane %v774_v53, %v9991_v50 }
 0x4ae   :  { %v815_v58 = vrot.slane %v771_v56, %v9991_v50 }
 0x4b0   :  { %v780_v10 = vpop.xlane.xlu1 %779  ;;  %v839_v60 = vsel %vm838_vm4, %v815_v58, %v837_v59 }
 0x4b1   :  { %v777_v63 = vpop.xlane.xlu0 %776  ;;  %v841_v3 = vsel %vm840_vm5, %v819_v61, %v839_v60  ;;  %v827_v8 = vrot.slane %v780_v10, %v9991_v50 }
 0x4b2   :  { %v823_v2 = vrot.slane %v777_v63, %v9991_v50 }
 0x4b4   :  { %v843_v4 = vsel %vm842_vm6, %v823_v2, %v841_v3  ;;  %v786_v6 = vpop.xlane.xlu1 %785 }
 0x4b5   :  { %v783_v9 = vpop.xlane.xlu0 %782  ;;  %v835_v13 = vrot.slane %v786_v6, %v9991_v50  ;;  %v845_v14 = vsel %vm844_vm7, %v827_v8, %v843_v4 }
 0x4b6   :  { %v831_v12 = vrot.slane %v783_v9, %v9991_v50 }
 0x4b8   :  { %v847_v16 = vsel %vm846_vm8, %v831_v12, %v845_v14 }
 0x4b9   :  { %v849_v18 = vsel %vm848_vm9, %v835_v13, %v847_v16 }
 0x4ba   :  { %v852_v20 = vsel %vm851_vm10, %v849_v18, -inf }
 0x4bb   :  { %853 = vmax.xlane.f32.xlu0 %v852_v20 }
 0x548   :  { %v854_v25 = vpop.xlane.xlu0 %853 }
 0x549   :  { %v859_v27 = vrot.slane %v854_v25, %v9936_v26  ;;  %v863_v28 = vrot.slane %v854_v25, %v10010_v22  ;;  %v867_v29 = vrot.slane %v854_v25, %v10013_v23  ;;  %v871_v35 = vrot.slane %v854_v25, %v10016_v24 }
 0x54a   :  { %v875_v52 = vrot.slane %v854_v25, %v10022_v34 }
 0x54b   :  { %v897_v32 = vsub.f32 %v768_v51, %v863_v28  ;;  %v896_v33 = vsub.f32 %v765_v48, %v859_v27  ;;  %v898_v40 = vsub.f32 %v771_v56, %v867_v29  ;;  %v899_v58 = vsub.f32 %v774_v53, %v871_v35 }
 0x54c   :  { %v10030_v51 = vsub.s32 6, %v9921_v15  ;;  %v879_v48 = vrot.slane %v854_v25, %v10026_v46  ;;  %v900_v60 = vsub.f32 %v777_v63, %v875_v52  ;;  %v10034_v56 = vsub.s32 7, %v9921_v15 }
 0x54d   :  { %v906_v43 = vmul.f32 1.442695, %v897_v32  ;;  %v904_v45 = vmul.f32 1.442695, %v896_v33  ;;  %v908_v54 = vmul.f32 1.442695, %v898_v40 }
 0x54e   :  { %v910_v59 = vmul.f32 1.442695, %v899_v58  ;;  %v883_v61 = vrot.slane %v854_v25, %v10030_v51  ;;  %v912_v2 = vmul.f32 1.442695, %v900_v60  ;;  %v901_v3 = vsub.f32 %v780_v10, %v879_v48 }
 0x54f   :  { %8944 = vpow2.f32 %v906_v43  ;;  %v887_v53 = vrot.slane %v854_v25, %v10034_v56 }
 0x550   :  { %8946 = vpow2.f32 %v904_v45  ;;  %v914_v12 = vmul.f32 1.442695, %v901_v3  ;;  %v902_v13 = vsub.f32 %v783_v9, %v883_v61 }
 0x551   :  { %8948 = vpow2.f32 %v908_v54  ;;  %v903_v14 = vsub.f32 %v786_v6, %v887_v53 }
 0x552   :  { %8950 = vpow2.f32 %v910_v59  ;;  %v916_v15 = vmul.f32 1.442695, %v902_v13 }
 0x553   :  { %8952 = vpow2.f32 %v912_v2  ;;  %v918_v10 = vmul.f32 1.442695, %v903_v14 }
 0x554   :  { %8954 = vpow2.f32 %v914_v12 }
 0x555   :  { %8956 = vpow2.f32 %v916_v15 }
 0x556   :  { %8958 = vpow2.f32 %v918_v10 }
 0x559   :  { %v10037_v4 = vpop.eup %8944 }
 0x55a   :  { %v8947_v8 = vpop.eup %8946  ;;  %932 = vperm.xlu0 %8919, %v10037_v4  }
 0x55b   :  { %929 = vperm.xlu1 %8918, %v8947_v8   ;;  %v10041_v63 = vpop.eup %8948 }
 0x55c   :  { %v10044_v16 = vpop.eup %8950 }
 0x55d   :  { %v10047_v18 = vpop.eup %8952 }
 0x55e   :  { %v10050_v20 = vpop.eup %8954 }
 0x55f   :  { %935 = vperm.xlu1 %8918, %v10041_v63   ;;  %v10053_v9 = vpop.eup %8956 }
 0x560   :  { %v10056_v6 = vpop.eup %8958 }
 0x563   :  { %938 = vperm.xlu1 %8918, %v10044_v16  }
 0x567   :  { %941 = vperm.xlu1 %8918, %v10047_v18  }
 0x56b   :  { %944 = vperm.xlu1 %8918, %v10050_v20  }
 0x56f   :  { %947 = vperm.xlu1 %8918, %v10053_v9  }
 0x573   :  { %950 = vperm.xlu1 %8918, %v10056_v6  }
 0x5d9   :  { %v933_v29 = vpop.permute.xlu0 %932 }
 0x5da   :  { %v930_v21 = vpop.permute.xlu1 %929  ;;  %v959_v33 = vrot.slane %v933_v29, %v9991_v50 }
 0x5db   :  { %v955_v35 = vrot.slane %v930_v21, %v9991_v50 }
 0x5dd   :  { %v984_v54 = vsel %vm836_vm3, %v959_v33, %v955_v35 }
 0x5de   :  { %v936_v25 = vpop.permute.xlu1 %935 }
 0x5df   :  { %v963_v40 = vrot.slane %v936_v25, %v9991_v50 }
 0x5e1   :  { %v985_v48 = vsel %vm838_vm4, %v963_v40, %v984_v54 }
 0x5e2   :  { %v939_v27 = vpop.permute.xlu1 %938 }
 0x5e3   :  { %v967_v43 = vrot.slane %v939_v27, %v9991_v50 }
 0x5e5   :  { %v986_v60 = vsel %vm840_vm5, %v967_v43, %v985_v48 }
 0x5e6   :  { %v942_v28 = vpop.permute.xlu1 %941 }
 0x5e7   :  { %v971_v45 = vrot.slane %v942_v28, %v9991_v50 }
 0x5e9   :  { %v987_v61 = vsel %vm842_vm6, %v971_v45, %v986_v60 }
 0x5ea   :  { %v945_v32 = vpop.permute.xlu1 %944 }
 0x5eb   :  { %v975_v58 = vrot.slane %v945_v32, %v9991_v50 }
 0x5ed   :  { %v988_v53 = vsel %vm844_vm7, %v975_v58, %v987_v61 }
 0x5ee   :  { %v948_v52 = vpop.permute.xlu1 %947 }
 0x5ef   :  { %v979_v59 = vrot.slane %v948_v52, %v9991_v50 }
 0x5f1   :  { %v989_v12 = vsel %vm846_vm8, %v979_v59, %v988_v53 }
 0x5f2   :  { %v951_v2 = vpop.permute.xlu1 %950 }
 0x5f3   :  { %v983_v3 = vrot.slane %v951_v2, %v9991_v50 }
 0x5f5   :  { %v990_v13 = vsel %vm848_vm9, %v983_v3, %v989_v12  ;;  %v213_v3 = vld [vmem:[#allocation14 + $0x8] sm:$0xff]  ;;  %v215_v12 = vld [vmem:[#allocation14 + $0x18] sm:$0xff] }
 0x5f6   :  { %v992_v15 = vsel %vm851_vm10, %v990_v13, 0.0 }
 0x5f7   :  { %993 = vadd.xlane.f32.xlu1 %v992_v15 }
 0x684   :  { %v994_v14 = vpop.xlane.xlu1 %993 }
 0x685   :  { %v999_v10 = vrot.slane %v994_v14, %v9936_v26  ;;  %v1003_v21 = vrot.slane %v994_v14, %v10010_v22  ;;  %v1007_v25 = vrot.slane %v994_v14, %v10013_v23  ;;  %v1011_v27 = vrot.slane %v994_v14, %v10016_v24 }
 0x686   :  { %v1015_v29 = vrot.slane %v994_v14, %v10022_v34  ;;  %v1019_v35 = vrot.slane %v994_v14, %v10026_v46  ;;  %v1023_v45 = vrot.slane %v994_v14, %v10030_v51  ;;  %v1027_v54 = vrot.slane %v994_v14, %v10034_v56 }
 0x687   :  { %8960 = vrcp.f32 %v999_v10 }
 0x688   :  { %8962 = vrcp.f32 %v1003_v21 }
 0x689   :  { %8964 = vrcp.f32 %v1007_v25 }
 0x68a   :  { %8966 = vrcp.f32 %v1011_v27 }
 0x68b   :  { %8968 = vrcp.f32 %v1015_v29 }
 0x68c   :  { %8970 = vrcp.f32 %v1019_v35 }
 0x68d   :  { %8972 = vrcp.f32 %v1023_v45 }
 0x68e   :  { %8974 = vrcp.f32 %v1027_v54 }
 0x691   :  { %v8961_v28 = vpop.eup %8960 }
 0x692   :  { %v10080_v32 = vmul.f32 %v8961_v28, %v8947_v8  ;;  %v8963_v33 = vpop.eup %8962 }
 0x693   :  { %v10085_v40 = vmul.f32 %v8963_v33, %v10037_v4  ;;  %v8965_v43 = vpop.eup %8964 }
 0x694   :  { %11836 = vst [vmem:[#allocation45_spill] sm:$0xff] %v10080_v32  ;;  %1061 = vperm.xlu0 %8919, %v10080_v32   ;;  %v10090_v52 = vmul.f32 %v8965_v43, %v10041_v63  ;;  %v8967_v8 = vpop.eup %8966 }
 0x695   :  { %11837 = vst [vmem:[#allocation46_spill] sm:$0xff] %v10085_v40  ;;  %v10095_v58 = vmul.f32 %v8967_v8, %v10044_v16  ;;  %v8969_v4 = vpop.eup %8968 }
 0x696   :  { %11838 = vst [vmem:[#allocation47_spill] sm:$0xff] %v10090_v52  ;;  %v10099_v48 = vmul.f32 %v8969_v4, %v10047_v18  ;;  %v8971_v59 = vpop.eup %8970  ;;  %v212_v18 = vld [vmem:[#allocation14] sm:$0xff] }
 0x697   :  { %11839 = vst [vmem:[#allocation48_spill] sm:$0xff] %v10095_v58  ;;  %v10103_v63 = vmul.f32 %v8971_v59, %v10050_v20  ;;  %v8973_v60 = vpop.eup %8972  ;;  %v214_v20 = vld [vmem:[#allocation14 + $0x10] sm:$0xff]  ;;  %v10115_v53 = vpack.c.bf16 %v213_v3, %v212_v18 }
 0x698   :  { %1064 = vperm.xlu0 %8919, %v10085_v40   ;;  %11840 = vst [vmem:[#allocation49_spill] sm:$0xff] %v10099_v48  ;;  %v10107_v61 = vmul.f32 %v8973_v60, %v10053_v9  ;;  %v8975_v16 = vpop.eup %8974  ;;  %v10118_v9 = vpack.c.bf16 %v215_v12, %v214_v20 }
 0x699   :  { %11841 = vst [vmem:[#allocation50_spill] sm:$0xff] %v10103_v63  ;;  %v10111_v2 = vmul.f32 %v8975_v16, %v10056_v6  ;;  %8701 = vmatpush3.bf16.msra.mxu1 %v10115_v53 }
 0x69a   :  { %11842 = vst [vmem:[#allocation51_spill] sm:$0xff] %v10107_v61  ;;  %8702 = vmatprep.subr.bf16.mxu1 %v11742_v0 }
 0x69b   :  { %11843 = vst [vmem:[#allocation52_spill] sm:$0xff] %v10111_v2 }
 0x69c   :  { %1067 = vperm.xlu0 %8919, %v10090_v52  }
 0x69d   :  { %8704 = vmatpush3.bf16.msra.mxu1 %v10118_v9 }
 0x69e   :  { %8711 = vmatprep.subr.bf16.mxu1 %v11742_v0 }
 0x6a0   :  { %1070 = vperm.xlu0 %8919, %v10095_v58  }
 0x6a4   :  { %1073 = vperm.xlu0 %8919, %v10099_v48  }
 0x6a8   :  { %1076 = vperm.xlu0 %8919, %v10103_v63  }
 0x6ac   :  { %1079 = vperm.xlu0 %8919, %v10107_v61  }
 0x6b0   :  { %1082 = vperm.xlu0 %8919, %v10111_v2  }
 0x6b4   :  { %1177 = vbcast.lane.b32.xlu0 %v9987_v47, 256 }
 0x713   :  { %v1062_v6 = vpop.permute.xlu0 %1061 }
 0x714   :  { %v1277_v14 = vmul.f32 %v1062_v6, %v9942_v31  ;;  %v1087_v0 = vrot.slane %v1062_v6, %v9991_v50 }
 0x716   :  { %v1285_v27 = vsel %vm263_vm1, %v1277_v14, 0.0 }
 0x717   :  { %v1065_v13 = vpop.permute.xlu0 %1064  ;;  %v1286_v43 = vrot.slane %v1285_v27, 4 }
 0x718   :  { %v1278_v15 = vmul.f32 %v1065_v13, %v9940_v30  ;;  %v1091_v14 = vrot.slane %v1065_v13, %v9991_v50 }
 0x719   :  { %v1287_v16 = vadd.f32 %v1286_v43, %v1285_v27 }
 0x71a   :  { %v1292_v25 = vsel %vm263_vm1, %v1278_v15, 0.0  ;;  %v1116_v13 = vsel %vm836_vm3, %v1091_v14, %v1087_v0 }
 0x71b   :  { %v1068_v10 = vpop.permute.xlu0 %1067  ;;  %v1293_v35 = vrot.slane %v1292_v25, 4 }
 0x71c   :  { %v1279_v21 = vmul.f32 %v1068_v10, %v9948_v38  ;;  %v1288_v38 = vrot.slane %v1287_v16, 2 }
 0x71d   :  { %v1294_v60 = vadd.f32 %v1293_v35, %v1292_v25 }
 0x71e   :  { %v1299_v28 = vsel %vm263_vm1, %v1279_v21, 0.0 }
 0x71f   :  { %v1071_v29 = vpop.permute.xlu0 %1070  ;;  %v1300_v45 = vrot.slane %v1299_v28, 4  ;;  %v1295_v1 = vrot.slane %v1294_v60, 2 }
 0x720   :  { %v1280_v33 = vmul.f32 %v1071_v29, %v9946_v36  ;;  %v1099_v25 = vrot.slane %v1071_v29, %v9991_v50 }
 0x721   :  { %v1301_v18 = vadd.f32 %v1300_v45, %v1299_v28 }
 0x722   :  { %v1306_v8 = vsel %vm263_vm1, %v1280_v33, 0.0  ;;  %v1095_v33 = vrot.slane %v1068_v10, %v9991_v50  ;;  %v1296_v10 = vadd.f32 %v1295_v1, %v1294_v60 }
 0x723   :  { %v1307_v54 = vrot.slane %v1306_v8, 4  ;;  %v1074_v4 = vpop.permute.xlu0 %1073 }
 0x724   :  { %v1281_v59 = vmul.f32 %v1074_v4, %v9953_v41  ;;  %v1302_v41 = vrot.slane %v1301_v18, 2  ;;  %v1103_v35 = vrot.slane %v1074_v4, %v9991_v50 }
 0x725   :  { %v1308_v20 = vadd.f32 %v1307_v54, %v1306_v8 }
 0x726   :  { %v1313_v3 = vsel %vm263_vm1, %v1281_v59, 0.0  ;;  %v1117_v59 = vsel %vm838_vm4, %v1095_v33, %v1116_v13 }
 0x727   :  { %v1314_v12 = vrot.slane %v1313_v3, 4  ;;  %v1077_v15 = vpop.permute.xlu0 %1076  ;;  %v1309_v28 = vrot.slane %v1308_v20, 2 }
 0x728   :  { %v1282_v21 = vmul.f32 %v1077_v15, %v9950_v39  ;;  %v1107_v6 = vrot.slane %v1077_v15, %v9991_v50  ;;  %v1118_v39 = vsel %vm840_vm5, %v1099_v25, %v1117_v59 }
 0x729   :  { %v1315_v36 = vadd.f32 %v1314_v12, %v1313_v3  ;;  %v1289_v12 = vadd.f32 %v1288_v38, %v1287_v16  ;;  %v1310_v30 = vadd.f32 %v1309_v28, %v1308_v20  ;;  %v1119_v0 = vsel %vm842_vm6, %v1103_v35, %v1118_v39 }
 0x72a   :  { %v1320_v27 = vsel %vm263_vm1, %v1282_v21, 0.0  ;;  %v1303_v21 = vadd.f32 %v1302_v41, %v1301_v18  ;;  %v1120_v33 = vsel %vm844_vm7, %v1107_v6, %v1119_v0 }
 0x72b   :  { %v1321_v43 = vrot.slane %v1320_v27, 4  ;;  %v1080_v45 = vpop.permute.xlu0 %1079  ;;  %v1316_v8 = vrot.slane %v1315_v36, 2  ;;  %v1290_v18 = vrot.slane %v1289_v12, 1  ;;  %v1311_v28 = vrot.slane %v1310_v30, 1 }
 0x72c   :  { %v1283_v54 = vmul.f32 %v1080_v45, %v9969_v62  ;;  %v1111_v29 = vrot.slane %v1080_v45, %v9991_v50  ;;  %v1304_v25 = vrot.slane %v1303_v21, 1 }
 0x72d   :  { %v1322_v3 = vadd.f32 %v1321_v43, %v1320_v27  ;;  %v1317_v17 = vadd.f32 %v1316_v8, %v1315_v36  ;;  %v1297_v27 = vrot.slane %v1296_v10, 1  ;;  %v1291_v59 = vadd.f32 %v1290_v18, %v1289_v12 }
 0x72e   :  { %v1327_v4 = vsel %vm263_vm1, %v1283_v54, 0.0  ;;  %v1121_v16 = vsel %vm846_vm8, %v1111_v29, %v1120_v33 }
 0x72f   :  { %v1323_v14 = vrot.slane %v1322_v3, 2  ;;  %v1328_v31 = vrot.slane %v1327_v4, 4  ;;  %v1083_v15 = vpop.permute.xlu0 %1082  ;;  %v1318_v45 = vrot.slane %v1317_v17, 1  ;;  %v1298_v13 = vadd.f32 %v1297_v27, %v1296_v10 }
 0x730   :  { %v1115_v1 = vrot.slane %v1083_v15, %v9991_v50  ;;  %v1284_v60 = vmul.f32 %v1083_v15, %v9962_v55 }
 0x731   :  { %v1324_v38 = vadd.f32 %v1323_v14, %v1322_v3  ;;  %v1329_v41 = vadd.f32 %v1328_v31, %v1327_v4  ;;  %v1305_v31 = vadd.f32 %v1304_v25, %v1303_v21  ;;  %v1312_v3 = vadd.f32 %v1311_v28, %v1310_v30 }
 0x732   :  { %v1334_v20 = vsel %vm263_vm1, %v1284_v60, 0.0  ;;  %v1122_v39 = vsel %vm848_vm9, %v1115_v1, %v1121_v16  ;;  %v1319_v0 = vadd.f32 %v1318_v45, %v1317_v17  ;;  %v1539_v14 = vsel %vm836_vm3, %v1298_v13, %v1291_v59 }
 0x733   :  { %v1330_v35 = vrot.slane %v1329_v41, 2  ;;  %v1335_v36 = vrot.slane %v1334_v20, 4  ;;  %v1124_v43 = vsel %vm851_vm10, %v1122_v39, -inf  ;;  %v1325_v8 = vrot.slane %v1324_v38, 1  ;;  %v1178_v18 = vpop.permute.xlu0 %1177 }
 0x734   :  { %1125 = vmax.xlane.f32.xlu1 %v1124_v43  ;;  %v1540_v60 = vsel %vm838_vm4, %v1305_v31, %v1539_v14  ;;  %v11844_v17 = vmov 0.0  }
 0x735   :  { %v1331_v6 = vadd.f32 %v1330_v35, %v1329_v41  ;;  %v1336_v54 = vadd.f32 %v1335_v36, %v1334_v20  ;;  %v1326_v15 = vadd.f32 %v1325_v8, %v1324_v38  ;;  %v1541_v39 = vsel %vm840_vm5, %v1312_v3, %v1540_v60 }
 0x736   :  { %v1542_v10 = vsel %vm842_vm6, %v1319_v0, %v1541_v39  ;;  %v11845_v38 = vmov 0.0|0.0   ;;  %v10186_v0 = vld [vmem:[%s11727_s10] ss:$0 sm:$0xff] }
 0x737   :  { %v1332_v29 = vrot.slane %v1331_v6, 1  ;;  %v1337_v4 = vrot.slane %v1336_v54, 2  ;;  %v1543_v21 = vsel %vm844_vm7, %v1326_v15, %v1542_v10 }
 0x739   :  { %v1338_v1 = vadd.f32 %v1337_v4, %v1336_v54  ;;  %v1333_v33 = vadd.f32 %v1332_v29, %v1331_v6 }
 0x73b   :  { %v1339_v16 = vrot.slane %v1338_v1, 1  ;;  %v1544_v30 = vsel %vm846_vm8, %v1333_v33, %v1543_v21 }
 0x73d   :  { %v1340_v27 = vadd.f32 %v1339_v16, %v1338_v1 }
 0x73f   :  { %v1545_v12 = vsel %vm848_vm9, %v1340_v27, %v1544_v30 }
 0x740   :  { %8311 = vmatmul.mubr.msk.f32.vlgmr.msra.gmra.mrb[6].mxu1 %vm263_vm1, %v1545_v12 }
 0x741   :  { %8713 = vmatpush3.bf16.msra.mxu1 %v9849_v11  ;;  %8328 = vmatprep.mubr.msk.f32.mxu1 %vm9566_vm0, %v11844_v17 }
 0x742   :  { %8720 = vmatprep.subr.bf16.mxu1 %v11845_v38 }
 0x7c1   :  { %v1126_v41 = vpop.xlane.xlu1 %1125 }
 0x7c2   :  { %v1135_v25 = vrot.slane %v1126_v41, %v10010_v22  ;;  %v1131_v20 = vrot.slane %v1126_v41, %v9936_v26  ;;  %v1139_v28 = vrot.slane %v1126_v41, %v10013_v23  ;;  %v1151_v35 = vrot.slane %v1126_v41, %v10026_v46 }
 0x7c3   :  { %v1143_v45 = vrot.slane %v1126_v41, %v10016_v24  ;;  %v1159_v13 = vrot.slane %v1126_v41, %v10034_v56  ;;  %v1147_v54 = vrot.slane %v1126_v41, %v10022_v34  ;;  %v1155_v3 = vrot.slane %v1126_v41, %v10030_v51 }
 0x7c4   :  { %vm1169_vm11 = vcmp.eq.f32.partialorder %v10085_v40, %v1135_v25  ;;  %vm1168_vm12 = vcmp.eq.f32.partialorder %v10080_v32, %v1131_v20  ;;  %vm1170_vm13 = vcmp.eq.f32.partialorder %v10090_v52, %v1139_v28  ;;  %vm1173_vm14 = vcmp.eq.f32.partialorder %v10103_v63, %v1151_v35 }
 0x7c5   :  { %v1180_v36 = vsel %vm1169_vm11, %v1178_v18, 8  ;;  %v1179_v43 = vsel %vm1168_vm12, %v1178_v18, 8  ;;  %v1181_v8 = vsel %vm1170_vm13, %v1178_v18, 8  ;;  %v1184_v6 = vsel %vm1173_vm14, %v1178_v18, 8 }
 0x7c6   :  { %1191 = vperm.xlu0 %8919, %v1180_v36   ;;  %1188 = vperm.xlu1 %8918, %v1179_v43   ;;  %vm1171_vm15 = vcmp.eq.f32.partialorder %v10095_v58, %v1143_v45  ;;  %vm1175_vm2 = vcmp.eq.f32.partialorder %v10111_v2, %v1159_v13  ;;  %vm1172_vm11 = vcmp.eq.f32.partialorder %v10099_v48, %v1147_v54  ;;  %vm11846_vm14 = vcmask 130048  }
 0x7c7   :  { %v1182_v31 = vsel %vm1171_vm15, %v1178_v18, 8  ;;  %v1186_v59 = vsel %vm1175_vm2, %v1178_v18, 8  ;;  %v1183_v29 = vsel %vm1172_vm11, %v1178_v18, 8  ;;  %vm1174_vm12 = vcmp.eq.f32.partialorder %v10107_v61, %v1155_v3  ;;  %vm11847_vm15 = vmmov %vm11846_vm14 }
 0x7c8   :  { %v1185_v4 = vsel %vm1174_vm12, %v1178_v18, 8  ;;  %vm11849_vm11 = vmmov %vm11846_vm14 }
 0x7c9   :  { %vm11850_vm12 = vmmov %vm11849_vm11 }
 0x7ca   :  { %1194 = vperm.xlu0 %8919, %v1181_v8   ;;  %1203 = vperm.xlu1 %8918, %v1184_v6  }
 0x7ce   :  { %1197 = vperm.xlu0 %8919, %v1182_v31   ;;  %1209 = vperm.xlu1 %8918, %v1186_v59  }
 0x7d2   :  { %1200 = vperm.xlu0 %8919, %v1183_v29  }
 0x7d6   :  { %1206 = vperm.xlu0 %8919, %v1185_v4  }
 0x813   :  { %v1614_v14 = vpop.f32.mrb[6].mxu1 }
 0x814   :  { %v1615_v15 = vadd.f32 %v1614_v14, %v9929_v19  ;;  %v8312_v1 = vpop.f32.mrb[7].mxu1 }
 0x816   :  { %v1618_v60 = vadd.f32 %v10186_v0, %v1615_v15 }
 0x818   :  { %8976 = vtanh.f32 %v1618_v60 }
 0x822   :  { %v8977_v33 = vpop.eup %8976 }
 0x823   :  { %8322 = vmatmul.mubr.msk.f32.vlgmr.msra.gmra.mrb[10].mxu0 %vm263_vm1, %v8977_v33 }
 0x824   :  { %8716 = vmatpush3.bf16.msra.mxu0 %v9868_v37  ;;  %8339 = vmatprep.mubr.msk.f32.mxu0 %vm9566_vm0, %v11844_v17 }
 0x825   :  { %8717 = vmatprep.subr.bf16.mxu0 %v11845_v38 }
 0x828   :  { %8719 = vmatpush3.bf16.msra.mxu0 %v9877_v42 }
 0x829   :  { %8726 = vmatprep.subr.bf16.mxu0 %v11845_v38 }
 0x845   :  { %v1192_v16 = vpop.permute.xlu0 %1191  ;;  %v1189_v19 = vpop.permute.xlu1 %1188 }
 0x846   :  { %v1218_v10 = vrot.slane %v1192_v16, %v9991_v50  ;;  %v1214_v27 = vrot.slane %v1189_v19, %v9991_v50 }
 0x848   :  { %v1243_v18 = vsel %vm836_vm3, %v1218_v10, %v1214_v27 }
 0x849   :  { %v1195_v39 = vpop.permute.xlu0 %1194  ;;  %v1204_v12 = vpop.permute.xlu1 %1203 }
 0x84a   :  { %v1222_v30 = vrot.slane %v1195_v39, %v9991_v50  ;;  %v1234_v45 = vrot.slane %v1204_v12, %v9991_v50 }
 0x84c   :  { %v1244_v20 = vsel %vm838_vm4, %v1222_v30, %v1243_v18 }
 0x84d   :  { %v1198_v21 = vpop.permute.xlu0 %1197  ;;  %v1210_v36 = vpop.permute.xlu1 %1209 }
 0x84e   :  { %v1226_v41 = vrot.slane %v1198_v21, %v9991_v50  ;;  %v1242_v6 = vrot.slane %v1210_v36, %v9991_v50 }
 0x850   :  { %v1245_v35 = vsel %vm840_vm5, %v1226_v41, %v1244_v20 }
 0x851   :  { %v1201_v25 = vpop.permute.xlu0 %1200 }
 0x852   :  { %v1230_v28 = vrot.slane %v1201_v25, %v9991_v50 }
 0x854   :  { %v1246_v43 = vsel %vm842_vm6, %v1230_v28, %v1245_v35 }
 0x855   :  { %v1207_v13 = vpop.permute.xlu0 %1206  ;;  %v1247_v54 = vsel %vm844_vm7, %v1234_v45, %v1246_v43  ;;  %v10238_v43 = vld [vmem:[#allocation2 + $0x8] sm:$0xff]  ;;  %v10240_v45 = vld [vmem:[#allocation2] sm:$0xff] }
 0x856   :  { %v1238_v8 = vrot.slane %v1207_v13, %v9991_v50 }
 0x858   :  { %v1248_v31 = vsel %vm846_vm8, %v1238_v8, %v1247_v54 }
 0x859   :  { %v1249_v59 = vsel %vm848_vm9, %v1242_v6, %v1248_v31  ;;  %v10244_v31 = vld [vmem:[#allocation2 + $0x18] sm:$0xff] }
 0x85a   :  { %v1250_v3 = vsel %vm851_vm10, %v1249_v59, 2147483647  ;;  %v10246_v59 = vld [vmem:[#allocation2 + $0x10] sm:$0xff] }
 0x85b   :  { %v1252_v29 = vshra.s32 %v1250_v3, 16  ;;  %v1251_v14 = vand.u32 65535, %v1250_v3 }
 0x85d   :  { %v1254_v4 = vcvt.s32.f32 %v1252_v29  ;;  %v1253_v1 = vcvt.s32.f32 %v1251_v14 }
 0x85f   :  { %1255 = vmin.xlane.f32.xlu0 %v1254_v4 }
 0x8ec   :  { %v1256_v15 = vpop.xlane.xlu0 %1255 }
 0x8ed   :  { %vm1257_vm2 = vcmp.eq.f32.partialorder %v1254_v4, %v1256_v15  ;;  %v1262_v19 = vcvt.f32.s32 %v1256_v15 }
 0x8ee   :  { %v1258_v60 = vsel %vm1257_vm2, %v1253_v1, inf  ;;  %vm11852_vm2 = vmmov %vm11849_vm11 }
 0x8ef   :  { %1259 = vmin.xlane.f32.xlu1 %v1258_v60  ;;  %v1263_v10 = vshll.u32 %v1262_v19, 16 }
 0x8f6   :  { %v10213_v33 = vpop.f32.mrb[10].mxu0 }
 0x8f7   :  { %v8323_v16 = vpop.f32.mrb[11].mxu0 }
 0x97c   :  { %v1260_v39 = vpop.xlane.xlu1 %1259 }
 0x97d   :  { %v1261_v27 = vcvt.f32.s32 %v1260_v39 }
 0x97f   :  { %v10215_v21 = vadd.s32 %v1263_v10, %v1261_v27  ;;  %v10252_v10 = vld [vmem:[#allocation2 + $0x28] sm:$0xff]  ;;  %v10254_v27 = vld [vmem:[#allocation2 + $0x20] sm:$0xff] }
 0x980   :  { %11848 = vst [vmem:[#allocation53_spill] sm:$0xff] %v10252_v10 }
 0x981   :  { %vm1265_vm13 = vcmp.eq.s32.totalorder %v9987_v47, %v10215_v21 }
 0x982   :  { %v10220_v30 = vsel %vm1265_vm13, 1.0, %v11844_v17  ;;  %vm11853_vm13 = vmmov %vm11852_vm2 }
 0x983   :  { %v1351_v12 = vrot.slane %v10220_v30, %v10010_v22  ;;  %v1344_v41 = vrot.slane %v10220_v30, %v9936_v26  ;;  %v1365_v18 = vrot.slane %v10220_v30, %v10016_v24  ;;  %v1358_v25 = vrot.slane %v10220_v30, %v10013_v23 }
 0x984   :  { %v1379_v20 = vrot.slane %v10220_v30, %v10026_v46  ;;  %v1372_v28 = vrot.slane %v10220_v30, %v10022_v34  ;;  %v1393_v35 = vrot.slane %v10220_v30, %v10034_v56  ;;  %v1386_v36 = vrot.slane %v10220_v30, %v10030_v51 }
 0x985   :  { %1353 = vbcast.lane.b32.xlu1 %v1351_v12, 256  ;;  %1346 = vbcast.lane.b32.xlu0 %v1344_v41, 256 }
 0x989   :  { %1367 = vbcast.lane.b32.xlu1 %v1365_v18, 256  ;;  %1360 = vbcast.lane.b32.xlu0 %v1358_v25, 256 }
 0x98d   :  { %1381 = vbcast.lane.b32.xlu1 %v1379_v20, 256  ;;  %1374 = vbcast.lane.b32.xlu0 %v1372_v28, 256 }
 0x991   :  { %1395 = vbcast.lane.b32.xlu1 %v1393_v35, 256  ;;  %1388 = vbcast.lane.b32.xlu0 %v1386_v36, 256 }
 0x9f7   :  { %v1354_v13 = vpop.permute.xlu1 %1353  ;;  %v1347_v8 = vpop.permute.xlu0 %1346 }
 0x9f8   :  { %v1398_v6 = vmul.f32 %v1354_v13, %v10238_v43  ;;  %v1397_v54 = vmul.f32 %v1347_v8, %v10240_v45 }
 0x9fa   :  { %v1412_v3 = vsel %vm11846_vm14, %v1398_v6, 0.0  ;;  %v1405_v29 = vsel %vm11847_vm15, %v1397_v54, 0.0  ;;  %vm11854_vm14 = vmmov %vm11852_vm2 }
 0x9fb   :  { %v1413_v4 = vrot.slane %v1412_v3, 4  ;;  %v1406_v14 = vrot.slane %v1405_v29, 4  ;;  %v1368_v15 = vpop.permute.xlu1 %1367  ;;  %v1361_v1 = vpop.permute.xlu0 %1360  ;;  %vm11855_vm15 = vmmov %vm11852_vm2 }
 0x9fc   :  { %v1400_v60 = vmul.f32 %v1368_v15, %v10244_v31  ;;  %v1399_v16 = vmul.f32 %v1361_v1, %v10246_v59 }
 0x9fd   :  { %v1414_v19 = vadd.f32 %v1413_v4, %v1412_v3  ;;  %v1407_v39 = vadd.f32 %v1406_v14, %v1405_v29  ;;  %v10260_v4 = vld [vmem:[#allocation2 + $0x38] sm:$0xff]  ;;  %v10262_v14 = vld [vmem:[#allocation2 + $0x30] sm:$0xff] }
 0x9fe   :  { %v1426_v12 = vsel %vm11849_vm11, %v1400_v60, 0.0  ;;  %v1419_v41 = vsel %vm11850_vm12, %v1399_v16, 0.0  ;;  %11851 = vst [vmem:[#allocation54_spill] sm:$0xff] %v10260_v4  ;;  %vm11856_vm11 = vmmov %vm11852_vm2 }
 0x9ff   :  { %v1415_v18 = vrot.slane %v1414_v19, 2  ;;  %v1408_v25 = vrot.slane %v1407_v39, 2  ;;  %v1427_v20 = vrot.slane %v1426_v12, 4  ;;  %v1420_v28 = vrot.slane %v1419_v41, 4  ;;  %v1382_v35 = vpop.permute.xlu1 %1381  ;;  %v1375_v36 = vpop.permute.xlu0 %1374 }
 0xa00   :  { %v1402_v13 = vmul.f32 %v1382_v35, %v10252_v10  ;;  %v1401_v8 = vmul.f32 %v1375_v36, %v10254_v27 }
 0xa01   :  { %v1416_v6 = vadd.f32 %v1415_v18, %v1414_v19  ;;  %v1409_v54 = vadd.f32 %v1408_v25, %v1407_v39  ;;  %v1428_v3 = vadd.f32 %v1427_v20, %v1426_v12  ;;  %v1421_v29 = vadd.f32 %v1420_v28, %v1419_v41 }
 0xa02   :  { %v1440_v15 = vsel %vm11852_vm2, %v1402_v13, 0.0  ;;  %v1433_v1 = vsel %vm11853_vm13, %v1401_v8, 0.0 }
 0xa03   :  { %v1417_v60 = vrot.slane %v1416_v6, 1  ;;  %v1410_v16 = vrot.slane %v1409_v54, 1  ;;  %v1429_v2 = vrot.slane %v1428_v3, 2  ;;  %v1422_v61 = vrot.slane %v1421_v29, 2  ;;  %v1396_v48 = vpop.permute.xlu1 %1395  ;;  %v1389_v35 = vpop.permute.xlu0 %1388 }
 0xa04   :  { %v1441_v52 = vrot.slane %v1440_v15, 4  ;;  %v1434_v36 = vrot.slane %v1433_v1, 4  ;;  %v1404_v19 = vmul.f32 %v1396_v48, %v10260_v4  ;;  %v1403_v39 = vmul.f32 %v1389_v35, %v10262_v14 }
 0xa05   :  { %v1418_v12 = vadd.f32 %v1417_v60, %v1416_v6  ;;  %v1430_v41 = vadd.f32 %v1429_v2, %v1428_v3  ;;  %v1423_v18 = vadd.f32 %v1422_v61, %v1421_v29  ;;  %v1411_v8 = vadd.f32 %v1410_v16, %v1409_v54 }
 0xa06   :  { %v1442_v25 = vadd.f32 %v1441_v52, %v1440_v15  ;;  %v1435_v20 = vadd.f32 %v1434_v36, %v1433_v1  ;;  %v1454_v28 = vsel %vm11854_vm14, %v1404_v19, 0.0  ;;  %v1447_v13 = vsel %vm11855_vm15, %v1403_v39, 0.0 }
 0xa07   :  { %v1431_v40 = vrot.slane %v1430_v41, 1  ;;  %v1424_v63 = vrot.slane %v1423_v18, 1  ;;  %v1455_v58 = vrot.slane %v1454_v28, 4  ;;  %v1448_v37 = vrot.slane %v1447_v13, 4 }
 0xa08   :  { %v1443_v32 = vrot.slane %v1442_v25, 2  ;;  %v1436_v42 = vrot.slane %v1435_v20, 2  ;;  %v1719_v61 = vsel %vm836_vm3, %v1418_v12, %v1411_v8  ;;  %vm1620_vm14 = vcmp.eq.s32.totalorder %v9987_v47, 0 }
 0xa09   :  { %v1425_v10 = vadd.f32 %v1424_v63, %v1423_v18  ;;  %v1456_v48 = vadd.f32 %v1455_v58, %v1454_v28  ;;  %v1449_v6 = vadd.f32 %v1448_v37, %v1447_v13  ;;  %v1432_v52 = vadd.f32 %v1431_v40, %v1430_v41  ;;  %v10288_v18 = vld [vmem:[%s11724_s7] ss:$0 sm:$0xff] }
 0xa0a   :  { %v1444_v4 = vadd.f32 %v1443_v32, %v1442_v25  ;;  %v1437_v35 = vadd.f32 %v1436_v42, %v1435_v20  ;;  %vm2522_vm15 = vcmp.eq.s32.totalorder %v9987_v47, 1 }
 0xa0b   :  { %v1457_v2 = vrot.slane %v1456_v48, 2  ;;  %v1720_v3 = vsel %vm838_vm4, %v1425_v10, %v1719_v61  ;;  %v1450_v54 = vrot.slane %v1449_v6, 2 }
 0xa0c   :  { %v1445_v29 = vrot.slane %v1444_v4, 1  ;;  %v1438_v15 = vrot.slane %v1437_v35, 1  ;;  %v1721_v63 = vsel %vm840_vm5, %v1432_v52, %v1720_v3 }
 0xa0d   :  { %v1458_v1 = vadd.f32 %v1457_v2, %v1456_v48  ;;  %v1451_v16 = vadd.f32 %v1450_v54, %v1449_v6 }
 0xa0e   :  { %v1439_v60 = vadd.f32 %v1438_v15, %v1437_v35  ;;  %v1446_v36 = vadd.f32 %v1445_v29, %v1444_v4 }
 0xa0f   :  { %v1459_v19 = vrot.slane %v1458_v1, 1  ;;  %v1452_v58 = vrot.slane %v1451_v16, 1 }
 0xa10   :  { %v1722_v42 = vsel %vm842_vm6, %v1439_v60, %v1721_v63  ;;  %v11857_v63 = vld [vmem:[#allocation36_spill] sm:$0xff] }
 0xa11   :  { %v1460_v37 = vadd.f32 %v1459_v19, %v1458_v1  ;;  %v1453_v32 = vadd.f32 %v1452_v58, %v1451_v16  ;;  %v1723_v40 = vsel %vm844_vm7, %v1446_v36, %v1722_v42  ;;  %v10318_v1 = vld [vmem:[%s11729_s12] ss:$0 sm:$0xff] }
 0xa13   :  { %v1724_v39 = vsel %vm846_vm8, %v1453_v32, %v1723_v40 }
 0xa14   :  { %v1725_v10 = vsel %vm848_vm9, %v1460_v37, %v1724_v39 }
 0xa15   :  { %8329 = vmatmul.mubr.msk.f32.vlgmr.msra.gmra.mrb[8].mxu1 %vm11856_vm11, %v1725_v10 }
 0xa16   :  { %8722 = vmatpush3.bf16.msra.mxu1 %v9880_v44  ;;  %8350 = vmatprep.mubr.msk.f32.mxu1 %vm9566_vm0, %v11844_v17 }
 0xa17   :  { %8723 = vmatprep.subr.bf16.mxu1 %v11845_v38 }
 0xa1a   :  { %8725 = vmatpush3.bf16.msra.mxu1 %v9894_v49 }
 0xa1b   :  { %8732 = vmatprep.subr.bf16.mxu1 %v11845_v38 }
 0xae8   :  { %v1794_v4 = vpop.f32.mrb[8].mxu1 }
 0xae9   :  { %v1795_v12 = vadd.f32 %v1794_v4, %v10213_v33  ;;  %v8330_v41 = vpop.f32.mrb[9].mxu1 }
 0xaeb   :  { %v1798_v25 = vadd.f32 %v10288_v18, %v1795_v12 }
 0xaed   :  { %v8000_v20 = vmul.f32 -1.442695, %v1798_v25  ;;  %8978 = vtanh.f32 %v1798_v25 }
 0xaef   :  { %8980 = vpow2.f32 %v8000_v20 }
 0xaf7   :  { %v8979_v28 = vpop.eup %8978 }
 0xaf8   :  { %1808 = vrot.lane.b32.xlu0 %v8979_v28, %s9568_s2 }
 0xaf9   :  { %v8981_v13 = vpop.eup %8980 }
 0xafa   :  { %v1802_v8 = vadd.f32 1.0, %v8981_v13 }
 0xafc   :  { %8982 = vrcp.f32 %v1802_v8  ;;  %v11858_v8 = vld [vmem:[#allocation38_spill] sm:$0xff] }
 0xb06   :  { %v8983_v48 = vpop.eup %8982 }
 0xb07   :  { %1819 = vrot.lane.b32.xlu0 %v8983_v48, %s9568_s2  ;;  %v1806_v6 = vmul.f32 %v8983_v48, %v9906_v57 }
 0xb6a   :  { %v1809_v33 = vpop.permute.xlu0 %1808 }
 0xb6b   :  { %v1811_v35 = vmul.f32 %v8983_v48, %v1809_v33 }
 0xb6d   :  { %1813 = vrot.lane.b32.xlu1 %v1811_v35, %s9569_s24 }
 0xb79   :  { %v1820_v3 = vpop.permute.xlu0 %1819 }
 0xbdf   :  { %v1814_v61 = vpop.permute.xlu1 %1813 }
 0xbe0   :  { %v10295_v52 = vadd.f32 %v1814_v61, %v1806_v6 }
 0xbe2   :  { %8984 = vtanh.f32 %v10295_v52 }
 0xbec   :  { %v8985_v2 = vpop.eup %8984 }
 0xbed   :  { %v1822_v29 = vmul.f32 %v8985_v2, %v1820_v3  ;;  %v11859_v2 = vld [vmem:[#allocation37_spill] sm:$0xff] }
 0xbef   :  { %1824 = vrot.lane.b32.xlu1 %v1822_v29, %s9570_s9  ;;  %v11860_v29 = vld [vmem:[#allocation40_spill] sm:$0xff] }
 0xc61   :  { %v1825_v15 = vpop.permute.xlu1 %1824 }
 0xc62   :  { %8340 = vmatmul.mubr.msk.f32.vlgmr.msra.gmra.mrb[12].mxu0 %vm263_vm1, %v1825_v15  ;;  %8351 = vmatmul.mubr.msk.f32.vlgmr.msra.gmra.mrb[10].mxu1 %vm263_vm1, %v1825_v15 }
 0xc63   :  { %8728 = vmatpush3.bf16.msra.mxu0 %v10115_v53  ;;  %8361 = vmatprep.mubr.msk.f32.mxu0 %vm9566_vm0, %v11844_v17 }
 0xc64   :  { %8729 = vmatprep.subr.bf16.mxu0 %v11845_v38  ;;  %8734 = vmatpush3.bf16.msra.mxu1 %v9842_v5 }
 0xc65   :  { %8735 = vmatprep.subr.bf16.mxu1 %v11845_v38  ;;  %8372 = vmatprep.mubr.msk.f32.mxu1 %vm9566_vm0, %v11844_v17 }
 0xc67   :  { %8731 = vmatpush3.bf16.msra.mxu0 %v10118_v9 }
 0xc68   :  { %8737 = vmatpush3.bf16.msra.mxu1 %v9845_v7  ;;  %8747 = vmatprep.subr.bf16.mxu0 %v11845_v38 }
 0xc69   :  { %8738 = vmatprep.subr.bf16.mxu1 %v11845_v38 }
 0xd35   :  { %v1894_v57 = vpop.f32.mrb[12].mxu0  ;;  %v10313_v54 = vpop.f32.mrb[10].mxu1 }
 0xd36   :  { %v1895_v60 = vadd.f32 %v10318_v1, %v1894_v57  ;;  %v8341_v16 = vpop.f32.mrb[13].mxu0  ;;  %v8352_v36 = vpop.f32.mrb[11].mxu1 }
 0xd37   :  { %v11862_v36 = vld [vmem:[#allocation41_spill] sm:$0xff] }
 0xd38   :  { %v1899_v19 = vcombine.high %v1895_v60, %v1895_v60  ;;  %v1906_v58 = vrot.slane %v1895_v60, %v11857_v63  ;;  %v11861_v60 = vld [vmem:[#allocation42_spill] sm:$0xff] }
 0xd3a   :  { %v1913_v42 = vrot.slane %v1899_v19, %v11857_v63  ;;  %v1914_v37 = vcombine.high %v1906_v58, %v1906_v58  ;;  %v1922_v32 = vrot.slane %v1906_v58, %v11857_v63  ;;  %v11863_v58 = vld [vmem:[#allocation39_spill] sm:$0xff] }
 0xd3c   :  { %v1915_v40 = vcombine.high %v1913_v42, %v1913_v42  ;;  %v1929_v39 = vrot.slane %v1913_v42, %v11857_v63  ;;  %v1936_v10 = vrot.slane %v1914_v37, %v11857_v63  ;;  %v1944_v4 = vcombine.high %v1922_v32, %v1922_v32 }
 0xd3d   :  { %v1951_v12 = vrot.slane %v1922_v32, %v9936_v26 }
 0xd3e   :  { %v1943_v41 = vrot.slane %v1915_v40, %v11857_v63  ;;  %v1946_v25 = vcombine.high %v1936_v10, %v1936_v10  ;;  %v1955_v20 = vrot.slane %v1936_v10, %v9936_v26  ;;  %v1959_v28 = vrot.slane %v1944_v4, %v9936_v26  ;;  %v10346_v10 = vld [vmem:[%s11732_s15] ss:$0 sm:$0xff] }
 0xd3f   :  { %v1967_v13 = vrot.slane %v1929_v39, %v9936_v26  ;;  %v1988_v48 = vadd.f32 %v1951_v12, %v11858_v8  ;;  %v1945_v61 = vcombine.high %v1929_v39, %v1929_v39  ;;  %11864 = vst [vmem:[#allocation36_spill] sm:$0xff] %v10346_v10 }
 0xd40   :  { %v1947_v33 = vcombine.high %v1943_v41, %v1943_v41  ;;  %v1963_v35 = vrot.slane %v1946_v25, %v9936_v26  ;;  %v1971_v6 = vrot.slane %v1943_v41, %v9936_v26  ;;  %v1989_v3 = vadd.f32 %v1955_v20, %v11859_v2 }
 0xd41   :  { %v1990_v15 = vadd.f32 %v1959_v28, %v11860_v29  ;;  %8986 = vtanh.f32 %v1988_v48  ;;  %v1992_v16 = vadd.f32 %v1967_v13, %v11861_v60  ;;  %v1975_v37 = vrot.slane %v1945_v61, %v9936_v26 }
 0xd42   :  { %v1979_v57 = vrot.slane %v1947_v33, %v9936_v26  ;;  %v1993_v19 = vadd.f32 %v1971_v6, %v11862_v36  ;;  %8988 = vtanh.f32 %v1989_v3  ;;  %v1991_v42 = vadd.f32 %v1963_v35, %v11863_v58 }
 0xd43   :  { %8990 = vtanh.f32 %v1990_v15  ;;  %v1994_v40 = vadd.f32 %v1975_v37, %v9969_v62 }
 0xd44   :  { %v1995_v32 = vadd.f32 %v1979_v57, %v9962_v55  ;;  %8992 = vtanh.f32 %v1992_v16 }
 0xd45   :  { %8994 = vtanh.f32 %v1993_v19 }
 0xd46   :  { %8996 = vtanh.f32 %v1991_v42 }
 0xd47   :  { %8998 = vtanh.f32 %v1995_v32 }
 0xd48   :  { %9000 = vtanh.f32 %v1994_v40 }
 0xd4b   :  { %v8987_v39 = vpop.eup %8986 }
 0xd4c   :  { %v2004_v4 = vmul.f32 %v10346_v10, %v8987_v39  ;;  %v8989_v12 = vpop.eup %8988 }
 0xd4d   :  { %v8991_v41 = vpop.eup %8990  ;;  %v2005_v20 = vmul.f32 %v10346_v10, %v8989_v12 }
 0xd4e   :  { %v2012_v25 = vsel %vm263_vm1, %v2004_v4, 0.0  ;;  %v2006_v28 = vmul.f32 %v10346_v10, %v8991_v41  ;;  %v8993_v13 = vpop.eup %8992 }
 0xd4f   :  { %2013 = vadd.xlane.f32.xlu0 %v2012_v25  ;;  %v2015_v48 = vsel %vm263_vm1, %v2005_v20, 0.0  ;;  %v8995_v33 = vpop.eup %8994  ;;  %v2008_v3 = vmul.f32 %v10346_v10, %v8993_v13 }
 0xd50   :  { %2016 = vadd.xlane.f32.xlu1 %v2015_v48  ;;  %v8997_v35 = vpop.eup %8996  ;;  %v2018_v6 = vsel %vm263_vm1, %v2006_v28, 0.0  ;;  %v2009_v61 = vmul.f32 %v10346_v10, %v8995_v33 }
 0xd51   :  { %v8999_v15 = vpop.eup %8998  ;;  %v2024_v19 = vsel %vm263_vm1, %v2008_v3, 0.0  ;;  %v2007_v42 = vmul.f32 %v10346_v10, %v8997_v35 }
 0xd52   :  { %v2027_v57 = vsel %vm263_vm1, %v2009_v61, 0.0  ;;  %v2011_v16 = vmul.f32 %v10346_v10, %v8999_v15  ;;  %v9001_v37 = vpop.eup %9000 }
 0xd53   :  { %2019 = vadd.xlane.f32.xlu0 %v2018_v6  ;;  %v2021_v40 = vsel %vm263_vm1, %v2007_v42, 0.0  ;;  %v2010_v39 = vmul.f32 %v10346_v10, %v9001_v37 }
 0xd54   :  { %2028 = vadd.xlane.f32.xlu1 %v2027_v57  ;;  %v2033_v32 = vsel %vm263_vm1, %v2011_v16, 0.0 }
 0xd55   :  { %v2030_v4 = vsel %vm263_vm1, %v2010_v39, 0.0 }
 0xd57   :  { %2025 = vadd.xlane.f32.xlu0 %v2024_v19 }
 0xd58   :  { %2034 = vadd.xlane.f32.xlu1 %v2033_v32  ;;  %v10375_v32 = vsub.f32 1.0, %v10220_v30 }
 0xd5a   :  { %11865 = vst [vmem:[#allocation55_spill] sm:$0xff] %v10375_v32  ;;  %vm2036_vm12 = vcmp.eq.f32.partialorder %v10375_v32, 0.0 }
 0xd5b   :  { %2022 = vadd.xlane.f32.xlu0 %v2021_v40 }
 0xd5f   :  { %2031 = vadd.xlane.f32.xlu0 %v2030_v4 }
 0xddc   :  { %v2014_v12 = vpop.xlane.xlu0 %2013 }
 0xddd   :  { %v2017_v41 = vpop.xlane.xlu1 %2016  ;;  %v2048_v13 = vrot.slane %v2014_v12, %v9991_v50 }
 0xdde   :  { %v2052_v20 = vrot.slane %v2017_v41, %v9991_v50 }
 0xde0   :  { %v2020_v25 = vpop.xlane.xlu0 %2019  ;;  %v2077_v35 = vsel %vm836_vm3, %v2052_v20, %v2048_v13 }
 0xde1   :  { %v2029_v48 = vpop.xlane.xlu1 %2028  ;;  %v2056_v33 = vrot.slane %v2020_v25, %v9991_v50 }
 0xde2   :  { %v2068_v57 = vrot.slane %v2029_v48, %v9991_v50 }
 0xde3   :  { %v2078_v3 = vsel %vm838_vm4, %v2056_v33, %v2077_v35 }
 0xde4   :  { %v2026_v28 = vpop.xlane.xlu0 %2025 }
 0xde5   :  { %v2064_v15 = vrot.slane %v2026_v28, %v9991_v50  ;;  %v2035_v16 = vpop.xlane.xlu1 %2034 }
 0xde6   :  { %v2076_v4 = vrot.slane %v2035_v16, %v9991_v50 }
 0xde8   :  { %v2023_v6 = vpop.xlane.xlu0 %2022 }
 0xde9   :  { %v2060_v61 = vrot.slane %v2023_v6, %v9991_v50 }
 0xdeb   :  { %v2079_v19 = vsel %vm840_vm5, %v2060_v61, %v2078_v3 }
 0xdec   :  { %v2080_v42 = vsel %vm842_vm6, %v2064_v15, %v2079_v19  ;;  %v2032_v37 = vpop.xlane.xlu0 %2031 }
 0xded   :  { %v2072_v40 = vrot.slane %v2032_v37, %v9991_v50  ;;  %v2081_v39 = vsel %vm844_vm7, %v2068_v57, %v2080_v42 }
 0xdef   :  { %v2082_v12 = vsel %vm846_vm8, %v2072_v40, %v2081_v39 }
 0xdf0   :  { %v2083_v41 = vsel %vm848_vm9, %v2076_v4, %v2082_v12 }
 0xdf1   :  { %v2085_v25 = vsel %vm2036_vm12, -inf, %v2083_v41  ;;  %vm11866_vm12 = vcmask 130048  }
 0xdf2   :  { %v2086_v20 = vsel %vm851_vm10, %v2085_v25, -inf }
 0xdf3   :  { %2087 = vmax.xlane.f32.xlu0 %v2086_v20 }
 0xe80   :  { %v2088_v28 = vpop.xlane.xlu0 %2087 }
 0xe81   :  { %v2089_v13 = vsub.f32 %v2085_v25, %v2088_v28 }
 0xe83   :  { %v2090_v30 = vmul.f32 1.442695, %v2089_v13 }
 0xe85   :  { %9002 = vpow2.f32 %v2090_v30 }
 0xe8f   :  { %v9003_v48 = vpop.eup %9002 }
 0xe90   :  { %v2092_v33 = vsel %vm851_vm10, %v9003_v48, 0.0 }
 0xe91   :  { %2093 = vadd.xlane.f32.xlu1 %v2092_v33 }
 0xf1e   :  { %v2094_v35 = vpop.xlane.xlu1 %2093 }
 0xf1f   :  { %9004 = vrcp.f32 %v2094_v35 }
 0xf29   :  { %v9005_v6 = vpop.eup %9004 }
 0xf2a   :  { %v2096_v61 = vmul.f32 %v9005_v6, %v9003_v48 }
 0xf2c   :  { %7901 = vst.msk [vmem:[#allocation19 + $0x8] sm:$0xff] %vm851_vm10, %v2096_v61  ;;  %v2133_v3 = vrot.slane %v2096_v61, %v10010_v22  ;;  %v2126_v15 = vrot.slane %v2096_v61, %v9936_v26  ;;  %v2161_v57 = vrot.slane %v2096_v61, %v10026_v46  ;;  %v2140_v16 = vrot.slane %v2096_v61, %v10013_v23 }
 0xf2d   :  { %v2147_v19 = vrot.slane %v2096_v61, %v10016_v24  ;;  %v2154_v42 = vrot.slane %v2096_v61, %v10022_v34  ;;  %v2168_v37 = vrot.slane %v2096_v61, %v10030_v51  ;;  %v2097_v40 = vmul.f32 %v2096_v61, %v10375_v32 }
 0xf2e   :  { %2135 = vbcast.lane.b32.xlu0 %v2133_v3, 256  ;;  %2128 = vbcast.lane.b32.xlu1 %v2126_v15, 256  ;;  %v2175_v4 = vrot.slane %v2096_v61, %v10034_v56 }
 0xf2f   :  { %v2098_v39 = vsel %vm851_vm10, %v2097_v40, -inf }
 0xf32   :  { %2163 = vbcast.lane.b32.xlu0 %v2161_v57, 256  ;;  %2142 = vbcast.lane.b32.xlu1 %v2140_v16, 256 }
 0xf36   :  { %2149 = vbcast.lane.b32.xlu1 %v2147_v19, 256 }
 0xf3a   :  { %2156 = vbcast.lane.b32.xlu1 %v2154_v42, 256 }
 0xf3e   :  { %2170 = vbcast.lane.b32.xlu1 %v2168_v37, 256 }
 0xf51   :  { %2099 = vmax.xlane.f32.xlu0 %v2098_v39 }
 0xf67   :  { %2177 = vbcast.lane.b32.xlu0 %v2175_v4, 256 }
 0xfa0   :  { %v2129_v12 = vpop.permute.xlu1 %2128  ;;  %v2136_v20 = vpop.permute.xlu0 %2135 }
 0xfa1   :  { %v2180_v13 = vmul.f32 %v2136_v20, %v11859_v2  ;;  %v2179_v30 = vmul.f32 %v2129_v12, %v11858_v8 }
 0xfa3   :  { %v2194_v6 = vsel %vm263_vm1, %v2180_v13, 0.0  ;;  %v2187_v61 = vsel %vm263_vm1, %v2179_v30, 0.0 }
 0xfa4   :  { %v2143_v41 = vpop.permute.xlu1 %2142  ;;  %v2164_v15 = vpop.permute.xlu0 %2163  ;;  %v2195_v19 = vrot.slane %v2194_v6, 4  ;;  %v2188_v42 = vrot.slane %v2187_v61, 4 }
 0xfa5   :  { %v2181_v48 = vmul.f32 %v2143_v41, %v11860_v29  ;;  %v2184_v4 = vmul.f32 %v2164_v15, %v11862_v36 }
 0xfa6   :  { %v2196_v20 = vadd.f32 %v2195_v19, %v2194_v6 }
 0xfa7   :  { %v2201_v57 = vsel %vm263_vm1, %v2181_v48, 0.0  ;;  %v2222_v30 = vsel %vm263_vm1, %v2184_v4, 0.0 }
 0xfa8   :  { %v2150_v25 = vpop.permute.xlu1 %2149  ;;  %v2202_v12 = vrot.slane %v2201_v57, 4  ;;  %v2197_v10 = vrot.slane %v2196_v20, 2 }
 0xfa9   :  { %v2182_v33 = vmul.f32 %v2150_v25, %v11863_v58 }
 0xfaa   :  { %v2203_v48 = vadd.f32 %v2202_v12, %v2201_v57  ;;  %v2198_v36 = vadd.f32 %v2197_v10, %v2196_v20 }
 0xfab   :  { %v2208_v16 = vsel %vm263_vm1, %v2182_v33, 0.0 }
 0xfac   :  { %v2157_v28 = vpop.permute.xlu1 %2156  ;;  %v2209_v41 = vrot.slane %v2208_v16, 4 }
 0xfad   :  { %v2183_v35 = vmul.f32 %v2157_v28, %v11861_v60  ;;  %v2189_v28 = vadd.f32 %v2188_v42, %v2187_v61  ;;  %v2204_v60 = vrot.slane %v2203_v48, 2 }
 0xfae   :  { %v2210_v32 = vadd.f32 %v2209_v41, %v2208_v16 }
 0xfaf   :  { %v2215_v37 = vsel %vm263_vm1, %v2183_v35, 0.0  ;;  %v2190_v58 = vrot.slane %v2189_v28, 2  ;;  %v2223_v35 = vrot.slane %v2222_v30, 4  ;;  %v2205_v61 = vadd.f32 %v2204_v60, %v2203_v48 }
 0xfb0   :  { %v2171_v3 = vpop.permute.xlu1 %2170  ;;  %v2216_v25 = vrot.slane %v2215_v37, 4 }
 0xfb1   :  { %v2185_v39 = vmul.f32 %v2171_v3, %v9969_v62  ;;  %v2211_v3 = vrot.slane %v2210_v32, 2  ;;  %v2191_v29 = vadd.f32 %v2190_v58, %v2189_v28  ;;  %v2224_v2 = vadd.f32 %v2223_v35, %v2222_v30 }
 0xfb2   :  { %v2217_v33 = vadd.f32 %v2216_v25, %v2215_v37  ;;  %v2206_v8 = vrot.slane %v2205_v61, 1 }
 0xfb3   :  { %v2229_v13 = vsel %vm263_vm1, %v2185_v39, 0.0  ;;  %v2212_v19 = vadd.f32 %v2211_v3, %v2210_v32  ;;  %v2199_v39 = vrot.slane %v2198_v36, 1  ;;  %v2192_v4 = vrot.slane %v2191_v29, 1 }
 0xfb4   :  { %v2230_v50 = vrot.slane %v2229_v13, 4  ;;  %v2218_v62 = vrot.slane %v2217_v33, 2  ;;  %v2225_v12 = vrot.slane %v2224_v2, 2  ;;  %v2207_v30 = vadd.f32 %v2206_v8, %v2205_v61 }
 0xfb5   :  { %v2213_v58 = vrot.slane %v2212_v19, 1  ;;  %v2193_v28 = vadd.f32 %v2192_v4, %v2191_v29 }
 0xfb6   :  { %v2231_v15 = vadd.f32 %v2230_v50, %v2229_v13  ;;  %v2219_v57 = vadd.f32 %v2218_v62, %v2217_v33  ;;  %v2226_v62 = vadd.f32 %v2225_v12, %v2224_v2 }
 0xfb7   :  { %v2214_v48 = vadd.f32 %v2213_v58, %v2212_v19 }
 0xfb8   :  { %v2232_v16 = vrot.slane %v2231_v15, 2  ;;  %v2220_v20 = vrot.slane %v2219_v57, 1 }
 0xfba   :  { %v2233_v60 = vadd.f32 %v2232_v16, %v2231_v15  ;;  %v2221_v35 = vadd.f32 %v2220_v20, %v2219_v57 }
 0xfbc   :  { %v2234_v3 = vrot.slane %v2233_v60, 1 }
 0xfde   :  { %v2100_v6 = vpop.xlane.xlu0 %2099 }
 0xfdf   :  { %vm2101_vm2 = vcmp.eq.f32.partialorder %v2097_v40, %v2100_v6  ;;  %v2200_v40 = vadd.f32 %v2199_v39, %v2198_v36 }
 0xfe0   :  { %v2102_v42 = vsel %vm2101_vm2, %v9987_v47, 8  ;;  %vm11867_vm2 = vmmov %vm11866_vm12 }
 0xfe1   :  { %v2103_v37 = vsel %vm851_vm10, %v2102_v42, 2147483647  ;;  %v2441_v6 = vsel %vm836_vm3, %v2200_v40, %v2193_v28  ;;  %v2227_v42 = vrot.slane %v2226_v62, 1 }
 0xfe2   :  { %v2178_v41 = vpop.permute.xlu0 %2177  ;;  %v2105_v25 = vshra.s32 %v2103_v37, 16  ;;  %v2104_v57 = vand.u32 65535, %v2103_v37 }
 0xfe3   :  { %v2186_v50 = vmul.f32 %v2178_v41, %v9962_v55  ;;  %v2228_v2 = vadd.f32 %v2227_v42, %v2226_v62 }
 0xfe4   :  { %v2107_v10 = vcvt.s32.f32 %v2105_v25  ;;  %v2442_v25 = vsel %vm838_vm4, %v2207_v30, %v2441_v6  ;;  %v2106_v12 = vcvt.s32.f32 %v2104_v57 }
 0xfe5   :  { %v2236_v32 = vsel %vm263_vm1, %v2186_v50, 0.0  ;;  %v2443_v15 = vsel %vm840_vm5, %v2214_v48, %v2442_v25  ;;  %v2235_v50 = vadd.f32 %v2234_v3, %v2233_v60 }
 0xfe6   :  { %v2237_v13 = vrot.slane %v2236_v32, 4  ;;  %2108 = vmin.xlane.f32.xlu1 %v2107_v10  ;;  %v2444_v29 = vsel %vm842_vm6, %v2221_v35, %v2443_v15 }
 0xfe7   :  { %v2445_v8 = vsel %vm844_vm7, %v2228_v2, %v2444_v29 }
 0xfe8   :  { %v2238_v33 = vadd.f32 %v2237_v13, %v2236_v32  ;;  %v2446_v61 = vsel %vm846_vm8, %v2235_v50, %v2445_v8  ;;  %v1621_v13 = vsel %vm1620_vm14, %v10215_v21, 0  ;;  %vm11869_vm14 = vmmov %vm11867_vm2 }
 0xfea   :  { %v2239_v41 = vrot.slane %v2238_v33, 2 }
 0xfec   :  { %v2240_v16 = vadd.f32 %v2239_v41, %v2238_v33 }
 0xfee   :  { %v2241_v36 = vrot.slane %v2240_v16, 1 }
 0xff0   :  { %v2242_v39 = vadd.f32 %v2241_v36, %v2240_v16 }
 0xff2   :  { %v2447_v19 = vsel %vm848_vm9, %v2242_v39, %v2446_v61 }
 0xff3   :  { %8362 = vmatmul.mubr.msk.f32.vlgmr.msra.gmra.mrb[14].mxu0 %vm263_vm1, %v2447_v19 }
 0xff4   :  { %8749 = vmatpush3.bf16.msra.mxu0 %v9880_v44  ;;  %8401 = vmatprep.mubr.msk.f32.mxu0 %vm9566_vm0, %v11844_v17 }
 0xff5   :  { %8750 = vmatprep.subr.bf16.mxu0 %v11845_v38 }
 0xff8   :  { %8752 = vmatpush3.bf16.msra.mxu0 %v9894_v49 }
 0xff9   :  { %8759 = vmatprep.subr.bf16.mxu0 %v11845_v38 }
0x1073   :  { %v2109_v4 = vpop.xlane.xlu1 %2108 }
0x1074   :  { %vm2110_vm13 = vcmp.eq.f32.partialorder %v2107_v10, %v2109_v4  ;;  %v2115_v37 = vcvt.f32.s32 %v2109_v4 }
0x1075   :  { %v2111_v58 = vsel %vm2110_vm13, %v2106_v12, inf  ;;  %vm11868_vm13 = vmmov %vm11867_vm2 }
0x1076   :  { %2112 = vmin.xlane.f32.xlu0 %v2111_v58  ;;  %v2116_v62 = vshll.u32 %v2115_v37, 16 }
0x10c6   :  { %v2516_v20 = vpop.f32.mrb[14].mxu0 }
0x10c7   :  { %v2517_v60 = vadd.f32 %v2516_v20, %v10313_v54  ;;  %v8363_v32 = vpop.f32.mrb[15].mxu0 }
0x10c9   :  { %v2520_v40 = vadd.f32 %v10186_v0, %v2517_v60 }
0x10cb   :  { %9006 = vtanh.f32 %v2520_v40 }
0x10d5   :  { %v9007_v28 = vpop.eup %9006 }
0x10d6   :  { %8373 = vmatmul.mubr.msk.f32.vlgmr.msra.gmra.mrb[12].mxu1 %vm263_vm1, %v9007_v28 }
0x10d7   :  { %8740 = vmatpush3.bf16.msra.mxu1 %v9849_v11  ;;  %8379 = vmatprep.mubr.msk.f32.mxu1 %vm9566_vm0, %v11844_v17 }
0x10d8   :  { %8741 = vmatprep.subr.bf16.mxu1 %v11845_v38 }
0x1103   :  { %v2113_v10 = vpop.xlane.xlu0 %2112 }
0x1104   :  { %v2114_v54 = vcvt.f32.s32 %v2113_v10 }
0x1106   :  { %v2117_v0 = vadd.s32 %v2116_v62, %v2114_v54  ;;  %v11870_v62 = vld [vmem:[#allocation53_spill] sm:$0xff] }
0x1108   :  { %vm2118_vm11 = vcmp.eq.s32.totalorder %v9987_v47, %v2117_v0  ;;  %v10439_v30 = vsel %vm2522_vm15, %v2117_v0, %v1621_v13  ;;  %vm11871_vm15 = vmmov %vm11867_vm2 }
0x1109   :  { %v10442_v48 = vsel %vm2118_vm11, 1.0, %v11844_v17  ;;  %vm11872_vm11 = vmmov %vm11867_vm2 }
0x110a   :  { %v2253_v33 = vrot.slane %v10442_v48, %v10010_v22  ;;  %v2246_v35 = vrot.slane %v10442_v48, %v9936_v26  ;;  %v2260_v3 = vrot.slane %v10442_v48, %v10013_v23  ;;  %v2267_v21 = vrot.slane %v10442_v48, %v10016_v24 }
0x110b   :  { %v2274_v6 = vrot.slane %v10442_v48, %v10022_v34  ;;  %v2281_v42 = vrot.slane %v10442_v48, %v10026_v46  ;;  %v2288_v41 = vrot.slane %v10442_v48, %v10030_v51  ;;  %v2295_v25 = vrot.slane %v10442_v48, %v10034_v56 }
0x110c   :  { %2255 = vbcast.lane.b32.xlu1 %v2253_v33, 256  ;;  %2248 = vbcast.lane.b32.xlu0 %v2246_v35, 256 }
0x1110   :  { %2262 = vbcast.lane.b32.xlu1 %v2260_v3, 256  ;;  %2269 = vbcast.lane.b32.xlu0 %v2267_v21, 256 }
0x1114   :  { %2276 = vbcast.lane.b32.xlu1 %v2274_v6, 256  ;;  %2283 = vbcast.lane.b32.xlu0 %v2281_v42, 256 }
0x1118   :  { %2290 = vbcast.lane.b32.xlu1 %v2288_v41, 256  ;;  %2297 = vbcast.lane.b32.xlu0 %v2295_v25, 256 }
0x117e   :  { %v2256_v15 = vpop.permute.xlu1 %2255  ;;  %v2249_v16 = vpop.permute.xlu0 %2248 }
0x117f   :  { %v2300_v50 = vmul.f32 %v2256_v15, %v10238_v43  ;;  %v2299_v29 = vmul.f32 %v2249_v16, %v10240_v45 }
0x1181   :  { %v2314_v2 = vsel %vm11866_vm12, %v2300_v50, 0.0  ;;  %v2307_v36 = vsel %vm11867_vm2, %v2299_v29, 0.0  ;;  %v11873_v50 = vld [vmem:[#allocation54_spill] sm:$0xff]  ;;  %vm11874_vm12 = vmmov %vm11867_vm2 }
0x1182   :  { %v2315_v39 = vrot.slane %v2314_v2, 4  ;;  %v2308_v8 = vrot.slane %v2307_v36, 4  ;;  %v2263_v61 = vpop.permute.xlu1 %2262  ;;  %v2270_v19 = vpop.permute.xlu0 %2269 }
0x1183   :  { %v2301_v57 = vmul.f32 %v2263_v61, %v10246_v59  ;;  %v2302_v4 = vmul.f32 %v2270_v19, %v10244_v31 }
0x1184   :  { %v2316_v12 = vadd.f32 %v2315_v39, %v2314_v2  ;;  %v2309_v58 = vadd.f32 %v2308_v8, %v2307_v36 }
0x1185   :  { %v2321_v20 = vsel %vm11868_vm13, %v2301_v57, 0.0  ;;  %v2328_v43 = vsel %vm11869_vm14, %v2302_v4, 0.0  ;;  %vm11875_vm13 = vmmov %vm11867_vm2 }
0x1186   :  { %v2317_v60 = vrot.slane %v2316_v12, 2  ;;  %v2310_v45 = vrot.slane %v2309_v58, 2  ;;  %v2322_v32 = vrot.slane %v2321_v20, 4  ;;  %v2329_v40 = vrot.slane %v2328_v43, 4  ;;  %v2277_v28 = vpop.permute.xlu1 %2276  ;;  %v2284_v37 = vpop.permute.xlu0 %2283 }
0x1187   :  { %v2303_v10 = vmul.f32 %v2277_v28, %v10254_v27  ;;  %v2304_v54 = vmul.f32 %v2284_v37, %v11870_v62 }
0x1188   :  { %v2318_v0 = vadd.f32 %v2317_v60, %v2316_v12  ;;  %v2311_v59 = vadd.f32 %v2310_v45, %v2309_v58  ;;  %v2323_v13 = vadd.f32 %v2322_v32, %v2321_v20  ;;  %v2330_v31 = vadd.f32 %v2329_v40, %v2328_v43 }
0x1189   :  { %v2335_v33 = vsel %vm11871_vm15, %v2303_v10, 0.0  ;;  %v2342_v35 = vsel %vm11872_vm11, %v2304_v54, 0.0 }
0x118a   :  { %v2319_v3 = vrot.slane %v2318_v0, 1  ;;  %v2312_v21 = vrot.slane %v2311_v59, 1  ;;  %v2324_v6 = vrot.slane %v2323_v13, 2  ;;  %v2331_v42 = vrot.slane %v2330_v31, 2  ;;  %v2291_v41 = vpop.permute.xlu1 %2290  ;;  %v2298_v25 = vpop.permute.xlu0 %2297 }
0x118b   :  { %v2336_v15 = vrot.slane %v2335_v33, 4  ;;  %v2343_v16 = vrot.slane %v2342_v35, 4  ;;  %v2305_v27 = vmul.f32 %v2291_v41, %v10262_v14  ;;  %v2306_v29 = vmul.f32 %v2298_v25, %v11873_v50 }
0x118c   :  { %v2320_v2 = vadd.f32 %v2319_v3, %v2318_v0  ;;  %v2325_v36 = vadd.f32 %v2324_v6, %v2323_v13  ;;  %v2332_v39 = vadd.f32 %v2331_v42, %v2330_v31  ;;  %v2313_v4 = vadd.f32 %v2312_v21, %v2311_v59 }
0x118d   :  { %v2337_v8 = vadd.f32 %v2336_v15, %v2335_v33  ;;  %v2344_v61 = vadd.f32 %v2343_v16, %v2342_v35  ;;  %v2349_v19 = vsel %vm11874_vm12, %v2305_v27, 0.0  ;;  %v2356_v57 = vsel %vm11867_vm2, %v2306_v29, 0.0 }
0x118e   :  { %v2326_v12 = vrot.slane %v2325_v36, 1  ;;  %v2333_v58 = vrot.slane %v2332_v39, 1  ;;  %v2350_v20 = vrot.slane %v2349_v19, 4  ;;  %v2357_v45 = vrot.slane %v2356_v57, 4 }
0x118f   :  { %v2338_v43 = vrot.slane %v2337_v8, 2  ;;  %v2345_v60 = vrot.slane %v2344_v61, 2  ;;  %v2752_v10 = vsel %vm836_vm3, %v2320_v2, %v2313_v4  ;;  %v11876_v2 = vld [vmem:[#allocation34_spill] sm:$0xff]  ;;  %vm3555_vm12 = vcmp.eq.s32.totalorder %v9987_v47, 2 }
0x1190   :  { %v2327_v32 = vadd.f32 %v2326_v12, %v2325_v36  ;;  %v2351_v14 = vadd.f32 %v2350_v20, %v2349_v19  ;;  %v2358_v37 = vadd.f32 %v2357_v45, %v2356_v57  ;;  %v2334_v62 = vadd.f32 %v2333_v58, %v2332_v39  ;;  %v11877_v36 = vld [vmem:[#allocation35_spill] sm:$0xff] }
0x1191   :  { %v2339_v40 = vadd.f32 %v2338_v43, %v2337_v8  ;;  %v2346_v28 = vadd.f32 %v2345_v60, %v2344_v61 }
0x1192   :  { %v2352_v54 = vrot.slane %v2351_v14, 2  ;;  %v2753_v0 = vsel %vm838_vm4, %v2327_v32, %v2752_v10  ;;  %v2359_v59 = vrot.slane %v2358_v37, 2 }
0x1193   :  { %v2340_v13 = vrot.slane %v2339_v40, 1  ;;  %v2347_v31 = vrot.slane %v2346_v28, 1  ;;  %v2754_v6 = vsel %vm840_vm5, %v2334_v62, %v2753_v0 }
0x1194   :  { %v2353_v33 = vadd.f32 %v2352_v54, %v2351_v14  ;;  %v2360_v21 = vadd.f32 %v2359_v59, %v2358_v37 }
0x1195   :  { %v2341_v35 = vadd.f32 %v2340_v13, %v2339_v40  ;;  %v2348_v3 = vadd.f32 %v2347_v31, %v2346_v28 }
0x1196   :  { %v2354_v42 = vrot.slane %v2353_v33, 1  ;;  %v2361_v41 = vrot.slane %v2360_v21, 1 }
0x1197   :  { %v2755_v25 = vsel %vm842_vm6, %v2341_v35, %v2754_v6 }
0x1198   :  { %v2355_v15 = vadd.f32 %v2354_v42, %v2353_v33  ;;  %v2362_v16 = vadd.f32 %v2361_v41, %v2360_v21  ;;  %v2756_v27 = vsel %vm844_vm7, %v2348_v3, %v2755_v25 }
0x119a   :  { %v2757_v50 = vsel %vm846_vm8, %v2355_v15, %v2756_v27 }
0x119b   :  { %v2758_v29 = vsel %vm848_vm9, %v2362_v16, %v2757_v50 }
0x119c   :  { %8380 = vmatmul.mubr.msk.f32.vlgmr.msra.gmra.mrb[14].mxu1 %vm11875_vm13, %v2758_v29 }
0x119d   :  { %8743 = vmatpush3.bf16.msra.mxu1 %v11876_v2  ;;  %8390 = vmatprep.mubr.msk.f32.mxu1 %vm9566_vm0, %v11844_v17 }
0x119e   :  { %8744 = vmatprep.subr.bf16.mxu1 %v11845_v38 }
0x11a1   :  { %8746 = vmatpush3.bf16.msra.mxu1 %v11877_v36 }
0x11a2   :  { %8753 = vmatprep.subr.bf16.mxu1 %v11845_v38 }
0x11a9   :  { %v2740_v39 = vpop.f32.mrb[12].mxu1 }
0x11aa   :  { %v8374_v8 = vpop.f32.mrb[13].mxu1 }
0x11ab   :  { %v11878_v8 = vld [vmem:[#allocation38_spill] sm:$0xff] }
0x126f   :  { %v2827_v61 = vpop.f32.mrb[14].mxu1 }
0x1270   :  { %v2828_v19 = vadd.f32 %v2827_v61, %v2740_v39  ;;  %v8381_v57 = vpop.f32.mrb[15].mxu1 }
0x1272   :  { %v2831_v4 = vadd.f32 %v10288_v18, %v2828_v19 }
0x1274   :  { %v8007_v12 = vmul.f32 -1.442695, %v2831_v4  ;;  %9008 = vtanh.f32 %v2831_v4  ;;  %v11879_v4 = vld [vmem:[#allocation37_spill] sm:$0xff] }
0x1276   :  { %9010 = vpow2.f32 %v8007_v12 }
0x127e   :  { %v9009_v58 = vpop.eup %9008 }
0x127f   :  { %2841 = vrot.lane.b32.xlu1 %v9009_v58, %s9568_s2  ;;  %v11880_v58 = vld [vmem:[#allocation40_spill] sm:$0xff] }
0x1280   :  { %v9011_v20 = vpop.eup %9010 }
0x1281   :  { %v2835_v43 = vadd.f32 1.0, %v9011_v20 }
0x1283   :  { %9012 = vrcp.f32 %v2835_v43  ;;  %v11881_v43 = vld [vmem:[#allocation42_spill] sm:$0xff] }
0x128d   :  { %v9013_v60 = vpop.eup %9012 }
0x128e   :  { %2852 = vrot.lane.b32.xlu1 %v9013_v60, %s9568_s2  ;;  %v2839_v14 = vmul.f32 %v9013_v60, %v10295_v52 }
0x12f1   :  { %v2842_v45 = vpop.permute.xlu1 %2841 }
0x12f2   :  { %v2844_v32 = vmul.f32 %v9013_v60, %v2842_v45 }
0x12f4   :  { %2846 = vrot.lane.b32.xlu0 %v2844_v32, %s9569_s24 }
0x1300   :  { %v2853_v37 = vpop.permute.xlu1 %2852 }
0x1366   :  { %v2847_v40 = vpop.permute.xlu0 %2846 }
0x1367   :  { %v10495_v18 = vadd.f32 %v2847_v40, %v2839_v14  ;;  %v11882_v14 = vld [vmem:[#allocation39_spill] sm:$0xff] }
0x1369   :  { %9014 = vtanh.f32 %v10495_v18 }
0x1373   :  { %v9015_v28 = vpop.eup %9014 }
0x1374   :  { %v2855_v10 = vmul.f32 %v9015_v28, %v2853_v37  ;;  %v11883_v28 = vld [vmem:[#allocation43_spill] sm:$0xff] }
0x1376   :  { %2857 = vrot.lane.b32.xlu0 %v2855_v10, %s9570_s9 }
0x13e8   :  { %v2858_v62 = vpop.permute.xlu0 %2857 }
0x13e9   :  { %8391 = vmatmul.mubr.msk.f32.vlgmr.msra.gmra.mrb[16].mxu1 %vm263_vm1, %v2858_v62  ;;  %8402 = vmatmul.mubr.msk.f32.vlgmr.msra.gmra.mrb[16].mxu0 %vm263_vm1, %v2858_v62  ;;  %v11884_v62 = vld [vmem:[#allocation41_spill] sm:$0xff] }
0x13ea   :  { %8755 = vmatpush3.bf16.msra.mxu1 %v10115_v53  ;;  %8412 = vmatprep.mubr.msk.f32.mxu1 %vm9566_vm0, %v11844_v17 }
0x13eb   :  { %8756 = vmatprep.subr.bf16.mxu1 %v11845_v38  ;;  %8761 = vmatpush3.bf16.msra.mxu0 %v9842_v5 }
0x13ec   :  { %8762 = vmatprep.subr.bf16.mxu0 %v11845_v38  ;;  %8423 = vmatprep.mubr.msk.f32.mxu0 %vm9566_vm0, %v11844_v17 }
0x13ee   :  { %8758 = vmatpush3.bf16.msra.mxu1 %v10118_v9 }
0x13ef   :  { %8764 = vmatpush3.bf16.msra.mxu0 %v9845_v7  ;;  %8765 = vmatprep.subr.bf16.mxu1 %v11845_v38 }
0x13f0   :  { %8768 = vmatprep.subr.bf16.mxu0 %v11845_v38 }
0x14bc   :  { %v2927_v52 = vpop.f32.mrb[16].mxu1  ;;  %v10513_v54 = vpop.f32.mrb[16].mxu0 }
0x14bd   :  { %v2928_v0 = vadd.f32 %v10318_v1, %v2927_v52  ;;  %v8392_v13 = vpop.f32.mrb[17].mxu1  ;;  %v8403_v31 = vpop.f32.mrb[17].mxu0 }
0x14be   :  { %v11885_v31 = vld [vmem:[#allocation36_spill] sm:$0xff] }
0x14bf   :  { %v2932_v59 = vcombine.high %v2928_v0, %v2928_v0  ;;  %v2939_v33 = vrot.slane %v2928_v0, %v11857_v63 }
0x14c1   :  { %v2946_v35 = vrot.slane %v2932_v59, %v11857_v63  ;;  %v2947_v3 = vcombine.high %v2939_v33, %v2939_v33  ;;  %v2955_v21 = vrot.slane %v2939_v33, %v11857_v63 }
0x14c3   :  { %v2948_v6 = vcombine.high %v2946_v35, %v2946_v35  ;;  %v2962_v42 = vrot.slane %v2946_v35, %v11857_v63  ;;  %v2969_v41 = vrot.slane %v2947_v3, %v11857_v63  ;;  %v2977_v25 = vcombine.high %v2955_v21, %v2955_v21 }
0x14c4   :  { %v2984_v15 = vrot.slane %v2955_v21, %v9936_v26 }
0x14c5   :  { %v2978_v16 = vcombine.high %v2962_v42, %v2962_v42  ;;  %v2979_v1 = vcombine.high %v2969_v41, %v2969_v41  ;;  %v2988_v27 = vrot.slane %v2969_v41, %v9936_v26  ;;  %v2976_v50 = vrot.slane %v2948_v6, %v11857_v63 }
0x14c6   :  { %v2992_v29 = vrot.slane %v2977_v25, %v9936_v26  ;;  %v3000_v39 = vrot.slane %v2962_v42, %v9936_v26  ;;  %v3021_v61 = vadd.f32 %v2984_v15, %v11878_v8 }
0x14c7   :  { %v2996_v19 = vrot.slane %v2979_v1, %v9936_v26  ;;  %v3008_v57 = vrot.slane %v2978_v16, %v9936_v26  ;;  %v3022_v12 = vadd.f32 %v2988_v27, %v11879_v4  ;;  %v2980_v45 = vcombine.high %v2976_v50, %v2976_v50 }
0x14c8   :  { %v3023_v20 = vadd.f32 %v2992_v29, %v11880_v58  ;;  %9016 = vtanh.f32 %v3021_v61  ;;  %v3025_v60 = vadd.f32 %v3000_v39, %v11881_v43  ;;  %v3004_v32 = vrot.slane %v2976_v50, %v9936_v26 }
0x14c9   :  { %v3024_v40 = vadd.f32 %v2996_v19, %v11882_v14  ;;  %9018 = vtanh.f32 %v3022_v12  ;;  %v3027_v37 = vadd.f32 %v3008_v57, %v11883_v28  ;;  %v3012_v10 = vrot.slane %v2980_v45, %v9936_v26 }
0x14ca   :  { %9020 = vtanh.f32 %v3023_v20  ;;  %v3026_v52 = vadd.f32 %v3004_v32, %v11884_v62 }
0x14cb   :  { %9022 = vtanh.f32 %v3025_v60  ;;  %v3028_v13 = vadd.f32 %v3012_v10, %v9962_v55  ;;  %v11886_v10 = vld [vmem:[#allocation44_spill] sm:$0xff] }
0x14cc   :  { %9024 = vtanh.f32 %v3024_v40 }
0x14cd   :  { %9026 = vtanh.f32 %v3027_v37 }
0x14ce   :  { %9028 = vtanh.f32 %v3026_v52 }
0x14cf   :  { %9030 = vtanh.f32 %v3028_v13 }
0x14d2   :  { %v9017_v0 = vpop.eup %9016 }
0x14d3   :  { %v3037_v59 = vmul.f32 %v11885_v31, %v9017_v0  ;;  %v9019_v33 = vpop.eup %9018 }
0x14d4   :  { %v9021_v35 = vpop.eup %9020  ;;  %v3038_v21 = vmul.f32 %v11885_v31, %v9019_v33 }
0x14d5   :  { %v3045_v3 = vsel %vm263_vm1, %v3037_v59, 0.0  ;;  %v9023_v6 = vpop.eup %9022  ;;  %v3039_v41 = vmul.f32 %v11885_v31, %v9021_v35 }
0x14d6   :  { %3046 = vadd.xlane.f32.xlu1 %v3045_v3  ;;  %v3048_v42 = vsel %vm263_vm1, %v3038_v21, 0.0  ;;  %v9025_v25 = vpop.eup %9024  ;;  %v3041_v15 = vmul.f32 %v11885_v31, %v9023_v6  ;;  %v2121_v6 = vsub.f32 1.0, %v10442_v48 }
0x14d7   :  { %3049 = vadd.xlane.f32.xlu0 %v3048_v42  ;;  %v9027_v16 = vpop.eup %9026  ;;  %v3051_v50 = vsel %vm263_vm1, %v3039_v41, 0.0  ;;  %v3040_v29 = vmul.f32 %v11885_v31, %v9025_v25 }
0x14d8   :  { %v3057_v1 = vsel %vm263_vm1, %v3041_v15, 0.0  ;;  %v3043_v27 = vmul.f32 %v11885_v31, %v9027_v16  ;;  %v9029_v39 = vpop.eup %9028 }
0x14d9   :  { %v3054_v19 = vsel %vm263_vm1, %v3040_v29, 0.0  ;;  %v3042_v57 = vmul.f32 %v11885_v31, %v9029_v39  ;;  %v9031_v12 = vpop.eup %9030 }
0x14da   :  { %3058 = vadd.xlane.f32.xlu1 %v3057_v1  ;;  %v3063_v61 = vsel %vm263_vm1, %v3043_v27, 0.0  ;;  %v3044_v60 = vmul.f32 %v11885_v31, %v9031_v12  ;;  %v11887_v27 = vld [vmem:[#allocation55_spill] sm:$0xff] }
0x14db   :  { %3052 = vadd.xlane.f32.xlu0 %v3051_v50  ;;  %v3060_v20 = vsel %vm263_vm1, %v3042_v57, 0.0  ;;  %v10567_v50 = vmul.f32 %v2121_v6, %v11887_v27 }
0x14dc   :  { %v3066_v45 = vsel %vm263_vm1, %v3044_v60, 0.0 }
0x14dd   :  { %11888 = vst [vmem:[#allocation53_spill] sm:$0xff] %v10567_v50  ;;  %vm3069_vm14 = vcmp.eq.f32.partialorder %v10567_v50, 0.0 }
0x14de   :  { %3064 = vadd.xlane.f32.xlu1 %v3063_v61 }
0x14df   :  { %3055 = vadd.xlane.f32.xlu0 %v3054_v19 }
0x14e3   :  { %3061 = vadd.xlane.f32.xlu0 %v3060_v20 }
0x14e7   :  { %3067 = vadd.xlane.f32.xlu0 %v3066_v45 }
0x1563   :  { %v3047_v40 = vpop.xlane.xlu1 %3046 }
0x1564   :  { %v3050_v32 = vpop.xlane.xlu0 %3049  ;;  %v3081_v13 = vrot.slane %v3047_v40, %v11886_v10 }
0x1565   :  { %v3085_v52 = vrot.slane %v3050_v32, %v11886_v10 }
0x1567   :  { %v3059_v59 = vpop.xlane.xlu1 %3058  ;;  %v3110_v35 = vsel %vm836_vm3, %v3085_v52, %v3081_v13 }
0x1568   :  { %v3053_v37 = vpop.xlane.xlu0 %3052  ;;  %v3097_v42 = vrot.slane %v3059_v59, %v11886_v10 }
0x1569   :  { %v3089_v0 = vrot.slane %v3053_v37, %v11886_v10 }
0x156b   :  { %v3111_v31 = vsel %vm838_vm4, %v3089_v0, %v3110_v35  ;;  %v3065_v25 = vpop.xlane.xlu1 %3064 }
0x156c   :  { %v3056_v33 = vpop.xlane.xlu0 %3055  ;;  %v3105_v29 = vrot.slane %v3065_v25, %v11886_v10 }
0x156d   :  { %v3093_v3 = vrot.slane %v3056_v33, %v11886_v10 }
0x156f   :  { %v3112_v21 = vsel %vm840_vm5, %v3093_v3, %v3111_v31 }
0x1570   :  { %v3062_v41 = vpop.xlane.xlu0 %3061  ;;  %v3113_v16 = vsel %vm842_vm6, %v3097_v42, %v3112_v21 }
0x1571   :  { %v3101_v15 = vrot.slane %v3062_v41, %v11886_v10 }
0x1573   :  { %v3114_v1 = vsel %vm844_vm7, %v3101_v15, %v3113_v16 }
0x1574   :  { %v3068_v39 = vpop.xlane.xlu0 %3067  ;;  %v3115_v48 = vsel %vm846_vm8, %v3105_v29, %v3114_v1 }
0x1575   :  { %v3109_v61 = vrot.slane %v3068_v39, %v11886_v10 }
0x1577   :  { %v3116_v19 = vsel %vm848_vm9, %v3109_v61, %v3115_v48 }
0x1578   :  { %v3118_v57 = vsel %vm3069_vm14, -inf, %v3116_v19  ;;  %vm11892_vm14 = vmmov %vm11875_vm13 }
0x1579   :  { %v3119_v12 = vsel %vm851_vm10, %v3118_v57, -inf }
0x157a   :  { %3120 = vmax.xlane.f32.xlu1 %v3119_v12 }
0x1607   :  { %v3121_v20 = vpop.xlane.xlu1 %3120 }
0x1608   :  { %v3122_v60 = vsub.f32 %v3118_v57, %v3121_v20 }
0x160a   :  { %v3123_v45 = vmul.f32 1.442695, %v3122_v60 }
0x160c   :  { %9032 = vpow2.f32 %v3123_v45 }
0x1616   :  { %v9033_v32 = vpop.eup %9032 }
0x1617   :  { %v3125_v40 = vsel %vm851_vm10, %v9033_v32, 0.0 }
0x1618   :  { %3126 = vadd.xlane.f32.xlu0 %v3125_v40 }
0x16a5   :  { %v3127_v37 = vpop.xlane.xlu0 %3126 }
0x16a6   :  { %9034 = vrcp.f32 %v3127_v37 }
0x16b0   :  { %v9035_v52 = vpop.eup %9034 }
0x16b1   :  { %v3129_v0 = vmul.f32 %v9035_v52, %v9033_v32 }
0x16b3   :  { %7902 = vst.msk [vmem:[#allocation19 + $0x10] sm:$0xff] %vm851_vm10, %v3129_v0  ;;  %v3166_v13 = vrot.slane %v3129_v0, %v10010_v22  ;;  %v3159_v59 = vrot.slane %v3129_v0, %v9936_v26  ;;  %v3173_v33 = vrot.slane %v3129_v0, %v10013_v23  ;;  %v3187_v35 = vrot.slane %v3129_v0, %v10022_v34 }
0x16b4   :  { %v3180_v3 = vrot.slane %v3129_v0, %v10016_v24  ;;  %v3201_v31 = vrot.slane %v3129_v0, %v10030_v51  ;;  %v3194_v21 = vrot.slane %v3129_v0, %v10026_v46  ;;  %v3130_v6 = vmul.f32 %v3129_v0, %v10567_v50 }
0x16b5   :  { %3168 = vbcast.lane.b32.xlu1 %v3166_v13, 256  ;;  %3161 = vbcast.lane.b32.xlu0 %v3159_v59, 256  ;;  %v3208_v41 = vrot.slane %v3129_v0, %v10034_v56 }
0x16b6   :  { %v3131_v42 = vsel %vm851_vm10, %v3130_v6, -inf }
0x16b9   :  { %3175 = vbcast.lane.b32.xlu1 %v3173_v33, 256  ;;  %3189 = vbcast.lane.b32.xlu0 %v3187_v35, 256 }
0x16bd   :  { %3182 = vbcast.lane.b32.xlu1 %v3180_v3, 256  ;;  %3203 = vbcast.lane.b32.xlu0 %v3201_v31, 256 }
0x16c1   :  { %3196 = vbcast.lane.b32.xlu1 %v3194_v21, 256 }
0x16e5   :  { %3132 = vmax.xlane.f32.xlu1 %v3131_v42 }
0x16f6   :  { %3210 = vbcast.lane.b32.xlu1 %v3208_v41, 256 }
0x1727   :  { %v3169_v25 = vpop.permute.xlu1 %3168  ;;  %v3162_v16 = vpop.permute.xlu0 %3161 }
0x1728   :  { %v3213_v27 = vmul.f32 %v3169_v25, %v11879_v4  ;;  %v3212_v29 = vmul.f32 %v3162_v16, %v11878_v8 }
0x172a   :  { %v3227_v57 = vsel %vm263_vm1, %v3213_v27, 0.0  ;;  %v3220_v12 = vsel %vm263_vm1, %v3212_v29, 0.0 }
0x172b   :  { %v3176_v15 = vpop.permute.xlu1 %3175  ;;  %v3190_v61 = vpop.permute.xlu0 %3189  ;;  %v3228_v32 = vrot.slane %v3227_v57, 4  ;;  %v3221_v40 = vrot.slane %v3220_v12, 4 }
0x172c   :  { %v3214_v39 = vmul.f32 %v3176_v15, %v11880_v58  ;;  %v3216_v37 = vmul.f32 %v3190_v61, %v11881_v43 }
0x172d   :  { %v3229_v33 = vadd.f32 %v3228_v32, %v3227_v57  ;;  %v3222_v35 = vadd.f32 %v3221_v40, %v3220_v12 }
0x172e   :  { %v3234_v20 = vsel %vm263_vm1, %v3214_v39, 0.0  ;;  %v3248_v3 = vsel %vm263_vm1, %v3216_v37, 0.0 }
0x172f   :  { %v3183_v1 = vpop.permute.xlu1 %3182  ;;  %v3235_v52 = vrot.slane %v3234_v20, 4  ;;  %v3204_v0 = vpop.permute.xlu0 %3203  ;;  %v3249_v25 = vrot.slane %v3248_v3, 4  ;;  %v3230_v15 = vrot.slane %v3229_v33, 2  ;;  %v3223_v16 = vrot.slane %v3222_v35, 2 }
0x1730   :  { %v3215_v48 = vmul.f32 %v3183_v1, %v11882_v14  ;;  %v3218_v31 = vmul.f32 %v3204_v0, %v11883_v28 }
0x1731   :  { %v3236_v21 = vadd.f32 %v3235_v52, %v3234_v20  ;;  %v3250_v61 = vadd.f32 %v3249_v25, %v3248_v3  ;;  %v3224_v57 = vadd.f32 %v3223_v16, %v3222_v35 }
0x1732   :  { %v3241_v60 = vsel %vm263_vm1, %v3215_v48, 0.0  ;;  %v3262_v1 = vsel %vm263_vm1, %v3218_v31, 0.0 }
0x1733   :  { %v3197_v19 = vpop.permute.xlu1 %3196  ;;  %v3242_v13 = vrot.slane %v3241_v60, 4  ;;  %v3237_v27 = vrot.slane %v3236_v21, 2  ;;  %v3263_v48 = vrot.slane %v3262_v1, 4  ;;  %v3251_v37 = vrot.slane %v3250_v61, 2 }
0x1734   :  { %v3217_v45 = vmul.f32 %v3197_v19, %v11884_v62  ;;  %v3231_v19 = vadd.f32 %v3230_v15, %v3229_v33  ;;  %v3225_v52 = vrot.slane %v3224_v57, 1 }
0x1735   :  { %v3243_v42 = vadd.f32 %v3242_v13, %v3241_v60  ;;  %v3238_v12 = vadd.f32 %v3237_v27, %v3236_v21  ;;  %v3264_v20 = vadd.f32 %v3263_v48, %v3262_v1  ;;  %v3252_v33 = vadd.f32 %v3251_v37, %v3250_v61 }
0x1736   :  { %v3255_v59 = vsel %vm263_vm1, %v3217_v45, 0.0  ;;  %v3232_v60 = vrot.slane %v3231_v19, 1  ;;  %v3226_v25 = vadd.f32 %v3225_v52, %v3224_v57 }
0x1737   :  { %v3256_v41 = vrot.slane %v3255_v59, 4  ;;  %v3244_v29 = vrot.slane %v3243_v42, 2  ;;  %v3239_v13 = vrot.slane %v3238_v12, 1  ;;  %v3265_v35 = vrot.slane %v3264_v20, 2 }
0x1738   :  { %v3253_v48 = vrot.slane %v3252_v33, 1 }
0x1739   :  { %v3257_v39 = vadd.f32 %v3256_v41, %v3255_v59  ;;  %v3245_v45 = vadd.f32 %v3244_v29, %v3243_v42  ;;  %v3233_v42 = vadd.f32 %v3232_v60, %v3231_v19  ;;  %v3240_v16 = vadd.f32 %v3239_v13, %v3238_v12 }
0x173a   :  { %v3254_v57 = vadd.f32 %v3253_v48, %v3252_v33 }
0x173b   :  { %v3258_v32 = vrot.slane %v3257_v39, 2  ;;  %v3246_v50 = vrot.slane %v3245_v45, 1 }
0x173d   :  { %v3259_v59 = vadd.f32 %v3258_v32, %v3257_v39  ;;  %v3247_v1 = vadd.f32 %v3246_v50, %v3245_v45  ;;  %v3474_v39 = vsel %vm836_vm3, %v3233_v42, %v3226_v25 }
0x173e   :  { %v3475_v61 = vsel %vm838_vm4, %v3240_v16, %v3474_v39 }
0x173f   :  { %v3260_v27 = vrot.slane %v3259_v59, 1  ;;  %v3476_v37 = vsel %vm840_vm5, %v3247_v1, %v3475_v61 }
0x1740   :  { %v3477_v52 = vsel %vm842_vm6, %v3254_v57, %v3476_v37 }
0x1772   :  { %v3133_v40 = vpop.xlane.xlu1 %3132 }
0x1773   :  { %vm3134_vm15 = vcmp.eq.f32.partialorder %v3130_v6, %v3133_v40  ;;  %v3266_v40 = vadd.f32 %v3265_v35, %v3264_v20 }
0x1774   :  { %v3135_v0 = vsel %vm3134_vm15, %v9987_v47, 8  ;;  %vm11895_vm15 = vmmov %vm11875_vm13 }
0x1775   :  { %v3136_v31 = vsel %vm851_vm10, %v3135_v0, 2147483647  ;;  %v3261_v0 = vadd.f32 %v3260_v27, %v3259_v59  ;;  %v3267_v60 = vrot.slane %v3266_v40, 1 }
0x1776   :  { %v3211_v3 = vpop.permute.xlu1 %3210  ;;  %v3138_v41 = vshra.s32 %v3136_v31, 16  ;;  %v3137_v59 = vand.u32 65535, %v3136_v31 }
0x1777   :  { %v3219_v21 = vmul.f32 %v3211_v3, %v9962_v55  ;;  %v3478_v45 = vsel %vm844_vm7, %v3261_v0, %v3477_v52  ;;  %v3268_v13 = vadd.f32 %v3267_v60, %v3266_v40 }
0x1778   :  { %v3140_v15 = vcvt.s32.f32 %v3138_v41  ;;  %v3139_v35 = vcvt.s32.f32 %v3137_v59 }
0x1779   :  { %v3269_v6 = vsel %vm263_vm1, %v3219_v21, 0.0  ;;  %v3479_v20 = vsel %vm846_vm8, %v3268_v13, %v3478_v45  ;;  %v10658_v13 = vld [vmem:[#allocation2] sm:$0xff] }
0x177a   :  { %v3270_v29 = vrot.slane %v3269_v6, 4  ;;  %3141 = vmin.xlane.f32.xlu0 %v3140_v15  ;;  %11891 = vst [vmem:[#allocation37_spill] sm:$0xff] %v10658_v13 }
0x177c   :  { %v3271_v32 = vadd.f32 %v3270_v29, %v3269_v6  ;;  %v10621_v6 = vld [vmem:[%s11727_s10] ss:$0 sm:$0xff] }
0x177e   :  { %v3272_v19 = vrot.slane %v3271_v32, 2 }
0x1780   :  { %v3273_v12 = vadd.f32 %v3272_v19, %v3271_v32 }
0x1782   :  { %v3274_v50 = vrot.slane %v3273_v12, 1 }
0x1784   :  { %v3275_v3 = vadd.f32 %v3274_v50, %v3273_v12  ;;  %v10655_v50 = vld [vmem:[#allocation2 + $0x8] sm:$0xff] }
0x1785   :  { %11890 = vst [vmem:[#allocation38_spill] sm:$0xff] %v10655_v50 }
0x1786   :  { %v3480_v41 = vsel %vm848_vm9, %v3275_v3, %v3479_v20 }
0x1787   :  { %8413 = vmatmul.mubr.msk.f32.vlgmr.msra.gmra.mrb[18].mxu1 %vm263_vm1, %v3480_v41 }
0x1788   :  { %8767 = vmatpush3.bf16.msra.mxu1 %v9849_v11  ;;  %8430 = vmatprep.mubr.msk.f32.mxu1 %vm9566_vm0, %v11844_v17 }
0x1789   :  { %8774 = vmatprep.subr.bf16.mxu1 %v11845_v38 }
0x1807   :  { %v3142_v33 = vpop.xlane.xlu0 %3141 }
0x1808   :  { %vm3143_vm11 = vcmp.eq.f32.partialorder %v3140_v15, %v3142_v33 }
0x1809   :  { %v3144_v21 = vsel %vm3143_vm11, %v3139_v35, inf  ;;  %vm11896_vm11 = vmmov %vm11875_vm13 }
0x180a   :  { %3145 = vmin.xlane.f32.xlu1 %v3144_v21 }
0x185a   :  { %v3549_v42 = vpop.f32.mrb[18].mxu1 }
0x185b   :  { %v3550_v25 = vadd.f32 %v3549_v42, %v10513_v54  ;;  %v8414_v16 = vpop.f32.mrb[19].mxu1  ;;  %v3148_v54 = vcvt.f32.s32 %v3142_v33  ;;  %v10663_v42 = vld [vmem:[#allocation2 + $0x18] sm:$0xff] }
0x185c   :  { %11893 = vst [vmem:[#allocation40_spill] sm:$0xff] %v10663_v42  ;;  %v10666_v16 = vld [vmem:[#allocation2 + $0x10] sm:$0xff] }
0x185d   :  { %v3553_v1 = vadd.f32 %v10621_v6, %v3550_v25  ;;  %v3149_v15 = vshll.u32 %v3148_v54, 16  ;;  %11894 = vst [vmem:[#allocation42_spill] sm:$0xff] %v10666_v16 }
0x185f   :  { %9036 = vtanh.f32 %v3553_v1 }
0x1869   :  { %v9037_v27 = vpop.eup %9036 }
0x186a   :  { %8424 = vmatmul.mubr.msk.f32.vlgmr.msra.gmra.mrb[18].mxu0 %vm263_vm1, %v9037_v27 }
0x186b   :  { %8770 = vmatpush3.bf16.msra.mxu0 %v11876_v2  ;;  %8441 = vmatprep.mubr.msk.f32.mxu0 %vm9566_vm0, %v11844_v17 }
0x186c   :  { %8771 = vmatprep.subr.bf16.mxu0 %v11845_v38 }
0x186f   :  { %8773 = vmatpush3.bf16.msra.mxu0 %v11877_v36 }
0x1870   :  { %8780 = vmatprep.subr.bf16.mxu0 %v11845_v38 }
0x1897   :  { %v3146_v31 = vpop.xlane.xlu1 %3145 }
0x1898   :  { %v3147_v29 = vcvt.f32.s32 %v3146_v31 }
0x189a   :  { %v3150_v48 = vadd.s32 %v3149_v15, %v3147_v29 }
0x189c   :  { %vm3151_vm2 = vcmp.eq.s32.totalorder %v9987_v47, %v3150_v48  ;;  %v10634_v40 = vsel %vm3555_vm12, %v3150_v48, %v10439_v30  ;;  %vm11899_vm12 = vmmov %vm11896_vm11 }
0x189d   :  { %11889 = vst [vmem:[#allocation54_spill] sm:$0xff] %v10634_v40  ;;  %v10637_v39 = vsel %vm3151_vm2, 1.0, %v11844_v17  ;;  %vm11900_vm2 = vmmov %vm11896_vm11 }
0x189e   :  { %v3286_v32 = vrot.slane %v10637_v39, %v10010_v22  ;;  %v3279_v61 = vrot.slane %v10637_v39, %v9936_v26  ;;  %v3300_v37 = vrot.slane %v10637_v39, %v10016_v24  ;;  %v3293_v0 = vrot.slane %v10637_v39, %v10013_v23 }
0x189f   :  { %v3314_v30 = vrot.slane %v10637_v39, %v10026_v46  ;;  %v3307_v19 = vrot.slane %v10637_v39, %v10022_v34  ;;  %v3328_v57 = vrot.slane %v10637_v39, %v10034_v56  ;;  %v3321_v60 = vrot.slane %v10637_v39, %v10030_v51 }
0x18a0   :  { %3288 = vbcast.lane.b32.xlu1 %v3286_v32, 256  ;;  %3281 = vbcast.lane.b32.xlu0 %v3279_v61, 256 }
0x18a4   :  { %3302 = vbcast.lane.b32.xlu1 %v3300_v37, 256  ;;  %3295 = vbcast.lane.b32.xlu0 %v3293_v0, 256 }
0x18a8   :  { %3316 = vbcast.lane.b32.xlu1 %v3314_v30, 256  ;;  %3309 = vbcast.lane.b32.xlu0 %v3307_v19, 256  ;;  %v10671_v30 = vld [vmem:[#allocation2 + $0x28] sm:$0xff] }
0x18a9   :  { %11897 = vst [vmem:[#allocation39_spill] sm:$0xff] %v10671_v30 }
0x18ac   :  { %3330 = vbcast.lane.b32.xlu1 %v3328_v57, 256  ;;  %3323 = vbcast.lane.b32.xlu0 %v3321_v60, 256  ;;  %v10674_v57 = vld [vmem:[#allocation2 + $0x20] sm:$0xff] }
0x18ad   :  { %11898 = vst [vmem:[#allocation43_spill] sm:$0xff] %v10674_v57 }
0x1912   :  { %v3289_v12 = vpop.permute.xlu1 %3288  ;;  %v3282_v52 = vpop.permute.xlu0 %3281 }
0x1913   :  { %v3333_v45 = vmul.f32 %v10655_v50, %v3289_v12  ;;  %v3332_v3 = vmul.f32 %v10658_v13, %v3282_v52 }
0x1915   :  { %v3347_v20 = vsel %vm11875_vm13, %v3333_v45, 0.0  ;;  %v3340_v41 = vsel %vm11892_vm14, %v3332_v3, 0.0  ;;  %vm11902_vm13 = vmmov %vm11900_vm2 }
0x1916   :  { %v3348_v59 = vrot.slane %v3347_v20, 4  ;;  %v3341_v33 = vrot.slane %v3340_v41, 4  ;;  %v3303_v35 = vpop.permute.xlu1 %3302  ;;  %v3296_v21 = vpop.permute.xlu0 %3295  ;;  %vm11903_vm14 = vmmov %vm11900_vm2 }
0x1917   :  { %v3335_v25 = vmul.f32 %v10663_v42, %v3303_v35  ;;  %v3334_v1 = vmul.f32 %v10666_v16, %v3296_v21 }
0x1918   :  { %v3349_v27 = vadd.f32 %v3348_v59, %v3347_v20  ;;  %v3342_v54 = vadd.f32 %v3341_v33, %v3340_v41 }
0x1919   :  { %v3361_v31 = vsel %vm11895_vm15, %v3335_v25, 0.0  ;;  %v3354_v15 = vsel %vm11896_vm11, %v3334_v1, 0.0  ;;  %vm11904_vm15 = vmmov %vm11900_vm2 }
0x191a   :  { %v3350_v29 = vrot.slane %v3349_v27, 2  ;;  %v3343_v48 = vrot.slane %v3342_v54, 2  ;;  %v3362_v32 = vrot.slane %v3361_v31, 4  ;;  %v3355_v61 = vrot.slane %v3354_v15, 4  ;;  %v3317_v37 = vpop.permute.xlu1 %3316  ;;  %v3310_v0 = vpop.permute.xlu0 %3309 }
0x191b   :  { %v3337_v19 = vmul.f32 %v10671_v30, %v3317_v37  ;;  %v3336_v60 = vmul.f32 %v10674_v57, %v3310_v0  ;;  %v10679_v30 = vld [vmem:[#allocation2 + $0x38] sm:$0xff] }
0x191c   :  { %v3351_v12 = vadd.f32 %v3350_v29, %v3349_v27  ;;  %v3344_v52 = vadd.f32 %v3343_v48, %v3342_v54  ;;  %v3363_v45 = vadd.f32 %v3362_v32, %v3361_v31  ;;  %v3356_v3 = vadd.f32 %v3355_v61, %v3354_v15  ;;  %11901 = vst [vmem:[#allocation36_spill] sm:$0xff] %v10679_v30  ;;  %v10682_v27 = vld [vmem:[#allocation2 + $0x30] sm:$0xff] }
0x191d   :  { %v3375_v20 = vsel %vm11899_vm12, %v3337_v19, 0.0  ;;  %v3368_v41 = vsel %vm11900_vm2, %v3336_v60, 0.0 }
0x191e   :  { %v3352_v59 = vrot.slane %v3351_v12, 1  ;;  %v3345_v33 = vrot.slane %v3344_v52, 1  ;;  %v3364_v35 = vrot.slane %v3363_v45, 2  ;;  %v3357_v21 = vrot.slane %v3356_v3, 2  ;;  %v3331_v25 = vpop.permute.xlu1 %3330  ;;  %v3324_v1 = vpop.permute.xlu0 %3323 }
0x191f   :  { %v3376_v42 = vrot.slane %v3375_v20, 4  ;;  %v3369_v37 = vrot.slane %v3368_v41, 4  ;;  %v3339_v0 = vmul.f32 %v10679_v30, %v3331_v25  ;;  %v3338_v54 = vmul.f32 %v10682_v27, %v3324_v1 }
0x1920   :  { %v3353_v31 = vadd.f32 %v3352_v59, %v3351_v12  ;;  %v3365_v15 = vadd.f32 %v3364_v35, %v3363_v45  ;;  %v3358_v29 = vadd.f32 %v3357_v21, %v3356_v3  ;;  %v3346_v60 = vadd.f32 %v3345_v33, %v3344_v52 }
0x1921   :  { %v3377_v48 = vadd.f32 %v3376_v42, %v3375_v20  ;;  %v3370_v32 = vadd.f32 %v3369_v37, %v3368_v41  ;;  %v3389_v61 = vsel %vm11902_vm13, %v3339_v0, 0.0  ;;  %v3382_v19 = vsel %vm11903_vm14, %v3338_v54, 0.0 }
0x1922   :  { %v3366_v57 = vrot.slane %v3365_v15, 1  ;;  %v3359_v16 = vrot.slane %v3358_v29, 1  ;;  %v3390_v13 = vrot.slane %v3389_v61, 4  ;;  %v3383_v25 = vrot.slane %v3382_v19, 4 }
0x1923   :  { %v3378_v50 = vrot.slane %v3377_v48, 2  ;;  %v3371_v40 = vrot.slane %v3370_v32, 2  ;;  %v3642_v45 = vsel %vm836_vm3, %v3353_v31, %v3346_v60  ;;  %vm4445_vm13 = vcmp.eq.s32.totalorder %v9987_v47, 3 }
0x1924   :  { %v3360_v30 = vadd.f32 %v3359_v16, %v3358_v29  ;;  %v3391_v36 = vadd.f32 %v3390_v13, %v3389_v61  ;;  %v3384_v12 = vadd.f32 %v3383_v25, %v3382_v19  ;;  %v3367_v42 = vadd.f32 %v3366_v57, %v3365_v15 }
0x1925   :  { %v3379_v2 = vadd.f32 %v3378_v50, %v3377_v48  ;;  %v3372_v1 = vadd.f32 %v3371_v40, %v3370_v32  ;;  %v10704_v32 = vld [vmem:[%s11724_s7] ss:$0 sm:$0xff] }
0x1926   :  { %v3392_v3 = vrot.slane %v3391_v36, 2  ;;  %v3643_v20 = vsel %vm838_vm4, %v3360_v30, %v3642_v45  ;;  %v3385_v52 = vrot.slane %v3384_v12, 2 }
0x1927   :  { %v3380_v41 = vrot.slane %v3379_v2, 1  ;;  %v3373_v59 = vrot.slane %v3372_v1, 1  ;;  %v3644_v16 = vsel %vm840_vm5, %v3367_v42, %v3643_v20 }
0x1928   :  { %v3393_v33 = vadd.f32 %v3392_v3, %v3391_v36  ;;  %v3386_v21 = vadd.f32 %v3385_v52, %v3384_v12 }
0x1929   :  { %v3374_v35 = vadd.f32 %v3373_v59, %v3372_v1  ;;  %v3381_v37 = vadd.f32 %v3380_v41, %v3379_v2 }
0x192a   :  { %v3394_v0 = vrot.slane %v3393_v33, 1  ;;  %v3387_v13 = vrot.slane %v3386_v21, 1 }
0x192b   :  { %v3645_v40 = vsel %vm842_vm6, %v3374_v35, %v3644_v16 }
0x192c   :  { %v3395_v50 = vadd.f32 %v3394_v0, %v3393_v33  ;;  %v3388_v54 = vadd.f32 %v3387_v13, %v3386_v21  ;;  %v3646_v57 = vsel %vm844_vm7, %v3381_v37, %v3645_v40  ;;  %v10734_v37 = vld [vmem:[%s11729_s12] ss:$0 sm:$0xff] }
0x192e   :  { %v3647_v31 = vsel %vm846_vm8, %v3388_v54, %v3646_v57 }
0x192f   :  { %v3648_v30 = vsel %vm848_vm9, %v3395_v50, %v3647_v31 }
0x1930   :  { %8431 = vmatmul.mubr.msk.f32.vlgmr.msra.gmra.mrb[20].mxu1 %vm11904_vm15, %v3648_v30 }
0x1931   :  { %8776 = vmatpush3.bf16.msra.mxu1 %v9880_v44  ;;  %8452 = vmatprep.mubr.msk.f32.mxu1 %vm9566_vm0, %v11844_v17 }
0x1932   :  { %8777 = vmatprep.subr.bf16.mxu1 %v11845_v38 }
0x1935   :  { %8779 = vmatpush3.bf16.msra.mxu1 %v9894_v49 }
0x1936   :  { %8786 = vmatprep.subr.bf16.mxu1 %v11845_v38 }
0x193d   :  { %v3630_v2 = vpop.f32.mrb[18].mxu0 }
0x193e   :  { %v8425_v36 = vpop.f32.mrb[19].mxu0 }
0x1a03   :  { %v3717_v15 = vpop.f32.mrb[20].mxu1 }
0x1a04   :  { %v3718_v29 = vadd.f32 %v3717_v15, %v3630_v2  ;;  %v8432_v48 = vpop.f32.mrb[21].mxu1 }
0x1a06   :  { %v3721_v61 = vadd.f32 %v10704_v32, %v3718_v29 }
0x1a08   :  { %v8014_v19 = vmul.f32 -1.442695, %v3721_v61  ;;  %9038 = vtanh.f32 %v3721_v61 }
0x1a0a   :  { %9040 = vpow2.f32 %v8014_v19 }
0x1a12   :  { %v9039_v60 = vpop.eup %9038 }
0x1a13   :  { %3731 = vrot.lane.b32.xlu0 %v9039_v60, %s9568_s2 }
0x1a14   :  { %v9041_v25 = vpop.eup %9040 }
0x1a15   :  { %v3725_v1 = vadd.f32 1.0, %v9041_v25 }
0x1a17   :  { %9042 = vrcp.f32 %v3725_v1 }
0x1a21   :  { %v9043_v12 = vpop.eup %9042 }
0x1a22   :  { %3742 = vrot.lane.b32.xlu0 %v9043_v12, %s9568_s2  ;;  %v3729_v3 = vmul.f32 %v9043_v12, %v10495_v18 }
0x1a85   :  { %v3732_v45 = vpop.permute.xlu0 %3731 }
0x1a86   :  { %v3734_v42 = vmul.f32 %v9043_v12, %v3732_v45 }
0x1a88   :  { %3736 = vrot.lane.b32.xlu1 %v3734_v42, %s9569_s24 }
0x1a94   :  { %v3743_v52 = vpop.permute.xlu0 %3742 }
0x1afa   :  { %v3737_v20 = vpop.permute.xlu1 %3736 }
0x1afb   :  { %v10711_v41 = vadd.f32 %v3737_v20, %v3729_v3 }
0x1afd   :  { %9044 = vtanh.f32 %v10711_v41 }
0x1b07   :  { %v9045_v59 = vpop.eup %9044 }
0x1b08   :  { %v3745_v33 = vmul.f32 %v9045_v59, %v3743_v52 }
0x1b0a   :  { %3747 = vrot.lane.b32.xlu1 %v3745_v33, %s9570_s9 }
0x1b7c   :  { %v3748_v35 = vpop.permute.xlu1 %3747 }
0x1b7d   :  { %8442 = vmatmul.mubr.msk.f32.vlgmr.msra.gmra.mrb[20].mxu0 %vm263_vm1, %v3748_v35  ;;  %8453 = vmatmul.mubr.msk.f32.vlgmr.msra.gmra.mrb[22].mxu1 %vm263_vm1, %v3748_v35 }
0x1b7e   :  { %8782 = vmatpush3.bf16.msra.mxu0 %v10115_v53  ;;  %8463 = vmatprep.mubr.msk.f32.mxu0 %vm9566_vm0, %v11844_v17 }
0x1b7f   :  { %8783 = vmatprep.subr.bf16.mxu0 %v11845_v38  ;;  %8788 = vmatpush3.bf16.msra.mxu1 %v9842_v5 }
0x1b80   :  { %8789 = vmatprep.subr.bf16.mxu1 %v11845_v38  ;;  %8474 = vmatprep.mubr.msk.f32.mxu1 %vm9566_vm0, %v11844_v17 }
0x1b82   :  { %8785 = vmatpush3.bf16.msra.mxu0 %v10118_v9 }
0x1b83   :  { %8791 = vmatpush3.bf16.msra.mxu1 %v9845_v7  ;;  %8792 = vmatprep.subr.bf16.mxu0 %v11845_v38 }
0x1b84   :  { %8795 = vmatprep.subr.bf16.mxu1 %v11845_v38 }
0x1c50   :  { %v3817_v18 = vpop.f32.mrb[20].mxu0  ;;  %v10729_v21 = vpop.f32.mrb[22].mxu1 }
0x1c51   :  { %v3818_v0 = vadd.f32 %v10734_v37, %v3817_v18  ;;  %v8443_v16 = vpop.f32.mrb[21].mxu0  ;;  %v8454_v13 = vpop.f32.mrb[23].mxu1 }
0x1c53   :  { %v3822_v40 = vcombine.high %v3818_v0, %v3818_v0  ;;  %v3829_v50 = vrot.slane %v3818_v0, %v11857_v63 }
0x1c55   :  { %v3836_v54 = vrot.slane %v3822_v40, %v11857_v63  ;;  %v3837_v57 = vcombine.high %v3829_v50, %v3829_v50  ;;  %v3845_v31 = vrot.slane %v3829_v50, %v11857_v63  ;;  %v10762_v50 = vld [vmem:[%s11732_s15] ss:$0 sm:$0xff] }
0x1c56   :  { %11905 = vst [vmem:[#allocation55_spill] sm:$0xff] %v10762_v50 }
0x1c57   :  { %v3838_v30 = vcombine.high %v3836_v54, %v3836_v54  ;;  %v3852_v2 = vrot.slane %v3836_v54, %v11857_v63  ;;  %v3859_v36 = vrot.slane %v3837_v57, %v11857_v63  ;;  %v3867_v15 = vcombine.high %v3845_v31, %v3845_v31 }
0x1c58   :  { %v3874_v29 = vrot.slane %v3845_v31, %v9936_v26 }
0x1c59   :  { %v3866_v48 = vrot.slane %v3838_v30, %v11857_v63  ;;  %v3869_v61 = vcombine.high %v3859_v36, %v3859_v36  ;;  %v3878_v19 = vrot.slane %v3859_v36, %v9936_v26  ;;  %v3882_v60 = vrot.slane %v3867_v15, %v9936_v26 }
0x1c5a   :  { %v3890_v25 = vrot.slane %v3852_v2, %v9936_v26  ;;  %v3911_v1 = vadd.f32 %v3874_v29, %v11878_v8  ;;  %v3868_v3 = vcombine.high %v3852_v2, %v3852_v2 }
0x1c5b   :  { %v3870_v12 = vcombine.high %v3866_v48, %v3866_v48  ;;  %v3886_v45 = vrot.slane %v3869_v61, %v9936_v26  ;;  %v3894_v42 = vrot.slane %v3866_v48, %v9936_v26  ;;  %v3912_v20 = vadd.f32 %v3878_v19, %v11879_v4 }
0x1c5c   :  { %v3913_v59 = vadd.f32 %v3882_v60, %v11880_v58  ;;  %9046 = vtanh.f32 %v3911_v1  ;;  %v3915_v33 = vadd.f32 %v3890_v25, %v11881_v43  ;;  %v3898_v0 = vrot.slane %v3868_v3, %v9936_v26 }
0x1c5d   :  { %v3902_v52 = vrot.slane %v3870_v12, %v9936_v26  ;;  %v3916_v35 = vadd.f32 %v3894_v42, %v11884_v62  ;;  %9048 = vtanh.f32 %v3912_v20  ;;  %v3914_v18 = vadd.f32 %v3886_v45, %v11882_v14 }
0x1c5e   :  { %9050 = vtanh.f32 %v3913_v59  ;;  %v3917_v13 = vadd.f32 %v3898_v0, %v11883_v28 }
0x1c5f   :  { %v3918_v16 = vadd.f32 %v3902_v52, %v9962_v55  ;;  %9052 = vtanh.f32 %v3915_v33 }
0x1c60   :  { %9054 = vtanh.f32 %v3916_v35 }
0x1c61   :  { %9056 = vtanh.f32 %v3914_v18 }
0x1c62   :  { %9058 = vtanh.f32 %v3918_v16 }
0x1c63   :  { %9060 = vtanh.f32 %v3917_v13 }
0x1c66   :  { %v9047_v40 = vpop.eup %9046 }
0x1c67   :  { %v3927_v54 = vmul.f32 %v10762_v50, %v9047_v40  ;;  %v9049_v57 = vpop.eup %9048 }
0x1c68   :  { %v9051_v31 = vpop.eup %9050  ;;  %v3928_v2 = vmul.f32 %v10762_v50, %v9049_v57 }
0x1c69   :  { %v3935_v30 = vsel %vm263_vm1, %v3927_v54, 0.0  ;;  %v3929_v36 = vmul.f32 %v10762_v50, %v9051_v31  ;;  %v9053_v15 = vpop.eup %9052 }
0x1c6a   :  { %3936 = vadd.xlane.f32.xlu0 %v3935_v30  ;;  %v3938_v29 = vsel %vm263_vm1, %v3928_v2, 0.0  ;;  %v9055_v48 = vpop.eup %9054  ;;  %v3931_v25 = vmul.f32 %v10762_v50, %v9053_v15 }
0x1c6b   :  { %3939 = vadd.xlane.f32.xlu1 %v3938_v29  ;;  %v9057_v61 = vpop.eup %9056  ;;  %v3941_v19 = vsel %vm263_vm1, %v3929_v36, 0.0  ;;  %v3932_v60 = vmul.f32 %v10762_v50, %v9055_v48  ;;  %v3154_v36 = vsub.f32 1.0, %v10637_v39 }
0x1c6c   :  { %v9059_v1 = vpop.eup %9058  ;;  %v3947_v42 = vsel %vm263_vm1, %v3931_v25, 0.0  ;;  %v3930_v3 = vmul.f32 %v10762_v50, %v9057_v61 }
0x1c6d   :  { %v3950_v12 = vsel %vm263_vm1, %v3932_v60, 0.0  ;;  %v3934_v45 = vmul.f32 %v10762_v50, %v9059_v1  ;;  %v9061_v20 = vpop.eup %9060 }
0x1c6e   :  { %3942 = vadd.xlane.f32.xlu0 %v3941_v19  ;;  %v3944_v52 = vsel %vm263_vm1, %v3930_v3, 0.0  ;;  %v3933_v33 = vmul.f32 %v10762_v50, %v9061_v20 }
0x1c6f   :  { %3951 = vadd.xlane.f32.xlu1 %v3950_v12  ;;  %v3956_v59 = vsel %vm263_vm1, %v3934_v45, 0.0  ;;  %v11906_v12 = vld [vmem:[#allocation53_spill] sm:$0xff] }
0x1c70   :  { %v3953_v35 = vsel %vm263_vm1, %v3933_v33, 0.0  ;;  %v10792_v45 = vmul.f32 %v3154_v36, %v11906_v12 }
0x1c72   :  { %3948 = vadd.xlane.f32.xlu0 %v3947_v42  ;;  %11907 = vst [vmem:[#allocation53_spill] sm:$0xff] %v10792_v45  ;;  %vm3959_vm11 = vcmp.eq.f32.partialorder %v10792_v45, 0.0 }
0x1c73   :  { %3957 = vadd.xlane.f32.xlu1 %v3956_v59 }
0x1c76   :  { %3945 = vadd.xlane.f32.xlu0 %v3944_v52 }
0x1c7a   :  { %3954 = vadd.xlane.f32.xlu0 %v3953_v35 }
0x1cf7   :  { %v3937_v18 = vpop.xlane.xlu0 %3936 }
0x1cf8   :  { %v3940_v0 = vpop.xlane.xlu1 %3939  ;;  %v3971_v54 = vrot.slane %v3937_v18, %v11886_v10 }
0x1cf9   :  { %v3975_v13 = vrot.slane %v3940_v0, %v11886_v10 }
0x1cfb   :  { %v3943_v16 = vpop.xlane.xlu0 %3942  ;;  %v4000_v30 = vsel %vm836_vm3, %v3975_v13, %v3971_v54 }
0x1cfc   :  { %v3952_v57 = vpop.xlane.xlu1 %3951  ;;  %v3979_v31 = vrot.slane %v3943_v16, %v11886_v10 }
0x1cfd   :  { %v3991_v61 = vrot.slane %v3952_v57, %v11886_v10 }
0x1cfe   :  { %v4001_v29 = vsel %vm838_vm4, %v3979_v31, %v4000_v30 }
0x1cff   :  { %v3949_v40 = vpop.xlane.xlu0 %3948 }
0x1d00   :  { %v3987_v48 = vrot.slane %v3949_v40, %v11886_v10  ;;  %v3958_v19 = vpop.xlane.xlu1 %3957 }
0x1d01   :  { %v3999_v3 = vrot.slane %v3958_v19, %v11886_v10 }
0x1d03   :  { %v3946_v2 = vpop.xlane.xlu0 %3945 }
0x1d04   :  { %v3983_v15 = vrot.slane %v3946_v2, %v11886_v10 }
0x1d06   :  { %v4002_v60 = vsel %vm840_vm5, %v3983_v15, %v4001_v29 }
0x1d07   :  { %v4003_v25 = vsel %vm842_vm6, %v3987_v48, %v4002_v60  ;;  %v3955_v1 = vpop.xlane.xlu0 %3954 }
0x1d08   :  { %v3995_v42 = vrot.slane %v3955_v1, %v11886_v10  ;;  %v4004_v39 = vsel %vm844_vm7, %v3991_v61, %v4003_v25 }
0x1d0a   :  { %v4005_v20 = vsel %vm846_vm8, %v3995_v42, %v4004_v39 }
0x1d0b   :  { %v4006_v59 = vsel %vm848_vm9, %v3999_v3, %v4005_v20 }
0x1d0c   :  { %v4008_v52 = vsel %vm3959_vm11, -inf, %v4006_v59  ;;  %vm11914_vm11 = vmmov %vm11904_vm15 }
0x1d0d   :  { %v4009_v33 = vsel %vm851_vm10, %v4008_v52, -inf }
0x1d0e   :  { %4010 = vmax.xlane.f32.xlu0 %v4009_v33 }
0x1d9b   :  { %v4011_v35 = vpop.xlane.xlu0 %4010 }
0x1d9c   :  { %v4012_v18 = vsub.f32 %v4008_v52, %v4011_v35 }
0x1d9e   :  { %v4013_v0 = vmul.f32 1.442695, %v4012_v18 }
0x1da0   :  { %9062 = vpow2.f32 %v4013_v0 }
0x1daa   :  { %v9063_v16 = vpop.eup %9062 }
0x1dab   :  { %v4015_v13 = vsel %vm851_vm10, %v9063_v16, 0.0 }
0x1dac   :  { %4016 = vadd.xlane.f32.xlu1 %v4015_v13 }
0x1e39   :  { %v4017_v40 = vpop.xlane.xlu1 %4016 }
0x1e3a   :  { %9064 = vrcp.f32 %v4017_v40 }
0x1e44   :  { %v9065_v54 = vpop.eup %9064 }
0x1e45   :  { %v4019_v57 = vmul.f32 %v9065_v54, %v9063_v16 }
0x1e47   :  { %7903 = vst.msk [vmem:[#allocation19 + $0x18] sm:$0xff] %vm851_vm10, %v4019_v57  ;;  %v4056_v31 = vrot.slane %v4019_v57, %v10010_v22  ;;  %v4049_v30 = vrot.slane %v4019_v57, %v9936_v26  ;;  %v4084_v2 = vrot.slane %v4019_v57, %v10026_v46  ;;  %v4063_v36 = vrot.slane %v4019_v57, %v10013_v23 }
0x1e48   :  { %v4070_v15 = vrot.slane %v4019_v57, %v10016_v24  ;;  %v4077_v29 = vrot.slane %v4019_v57, %v10022_v34  ;;  %v4091_v48 = vrot.slane %v4019_v57, %v10030_v51  ;;  %v4020_v61 = vmul.f32 %v4019_v57, %v10792_v45 }
0x1e49   :  { %4058 = vbcast.lane.b32.xlu0 %v4056_v31, 256  ;;  %4051 = vbcast.lane.b32.xlu1 %v4049_v30, 256  ;;  %v4098_v60 = vrot.slane %v4019_v57, %v10034_v56 }
0x1e4a   :  { %v4021_v19 = vsel %vm851_vm10, %v4020_v61, -inf }
0x1e4d   :  { %4086 = vbcast.lane.b32.xlu0 %v4084_v2, 256  ;;  %4065 = vbcast.lane.b32.xlu1 %v4063_v36, 256 }
0x1e51   :  { %4072 = vbcast.lane.b32.xlu1 %v4070_v15, 256 }
0x1e55   :  { %4079 = vbcast.lane.b32.xlu1 %v4077_v29, 256 }
0x1e59   :  { %4093 = vbcast.lane.b32.xlu1 %v4091_v48, 256 }
0x1e6c   :  { %4022 = vmax.xlane.f32.xlu0 %v4021_v19 }
0x1e82   :  { %4100 = vbcast.lane.b32.xlu0 %v4098_v60, 256 }
0x1ebb   :  { %v4052_v25 = vpop.permute.xlu1 %4051  ;;  %v4059_v42 = vpop.permute.xlu0 %4058 }
0x1ebc   :  { %v4103_v3 = vmul.f32 %v4059_v42, %v11879_v4  ;;  %v4102_v20 = vmul.f32 %v4052_v25, %v11878_v8 }
0x1ebe   :  { %v4117_v35 = vsel %vm263_vm1, %v4103_v3, 0.0  ;;  %v4110_v18 = vsel %vm263_vm1, %v4102_v20, 0.0 }
0x1ebf   :  { %v4066_v1 = vpop.permute.xlu1 %4065  ;;  %v4087_v16 = vpop.permute.xlu0 %4086  ;;  %v4118_v54 = vrot.slane %v4117_v35, 4  ;;  %v4111_v57 = vrot.slane %v4110_v18, 4 }
0x1ec0   :  { %v4104_v59 = vmul.f32 %v4066_v1, %v11880_v58  ;;  %v4107_v2 = vmul.f32 %v4087_v16, %v11884_v62 }
0x1ec1   :  { %v4119_v48 = vadd.f32 %v4118_v54, %v4117_v35  ;;  %v4112_v19 = vadd.f32 %v4111_v57, %v4110_v18 }
0x1ec2   :  { %v4124_v13 = vsel %vm263_vm1, %v4104_v59, 0.0  ;;  %v4145_v25 = vsel %vm263_vm1, %v4107_v2, 0.0 }
0x1ec3   :  { %v4073_v12 = vpop.permute.xlu1 %4072  ;;  %v4125_v36 = vrot.slane %v4124_v13, 4  ;;  %v4120_v3 = vrot.slane %v4119_v48, 2  ;;  %v4113_v20 = vrot.slane %v4112_v19, 2  ;;  %v4146_v59 = vrot.slane %v4145_v25, 4 }
0x1ec4   :  { %v4105_v52 = vmul.f32 %v4073_v12, %v11882_v14 }
0x1ec5   :  { %v4126_v1 = vadd.f32 %v4125_v36, %v4124_v13  ;;  %v4121_v45 = vadd.f32 %v4120_v3, %v4119_v48  ;;  %v4114_v10 = vadd.f32 %v4113_v20, %v4112_v19  ;;  %v4147_v50 = vadd.f32 %v4146_v59, %v4145_v25 }
0x1ec6   :  { %v4131_v40 = vsel %vm263_vm1, %v4105_v52, 0.0 }
0x1ec7   :  { %v4080_v39 = vpop.permute.xlu1 %4079  ;;  %v4132_v15 = vrot.slane %v4131_v40, 4  ;;  %v4127_v52 = vrot.slane %v4126_v1, 2  ;;  %v4115_v2 = vrot.slane %v4114_v10, 1  ;;  %v4148_v36 = vrot.slane %v4147_v50, 2 }
0x1ec8   :  { %v4106_v33 = vmul.f32 %v4080_v39, %v11881_v43 }
0x1ec9   :  { %v4133_v12 = vadd.f32 %v4132_v15, %v4131_v40  ;;  %v4128_v18 = vadd.f32 %v4127_v52, %v4126_v1 }
0x1eca   :  { %v4138_v31 = vsel %vm263_vm1, %v4106_v33, 0.0 }
0x1ecb   :  { %v4094_v0 = vpop.permute.xlu1 %4093  ;;  %v4139_v29 = vrot.slane %v4138_v31, 4  ;;  %v4134_v33 = vrot.slane %v4133_v12, 2  ;;  %v4129_v62 = vrot.slane %v4128_v18, 1 }
0x1ecc   :  { %v4108_v30 = vmul.f32 %v4094_v0, %v11883_v28 }
0x1ecd   :  { %v4140_v42 = vadd.f32 %v4139_v29, %v4138_v31  ;;  %v4135_v54 = vadd.f32 %v4134_v33, %v4133_v12  ;;  %v4130_v20 = vadd.f32 %v4129_v62, %v4128_v18 }
0x1ece   :  { %v4152_v60 = vsel %vm263_vm1, %v4108_v30, 0.0  ;;  %v4122_v30 = vrot.slane %v4121_v45, 1 }
0x1ecf   :  { %v4153_v39 = vrot.slane %v4152_v60, 4  ;;  %v4141_v0 = vrot.slane %v4140_v42, 2  ;;  %v4136_v19 = vrot.slane %v4135_v54, 1 }
0x1ed0   :  { %v4123_v12 = vadd.f32 %v4122_v30, %v4121_v45 }
0x1ed1   :  { %v4154_v16 = vadd.f32 %v4153_v39, %v4152_v60  ;;  %v4142_v13 = vadd.f32 %v4141_v0, %v4140_v42  ;;  %v4116_v39 = vadd.f32 %v4115_v2, %v4114_v10  ;;  %v4149_v42 = vadd.f32 %v4148_v36, %v4147_v50 }
0x1ed2   :  { %v4137_v59 = vadd.f32 %v4136_v19, %v4135_v54 }
0x1ed3   :  { %v4155_v40 = vrot.slane %v4154_v16, 2  ;;  %v4143_v25 = vrot.slane %v4142_v13, 1 }
0x1ed5   :  { %v4156_v1 = vadd.f32 %v4155_v40, %v4154_v16  ;;  %v4144_v33 = vadd.f32 %v4143_v25, %v4142_v13 }
0x1ed7   :  { %v4157_v0 = vrot.slane %v4156_v1, 1 }
0x1ef9   :  { %v4023_v35 = vpop.xlane.xlu0 %4022 }
0x1efa   :  { %vm4024_vm12 = vcmp.eq.f32.partialorder %v4020_v61, %v4023_v35  ;;  %v4364_v35 = vsel %vm836_vm3, %v4123_v12, %v4116_v39 }
0x1efb   :  { %v4025_v57 = vsel %vm4024_vm12, %v9987_v47, 8  ;;  %vm11917_vm12 = vmmov %vm11914_vm11 }
0x1efc   :  { %v4026_v31 = vsel %vm851_vm10, %v4025_v57, 2147483647  ;;  %v4150_v57 = vrot.slane %v4149_v42, 1 }
0x1efd   :  { %v4101_v15 = vpop.permute.xlu0 %4100  ;;  %v4028_v29 = vshra.s32 %v4026_v31, 16  ;;  %v4027_v13 = vand.u32 65535, %v4026_v31  ;;  %v11909_v31 = vld [vmem:[#allocation35_spill] sm:$0xff] }
0x1efe   :  { %v4109_v48 = vmul.f32 %v4101_v15, %v9962_v55  ;;  %v4151_v50 = vadd.f32 %v4150_v57, %v4149_v42  ;;  %v11908_v42 = vld [vmem:[#allocation34_spill] sm:$0xff] }
0x1eff   :  { %v4030_v60 = vcvt.s32.f32 %v4028_v29  ;;  %v4365_v29 = vsel %vm838_vm4, %v4130_v20, %v4364_v35  ;;  %v4029_v36 = vcvt.s32.f32 %v4027_v13 }
0x1f00   :  { %v4159_v61 = vsel %vm263_vm1, %v4109_v48, 0.0  ;;  %v4366_v16 = vsel %vm840_vm5, %v4137_v59, %v4365_v29  ;;  %v4158_v48 = vadd.f32 %v4157_v0, %v4156_v1  ;;  %v11910_v59 = vld [vmem:[#allocation54_spill] sm:$0xff] }
0x1f01   :  { %v4160_v3 = vrot.slane %v4159_v61, 4  ;;  %4031 = vmin.xlane.f32.xlu1 %v4030_v60  ;;  %v4367_v10 = vsel %vm842_vm6, %v4144_v33, %v4366_v16 }
0x1f02   :  { %v4368_v62 = vsel %vm844_vm7, %v4151_v50, %v4367_v10 }
0x1f03   :  { %v4161_v52 = vadd.f32 %v4160_v3, %v4159_v61  ;;  %v4369_v18 = vsel %vm846_vm8, %v4158_v48, %v4368_v62  ;;  %v11913_v62 = vld [vmem:[#allocation37_spill] sm:$0xff] }
0x1f05   :  { %v4162_v15 = vrot.slane %v4161_v52, 2 }
0x1f07   :  { %v4163_v40 = vadd.f32 %v4162_v15, %v4161_v52 }
0x1f09   :  { %v4164_v45 = vrot.slane %v4163_v40, 1 }
0x1f0b   :  { %v4165_v30 = vadd.f32 %v4164_v45, %v4163_v40  ;;  %v11912_v45 = vld [vmem:[#allocation38_spill] sm:$0xff] }
0x1f0d   :  { %v4370_v54 = vsel %vm848_vm9, %v4165_v30, %v4369_v18 }
0x1f0e   :  { %8464 = vmatmul.mubr.msk.f32.vlgmr.msra.gmra.mrb[22].mxu0 %vm263_vm1, %v4370_v54 }
0x1f0f   :  { %8794 = vmatpush3.bf16.msra.mxu0 %v9849_v11  ;;  %8481 = vmatprep.mubr.msk.f32.mxu0 %vm9566_vm0, %v11844_v17 }
0x1f10   :  { %8801 = vmatprep.subr.bf16.mxu0 %v11845_v38 }
0x1f8e   :  { %v4032_v2 = vpop.xlane.xlu1 %4031 }
0x1f8f   :  { %vm4033_vm2 = vcmp.eq.f32.partialorder %v4030_v60, %v4032_v2  ;;  %v4038_v60 = vcvt.f32.s32 %v4032_v2 }
0x1f90   :  { %v4034_v19 = vsel %vm4033_vm2, %v4029_v36, inf  ;;  %vm11918_vm2 = vmmov %vm11914_vm11 }
0x1f91   :  { %4035 = vmin.xlane.f32.xlu0 %v4034_v19  ;;  %v4039_v3 = vshll.u32 %v4038_v60, 16 }
0x1fe1   :  { %v4439_v25 = vpop.f32.mrb[22].mxu0 }
0x1fe2   :  { %v4440_v1 = vadd.f32 %v4439_v25, %v10729_v21  ;;  %v8465_v61 = vpop.f32.mrb[23].mxu0 }
0x1fe4   :  { %v4443_v12 = vadd.f32 %v10621_v6, %v4440_v1  ;;  %v11915_v1 = vld [vmem:[#allocation42_spill] sm:$0xff] }
0x1fe6   :  { %9066 = vtanh.f32 %v4443_v12  ;;  %v11916_v12 = vld [vmem:[#allocation40_spill] sm:$0xff] }
0x1ff0   :  { %v9067_v39 = vpop.eup %9066 }
0x1ff1   :  { %8475 = vmatmul.mubr.msk.f32.vlgmr.msra.gmra.mrb[24].mxu1 %vm263_vm1, %v9067_v39 }
0x1ff2   :  { %8797 = vmatpush3.bf16.msra.mxu1 %v11908_v42  ;;  %8492 = vmatprep.mubr.msk.f32.mxu1 %vm9566_vm0, %v11844_v17 }
0x1ff3   :  { %8798 = vmatprep.subr.bf16.mxu1 %v11845_v38 }
0x1ff6   :  { %8800 = vmatpush3.bf16.msra.mxu1 %v11909_v31 }
0x1ff7   :  { %8807 = vmatprep.subr.bf16.mxu1 %v11845_v38 }
0x201e   :  { %v4036_v21 = vpop.xlane.xlu0 %4035 }
0x201f   :  { %v4037_v20 = vcvt.f32.s32 %v4036_v21 }
0x2021   :  { %v4040_v6 = vadd.s32 %v4039_v3, %v4037_v20 }
0x2023   :  { %vm4041_vm14 = vcmp.eq.s32.totalorder %v9987_v47, %v4040_v6  ;;  %v10855_v52 = vsel %vm4445_vm13, %v4040_v6, %v11910_v59  ;;  %vm11921_vm13 = vmmov %vm11918_vm2 }
0x2024   :  { %11911 = vst [vmem:[#allocation54_spill] sm:$0xff] %v10855_v52  ;;  %v10858_v33 = vsel %vm4041_vm14, 1.0, %v11844_v17  ;;  %vm11922_vm14 = vmmov %vm11918_vm2 }
0x2025   :  { %v4176_v0 = vrot.slane %v10858_v33, %v10010_v22  ;;  %v4169_v35 = vrot.slane %v10858_v33, %v9936_v26  ;;  %v4183_v57 = vrot.slane %v10858_v33, %v10013_v23  ;;  %v4190_v15 = vrot.slane %v10858_v33, %v10016_v24 }
0x2026   :  { %v4197_v29 = vrot.slane %v10858_v33, %v10022_v34  ;;  %v4204_v16 = vrot.slane %v10858_v33, %v10026_v46  ;;  %v4211_v40 = vrot.slane %v10858_v33, %v10030_v51  ;;  %v4218_v48 = vrot.slane %v10858_v33, %v10034_v56 }
0x2027   :  { %4178 = vbcast.lane.b32.xlu1 %v4176_v0, 256  ;;  %4171 = vbcast.lane.b32.xlu0 %v4169_v35, 256 }
0x202b   :  { %4185 = vbcast.lane.b32.xlu1 %v4183_v57, 256  ;;  %4192 = vbcast.lane.b32.xlu0 %v4190_v15, 256 }
0x202f   :  { %4199 = vbcast.lane.b32.xlu1 %v4197_v29, 256  ;;  %4206 = vbcast.lane.b32.xlu0 %v4204_v16, 256  ;;  %v11919_v29 = vld [vmem:[#allocation43_spill] sm:$0xff] }
0x2033   :  { %4213 = vbcast.lane.b32.xlu1 %v4211_v40, 256  ;;  %4220 = vbcast.lane.b32.xlu0 %v4218_v48, 256  ;;  %v11920_v40 = vld [vmem:[#allocation39_spill] sm:$0xff] }
0x2099   :  { %v4179_v10 = vpop.permute.xlu1 %4178  ;;  %v4172_v50 = vpop.permute.xlu0 %4171 }
0x209a   :  { %v4223_v30 = vmul.f32 %v11912_v45, %v4179_v10  ;;  %v4222_v18 = vmul.f32 %v11913_v62, %v4172_v50 }
0x209c   :  { %v4237_v54 = vsel %vm11904_vm15, %v4223_v30, 0.0  ;;  %v4230_v13 = vsel %vm11914_vm11, %v4222_v18, 0.0  ;;  %vm11924_vm15 = vmmov %vm11918_vm2 }
0x209d   :  { %v4238_v2 = vrot.slane %v4237_v54, 4  ;;  %v4231_v36 = vrot.slane %v4230_v13, 4  ;;  %v4186_v19 = vpop.permute.xlu1 %4185  ;;  %v4193_v25 = vpop.permute.xlu0 %4192  ;;  %vm11925_vm11 = vmmov %vm11918_vm2 }
0x209e   :  { %v4224_v61 = vmul.f32 %v11915_v1, %v4186_v19  ;;  %v4225_v39 = vmul.f32 %v11916_v12, %v4193_v25 }
0x209f   :  { %v4239_v60 = vadd.f32 %v4238_v2, %v4237_v54  ;;  %v4232_v21 = vadd.f32 %v4231_v36, %v4230_v13 }
0x20a0   :  { %v4244_v3 = vsel %vm11917_vm12, %v4224_v61, 0.0  ;;  %v4251_v20 = vsel %vm11918_vm2, %v4225_v39, 0.0  ;;  %v11923_v39 = vld [vmem:[#allocation36_spill] sm:$0xff]  ;;  %vm11926_vm12 = vmmov %vm11918_vm2 }
0x20a1   :  { %v4240_v6 = vrot.slane %v4239_v60, 2  ;;  %v4233_v59 = vrot.slane %v4232_v21, 2  ;;  %v4245_v0 = vrot.slane %v4244_v3, 4  ;;  %v4252_v35 = vrot.slane %v4251_v20, 4  ;;  %v4200_v57 = vpop.permute.xlu1 %4199  ;;  %v4207_v15 = vpop.permute.xlu0 %4206 }
0x20a2   :  { %v4226_v16 = vmul.f32 %v11919_v29, %v4200_v57  ;;  %v4227_v48 = vmul.f32 %v11920_v40, %v4207_v15 }
0x20a3   :  { %v4241_v10 = vadd.f32 %v4240_v6, %v4239_v60  ;;  %v4234_v50 = vadd.f32 %v4233_v59, %v4232_v21  ;;  %v4246_v45 = vadd.f32 %v4245_v0, %v4244_v3  ;;  %v4253_v30 = vadd.f32 %v4252_v35, %v4251_v20 }
0x20a4   :  { %v4258_v62 = vsel %vm11921_vm13, %v4226_v16, 0.0  ;;  %v4265_v18 = vsel %vm11922_vm14, %v4227_v48, 0.0 }
0x20a5   :  { %v4242_v54 = vrot.slane %v4241_v10, 1  ;;  %v4235_v13 = vrot.slane %v4234_v50, 1  ;;  %v4247_v2 = vrot.slane %v4246_v45, 2  ;;  %v4254_v36 = vrot.slane %v4253_v30, 2  ;;  %v4214_v19 = vpop.permute.xlu1 %4213  ;;  %v4221_v25 = vpop.permute.xlu0 %4220 }
0x20a6   :  { %v4259_v1 = vrot.slane %v4258_v62, 4  ;;  %v4266_v61 = vrot.slane %v4265_v18, 4  ;;  %v4228_v12 = vmul.f32 %v10682_v27, %v4214_v19  ;;  %v4229_v57 = vmul.f32 %v11923_v39, %v4221_v25 }
0x20a7   :  { %v4243_v60 = vadd.f32 %v4242_v54, %v4241_v10  ;;  %v4248_v21 = vadd.f32 %v4247_v2, %v4246_v45  ;;  %v4255_v3 = vadd.f32 %v4254_v36, %v4253_v30  ;;  %v4236_v35 = vadd.f32 %v4235_v13, %v4234_v50 }
0x20a8   :  { %v4260_v20 = vadd.f32 %v4259_v1, %v4258_v62  ;;  %v4267_v6 = vadd.f32 %v4266_v61, %v4265_v18  ;;  %v4272_v59 = vsel %vm11924_vm15, %v4228_v12, 0.0  ;;  %v4279_v0 = vsel %vm11925_vm11, %v4229_v57, 0.0 }
0x20a9   :  { %v4249_v15 = vrot.slane %v4248_v21, 1  ;;  %v4256_v29 = vrot.slane %v4255_v3, 1  ;;  %v4273_v16 = vrot.slane %v4272_v59, 4  ;;  %v4280_v52 = vrot.slane %v4279_v0, 4 }
0x20aa   :  { %v4261_v40 = vrot.slane %v4260_v20, 2  ;;  %v4268_v48 = vrot.slane %v4267_v6, 2  ;;  %v4533_v45 = vsel %vm836_vm3, %v4243_v60, %v4236_v35  ;;  %vm5336_vm15 = vcmp.eq.s32.totalorder %v9987_v47, 4 }
0x20ab   :  { %v4250_v31 = vadd.f32 %v4249_v15, %v4248_v21  ;;  %v4274_v27 = vadd.f32 %v4273_v16, %v4272_v59  ;;  %v4281_v10 = vadd.f32 %v4280_v52, %v4279_v0  ;;  %v4257_v30 = vadd.f32 %v4256_v29, %v4255_v3 }
0x20ac   :  { %v4262_v19 = vadd.f32 %v4261_v40, %v4260_v20  ;;  %v4269_v25 = vadd.f32 %v4268_v48, %v4267_v6 }
0x20ad   :  { %v4275_v62 = vrot.slane %v4274_v27, 2  ;;  %v4534_v18 = vsel %vm838_vm4, %v4250_v31, %v4533_v45  ;;  %v4282_v50 = vrot.slane %v4281_v10, 2 }
0x20ae   :  { %v4263_v54 = vrot.slane %v4262_v19, 1  ;;  %v4270_v2 = vrot.slane %v4269_v25, 1  ;;  %v4535_v12 = vsel %vm840_vm5, %v4257_v30, %v4534_v18 }
0x20af   :  { %v4276_v13 = vadd.f32 %v4275_v62, %v4274_v27  ;;  %v4283_v61 = vadd.f32 %v4282_v50, %v4281_v10 }
0x20b0   :  { %v4264_v36 = vadd.f32 %v4263_v54, %v4262_v19  ;;  %v4271_v1 = vadd.f32 %v4270_v2, %v4269_v25 }
0x20b1   :  { %v4277_v39 = vrot.slane %v4276_v13, 1  ;;  %v4284_v57 = vrot.slane %v4283_v61, 1 }
0x20b2   :  { %v4536_v21 = vsel %vm842_vm6, %v4264_v36, %v4535_v12 }
0x20b3   :  { %v4278_v52 = vadd.f32 %v4277_v39, %v4276_v13  ;;  %v4285_v20 = vadd.f32 %v4284_v57, %v4283_v61  ;;  %v4537_v60 = vsel %vm844_vm7, %v4271_v1, %v4536_v21 }
0x20b5   :  { %v4538_v3 = vsel %vm846_vm8, %v4278_v52, %v4537_v60 }
0x20b6   :  { %v4539_v31 = vsel %vm848_vm9, %v4285_v20, %v4538_v3 }
0x20b7   :  { %8482 = vmatmul.mubr.msk.f32.vlgmr.msra.gmra.mrb[24].mxu0 %vm11926_vm12, %v4539_v31 }
0x20b8   :  { %8803 = vmatpush3.bf16.msra.mxu0 %v9880_v44  ;;  %8503 = vmatprep.mubr.msk.f32.mxu0 %vm9566_vm0, %v11844_v17 }
0x20b9   :  { %8804 = vmatprep.subr.bf16.mxu0 %v11845_v38 }
0x20bc   :  { %8806 = vmatpush3.bf16.msra.mxu0 %v9894_v49 }
0x20bd   :  { %8813 = vmatprep.subr.bf16.mxu0 %v11845_v38 }
0x20c4   :  { %v4521_v6 = vpop.f32.mrb[24].mxu1 }
0x20c5   :  { %v8476_v59 = vpop.f32.mrb[25].mxu1 }
0x218a   :  { %v4608_v0 = vpop.f32.mrb[24].mxu0 }
0x218b   :  { %v4609_v35 = vadd.f32 %v4608_v0, %v4521_v6  ;;  %v8483_v15 = vpop.f32.mrb[25].mxu0 }
0x218d   :  { %v4612_v29 = vadd.f32 %v10704_v32, %v4609_v35 }
0x218f   :  { %v8021_v16 = vmul.f32 -1.442695, %v4612_v29  ;;  %9068 = vtanh.f32 %v4612_v29 }
0x2191   :  { %9070 = vpow2.f32 %v8021_v16 }
0x2199   :  { %v9069_v40 = vpop.eup %9068 }
0x219a   :  { %4622 = vrot.lane.b32.xlu1 %v9069_v40, %s9568_s2 }
0x219b   :  { %v9071_v48 = vpop.eup %9070 }
0x219c   :  { %v4616_v27 = vadd.f32 1.0, %v9071_v48 }
0x219e   :  { %9072 = vrcp.f32 %v4616_v27 }
0x21a8   :  { %v9073_v19 = vpop.eup %9072 }
0x21a9   :  { %4633 = vrot.lane.b32.xlu1 %v9073_v19, %s9568_s2  ;;  %v4620_v45 = vmul.f32 %v9073_v19, %v10711_v41 }
0x220c   :  { %v4623_v25 = vpop.permute.xlu1 %4622 }
0x220d   :  { %v4625_v10 = vmul.f32 %v9073_v19, %v4623_v25 }
0x220f   :  { %4627 = vrot.lane.b32.xlu0 %v4625_v10, %s9569_s24 }
0x221b   :  { %v4634_v18 = vpop.permute.xlu1 %4633 }
0x2281   :  { %v4628_v30 = vpop.permute.xlu0 %4627 }
0x2282   :  { %v10911_v32 = vadd.f32 %v4628_v30, %v4620_v45 }
0x2284   :  { %9074 = vtanh.f32 %v10911_v32 }
0x228e   :  { %v9075_v62 = vpop.eup %9074 }
0x228f   :  { %v4636_v54 = vmul.f32 %v9075_v62, %v4634_v18  ;;  %v11927_v18 = vld [vmem:[#allocation41_spill] sm:$0xff] }
0x2291   :  { %4638 = vrot.lane.b32.xlu0 %v4636_v54, %s9570_s9 }
0x2303   :  { %v4639_v2 = vpop.permute.xlu0 %4638 }
0x2304   :  { %8493 = vmatmul.mubr.msk.f32.vlgmr.msra.gmra.mrb[26].mxu1 %vm263_vm1, %v4639_v2  ;;  %8504 = vmatmul.mubr.msk.f32.vlgmr.msra.gmra.mrb[26].mxu0 %vm263_vm1, %v4639_v2 }
0x2305   :  { %8809 = vmatpush3.bf16.msra.mxu1 %v10115_v53  ;;  %8514 = vmatprep.mubr.msk.f32.mxu1 %vm9566_vm0, %v11844_v17 }
0x2306   :  { %8810 = vmatprep.subr.bf16.mxu1 %v11845_v38  ;;  %8815 = vmatpush3.bf16.msra.mxu0 %v9842_v5 }
0x2307   :  { %8816 = vmatprep.subr.bf16.mxu0 %v11845_v38  ;;  %8525 = vmatprep.mubr.msk.f32.mxu0 %vm9566_vm0, %v11844_v17 }
0x2309   :  { %8812 = vmatpush3.bf16.msra.mxu1 %v10118_v9 }
0x230a   :  { %8818 = vmatpush3.bf16.msra.mxu0 %v9845_v7  ;;  %8819 = vmatprep.subr.bf16.mxu1 %v11845_v38 }
0x230b   :  { %8822 = vmatprep.subr.bf16.mxu0 %v11845_v38 }
0x23d7   :  { %v4708_v41 = vpop.f32.mrb[26].mxu1  ;;  %v10929_v50 = vpop.f32.mrb[26].mxu0 }
0x23d8   :  { %v4709_v13 = vadd.f32 %v10734_v37, %v4708_v41  ;;  %v8494_v36 = vpop.f32.mrb[27].mxu1  ;;  %v8505_v1 = vpop.f32.mrb[27].mxu0 }
0x23da   :  { %v4713_v61 = vcombine.high %v4709_v13, %v4709_v13  ;;  %v4720_v12 = vrot.slane %v4709_v13, %v11857_v63  ;;  %v11928_v13 = vld [vmem:[#allocation55_spill] sm:$0xff] }
0x23dc   :  { %v4727_v39 = vrot.slane %v4713_v61, %v11857_v63  ;;  %v4728_v57 = vcombine.high %v4720_v12, %v4720_v12  ;;  %v4736_v21 = vrot.slane %v4720_v12, %v11857_v63 }
0x23de   :  { %v4729_v52 = vcombine.high %v4727_v39, %v4727_v39  ;;  %v4743_v20 = vrot.slane %v4727_v39, %v11857_v63  ;;  %v4750_v60 = vrot.slane %v4728_v57, %v11857_v63  ;;  %v4758_v3 = vcombine.high %v4736_v21, %v4736_v21 }
0x23df   :  { %v4765_v31 = vrot.slane %v4736_v21, %v9936_v26 }
0x23e0   :  { %v4759_v6 = vcombine.high %v4743_v20, %v4743_v20  ;;  %v4760_v37 = vcombine.high %v4750_v60, %v4750_v60  ;;  %v4769_v59 = vrot.slane %v4750_v60, %v9936_v26  ;;  %v4757_v0 = vrot.slane %v4729_v52, %v11857_v63 }
0x23e1   :  { %v4773_v35 = vrot.slane %v4758_v3, %v9936_v26  ;;  %v4781_v15 = vrot.slane %v4743_v20, %v9936_v26  ;;  %v4802_v29 = vadd.f32 %v4765_v31, %v11878_v8 }
0x23e2   :  { %v4777_v16 = vrot.slane %v4760_v37, %v9936_v26  ;;  %v4789_v40 = vrot.slane %v4759_v6, %v9936_v26  ;;  %v4803_v48 = vadd.f32 %v4769_v59, %v11879_v4  ;;  %v4761_v25 = vcombine.high %v4757_v0, %v4757_v0 }
0x23e3   :  { %v4804_v27 = vadd.f32 %v4773_v35, %v11880_v58  ;;  %9076 = vtanh.f32 %v4802_v29  ;;  %v4806_v19 = vadd.f32 %v4781_v15, %v11881_v43  ;;  %v4785_v10 = vrot.slane %v4757_v0, %v9936_v26 }
0x23e4   :  { %v4805_v45 = vadd.f32 %v4777_v16, %v11882_v14  ;;  %9078 = vtanh.f32 %v4803_v48  ;;  %v4808_v30 = vadd.f32 %v4789_v40, %v11883_v28  ;;  %v4793_v62 = vrot.slane %v4761_v25, %v9936_v26 }
0x23e5   :  { %9080 = vtanh.f32 %v4804_v27  ;;  %v4807_v54 = vadd.f32 %v4785_v10, %v11927_v18 }
0x23e6   :  { %9082 = vtanh.f32 %v4806_v19  ;;  %v4809_v41 = vadd.f32 %v4793_v62, %v9962_v55 }
0x23e7   :  { %9084 = vtanh.f32 %v4805_v45  ;;  %v11929_v45 = vld [vmem:[#allocation44_spill] sm:$0xff] }
0x23e8   :  { %9086 = vtanh.f32 %v4808_v30 }
0x23e9   :  { %9088 = vtanh.f32 %v4807_v54 }
0x23ea   :  { %9090 = vtanh.f32 %v4809_v41 }
0x23ed   :  { %v9077_v2 = vpop.eup %9076 }
0x23ee   :  { %v4818_v36 = vmul.f32 %v11928_v13, %v9077_v2  ;;  %v9079_v1 = vpop.eup %9078 }
0x23ef   :  { %v9081_v61 = vpop.eup %9080  ;;  %v4819_v39 = vmul.f32 %v11928_v13, %v9079_v1 }
0x23f0   :  { %v4826_v12 = vsel %vm263_vm1, %v4818_v36, 0.0  ;;  %v9083_v57 = vpop.eup %9082  ;;  %v4820_v52 = vmul.f32 %v11928_v13, %v9081_v61 }
0x23f1   :  { %4827 = vadd.xlane.f32.xlu1 %v4826_v12  ;;  %v4829_v21 = vsel %vm263_vm1, %v4819_v39, 0.0  ;;  %v9085_v20 = vpop.eup %9084  ;;  %v4822_v60 = vmul.f32 %v11928_v13, %v9083_v57  ;;  %v4044_v12 = vsub.f32 1.0, %v10858_v33 }
0x23f2   :  { %4830 = vadd.xlane.f32.xlu0 %v4829_v21  ;;  %v9087_v3 = vpop.eup %9086  ;;  %v4832_v37 = vsel %vm263_vm1, %v4820_v52, 0.0  ;;  %v4821_v59 = vmul.f32 %v11928_v13, %v9085_v20 }
0x23f3   :  { %v4838_v31 = vsel %vm263_vm1, %v4822_v60, 0.0  ;;  %v4824_v6 = vmul.f32 %v11928_v13, %v9087_v3  ;;  %v9089_v0 = vpop.eup %9088  ;;  %v11930_v3 = vld [vmem:[#allocation53_spill] sm:$0xff] }
0x23f4   :  { %v4835_v15 = vsel %vm263_vm1, %v4821_v59, 0.0  ;;  %v4823_v29 = vmul.f32 %v11928_v13, %v9089_v0  ;;  %v9091_v16 = vpop.eup %9090 }
0x23f5   :  { %4839 = vadd.xlane.f32.xlu1 %v4838_v31  ;;  %v4844_v35 = vsel %vm263_vm1, %v4824_v6, 0.0  ;;  %v4825_v48 = vmul.f32 %v11928_v13, %v9091_v16  ;;  %v10983_v31 = vmul.f32 %v4044_v12, %v11930_v3 }
0x23f6   :  { %4833 = vadd.xlane.f32.xlu0 %v4832_v37  ;;  %v4841_v40 = vsel %vm263_vm1, %v4823_v29, 0.0 }
0x23f7   :  { %v4847_v27 = vsel %vm263_vm1, %v4825_v48, 0.0  ;;  %vm4850_vm2 = vcmp.eq.f32.partialorder %v10983_v31, 0.0 }
0x23f9   :  { %4845 = vadd.xlane.f32.xlu1 %v4844_v35 }
0x23fa   :  { %4836 = vadd.xlane.f32.xlu0 %v4835_v15 }
0x23fe   :  { %4842 = vadd.xlane.f32.xlu0 %v4841_v40 }
0x2402   :  { %4848 = vadd.xlane.f32.xlu0 %v4847_v27 }
0x247e   :  { %v4828_v25 = vpop.xlane.xlu1 %4827 }
0x247f   :  { %v4831_v19 = vpop.xlane.xlu0 %4830  ;;  %v4862_v54 = vrot.slane %v4828_v25, %v11929_v45 }
0x2480   :  { %v4866_v30 = vrot.slane %v4831_v19, %v11929_v45 }
0x2482   :  { %v4840_v2 = vpop.xlane.xlu1 %4839  ;;  %v4891_v36 = vsel %vm836_vm3, %v4866_v30, %v4862_v54 }
0x2483   :  { %v4834_v10 = vpop.xlane.xlu0 %4833  ;;  %v4878_v39 = vrot.slane %v4840_v2, %v11929_v45 }
0x2484   :  { %v4870_v62 = vrot.slane %v4834_v10, %v11929_v45 }
0x2486   :  { %v4892_v13 = vsel %vm838_vm4, %v4870_v62, %v4891_v36  ;;  %v4846_v21 = vpop.xlane.xlu1 %4845 }
0x2487   :  { %v4837_v41 = vpop.xlane.xlu0 %4836  ;;  %v4886_v6 = vrot.slane %v4846_v21, %v11929_v45 }
0x2488   :  { %v4874_v1 = vrot.slane %v4837_v41, %v11929_v45 }
0x248a   :  { %v4893_v61 = vsel %vm840_vm5, %v4874_v1, %v4892_v13 }
0x248b   :  { %v4843_v57 = vpop.xlane.xlu0 %4842  ;;  %v4894_v20 = vsel %vm842_vm6, %v4878_v39, %v4893_v61 }
0x248c   :  { %v4882_v52 = vrot.slane %v4843_v57, %v11929_v45 }
0x248e   :  { %v4895_v60 = vsel %vm844_vm7, %v4882_v52, %v4894_v20 }
0x248f   :  { %v4849_v37 = vpop.xlane.xlu0 %4848  ;;  %v4896_v33 = vsel %vm846_vm8, %v4886_v6, %v4895_v60 }
0x2490   :  { %v4890_v59 = vrot.slane %v4849_v37, %v11929_v45 }
0x2492   :  { %v4897_v0 = vsel %vm848_vm9, %v4890_v59, %v4896_v33 }
0x2493   :  { %v4899_v35 = vsel %vm4850_vm2, -inf, %v4897_v0  ;;  %vm11937_vm2 = vmmov %vm11926_vm12 }
0x2494   :  { %v4900_v15 = vsel %vm851_vm10, %v4899_v35, -inf }
0x2495   :  { %4901 = vmax.xlane.f32.xlu1 %v4900_v15 }
0x2522   :  { %v4902_v29 = vpop.xlane.xlu1 %4901 }
0x2523   :  { %v4903_v16 = vsub.f32 %v4899_v35, %v4902_v29 }
0x2525   :  { %v4904_v40 = vmul.f32 1.442695, %v4903_v16 }
0x2527   :  { %9092 = vpow2.f32 %v4904_v40 }
0x2531   :  { %v9093_v48 = vpop.eup %9092 }
0x2532   :  { %v4906_v27 = vsel %vm851_vm10, %v9093_v48, 0.0 }
0x2533   :  { %4907 = vadd.xlane.f32.xlu0 %v4906_v27 }
0x25c0   :  { %v4908_v19 = vpop.xlane.xlu0 %4907 }
0x25c1   :  { %9094 = vrcp.f32 %v4908_v19 }
0x25cb   :  { %v9095_v25 = vpop.eup %9094 }
0x25cc   :  { %v4910_v10 = vmul.f32 %v9095_v25, %v9093_v48 }
0x25ce   :  { %7904 = vst.msk [vmem:[#allocation19 + $0x20] sm:$0xff] %vm851_vm10, %v4910_v10  ;;  %v4947_v30 = vrot.slane %v4910_v10, %v10010_v22  ;;  %v4940_v62 = vrot.slane %v4910_v10, %v9936_v26  ;;  %v4954_v54 = vrot.slane %v4910_v10, %v10013_v23  ;;  %v4968_v2 = vrot.slane %v4910_v10, %v10022_v34 }
0x25cf   :  { %v4961_v41 = vrot.slane %v4910_v10, %v10016_v24  ;;  %v4982_v36 = vrot.slane %v4910_v10, %v10030_v51  ;;  %v4975_v1 = vrot.slane %v4910_v10, %v10026_v46  ;;  %v4911_v13 = vmul.f32 %v4910_v10, %v10983_v31 }
0x25d0   :  { %4949 = vbcast.lane.b32.xlu1 %v4947_v30, 256  ;;  %4942 = vbcast.lane.b32.xlu0 %v4940_v62, 256  ;;  %v4989_v12 = vrot.slane %v4910_v10, %v10034_v56 }
0x25d1   :  { %v4912_v61 = vsel %vm851_vm10, %v4911_v13, -inf }
0x25d4   :  { %4956 = vbcast.lane.b32.xlu1 %v4954_v54, 256  ;;  %4970 = vbcast.lane.b32.xlu0 %v4968_v2, 256 }
0x25d8   :  { %4963 = vbcast.lane.b32.xlu1 %v4961_v41, 256  ;;  %4984 = vbcast.lane.b32.xlu0 %v4982_v36, 256 }
0x25dc   :  { %4977 = vbcast.lane.b32.xlu1 %v4975_v1, 256 }
0x2600   :  { %4913 = vmax.xlane.f32.xlu1 %v4912_v61 }
0x2611   :  { %4991 = vbcast.lane.b32.xlu1 %v4989_v12, 256 }
0x2642   :  { %v4950_v39 = vpop.permute.xlu1 %4949  ;;  %v4943_v21 = vpop.permute.xlu0 %4942 }
0x2643   :  { %v4994_v20 = vmul.f32 %v4950_v39, %v11879_v4  ;;  %v4993_v60 = vmul.f32 %v4943_v21, %v11878_v8 }
0x2645   :  { %v5008_v33 = vsel %vm263_vm1, %v4994_v20, 0.0  ;;  %v5001_v0 = vsel %vm263_vm1, %v4993_v60, 0.0 }
0x2646   :  { %v4957_v57 = vpop.permute.xlu1 %4956  ;;  %v4971_v6 = vpop.permute.xlu0 %4970  ;;  %v5009_v16 = vrot.slane %v5008_v33, 4  ;;  %v5002_v40 = vrot.slane %v5001_v0, 4 }
0x2647   :  { %v4995_v3 = vmul.f32 %v4957_v57, %v11880_v58  ;;  %v4997_v48 = vmul.f32 %v4971_v6, %v11881_v43 }
0x2648   :  { %v5010_v30 = vadd.f32 %v5009_v16, %v5008_v33  ;;  %v5003_v62 = vadd.f32 %v5002_v40, %v5001_v0 }
0x2649   :  { %v5015_v35 = vsel %vm263_vm1, %v4995_v3, 0.0  ;;  %v5029_v54 = vsel %vm263_vm1, %v4997_v48, 0.0 }
0x264a   :  { %v4964_v52 = vpop.permute.xlu1 %4963  ;;  %v5016_v27 = vrot.slane %v5015_v35, 4  ;;  %v4985_v19 = vpop.permute.xlu0 %4984  ;;  %v5030_v61 = vrot.slane %v5029_v54, 4  ;;  %v5011_v12 = vrot.slane %v5010_v30, 2  ;;  %v5004_v39 = vrot.slane %v5003_v62, 2 }
0x264b   :  { %v4996_v37 = vmul.f32 %v4964_v52, %v11882_v14  ;;  %v4999_v2 = vmul.f32 %v4985_v19, %v11883_v28 }
0x264c   :  { %v5017_v41 = vadd.f32 %v5016_v27, %v5015_v35  ;;  %v5031_v60 = vadd.f32 %v5030_v61, %v5029_v54  ;;  %v5012_v6 = vadd.f32 %v5011_v12, %v5010_v30 }
0x264d   :  { %v5022_v15 = vsel %vm263_vm1, %v4996_v37, 0.0  ;;  %v5043_v57 = vsel %vm263_vm1, %v4999_v2, 0.0  ;;  %v5005_v37 = vadd.f32 %v5004_v39, %v5003_v62 }
0x264e   :  { %v4978_v59 = vpop.permute.xlu1 %4977  ;;  %v5023_v25 = vrot.slane %v5022_v15, 4  ;;  %v5018_v21 = vrot.slane %v5017_v41, 2  ;;  %v5044_v3 = vrot.slane %v5043_v57, 4  ;;  %v5032_v16 = vrot.slane %v5031_v60, 2 }
0x264f   :  { %v4998_v29 = vmul.f32 %v4978_v59, %v11927_v18  ;;  %v5006_v40 = vrot.slane %v5005_v37, 1 }
0x2650   :  { %v5024_v36 = vadd.f32 %v5023_v25, %v5022_v15  ;;  %v5019_v59 = vadd.f32 %v5018_v21, %v5017_v41  ;;  %v5045_v35 = vadd.f32 %v5044_v3, %v5043_v57  ;;  %v5013_v15 = vrot.slane %v5012_v6, 1 }
0x2651   :  { %v5036_v10 = vsel %vm263_vm1, %v4998_v29, 0.0  ;;  %v5033_v30 = vadd.f32 %v5032_v16, %v5031_v60 }
0x2652   :  { %v5037_v1 = vrot.slane %v5036_v10, 4  ;;  %v5025_v52 = vrot.slane %v5024_v36, 2  ;;  %v5020_v27 = vrot.slane %v5019_v59, 1  ;;  %v5046_v62 = vrot.slane %v5045_v35, 2 }
0x2654   :  { %v5038_v20 = vadd.f32 %v5037_v1, %v5036_v10  ;;  %v5026_v33 = vadd.f32 %v5025_v52, %v5024_v36  ;;  %v5014_v36 = vadd.f32 %v5013_v15, %v5012_v6  ;;  %v5007_v1 = vadd.f32 %v5006_v40, %v5005_v37 }
0x2655   :  { %v5021_v12 = vadd.f32 %v5020_v27, %v5019_v59  ;;  %v5034_v52 = vrot.slane %v5033_v30, 1  ;;  %v5047_v3 = vadd.f32 %v5046_v62, %v5045_v35 }
0x2656   :  { %v5039_v0 = vrot.slane %v5038_v20, 2  ;;  %v5027_v25 = vrot.slane %v5026_v33, 1 }
0x2657   :  { %v5035_v37 = vadd.f32 %v5034_v52, %v5033_v30  ;;  %v5048_v15 = vrot.slane %v5047_v3, 1 }
0x2658   :  { %v5040_v10 = vadd.f32 %v5039_v0, %v5038_v20  ;;  %v5028_v39 = vadd.f32 %v5027_v25, %v5026_v33  ;;  %v5255_v20 = vsel %vm836_vm3, %v5014_v36, %v5007_v1 }
0x2659   :  { %v5256_v60 = vsel %vm838_vm4, %v5021_v12, %v5255_v20  ;;  %v5049_v27 = vadd.f32 %v5048_v15, %v5047_v3  ;;  %v11037_v12 = vld [vmem:[%s11727_s10] ss:$0 sm:$0xff] }
0x265a   :  { %v5041_v57 = vrot.slane %v5040_v10, 1  ;;  %11931 = vst [vmem:[#allocation38_spill] sm:$0xff] %v11037_v12  ;;  %v11933_v3 = vld [vmem:[#allocation54_spill] sm:$0xff] }
0x265c   :  { %v5042_v16 = vadd.f32 %v5041_v57, %v5040_v10 }
0x268d   :  { %v4914_v29 = vpop.xlane.xlu1 %4913 }
0x268e   :  { %vm4915_vm13 = vcmp.eq.f32.partialorder %v4911_v13, %v4914_v29  ;;  %v5257_v29 = vsel %vm840_vm5, %v5028_v39, %v5256_v60 }
0x268f   :  { %v4916_v48 = vsel %vm4915_vm13, %v9987_v47, 8  ;;  %v5258_v40 = vsel %vm842_vm6, %v5035_v37, %v5257_v29  ;;  %vm11940_vm13 = vmmov %vm11937_vm2 }
0x2690   :  { %v4917_v19 = vsel %vm851_vm10, %v4916_v48, 2147483647  ;;  %v5259_v48 = vsel %vm844_vm7, %v5042_v16, %v5258_v40 }
0x2691   :  { %v4992_v54 = vpop.permute.xlu1 %4991  ;;  %v4919_v2 = vshra.s32 %v4917_v19, 16  ;;  %v5260_v35 = vsel %vm846_vm8, %v5049_v27, %v5259_v48  ;;  %v4918_v10 = vand.u32 65535, %v4917_v19  ;;  %v11071_v27 = vld [vmem:[#allocation2 + $0x8] sm:$0xff] }
0x2692   :  { %v5000_v41 = vmul.f32 %v4992_v54, %v9962_v55  ;;  %11935 = vst [vmem:[#allocation42_spill] sm:$0xff] %v11071_v27 }
0x2693   :  { %v4921_v61 = vcvt.s32.f32 %v4919_v2  ;;  %v4920_v30 = vcvt.s32.f32 %v4918_v10 }
0x2694   :  { %v5050_v13 = vsel %vm263_vm1, %v5000_v41, 0.0 }
0x2695   :  { %v5051_v21 = vrot.slane %v5050_v13, 4  ;;  %4922 = vmin.xlane.f32.xlu0 %v4921_v61 }
0x2697   :  { %v5052_v0 = vadd.f32 %v5051_v21, %v5050_v13 }
0x2699   :  { %v5053_v6 = vrot.slane %v5052_v0, 2 }
0x269b   :  { %v5054_v59 = vadd.f32 %v5053_v6, %v5052_v0 }
0x269d   :  { %v5055_v33 = vrot.slane %v5054_v59, 1 }
0x269f   :  { %v5056_v25 = vadd.f32 %v5055_v33, %v5054_v59 }
0x26a1   :  { %v5261_v54 = vsel %vm848_vm9, %v5056_v25, %v5260_v35  ;;  %v11074_v35 = vld [vmem:[#allocation2] sm:$0xff] }
0x26a2   :  { %8515 = vmatmul.mubr.msk.f32.vlgmr.msra.gmra.mrb[28].mxu1 %vm263_vm1, %v5261_v54  ;;  %11936 = vst [vmem:[#allocation40_spill] sm:$0xff] %v11074_v35 }
0x26a3   :  { %8821 = vmatpush3.bf16.msra.mxu1 %v9849_v11  ;;  %8532 = vmatprep.mubr.msk.f32.mxu1 %vm9566_vm0, %v11844_v17 }
0x26a4   :  { %8828 = vmatprep.subr.bf16.mxu1 %v11845_v38 }
0x2722   :  { %v4923_v2 = vpop.xlane.xlu0 %4922 }
0x2723   :  { %vm4924_vm14 = vcmp.eq.f32.partialorder %v4921_v61, %v4923_v2  ;;  %v4929_v19 = vcvt.f32.s32 %v4923_v2 }
0x2724   :  { %v4925_v62 = vsel %vm4924_vm14, %v4920_v30, inf  ;;  %vm11941_vm14 = vmmov %vm11937_vm2 }
0x2725   :  { %4926 = vmin.xlane.f32.xlu1 %v4925_v62  ;;  %v4930_v57 = vshll.u32 %v4929_v19, 16 }
0x2775   :  { %v5330_v41 = vpop.f32.mrb[28].mxu1 }
0x2776   :  { %v5331_v36 = vadd.f32 %v5330_v41, %v10929_v50  ;;  %v8516_v1 = vpop.f32.mrb[29].mxu1  ;;  %v11932_v50 = vld [vmem:[#allocation35_spill] sm:$0xff] }
0x2777   :  { %v11079_v1 = vld [vmem:[#allocation2 + $0x18] sm:$0xff] }
0x2778   :  { %v5334_v13 = vadd.f32 %v11037_v12, %v5331_v36  ;;  %11938 = vst [vmem:[#allocation43_spill] sm:$0xff] %v11079_v1 }
0x277a   :  { %9096 = vtanh.f32 %v5334_v13 }
0x2784   :  { %v9097_v39 = vpop.eup %9096 }
0x2785   :  { %8526 = vmatmul.mubr.msk.f32.vlgmr.msra.gmra.mrb[28].mxu0 %vm263_vm1, %v9097_v39  ;;  %v11082_v39 = vld [vmem:[#allocation2 + $0x10] sm:$0xff] }
0x2786   :  { %8824 = vmatpush3.bf16.msra.mxu0 %v11908_v42  ;;  %8543 = vmatprep.mubr.msk.f32.mxu0 %vm9566_vm0, %v11844_v17  ;;  %11939 = vst [vmem:[#allocation39_spill] sm:$0xff] %v11082_v39 }
0x2787   :  { %8825 = vmatprep.subr.bf16.mxu0 %v11845_v38 }
0x278a   :  { %8827 = vmatpush3.bf16.msra.mxu0 %v11932_v50 }
0x278b   :  { %8834 = vmatprep.subr.bf16.mxu0 %v11845_v38 }
0x27b2   :  { %v4927_v61 = vpop.xlane.xlu1 %4926 }
0x27b3   :  { %v4928_v21 = vcvt.f32.s32 %v4927_v61 }
0x27b5   :  { %v4931_v52 = vadd.s32 %v4930_v57, %v4928_v21 }
0x27b7   :  { %vm4932_vm11 = vcmp.eq.s32.totalorder %v9987_v47, %v4931_v52  ;;  %v11050_v20 = vsel %vm5336_vm15, %v4931_v52, %v11933_v3  ;;  %vm11944_vm15 = vmmov %vm11937_vm2 }
0x27b8   :  { %11934 = vst [vmem:[#allocation37_spill] sm:$0xff] %v11050_v20  ;;  %v11053_v0 = vsel %vm4932_vm11, 1.0, %v11844_v17  ;;  %vm11945_vm11 = vmmov %vm11937_vm2 }
0x27b9   :  { %v5067_v60 = vrot.slane %v11053_v0, %v10010_v22  ;;  %v5060_v29 = vrot.slane %v11053_v0, %v9936_v26  ;;  %v5081_v16 = vrot.slane %v11053_v0, %v10016_v24  ;;  %v5074_v6 = vrot.slane %v11053_v0, %v10013_v23 }
0x27ba   :  { %v5095_v37 = vrot.slane %v11053_v0, %v10026_v46  ;;  %v5088_v15 = vrot.slane %v11053_v0, %v10022_v34  ;;  %v5109_v59 = vrot.slane %v11053_v0, %v10034_v56  ;;  %v5102_v40 = vrot.slane %v11053_v0, %v10030_v51 }
0x27bb   :  { %5069 = vbcast.lane.b32.xlu1 %v5067_v60, 256  ;;  %5062 = vbcast.lane.b32.xlu0 %v5060_v29, 256 }
0x27bf   :  { %5083 = vbcast.lane.b32.xlu1 %v5081_v16, 256  ;;  %5076 = vbcast.lane.b32.xlu0 %v5074_v6, 256 }
0x27c3   :  { %5097 = vbcast.lane.b32.xlu1 %v5095_v37, 256  ;;  %5090 = vbcast.lane.b32.xlu0 %v5088_v15, 256  ;;  %v11087_v15 = vld [vmem:[#allocation2 + $0x28] sm:$0xff] }
0x27c4   :  { %11942 = vst [vmem:[#allocation36_spill] sm:$0xff] %v11087_v15 }
0x27c7   :  { %5111 = vbcast.lane.b32.xlu1 %v5109_v59, 256  ;;  %5104 = vbcast.lane.b32.xlu0 %v5102_v40, 256  ;;  %v11090_v40 = vld [vmem:[#allocation2 + $0x20] sm:$0xff] }
0x27c8   :  { %11943 = vst [vmem:[#allocation41_spill] sm:$0xff] %v11090_v40 }
0x282d   :  { %v5070_v33 = vpop.permute.xlu1 %5069  ;;  %v5063_v48 = vpop.permute.xlu0 %5062 }
0x282e   :  { %v5114_v25 = vmul.f32 %v11071_v27, %v5070_v33  ;;  %v5113_v54 = vmul.f32 %v11074_v35, %v5063_v48 }
0x2830   :  { %v5128_v10 = vsel %vm11926_vm12, %v5114_v25, 0.0  ;;  %v5121_v2 = vsel %vm11937_vm2, %v5113_v54, 0.0  ;;  %vm11947_vm12 = vmmov %vm11937_vm2 }
0x2831   :  { %v5129_v30 = vrot.slane %v5128_v10, 4  ;;  %v5122_v62 = vrot.slane %v5121_v2, 4  ;;  %v5084_v41 = vpop.permute.xlu1 %5083  ;;  %v5077_v36 = vpop.permute.xlu0 %5076 }
0x2832   :  { %v5116_v13 = vmul.f32 %v11079_v1, %v5084_v41  ;;  %v5115_v19 = vmul.f32 %v11082_v39, %v5077_v36 }
0x2833   :  { %v5130_v61 = vadd.f32 %v5129_v30, %v5128_v10  ;;  %v5123_v57 = vadd.f32 %v5122_v62, %v5121_v2 }
0x2834   :  { %v5142_v21 = vsel %vm11940_vm13, %v5116_v13, 0.0  ;;  %v5135_v52 = vsel %vm11941_vm14, %v5115_v19, 0.0  ;;  %vm11948_vm13 = vmmov %vm11937_vm2 }
0x2835   :  { %v5131_v3 = vrot.slane %v5130_v61, 2  ;;  %v5124_v60 = vrot.slane %v5123_v57, 2  ;;  %v5143_v29 = vrot.slane %v5142_v21, 4  ;;  %v5136_v16 = vrot.slane %v5135_v52, 4  ;;  %v5098_v6 = vpop.permute.xlu1 %5097  ;;  %v5091_v37 = vpop.permute.xlu0 %5090 }
0x2836   :  { %v5118_v59 = vmul.f32 %v11087_v15, %v5098_v6  ;;  %v5117_v33 = vmul.f32 %v11090_v40, %v5091_v37  ;;  %v11095_v15 = vld [vmem:[#allocation2 + $0x38] sm:$0xff] }
0x2837   :  { %v5132_v48 = vadd.f32 %v5131_v3, %v5130_v61  ;;  %v5125_v25 = vadd.f32 %v5124_v60, %v5123_v57  ;;  %v5144_v54 = vadd.f32 %v5143_v29, %v5142_v21  ;;  %v5137_v10 = vadd.f32 %v5136_v16, %v5135_v52  ;;  %11946 = vst [vmem:[#allocation55_spill] sm:$0xff] %v11095_v15  ;;  %v11098_v61 = vld [vmem:[#allocation2 + $0x30] sm:$0xff] }
0x2838   :  { %v5156_v2 = vsel %vm11944_vm15, %v5118_v59, 0.0  ;;  %v5149_v30 = vsel %vm11945_vm11, %v5117_v33, 0.0 }
0x2839   :  { %v5133_v62 = vrot.slane %v5132_v48, 1  ;;  %v5126_v41 = vrot.slane %v5125_v25, 1  ;;  %v5145_v36 = vrot.slane %v5144_v54, 2  ;;  %v5138_v13 = vrot.slane %v5137_v10, 2  ;;  %v5112_v19 = vpop.permute.xlu1 %5111  ;;  %v5105_v1 = vpop.permute.xlu0 %5104 }
0x283a   :  { %v5157_v39 = vrot.slane %v5156_v2, 4  ;;  %v5150_v6 = vrot.slane %v5149_v30, 4  ;;  %v5120_v37 = vmul.f32 %v11095_v15, %v5112_v19  ;;  %v5119_v57 = vmul.f32 %v11098_v61, %v5105_v1 }
0x283b   :  { %v5134_v21 = vadd.f32 %v5133_v62, %v5132_v48  ;;  %v5146_v52 = vadd.f32 %v5145_v36, %v5144_v54  ;;  %v5139_v3 = vadd.f32 %v5138_v13, %v5137_v10  ;;  %v5127_v33 = vadd.f32 %v5126_v41, %v5125_v25 }
0x283c   :  { %v5158_v60 = vadd.f32 %v5157_v39, %v5156_v2  ;;  %v5151_v29 = vadd.f32 %v5150_v6, %v5149_v30  ;;  %v5170_v16 = vsel %vm11947_vm12, %v5120_v37, 0.0  ;;  %v5163_v59 = vsel %vm11937_vm2, %v5119_v57, 0.0 }
0x283d   :  { %v5147_v40 = vrot.slane %v5146_v52, 1  ;;  %v5140_v35 = vrot.slane %v5139_v3, 1  ;;  %v5171_v27 = vrot.slane %v5170_v16, 4  ;;  %v5164_v19 = vrot.slane %v5163_v59, 4 }
0x283e   :  { %v5159_v20 = vrot.slane %v5158_v60, 2  ;;  %v5152_v50 = vrot.slane %v5151_v29, 2  ;;  %v5425_v54 = vsel %vm836_vm3, %v5134_v21, %v5127_v33  ;;  %vm6228_vm12 = vcmp.eq.s32.totalorder %v9987_v47, 5 }
0x283f   :  { %v5141_v15 = vadd.f32 %v5140_v35, %v5139_v3  ;;  %v5172_v42 = vadd.f32 %v5171_v27, %v5170_v16  ;;  %v5165_v48 = vadd.f32 %v5164_v19, %v5163_v59  ;;  %v5148_v39 = vadd.f32 %v5147_v40, %v5146_v52 }
0x2840   :  { %v5160_v12 = vadd.f32 %v5159_v20, %v5158_v60  ;;  %v5153_v1 = vadd.f32 %v5152_v50, %v5151_v29  ;;  %v11120_v29 = vld [vmem:[%s11724_s7] ss:$0 sm:$0xff] }
0x2841   :  { %v5173_v10 = vrot.slane %v5172_v42, 2  ;;  %v5426_v2 = vsel %vm838_vm4, %v5141_v15, %v5425_v54  ;;  %v5166_v25 = vrot.slane %v5165_v48, 2 }
0x2842   :  { %v5161_v30 = vrot.slane %v5160_v12, 1  ;;  %v5154_v62 = vrot.slane %v5153_v1, 1  ;;  %v5427_v35 = vsel %vm840_vm5, %v5148_v39, %v5426_v2 }
0x2843   :  { %v5174_v41 = vadd.f32 %v5173_v10, %v5172_v42  ;;  %v5167_v13 = vadd.f32 %v5166_v25, %v5165_v48 }
0x2844   :  { %v5155_v36 = vadd.f32 %v5154_v62, %v5153_v1  ;;  %v5162_v6 = vadd.f32 %v5161_v30, %v5160_v12 }
0x2845   :  { %v5175_v37 = vrot.slane %v5174_v41, 1  ;;  %v5168_v27 = vrot.slane %v5167_v13, 1 }
0x2846   :  { %v5428_v50 = vsel %vm842_vm6, %v5155_v36, %v5427_v35 }
0x2847   :  { %v5176_v20 = vadd.f32 %v5175_v37, %v5174_v41  ;;  %v5169_v57 = vadd.f32 %v5168_v27, %v5167_v13  ;;  %v5429_v40 = vsel %vm844_vm7, %v5162_v6, %v5428_v50  ;;  %v11150_v6 = vld [vmem:[%s11729_s12] ss:$0 sm:$0xff] }
0x2849   :  { %v5430_v21 = vsel %vm846_vm8, %v5169_v57, %v5429_v40 }
0x284a   :  { %v5431_v15 = vsel %vm848_vm9, %v5176_v20, %v5430_v21 }
0x284b   :  { %8533 = vmatmul.mubr.msk.f32.vlgmr.msra.gmra.mrb[30].mxu1 %vm11948_vm13, %v5431_v15 }
0x284c   :  { %8830 = vmatpush3.bf16.msra.mxu1 %v9880_v44  ;;  %8554 = vmatprep.mubr.msk.f32.mxu1 %vm9566_vm0, %v11844_v17 }
0x284d   :  { %8831 = vmatprep.subr.bf16.mxu1 %v11845_v38 }
0x2850   :  { %8833 = vmatpush3.bf16.msra.mxu1 %v9894_v49 }
0x2851   :  { %8840 = vmatprep.subr.bf16.mxu1 %v11845_v38 }
0x2858   :  { %v5413_v42 = vpop.f32.mrb[28].mxu0 }
0x2859   :  { %v8527_v12 = vpop.f32.mrb[29].mxu0 }
0x291e   :  { %v5500_v52 = vpop.f32.mrb[30].mxu1 }
0x291f   :  { %v5501_v3 = vadd.f32 %v5500_v52, %v5413_v42  ;;  %v8534_v60 = vpop.f32.mrb[31].mxu1 }
0x2921   :  { %v5504_v16 = vadd.f32 %v11120_v29, %v5501_v3 }
0x2923   :  { %v8028_v59 = vmul.f32 -1.442695, %v5504_v16  ;;  %9098 = vtanh.f32 %v5504_v16 }
0x2925   :  { %9100 = vpow2.f32 %v8028_v59 }
0x292d   :  { %v9099_v33 = vpop.eup %9098 }
0x292e   :  { %5514 = vrot.lane.b32.xlu0 %v9099_v33, %s9568_s2 }
0x292f   :  { %v9101_v19 = vpop.eup %9100 }
0x2930   :  { %v5508_v1 = vadd.f32 1.0, %v9101_v19 }
0x2932   :  { %9102 = vrcp.f32 %v5508_v1 }
0x293c   :  { %v9103_v48 = vpop.eup %9102 }
0x293d   :  { %5525 = vrot.lane.b32.xlu0 %v9103_v48, %s9568_s2  ;;  %v5512_v10 = vmul.f32 %v9103_v48, %v10911_v32 }
0x29a0   :  { %v5515_v54 = vpop.permute.xlu0 %5514 }
0x29a1   :  { %v5517_v39 = vmul.f32 %v9103_v48, %v5515_v54 }
0x29a3   :  { %5519 = vrot.lane.b32.xlu1 %v5517_v39, %s9569_s24 }
0x29af   :  { %v5526_v25 = vpop.permute.xlu0 %5525 }
0x2a15   :  { %v5520_v2 = vpop.permute.xlu1 %5519 }
0x2a16   :  { %v11127_v30 = vadd.f32 %v5520_v2, %v5512_v10 }
0x2a18   :  { %9104 = vtanh.f32 %v11127_v30 }
0x2a22   :  { %v9105_v62 = vpop.eup %9104 }
0x2a23   :  { %v5528_v41 = vmul.f32 %v9105_v62, %v5526_v25 }
0x2a25   :  { %5530 = vrot.lane.b32.xlu1 %v5528_v41, %s9570_s9 }
0x2a97   :  { %v5531_v36 = vpop.permute.xlu1 %5530 }
0x2a98   :  { %8544 = vmatmul.mubr.msk.f32.vlgmr.msra.gmra.mrb[30].mxu0 %vm263_vm1, %v5531_v36  ;;  %8555 = vmatmul.mubr.msk.f32.vlgmr.msra.gmra.mrb[32].mxu1 %vm263_vm1, %v5531_v36 }
0x2a99   :  { %8836 = vmatpush3.bf16.msra.mxu0 %v10115_v53  ;;  %8565 = vmatprep.mubr.msk.f32.mxu0 %vm9566_vm0, %v11844_v17 }
0x2a9a   :  { %8837 = vmatprep.subr.bf16.mxu0 %v11845_v38  ;;  %8842 = vmatpush3.bf16.msra.mxu1 %v9842_v5 }
0x2a9b   :  { %8843 = vmatprep.subr.bf16.mxu1 %v11845_v38  ;;  %8576 = vmatprep.mubr.msk.f32.mxu1 %vm9566_vm0, %v11844_v17 }
0x2a9d   :  { %8839 = vmatpush3.bf16.msra.mxu0 %v10118_v9 }
0x2a9e   :  { %8845 = vmatpush3.bf16.msra.mxu1 %v9845_v7  ;;  %8846 = vmatprep.subr.bf16.mxu0 %v11845_v38 }
0x2a9f   :  { %8849 = vmatprep.subr.bf16.mxu1 %v11845_v38 }
0x2b6b   :  { %v5600_v32 = vpop.f32.mrb[30].mxu0  ;;  %v11145_v13 = vpop.f32.mrb[32].mxu1 }
0x2b6c   :  { %v5601_v37 = vadd.f32 %v11150_v6, %v5600_v32  ;;  %v8545_v35 = vpop.f32.mrb[31].mxu0  ;;  %v8556_v27 = vpop.f32.mrb[33].mxu1 }
0x2b6e   :  { %v5605_v50 = vcombine.high %v5601_v37, %v5601_v37  ;;  %v5612_v20 = vrot.slane %v5601_v37, %v11857_v63 }
0x2b70   :  { %v5619_v57 = vrot.slane %v5605_v50, %v11857_v63  ;;  %v5620_v40 = vcombine.high %v5612_v20, %v5612_v20  ;;  %v5628_v21 = vrot.slane %v5612_v20, %v11857_v63  ;;  %v11178_v20 = vld [vmem:[%s11732_s15] ss:$0 sm:$0xff] }
0x2b71   :  { %11949 = vst [vmem:[#allocation53_spill] sm:$0xff] %v11178_v20 }
0x2b72   :  { %v5621_v15 = vcombine.high %v5619_v57, %v5619_v57  ;;  %v5635_v42 = vrot.slane %v5619_v57, %v11857_v63  ;;  %v5642_v12 = vrot.slane %v5620_v40, %v11857_v63  ;;  %v5650_v52 = vcombine.high %v5628_v21, %v5628_v21 }
0x2b73   :  { %v5657_v3 = vrot.slane %v5628_v21, %v9936_v26 }
0x2b74   :  { %v5649_v60 = vrot.slane %v5621_v15, %v11857_v63  ;;  %v5652_v16 = vcombine.high %v5642_v12, %v5642_v12  ;;  %v5661_v59 = vrot.slane %v5642_v12, %v9936_v26  ;;  %v5665_v33 = vrot.slane %v5650_v52, %v9936_v26 }
0x2b75   :  { %v5673_v19 = vrot.slane %v5635_v42, %v9936_v26  ;;  %v5694_v1 = vadd.f32 %v5657_v3, %v11878_v8  ;;  %v5651_v10 = vcombine.high %v5635_v42, %v5635_v42 }
0x2b76   :  { %v5653_v48 = vcombine.high %v5649_v60, %v5649_v60  ;;  %v5669_v54 = vrot.slane %v5652_v16, %v9936_v26  ;;  %v5677_v39 = vrot.slane %v5649_v60, %v9936_v26  ;;  %v5695_v2 = vadd.f32 %v5661_v59, %v11879_v4 }
0x2b77   :  { %v5696_v62 = vadd.f32 %v5665_v33, %v11880_v58  ;;  %9106 = vtanh.f32 %v5694_v1  ;;  %v5698_v41 = vadd.f32 %v5673_v19, %v11881_v43  ;;  %v5681_v37 = vrot.slane %v5651_v10, %v9936_v26 }
0x2b78   :  { %v5685_v25 = vrot.slane %v5653_v48, %v9936_v26  ;;  %v5699_v36 = vadd.f32 %v5677_v39, %v11927_v18  ;;  %9108 = vtanh.f32 %v5695_v2  ;;  %v5697_v32 = vadd.f32 %v5669_v54, %v11882_v14 }
0x2b79   :  { %9110 = vtanh.f32 %v5696_v62  ;;  %v5700_v27 = vadd.f32 %v5681_v37, %v11883_v28 }
0x2b7a   :  { %v5701_v35 = vadd.f32 %v5685_v25, %v9962_v55  ;;  %9112 = vtanh.f32 %v5698_v41 }
0x2b7b   :  { %9114 = vtanh.f32 %v5699_v36 }
0x2b7c   :  { %9116 = vtanh.f32 %v5697_v32 }
0x2b7d   :  { %9118 = vtanh.f32 %v5701_v35 }
0x2b7e   :  { %9120 = vtanh.f32 %v5700_v27 }
0x2b81   :  { %v9107_v50 = vpop.eup %9106 }
0x2b82   :  { %v5710_v57 = vmul.f32 %v11178_v20, %v9107_v50  ;;  %v9109_v40 = vpop.eup %9108 }
0x2b83   :  { %v9111_v21 = vpop.eup %9110  ;;  %v5711_v42 = vmul.f32 %v11178_v20, %v9109_v40 }
0x2b84   :  { %v5718_v15 = vsel %vm263_vm1, %v5710_v57, 0.0  ;;  %v5712_v12 = vmul.f32 %v11178_v20, %v9111_v21  ;;  %v9113_v52 = vpop.eup %9112 }
0x2b85   :  { %5719 = vadd.xlane.f32.xlu0 %v5718_v15  ;;  %v5721_v3 = vsel %vm263_vm1, %v5711_v42, 0.0  ;;  %v9115_v60 = vpop.eup %9114  ;;  %v5714_v19 = vmul.f32 %v11178_v20, %v9113_v52 }
0x2b86   :  { %5722 = vadd.xlane.f32.xlu1 %v5721_v3  ;;  %v9117_v16 = vpop.eup %9116  ;;  %v5724_v59 = vsel %vm263_vm1, %v5712_v12, 0.0  ;;  %v5715_v33 = vmul.f32 %v11178_v20, %v9115_v60  ;;  %v4935_v12 = vsub.f32 1.0, %v11053_v0 }
0x2b87   :  { %v9119_v1 = vpop.eup %9118  ;;  %v5730_v39 = vsel %vm263_vm1, %v5714_v19, 0.0  ;;  %v5713_v10 = vmul.f32 %v11178_v20, %v9117_v16 }
0x2b88   :  { %v5733_v48 = vsel %vm263_vm1, %v5715_v33, 0.0  ;;  %v5717_v54 = vmul.f32 %v11178_v20, %v9119_v1  ;;  %v9121_v2 = vpop.eup %9120 }
0x2b89   :  { %5725 = vadd.xlane.f32.xlu0 %v5724_v59  ;;  %v5727_v25 = vsel %vm263_vm1, %v5713_v10, 0.0  ;;  %v5716_v41 = vmul.f32 %v11178_v20, %v9121_v2 }
0x2b8a   :  { %5734 = vadd.xlane.f32.xlu1 %v5733_v48  ;;  %v5739_v62 = vsel %vm263_vm1, %v5717_v54, 0.0  ;;  %v11208_v48 = vmul.f32 %v4935_v12, %v10983_v31 }
0x2b8b   :  { %v5736_v36 = vsel %vm263_vm1, %v5716_v41, 0.0 }
0x2b8c   :  { %11950 = vst [vmem:[#allocation54_spill] sm:$0xff] %v11208_v48  ;;  %vm5742_vm14 = vcmp.eq.f32.partialorder %v11208_v48, 0.0 }
0x2b8d   :  { %5731 = vadd.xlane.f32.xlu0 %v5730_v39 }
0x2b8e   :  { %5740 = vadd.xlane.f32.xlu1 %v5739_v62 }
0x2b91   :  { %5728 = vadd.xlane.f32.xlu0 %v5727_v25 }
0x2b95   :  { %5737 = vadd.xlane.f32.xlu0 %v5736_v36 }
0x2c12   :  { %v5720_v32 = vpop.xlane.xlu0 %5719 }
0x2c13   :  { %v5723_v37 = vpop.xlane.xlu1 %5722  ;;  %v5754_v57 = vrot.slane %v5720_v32, %v11929_v45 }
0x2c14   :  { %v5758_v27 = vrot.slane %v5723_v37, %v11929_v45 }
0x2c16   :  { %v5726_v35 = vpop.xlane.xlu0 %5725  ;;  %v5783_v15 = vsel %vm836_vm3, %v5758_v27, %v5754_v57 }
0x2c17   :  { %v5735_v40 = vpop.xlane.xlu1 %5734  ;;  %v5762_v21 = vrot.slane %v5726_v35, %v11929_v45 }
0x2c18   :  { %v5774_v16 = vrot.slane %v5735_v40, %v11929_v45 }
0x2c19   :  { %v5784_v3 = vsel %vm838_vm4, %v5762_v21, %v5783_v15 }
0x2c1a   :  { %v5732_v50 = vpop.xlane.xlu0 %5731 }
0x2c1b   :  { %v5770_v60 = vrot.slane %v5732_v50, %v11929_v45  ;;  %v5741_v59 = vpop.xlane.xlu1 %5740 }
0x2c1c   :  { %v5782_v39 = vrot.slane %v5741_v59, %v11929_v45 }
0x2c1e   :  { %v5729_v42 = vpop.xlane.xlu0 %5728 }
0x2c1f   :  { %v5766_v52 = vrot.slane %v5729_v42, %v11929_v45 }
0x2c21   :  { %v5785_v33 = vsel %vm840_vm5, %v5766_v52, %v5784_v3 }
0x2c22   :  { %v5786_v19 = vsel %vm842_vm6, %v5770_v60, %v5785_v33  ;;  %v5738_v1 = vpop.xlane.xlu0 %5737 }
0x2c23   :  { %v5778_v54 = vrot.slane %v5738_v1, %v11929_v45  ;;  %v5787_v0 = vsel %vm844_vm7, %v5774_v16, %v5786_v19 }
0x2c25   :  { %v5788_v10 = vsel %vm846_vm8, %v5778_v54, %v5787_v0 }
0x2c26   :  { %v5789_v2 = vsel %vm848_vm9, %v5782_v39, %v5788_v10 }
0x2c27   :  { %v5791_v62 = vsel %vm5742_vm14, -inf, %v5789_v2  ;;  %vm11958_vm14 = vmmov %vm11948_vm13 }
0x2c28   :  { %v5792_v25 = vsel %vm851_vm10, %v5791_v62, -inf }
0x2c29   :  { %5793 = vmax.xlane.f32.xlu0 %v5792_v25 }
0x2cb6   :  { %v5794_v41 = vpop.xlane.xlu0 %5793 }
0x2cb7   :  { %v5795_v36 = vsub.f32 %v5791_v62, %v5794_v41 }
0x2cb9   :  { %v5796_v31 = vmul.f32 1.442695, %v5795_v36 }
0x2cbb   :  { %9122 = vpow2.f32 %v5796_v31 }
0x2cc5   :  { %v9123_v32 = vpop.eup %9122 }
0x2cc6   :  { %v5798_v37 = vsel %vm851_vm10, %v9123_v32, 0.0 }
0x2cc7   :  { %5799 = vadd.xlane.f32.xlu1 %v5798_v37 }
0x2d54   :  { %v5800_v35 = vpop.xlane.xlu1 %5799 }
0x2d55   :  { %9124 = vrcp.f32 %v5800_v35 }
0x2d5f   :  { %v9125_v27 = vpop.eup %9124 }
0x2d60   :  { %v5802_v50 = vmul.f32 %v9125_v27, %v9123_v32 }
0x2d62   :  { %7905 = vst.msk [vmem:[#allocation19 + $0x28] sm:$0xff] %vm851_vm10, %v5802_v50  ;;  %v5839_v57 = vrot.slane %v5802_v50, %v10010_v22  ;;  %v5832_v40 = vrot.slane %v5802_v50, %v9936_v26  ;;  %v5867_v21 = vrot.slane %v5802_v50, %v10026_v46  ;;  %v5846_v15 = vrot.slane %v5802_v50, %v10013_v23 }
0x2d63   :  { %v5853_v42 = vrot.slane %v5802_v50, %v10016_v24  ;;  %v5860_v12 = vrot.slane %v5802_v50, %v10022_v34  ;;  %v5874_v52 = vrot.slane %v5802_v50, %v10030_v51  ;;  %v5803_v3 = vmul.f32 %v5802_v50, %v11208_v48 }
0x2d64   :  { %5841 = vbcast.lane.b32.xlu0 %v5839_v57, 256  ;;  %5834 = vbcast.lane.b32.xlu1 %v5832_v40, 256  ;;  %v5881_v16 = vrot.slane %v5802_v50, %v10034_v56 }
0x2d65   :  { %v5804_v60 = vsel %vm851_vm10, %v5803_v3, -inf }
0x2d68   :  { %5869 = vbcast.lane.b32.xlu0 %v5867_v21, 256  ;;  %5848 = vbcast.lane.b32.xlu1 %v5846_v15, 256 }
0x2d6c   :  { %5855 = vbcast.lane.b32.xlu1 %v5853_v42, 256 }
0x2d70   :  { %5862 = vbcast.lane.b32.xlu1 %v5860_v12, 256 }
0x2d74   :  { %5876 = vbcast.lane.b32.xlu1 %v5874_v52, 256 }
0x2d87   :  { %5805 = vmax.xlane.f32.xlu0 %v5804_v60 }
0x2d9d   :  { %5883 = vbcast.lane.b32.xlu0 %v5881_v16, 256 }
0x2dd6   :  { %v5835_v59 = vpop.permute.xlu1 %5834  ;;  %v5842_v1 = vpop.permute.xlu0 %5841 }
0x2dd7   :  { %v5886_v0 = vmul.f32 %v5842_v1, %v11879_v4  ;;  %v5885_v39 = vmul.f32 %v5835_v59, %v11878_v8 }
0x2dd9   :  { %v5900_v25 = vsel %vm263_vm1, %v5886_v0, 0.0  ;;  %v5893_v41 = vsel %vm263_vm1, %v5885_v39, 0.0 }
0x2dda   :  { %v5849_v33 = vpop.permute.xlu1 %5848  ;;  %v5870_v31 = vpop.permute.xlu0 %5869  ;;  %v5901_v35 = vrot.slane %v5900_v25, 4  ;;  %v5894_v27 = vrot.slane %v5893_v41, 4 }
0x2ddb   :  { %v5887_v10 = vmul.f32 %v5849_v33, %v11880_v58  ;;  %v5890_v40 = vmul.f32 %v5870_v31, %v11927_v18 }
0x2ddc   :  { %v5902_v12 = vadd.f32 %v5901_v35, %v5900_v25  ;;  %v5895_v52 = vadd.f32 %v5894_v27, %v5893_v41 }
0x2ddd   :  { %v5907_v32 = vsel %vm263_vm1, %v5887_v10, 0.0  ;;  %v5928_v16 = vsel %vm263_vm1, %v5890_v40, 0.0 }
0x2dde   :  { %v5856_v19 = vpop.permute.xlu1 %5855  ;;  %v5908_v21 = vrot.slane %v5907_v32, 4  ;;  %v5896_v0 = vrot.slane %v5895_v52, 2  ;;  %v5929_v39 = vrot.slane %v5928_v16, 4 }
0x2ddf   :  { %v5888_v2 = vmul.f32 %v5856_v19, %v11882_v14 }
0x2de0   :  { %v5909_v59 = vadd.f32 %v5908_v21, %v5907_v32  ;;  %v5897_v48 = vadd.f32 %v5896_v0, %v5895_v52  ;;  %v5930_v45 = vadd.f32 %v5929_v39, %v5928_v16 }
0x2de1   :  { %v5914_v37 = vsel %vm263_vm1, %v5888_v2, 0.0 }
0x2de2   :  { %v5863_v54 = vpop.permute.xlu1 %5862  ;;  %v5915_v15 = vrot.slane %v5914_v37, 4  ;;  %v5910_v10 = vrot.slane %v5909_v59, 2  ;;  %v5898_v40 = vrot.slane %v5897_v48, 1  ;;  %v5931_v21 = vrot.slane %v5930_v45, 2 }
0x2de3   :  { %v5889_v62 = vmul.f32 %v5863_v54, %v11881_v43  ;;  %v5903_v54 = vrot.slane %v5902_v12, 2 }
0x2de4   :  { %v5916_v33 = vadd.f32 %v5915_v15, %v5914_v37  ;;  %v5911_v41 = vadd.f32 %v5910_v10, %v5909_v59 }
0x2de5   :  { %v5921_v50 = vsel %vm263_vm1, %v5889_v62, 0.0  ;;  %v5904_v31 = vadd.f32 %v5903_v54, %v5902_v12 }
0x2de6   :  { %v5877_v36 = vpop.permute.xlu1 %5876  ;;  %v5922_v42 = vrot.slane %v5921_v50, 4  ;;  %v5917_v2 = vrot.slane %v5916_v33, 2  ;;  %v5912_v20 = vrot.slane %v5911_v41, 1 }
0x2de7   :  { %v5891_v57 = vmul.f32 %v5877_v36, %v11883_v28 }
0x2de8   :  { %v5923_v19 = vadd.f32 %v5922_v42, %v5921_v50  ;;  %v5918_v35 = vadd.f32 %v5917_v2, %v5916_v33  ;;  %v5913_v0 = vadd.f32 %v5912_v20, %v5911_v41 }
0x2de9   :  { %v5935_v60 = vsel %vm263_vm1, %v5891_v57, 0.0  ;;  %v5905_v57 = vrot.slane %v5904_v31, 1 }
0x2dea   :  { %v5936_v1 = vrot.slane %v5935_v60, 4  ;;  %v5924_v62 = vrot.slane %v5923_v19, 2  ;;  %v5919_v52 = vrot.slane %v5918_v35, 1 }
0x2deb   :  { %v5906_v33 = vadd.f32 %v5905_v57, %v5904_v31 }
0x2dec   :  { %v5937_v36 = vadd.f32 %v5936_v1, %v5935_v60  ;;  %v5925_v32 = vadd.f32 %v5924_v62, %v5923_v19  ;;  %v5899_v1 = vadd.f32 %v5898_v40, %v5897_v48  ;;  %v5932_v19 = vadd.f32 %v5931_v21, %v5930_v45 }
0x2ded   :  { %v5920_v39 = vadd.f32 %v5919_v52, %v5918_v35 }
0x2dee   :  { %v5938_v37 = vrot.slane %v5937_v36, 2  ;;  %v5926_v16 = vrot.slane %v5925_v32, 1 }
0x2df0   :  { %v5939_v59 = vadd.f32 %v5938_v37, %v5937_v36  ;;  %v5927_v2 = vadd.f32 %v5926_v16, %v5925_v32 }
0x2df2   :  { %v5940_v62 = vrot.slane %v5939_v59, 1 }
0x2df4   :  { %v5941_v48 = vadd.f32 %v5940_v62, %v5939_v59 }
0x2e14   :  { %v5806_v25 = vpop.xlane.xlu0 %5805 }
0x2e15   :  { %vm5807_vm15 = vcmp.eq.f32.partialorder %v5803_v3, %v5806_v25  ;;  %v6147_v25 = vsel %vm836_vm3, %v5906_v33, %v5899_v1  ;;  %v11951_v33 = vld [vmem:[#allocation38_spill] sm:$0xff] }
0x2e16   :  { %v5808_v27 = vsel %vm5807_vm15, %v9987_v47, 8  ;;  %vm11961_vm15 = vmmov %vm11948_vm13 }
0x2e17   :  { %v5809_v50 = vsel %vm851_vm10, %v5808_v27, 2147483647  ;;  %v5933_v27 = vrot.slane %v5932_v19, 1 }
0x2e18   :  { %v5811_v15 = vshra.s32 %v5809_v50, 16  ;;  %v5884_v42 = vpop.permute.xlu0 %5883  ;;  %v5810_v32 = vand.u32 65535, %v5809_v50  ;;  %v11953_v50 = vld [vmem:[#allocation35_spill] sm:$0xff] }
0x2e19   :  { %v5892_v12 = vmul.f32 %v5884_v42, %v9962_v55  ;;  %v5934_v45 = vadd.f32 %v5933_v27, %v5932_v19 }
0x2e1a   :  { %v5813_v60 = vcvt.s32.f32 %v5811_v15  ;;  %v6148_v15 = vsel %vm838_vm4, %v5913_v0, %v6147_v25 }
0x2e1b   :  { %v5942_v3 = vsel %vm263_vm1, %v5892_v12, 0.0  ;;  %v6149_v36 = vsel %vm840_vm5, %v5920_v39, %v6148_v15  ;;  %v5812_v12 = vcvt.s32.f32 %v5810_v32 }
0x2e1c   :  { %v5943_v54 = vrot.slane %v5942_v3, 4  ;;  %5814 = vmin.xlane.f32.xlu1 %v5813_v60  ;;  %v6150_v31 = vsel %vm842_vm6, %v5927_v2, %v6149_v36  ;;  %v11954_v2 = vld [vmem:[#allocation37_spill] sm:$0xff] }
0x2e1d   :  { %v6151_v20 = vsel %vm844_vm7, %v5934_v45, %v6150_v31 }
0x2e1e   :  { %v5944_v10 = vadd.f32 %v5943_v54, %v5942_v3  ;;  %v6152_v41 = vsel %vm846_vm8, %v5941_v48, %v6151_v20  ;;  %v11952_v54 = vld [vmem:[#allocation34_spill] sm:$0xff] }
0x2e1f   :  { %v11956_v20 = vld [vmem:[#allocation42_spill] sm:$0xff] }
0x2e20   :  { %v5945_v42 = vrot.slane %v5944_v10, 2 }
0x2e22   :  { %v5946_v37 = vadd.f32 %v5945_v42, %v5944_v10 }
0x2e24   :  { %v5947_v57 = vrot.slane %v5946_v37, 1 }
0x2e26   :  { %v5948_v40 = vadd.f32 %v5947_v57, %v5946_v37 }
0x2e28   :  { %v6153_v35 = vsel %vm848_vm9, %v5948_v40, %v6152_v41 }
0x2e29   :  { %8566 = vmatmul.mubr.msk.f32.vlgmr.msra.gmra.mrb[32].mxu0 %vm263_vm1, %v6153_v35  ;;  %v11957_v35 = vld [vmem:[#allocation40_spill] sm:$0xff] }
0x2e2a   :  { %8848 = vmatpush3.bf16.msra.mxu0 %v9849_v11  ;;  %8583 = vmatprep.mubr.msk.f32.mxu0 %vm9566_vm0, %v11844_v17 }
0x2e2b   :  { %8855 = vmatprep.subr.bf16.mxu0 %v11845_v38 }
0x2ea9   :  { %v5815_v21 = vpop.xlane.xlu1 %5814 }
0x2eaa   :  { %vm5816_vm11 = vcmp.eq.f32.partialorder %v5813_v60, %v5815_v21  ;;  %v5821_v60 = vcvt.f32.s32 %v5815_v21 }
0x2eab   :  { %v5817_v52 = vsel %vm5816_vm11, %v5812_v12, inf  ;;  %vm11962_vm11 = vmmov %vm11948_vm13 }
0x2eac   :  { %5818 = vmin.xlane.f32.xlu0 %v5817_v52  ;;  %v5822_v0 = vshll.u32 %v5821_v60, 16 }
0x2efc   :  { %v6222_v16 = vpop.f32.mrb[32].mxu0 }
0x2efd   :  { %v6223_v59 = vadd.f32 %v6222_v16, %v11145_v13  ;;  %v8567_v3 = vpop.f32.mrb[33].mxu0 }
0x2eff   :  { %v6226_v1 = vadd.f32 %v11951_v33, %v6223_v59  ;;  %v11959_v33 = vld [vmem:[#allocation39_spill] sm:$0xff] }
0x2f01   :  { %9126 = vtanh.f32 %v6226_v1 }
0x2f0b   :  { %v9127_v19 = vpop.eup %9126 }
0x2f0c   :  { %8577 = vmatmul.mubr.msk.f32.vlgmr.msra.gmra.mrb[34].mxu1 %vm263_vm1, %v9127_v19  ;;  %v11960_v19 = vld [vmem:[#allocation43_spill] sm:$0xff] }
0x2f0d   :  { %8851 = vmatpush3.bf16.msra.mxu1 %v11952_v54  ;;  %8594 = vmatprep.mubr.msk.f32.mxu1 %vm9566_vm0, %v11844_v17 }
0x2f0e   :  { %8852 = vmatprep.subr.bf16.mxu1 %v11845_v38 }
0x2f11   :  { %8854 = vmatpush3.bf16.msra.mxu1 %v11953_v50 }
0x2f12   :  { %8861 = vmatprep.subr.bf16.mxu1 %v11845_v38 }
0x2f39   :  { %v5819_v13 = vpop.xlane.xlu0 %5818 }
0x2f3a   :  { %v5820_v39 = vcvt.f32.s32 %v5819_v13 }
0x2f3c   :  { %v5823_v10 = vadd.s32 %v5822_v0, %v5820_v39 }
0x2f3e   :  { %vm5824_vm2 = vcmp.eq.s32.totalorder %v9987_v47, %v5823_v10  ;;  %v11271_v62 = vsel %vm6228_vm12, %v5823_v10, %v11954_v2  ;;  %vm11965_vm12 = vmmov %vm11962_vm11 }
0x2f3f   :  { %11955 = vst [vmem:[#allocation38_spill] sm:$0xff] %v11271_v62  ;;  %v11274_v25 = vsel %vm5824_vm2, 1.0, %v11844_v17  ;;  %vm11966_vm2 = vmmov %vm11962_vm11 }
0x2f40   :  { %v5959_v27 = vrot.slane %v11274_v25, %v10010_v22  ;;  %v5952_v42 = vrot.slane %v11274_v25, %v9936_v26  ;;  %v5966_v15 = vrot.slane %v11274_v25, %v10013_v23  ;;  %v5973_v36 = vrot.slane %v11274_v25, %v10016_v24 }
0x2f41   :  { %v5980_v37 = vrot.slane %v11274_v25, %v10022_v34  ;;  %v5987_v31 = vrot.slane %v11274_v25, %v10026_v46  ;;  %v5994_v48 = vrot.slane %v11274_v25, %v10030_v51  ;;  %v6001_v45 = vrot.slane %v11274_v25, %v10034_v56 }
0x2f42   :  { %5961 = vbcast.lane.b32.xlu1 %v5959_v27, 256  ;;  %5954 = vbcast.lane.b32.xlu0 %v5952_v42, 256 }
0x2f46   :  { %5968 = vbcast.lane.b32.xlu1 %v5966_v15, 256  ;;  %5975 = vbcast.lane.b32.xlu0 %v5973_v36, 256 }
0x2f4a   :  { %5982 = vbcast.lane.b32.xlu1 %v5980_v37, 256  ;;  %5989 = vbcast.lane.b32.xlu0 %v5987_v31, 256  ;;  %v11963_v31 = vld [vmem:[#allocation41_spill] sm:$0xff] }
0x2f4e   :  { %5996 = vbcast.lane.b32.xlu1 %v5994_v48, 256  ;;  %6003 = vbcast.lane.b32.xlu0 %v6001_v45, 256  ;;  %v11964_v45 = vld [vmem:[#allocation36_spill] sm:$0xff] }
0x2fb4   :  { %v5962_v57 = vpop.permute.xlu1 %5961  ;;  %v5955_v40 = vpop.permute.xlu0 %5954 }
0x2fb5   :  { %v6006_v41 = vmul.f32 %v11956_v20, %v5962_v57  ;;  %v6005_v32 = vmul.f32 %v11957_v35, %v5955_v40 }
0x2fb7   :  { %v6020_v21 = vsel %vm11948_vm13, %v6006_v41, 0.0  ;;  %v6013_v12 = vsel %vm11958_vm14, %v6005_v32, 0.0  ;;  %vm11968_vm13 = vmmov %vm11966_vm2 }
0x2fb8   :  { %v6021_v52 = vrot.slane %v6020_v21, 4  ;;  %v6014_v16 = vrot.slane %v6013_v12, 4  ;;  %v5969_v59 = vpop.permute.xlu1 %5968  ;;  %v5976_v3 = vpop.permute.xlu0 %5975  ;;  %vm11969_vm14 = vmmov %vm11966_vm2 }
0x2fb9   :  { %v6007_v1 = vmul.f32 %v11959_v33, %v5969_v59  ;;  %v6008_v60 = vmul.f32 %v11960_v19, %v5976_v3 }
0x2fba   :  { %v6022_v13 = vadd.f32 %v6021_v52, %v6020_v21  ;;  %v6015_v0 = vadd.f32 %v6014_v16, %v6013_v12 }
0x2fbb   :  { %v6027_v39 = vsel %vm11961_vm15, %v6007_v1, 0.0  ;;  %v6034_v10 = vsel %vm11962_vm11, %v6008_v60, 0.0  ;;  %vm11970_vm15 = vmmov %vm11966_vm2 }
0x2fbc   :  { %v6023_v2 = vrot.slane %v6022_v13, 2  ;;  %v6016_v27 = vrot.slane %v6015_v0, 2  ;;  %v6028_v42 = vrot.slane %v6027_v39, 4  ;;  %v6035_v15 = vrot.slane %v6034_v10, 4  ;;  %v5983_v36 = vpop.permute.xlu1 %5982  ;;  %v5990_v37 = vpop.permute.xlu0 %5989 }
0x2fbd   :  { %v6009_v48 = vmul.f32 %v11963_v31, %v5983_v36  ;;  %v6010_v57 = vmul.f32 %v11964_v45, %v5990_v37  ;;  %v11967_v36 = vld [vmem:[#allocation55_spill] sm:$0xff] }
0x2fbe   :  { %v6024_v40 = vadd.f32 %v6023_v2, %v6022_v13  ;;  %v6017_v20 = vadd.f32 %v6016_v27, %v6015_v0  ;;  %v6029_v41 = vadd.f32 %v6028_v42, %v6027_v39  ;;  %v6036_v35 = vadd.f32 %v6035_v15, %v6034_v10 }
0x2fbf   :  { %v6041_v32 = vsel %vm11965_vm12, %v6009_v48, 0.0  ;;  %v6048_v21 = vsel %vm11966_vm2, %v6010_v57, 0.0 }
0x2fc0   :  { %v6025_v12 = vrot.slane %v6024_v40, 1  ;;  %v6018_v52 = vrot.slane %v6017_v20, 1  ;;  %v6030_v16 = vrot.slane %v6029_v41, 2  ;;  %v6037_v59 = vrot.slane %v6036_v35, 2  ;;  %v5997_v3 = vpop.permute.xlu1 %5996  ;;  %v6004_v33 = vpop.permute.xlu0 %6003 }
0x2fc1   :  { %v6042_v1 = vrot.slane %v6041_v32, 4  ;;  %v6049_v19 = vrot.slane %v6048_v21, 4  ;;  %v6011_v60 = vmul.f32 %v11098_v61, %v5997_v3  ;;  %v6012_v37 = vmul.f32 %v11967_v36, %v6004_v33 }
0x2fc2   :  { %v6026_v13 = vadd.f32 %v6025_v12, %v6024_v40  ;;  %v6031_v0 = vadd.f32 %v6030_v16, %v6029_v41  ;;  %v6038_v39 = vadd.f32 %v6037_v59, %v6036_v35  ;;  %v6019_v15 = vadd.f32 %v6018_v52, %v6017_v20 }
0x2fc3   :  { %v6043_v10 = vadd.f32 %v6042_v1, %v6041_v32  ;;  %v6050_v2 = vadd.f32 %v6049_v19, %v6048_v21  ;;  %v6055_v27 = vsel %vm11968_vm13, %v6011_v60, 0.0  ;;  %v6062_v42 = vsel %vm11969_vm14, %v6012_v37, 0.0 }
0x2fc4   :  { %v6032_v31 = vrot.slane %v6031_v0, 1  ;;  %v6039_v48 = vrot.slane %v6038_v39, 1  ;;  %v6056_v45 = vrot.slane %v6055_v27, 4  ;;  %v6063_v50 = vrot.slane %v6062_v42, 4 }
0x2fc5   :  { %v6044_v57 = vrot.slane %v6043_v10, 2  ;;  %v6051_v62 = vrot.slane %v6050_v2, 2  ;;  %v6318_v41 = vsel %vm836_vm3, %v6026_v13, %v6019_v15  ;;  %vm7121_vm13 = vcmp.eq.s32.totalorder %v9987_v47, 6 }
0x2fc6   :  { %v6033_v54 = vadd.f32 %v6032_v31, %v6031_v0  ;;  %v6057_v61 = vadd.f32 %v6056_v45, %v6055_v27  ;;  %v6064_v40 = vadd.f32 %v6063_v50, %v6062_v42  ;;  %v6040_v35 = vadd.f32 %v6039_v48, %v6038_v39 }
0x2fc7   :  { %v6045_v3 = vadd.f32 %v6044_v57, %v6043_v10  ;;  %v6052_v33 = vadd.f32 %v6051_v62, %v6050_v2 }
0x2fc8   :  { %v6058_v32 = vrot.slane %v6057_v61, 2  ;;  %v6319_v21 = vsel %vm838_vm4, %v6033_v54, %v6318_v41  ;;  %v6065_v20 = vrot.slane %v6064_v40, 2 }
0x2fc9   :  { %v6046_v12 = vrot.slane %v6045_v3, 1  ;;  %v6053_v16 = vrot.slane %v6052_v33, 1  ;;  %v6320_v60 = vsel %vm840_vm5, %v6040_v35, %v6319_v21 }
0x2fca   :  { %v6059_v52 = vadd.f32 %v6058_v32, %v6057_v61  ;;  %v6066_v19 = vadd.f32 %v6065_v20, %v6064_v40 }
0x2fcb   :  { %v6047_v59 = vadd.f32 %v6046_v12, %v6045_v3  ;;  %v6054_v1 = vadd.f32 %v6053_v16, %v6052_v33 }
0x2fcc   :  { %v6060_v36 = vrot.slane %v6059_v52, 1  ;;  %v6067_v62 = vrot.slane %v6066_v19, 1 }
0x2fcd   :  { %v6321_v37 = vsel %vm842_vm6, %v6047_v59, %v6320_v60 }
0x2fce   :  { %v6061_v50 = vadd.f32 %v6060_v36, %v6059_v52  ;;  %v6068_v0 = vadd.f32 %v6067_v62, %v6066_v19  ;;  %v6322_v13 = vsel %vm844_vm7, %v6054_v1, %v6321_v37 }
0x2fd0   :  { %v6323_v39 = vsel %vm846_vm8, %v6061_v50, %v6322_v13 }
0x2fd1   :  { %v6324_v54 = vsel %vm848_vm9, %v6068_v0, %v6323_v39 }
0x2fd2   :  { %8584 = vmatmul.mubr.msk.f32.vlgmr.msra.gmra.mrb[34].mxu0 %vm11970_vm15, %v6324_v54 }
0x2fd3   :  { %8857 = vmatpush3.bf16.msra.mxu0 %v9880_v44  ;;  %8605 = vmatprep.mubr.msk.f32.mxu0 %vm9566_vm0, %v11844_v17 }
0x2fd4   :  { %8858 = vmatprep.subr.bf16.mxu0 %v11845_v38 }
0x2fd7   :  { %8860 = vmatpush3.bf16.msra.mxu0 %v9894_v49 }
0x2fd8   :  { %8867 = vmatprep.subr.bf16.mxu0 %v11845_v38 }
0x2fdf   :  { %v6306_v10 = vpop.f32.mrb[34].mxu1 }
0x2fe0   :  { %v8578_v2 = vpop.f32.mrb[35].mxu1 }
0x30a5   :  { %v6393_v27 = vpop.f32.mrb[34].mxu0 }
0x30a6   :  { %v6394_v42 = vadd.f32 %v6393_v27, %v6306_v10  ;;  %v8585_v15 = vpop.f32.mrb[35].mxu0 }
0x30a8   :  { %v6397_v31 = vadd.f32 %v11120_v29, %v6394_v42 }
0x30aa   :  { %v8035_v48 = vmul.f32 -1.442695, %v6397_v31  ;;  %9128 = vtanh.f32 %v6397_v31 }
0x30ac   :  { %9130 = vpow2.f32 %v8035_v48 }
0x30b4   :  { %v9129_v45 = vpop.eup %9128 }
0x30b5   :  { %6407 = vrot.lane.b32.xlu1 %v9129_v45, %s9568_s2 }
0x30b6   :  { %v9131_v57 = vpop.eup %9130 }
0x30b7   :  { %v6401_v61 = vadd.f32 1.0, %v9131_v57 }
0x30b9   :  { %9132 = vrcp.f32 %v6401_v61 }
0x30c3   :  { %v9133_v3 = vpop.eup %9132 }
0x30c4   :  { %6418 = vrot.lane.b32.xlu1 %v9133_v3, %s9568_s2  ;;  %v6405_v41 = vmul.f32 %v9133_v3, %v11127_v30 }
0x3127   :  { %v6408_v33 = vpop.permute.xlu1 %6407 }
0x3128   :  { %v6410_v40 = vmul.f32 %v9133_v3, %v6408_v33 }
0x312a   :  { %6412 = vrot.lane.b32.xlu0 %v6410_v40, %s9569_s24 }
0x3136   :  { %v6419_v21 = vpop.permute.xlu1 %6418 }
0x319c   :  { %v6413_v35 = vpop.permute.xlu0 %6412 }
0x319d   :  { %v11327_v29 = vadd.f32 %v6413_v35, %v6405_v41 }
0x319f   :  { %9134 = vtanh.f32 %v11327_v29 }
0x31a9   :  { %v9135_v32 = vpop.eup %9134 }
0x31aa   :  { %v6421_v12 = vmul.f32 %v9135_v32, %v6419_v21 }
0x31ac   :  { %6423 = vrot.lane.b32.xlu0 %v6421_v12, %s9570_s9  ;;  %v11971_v12 = vld [vmem:[#allocation53_spill] sm:$0xff] }
0x321e   :  { %v6424_v16 = vpop.permute.xlu0 %6423 }
0x321f   :  { %8595 = vmatmul.mubr.msk.f32.vlgmr.msra.gmra.mrb[36].mxu1 %vm263_vm1, %v6424_v16  ;;  %8606 = vmatmul.mubr.msk.f32.vlgmr.msra.gmra.mrb[36].mxu0 %vm263_vm1, %v6424_v16 }
0x3220   :  { %8863 = vmatpush3.bf16.msra.mxu1 %v10115_v53  ;;  %8616 = vmatprep.mubr.msk.f32.mxu1 %vm9566_vm0, %v11844_v17 }
0x3221   :  { %8864 = vmatprep.subr.bf16.mxu1 %v11845_v38  ;;  %8869 = vmatpush3.bf16.msra.mxu0 %v9842_v5 }
0x3222   :  { %8870 = vmatprep.subr.bf16.mxu0 %v11845_v38  ;;  %8627 = vmatprep.mubr.msk.f32.mxu0 %vm9566_vm0, %v11844_v17 }
0x3224   :  { %8866 = vmatpush3.bf16.msra.mxu1 %v10118_v9 }
0x3225   :  { %8872 = vmatpush3.bf16.msra.mxu0 %v9845_v7  ;;  %8873 = vmatprep.subr.bf16.mxu1 %v11845_v38 }
0x3226   :  { %8876 = vmatprep.subr.bf16.mxu0 %v11845_v38 }
0x32f2   :  { %v6493_v30 = vpop.f32.mrb[36].mxu1  ;;  %v11345_v20 = vpop.f32.mrb[36].mxu0 }
0x32f3   :  { %v6494_v52 = vadd.f32 %v11150_v6, %v6493_v30  ;;  %v8596_v59 = vpop.f32.mrb[37].mxu1  ;;  %v8607_v5 = vpop.f32.mrb[37].mxu0 }
0x32f5   :  { %v6498_v1 = vcombine.high %v6494_v52, %v6494_v52  ;;  %v6505_v19 = vrot.slane %v6494_v52, %v11857_v63 }
0x32f7   :  { %v6512_v60 = vrot.slane %v6498_v1, %v11857_v63  ;;  %v6513_v36 = vcombine.high %v6505_v19, %v6505_v19  ;;  %v6521_v37 = vrot.slane %v6505_v19, %v11857_v63 }
0x32f9   :  { %v6514_v7 = vcombine.high %v6512_v60, %v6512_v60  ;;  %v6528_v62 = vrot.slane %v6512_v60, %v11857_v63  ;;  %v6535_v50 = vrot.slane %v6513_v36, %v11857_v63  ;;  %v6543_v0 = vcombine.high %v6521_v37, %v6521_v37 }
0x32fa   :  { %v6550_v13 = vrot.slane %v6521_v37, %v9936_v26 }
0x32fb   :  { %v6544_v39 = vcombine.high %v6528_v62, %v6528_v62  ;;  %v6545_v6 = vcombine.high %v6535_v50, %v6535_v50  ;;  %v6554_v54 = vrot.slane %v6535_v50, %v9936_v26  ;;  %v6542_v10 = vrot.slane %v6514_v7, %v11857_v63 }
0x32fc   :  { %v6558_v2 = vrot.slane %v6543_v0, %v9936_v26  ;;  %v6566_v27 = vrot.slane %v6528_v62, %v9936_v26  ;;  %v6587_v42 = vadd.f32 %v6550_v13, %v11878_v8 }
0x32fd   :  { %v6562_v15 = vrot.slane %v6545_v6, %v9936_v26  ;;  %v6574_v31 = vrot.slane %v6544_v39, %v9936_v26  ;;  %v6588_v48 = vadd.f32 %v6554_v54, %v11879_v4  ;;  %v6546_v61 = vcombine.high %v6542_v10, %v6542_v10 }
0x32fe   :  { %v6589_v45 = vadd.f32 %v6558_v2, %v11880_v58  ;;  %9136 = vtanh.f32 %v6587_v42  ;;  %v6591_v57 = vadd.f32 %v6566_v27, %v11881_v43  ;;  %v6570_v3 = vrot.slane %v6542_v10, %v9936_v26 }
0x32ff   :  { %v6590_v33 = vadd.f32 %v6562_v15, %v11882_v14  ;;  %9138 = vtanh.f32 %v6588_v48  ;;  %v6593_v40 = vadd.f32 %v6574_v31, %v11883_v28  ;;  %v6578_v41 = vrot.slane %v6546_v61, %v9936_v26 }
0x3300   :  { %9140 = vtanh.f32 %v6589_v45  ;;  %v6592_v35 = vadd.f32 %v6570_v3, %v11927_v18 }
0x3301   :  { %9142 = vtanh.f32 %v6591_v57  ;;  %v6594_v21 = vadd.f32 %v6578_v41, %v9962_v55  ;;  %v11972_v57 = vld [vmem:[#allocation44_spill] sm:$0xff] }
0x3302   :  { %9144 = vtanh.f32 %v6590_v33 }
0x3303   :  { %9146 = vtanh.f32 %v6593_v40 }
0x3304   :  { %9148 = vtanh.f32 %v6592_v35 }
0x3305   :  { %9150 = vtanh.f32 %v6594_v21 }
0x3308   :  { %v9137_v32 = vpop.eup %9136 }
0x3309   :  { %v6603_v16 = vmul.f32 %v11971_v12, %v9137_v32  ;;  %v9139_v30 = vpop.eup %9138 }
0x330a   :  { %v9141_v52 = vpop.eup %9140  ;;  %v6604_v5 = vmul.f32 %v11971_v12, %v9139_v30 }
0x330b   :  { %v6611_v59 = vsel %vm263_vm1, %v6603_v16, 0.0  ;;  %v9143_v1 = vpop.eup %9142  ;;  %v6605_v60 = vmul.f32 %v11971_v12, %v9141_v52  ;;  %v5827_v16 = vsub.f32 1.0, %v11274_v25 }
0x330c   :  { %6612 = vadd.xlane.f32.xlu1 %v6611_v59  ;;  %v6614_v19 = vsel %vm263_vm1, %v6604_v5, 0.0  ;;  %v9145_v36 = vpop.eup %9144  ;;  %v6607_v37 = vmul.f32 %v11971_v12, %v9143_v1 }
0x330d   :  { %6615 = vadd.xlane.f32.xlu0 %v6614_v19  ;;  %v9147_v7 = vpop.eup %9146  ;;  %v6617_v0 = vsel %vm263_vm1, %v6605_v60, 0.0  ;;  %v6606_v13 = vmul.f32 %v11971_v12, %v9145_v36  ;;  %v11973_v60 = vld [vmem:[#allocation54_spill] sm:$0xff] }
0x330e   :  { %v6623_v62 = vsel %vm263_vm1, %v6607_v37, 0.0  ;;  %v6609_v50 = vmul.f32 %v11971_v12, %v9147_v7  ;;  %v9149_v39 = vpop.eup %9148  ;;  %v11399_v36 = vmul.f32 %v5827_v16, %v11973_v60 }
0x330f   :  { %v6620_v54 = vsel %vm263_vm1, %v6606_v13, 0.0  ;;  %v6608_v10 = vmul.f32 %v11971_v12, %v9149_v39  ;;  %v9151_v2 = vpop.eup %9150 }
0x3310   :  { %6624 = vadd.xlane.f32.xlu1 %v6623_v62  ;;  %v6629_v6 = vsel %vm263_vm1, %v6609_v50, 0.0  ;;  %v6610_v42 = vmul.f32 %v11971_v12, %v9151_v2  ;;  %vm6635_vm11 = vcmp.eq.f32.partialorder %v11399_v36, 0.0 }
0x3311   :  { %6618 = vadd.xlane.f32.xlu0 %v6617_v0  ;;  %v6626_v27 = vsel %vm263_vm1, %v6608_v10, 0.0 }
0x3312   :  { %v6632_v15 = vsel %vm263_vm1, %v6610_v42, 0.0 }
0x3314   :  { %6630 = vadd.xlane.f32.xlu1 %v6629_v6 }
0x3315   :  { %6621 = vadd.xlane.f32.xlu0 %v6620_v54 }
0x3319   :  { %6627 = vadd.xlane.f32.xlu0 %v6626_v27 }
0x331d   :  { %6633 = vadd.xlane.f32.xlu0 %v6632_v15 }
0x3399   :  { %v6613_v48 = vpop.xlane.xlu1 %6612 }
0x339a   :  { %v6616_v31 = vpop.xlane.xlu0 %6615  ;;  %v6647_v33 = vrot.slane %v6613_v48, %v11972_v57 }
0x339b   :  { %v6651_v61 = vrot.slane %v6616_v31, %v11972_v57 }
0x339d   :  { %v6625_v40 = vpop.xlane.xlu1 %6624  ;;  %v6676_v35 = vsel %vm836_vm3, %v6651_v61, %v6647_v33 }
0x339e   :  { %v6619_v45 = vpop.xlane.xlu0 %6618  ;;  %v6663_v30 = vrot.slane %v6625_v40, %v11972_v57 }
0x339f   :  { %v6655_v3 = vrot.slane %v6619_v45, %v11972_v57 }
0x33a1   :  { %v6677_v21 = vsel %vm838_vm4, %v6655_v3, %v6676_v35  ;;  %v6631_v59 = vpop.xlane.xlu1 %6630 }
0x33a2   :  { %v6622_v41 = vpop.xlane.xlu0 %6621  ;;  %v6671_v37 = vrot.slane %v6631_v59, %v11972_v57 }
0x33a3   :  { %v6659_v32 = vrot.slane %v6622_v41, %v11972_v57 }
0x33a5   :  { %v6678_v12 = vsel %vm840_vm5, %v6659_v32, %v6677_v21 }
0x33a6   :  { %v6628_v52 = vpop.xlane.xlu0 %6627  ;;  %v6679_v1 = vsel %vm842_vm6, %v6663_v30, %v6678_v12 }
0x33a7   :  { %v6667_v5 = vrot.slane %v6628_v52, %v11972_v57 }
0x33a9   :  { %v6680_v19 = vsel %vm844_vm7, %v6667_v5, %v6679_v1 }
0x33aa   :  { %v6634_v7 = vpop.xlane.xlu0 %6633  ;;  %v6681_v25 = vsel %vm846_vm8, %v6671_v37, %v6680_v19 }
0x33ab   :  { %v6675_v62 = vrot.slane %v6634_v7, %v11972_v57 }
0x33ad   :  { %v6682_v50 = vsel %vm848_vm9, %v6675_v62, %v6681_v25 }
0x33ae   :  { %v6684_v0 = vsel %vm6635_vm11, -inf, %v6682_v50  ;;  %vm11977_vm11 = vmmov %vm11970_vm15 }
0x33af   :  { %v6685_v13 = vsel %vm851_vm10, %v6684_v0, -inf }
0x33b0   :  { %6686 = vmax.xlane.f32.xlu1 %v6685_v13 }
0x343d   :  { %v6687_v39 = vpop.xlane.xlu1 %6686 }
0x343e   :  { %v6688_v6 = vsub.f32 %v6684_v0, %v6687_v39 }
0x3440   :  { %v6689_v54 = vmul.f32 1.442695, %v6688_v6 }
0x3442   :  { %9152 = vpow2.f32 %v6689_v54 }
0x344c   :  { %v9153_v10 = vpop.eup %9152 }
0x344d   :  { %v6691_v2 = vsel %vm851_vm10, %v9153_v10, 0.0 }
0x344e   :  { %6692 = vadd.xlane.f32.xlu0 %v6691_v2 }
0x34db   :  { %v6693_v27 = vpop.xlane.xlu0 %6692 }
0x34dc   :  { %9154 = vrcp.f32 %v6693_v27 }
0x34e6   :  { %v9155_v42 = vpop.eup %9154 }
0x34e7   :  { %v6695_v15 = vmul.f32 %v9155_v42, %v9153_v10 }
0x34e9   :  { %7906 = vst.msk [vmem:[#allocation19 + $0x30] sm:$0xff] %vm851_vm10, %v6695_v15  ;;  %v6732_v31 = vrot.slane %v6695_v15, %v10010_v22  ;;  %v6725_v48 = vrot.slane %v6695_v15, %v9936_v26  ;;  %v6739_v45 = vrot.slane %v6695_v15, %v10013_v23  ;;  %v6753_v61 = vrot.slane %v6695_v15, %v10022_v34 }
0x34ea   :  { %v6746_v3 = vrot.slane %v6695_v15, %v10016_v24  ;;  %v6767_v33 = vrot.slane %v6695_v15, %v10030_v51  ;;  %v6760_v40 = vrot.slane %v6695_v15, %v10026_v46  ;;  %v6696_v41 = vmul.f32 %v6695_v15, %v11399_v36 }
0x34eb   :  { %6734 = vbcast.lane.b32.xlu1 %v6732_v31, 256  ;;  %6727 = vbcast.lane.b32.xlu0 %v6725_v48, 256  ;;  %v6774_v32 = vrot.slane %v6695_v15, %v10034_v56 }
0x34ec   :  { %v6697_v35 = vsel %vm851_vm10, %v6696_v41, -inf }
0x34ef   :  { %6741 = vbcast.lane.b32.xlu1 %v6739_v45, 256  ;;  %6755 = vbcast.lane.b32.xlu0 %v6753_v61, 256 }
0x34f3   :  { %6748 = vbcast.lane.b32.xlu1 %v6746_v3, 256  ;;  %6769 = vbcast.lane.b32.xlu0 %v6767_v33, 256 }
0x34f7   :  { %6762 = vbcast.lane.b32.xlu1 %v6760_v40, 256 }
0x351b   :  { %6698 = vmax.xlane.f32.xlu1 %v6697_v35 }
0x352c   :  { %6776 = vbcast.lane.b32.xlu1 %v6774_v32, 256 }
0x355d   :  { %v6735_v21 = vpop.permute.xlu1 %6734  ;;  %v6728_v16 = vpop.permute.xlu0 %6727 }
0x355e   :  { %v6779_v52 = vmul.f32 %v6735_v21, %v11879_v4  ;;  %v6778_v59 = vmul.f32 %v6728_v16, %v11878_v8 }
0x3560   :  { %v6793_v37 = vsel %vm263_vm1, %v6779_v52, 0.0  ;;  %v6786_v7 = vsel %vm263_vm1, %v6778_v59, 0.0 }
0x3561   :  { %v6742_v12 = vpop.permute.xlu1 %6741  ;;  %v6756_v1 = vpop.permute.xlu0 %6755  ;;  %v6794_v0 = vrot.slane %v6793_v37, 4  ;;  %v6787_v13 = vrot.slane %v6786_v7, 4 }
0x3562   :  { %v6780_v5 = vmul.f32 %v6742_v12, %v11880_v58  ;;  %v6782_v39 = vmul.f32 %v6756_v1, %v11881_v43 }
0x3563   :  { %v6795_v27 = vadd.f32 %v6794_v0, %v6793_v37  ;;  %v6788_v42 = vadd.f32 %v6787_v13, %v6786_v7 }
0x3564   :  { %v6800_v62 = vsel %vm263_vm1, %v6780_v5, 0.0  ;;  %v6814_v15 = vsel %vm263_vm1, %v6782_v39, 0.0 }
0x3565   :  { %v6749_v30 = vpop.permute.xlu1 %6748  ;;  %v6801_v6 = vrot.slane %v6800_v62, 4  ;;  %v6770_v54 = vpop.permute.xlu0 %6769  ;;  %v6815_v3 = vrot.slane %v6814_v15, 4  ;;  %v6796_v33 = vrot.slane %v6795_v27, 2  ;;  %v6789_v40 = vrot.slane %v6788_v42, 2 }
0x3566   :  { %v6781_v19 = vmul.f32 %v6749_v30, %v11882_v14  ;;  %v6784_v31 = vmul.f32 %v6770_v54, %v11883_v28 }
0x3567   :  { %v6802_v48 = vadd.f32 %v6801_v6, %v6800_v62  ;;  %v6816_v16 = vadd.f32 %v6815_v3, %v6814_v15  ;;  %v6797_v52 = vadd.f32 %v6796_v33, %v6795_v27  ;;  %v6790_v59 = vadd.f32 %v6789_v40, %v6788_v42 }
0x3568   :  { %v6807_v25 = vsel %vm263_vm1, %v6781_v19, 0.0  ;;  %v6828_v35 = vsel %vm263_vm1, %v6784_v31, 0.0 }
0x3569   :  { %v6763_v60 = vpop.permute.xlu1 %6762  ;;  %v6808_v10 = vrot.slane %v6807_v25, 4  ;;  %v6803_v32 = vrot.slane %v6802_v48, 2  ;;  %v6829_v30 = vrot.slane %v6828_v35, 4  ;;  %v6817_v37 = vrot.slane %v6816_v16, 2 }
0x356a   :  { %v6783_v50 = vmul.f32 %v6763_v60, %v11927_v18  ;;  %v6798_v62 = vrot.slane %v6797_v52, 1 }
0x356b   :  { %v6809_v45 = vadd.f32 %v6808_v10, %v6807_v25  ;;  %v6804_v5 = vadd.f32 %v6803_v32, %v6802_v48  ;;  %v6830_v7 = vadd.f32 %v6829_v30, %v6828_v35  ;;  %v6791_v25 = vrot.slane %v6790_v59, 1 }
0x356c   :  { %v6821_v2 = vsel %vm263_vm1, %v6783_v50, 0.0  ;;  %v6799_v15 = vadd.f32 %v6798_v62, %v6797_v52 }
0x356d   :  { %v6822_v61 = vrot.slane %v6821_v2, 4  ;;  %v6810_v21 = vrot.slane %v6809_v45, 2  ;;  %v6805_v0 = vrot.slane %v6804_v5, 1  ;;  %v6831_v27 = vrot.slane %v6830_v7, 2 }
0x356e   :  { %v6792_v31 = vadd.f32 %v6791_v25, %v6790_v59 }
0x356f   :  { %v6823_v12 = vadd.f32 %v6822_v61, %v6821_v2  ;;  %v6811_v1 = vadd.f32 %v6810_v21, %v6809_v45  ;;  %v6818_v2 = vadd.f32 %v6817_v37, %v6816_v16  ;;  %v6806_v45 = vadd.f32 %v6805_v0, %v6804_v5 }
0x3570   :  { %v6832_v35 = vadd.f32 %v6831_v27, %v6830_v7  ;;  %v7040_v32 = vsel %vm836_vm3, %v6799_v15, %v6792_v31 }
0x3571   :  { %v6824_v19 = vrot.slane %v6823_v12, 2  ;;  %v6812_v39 = vrot.slane %v6811_v1, 1  ;;  %v6819_v40 = vrot.slane %v6818_v2, 1 }
0x3573   :  { %v6825_v6 = vadd.f32 %v6824_v19, %v6823_v12  ;;  %v6813_v61 = vadd.f32 %v6812_v39, %v6811_v1  ;;  %v7041_v12 = vsel %vm838_vm4, %v6806_v45, %v7040_v32  ;;  %v6820_v59 = vadd.f32 %v6819_v40, %v6818_v2 }
0x3574   :  { %v6833_v19 = vrot.slane %v6832_v35, 1 }
0x3575   :  { %v6826_v3 = vrot.slane %v6825_v6, 1  ;;  %v7042_v16 = vsel %vm840_vm5, %v6813_v61, %v7041_v12 }
0x3576   :  { %v6834_v62 = vadd.f32 %v6833_v19, %v6832_v35 }
0x3577   :  { %v6827_v30 = vadd.f32 %v6826_v3, %v6825_v6  ;;  %v11976_v3 = vld [vmem:[#allocation38_spill] sm:$0xff] }
0x35a8   :  { %v6699_v60 = vpop.xlane.xlu1 %6698 }
0x35a9   :  { %vm6700_vm12 = vcmp.eq.f32.partialorder %v6696_v41, %v6699_v60  ;;  %v7043_v60 = vsel %vm842_vm6, %v6820_v59, %v7042_v16 }
0x35aa   :  { %v6701_v50 = vsel %vm6700_vm12, %v9987_v47, 8  ;;  %v7044_v37 = vsel %vm844_vm7, %v6827_v30, %v7043_v60  ;;  %v9216_v60 = vld [vmem:[#allocation2 + $0x8] sm:$0xff]  ;;  %vm11978_vm12 = vmmov %vm11977_vm11 }
0x35ab   :  { %v6702_v13 = vsel %vm851_vm10, %v6701_v50, 2147483647  ;;  %v7045_v7 = vsel %vm846_vm8, %v6834_v62, %v7044_v37  ;;  %v9217_v37 = vld [vmem:[#allocation2] sm:$0xff] }
0x35ac   :  { %v6704_v54 = vshra.s32 %v6702_v13, 16  ;;  %v6777_v10 = vpop.permute.xlu1 %6776  ;;  %v6703_v0 = vand.u32 65535, %v6702_v13  ;;  %v11974_v13 = vld [vmem:[#allocation34_spill] sm:$0xff] }
0x35ad   :  { %v6785_v42 = vmul.f32 %v6777_v10, %v9962_v55 }
0x35ae   :  { %v6706_v48 = vcvt.s32.f32 %v6704_v54  ;;  %v6705_v6 = vcvt.s32.f32 %v6703_v0 }
0x35af   :  { %v6835_v41 = vsel %vm263_vm1, %v6785_v42, 0.0  ;;  %v11453_v42 = vld [vmem:[%s11727_s10] ss:$0 sm:$0xff] }
0x35b0   :  { %v6836_v33 = vrot.slane %v6835_v41, 4  ;;  %6707 = vmin.xlane.f32.xlu0 %v6706_v48 }
0x35b2   :  { %v6837_v21 = vadd.f32 %v6836_v33, %v6835_v41 }
0x35b4   :  { %v6838_v52 = vrot.slane %v6837_v21, 2 }
0x35b6   :  { %v6839_v5 = vadd.f32 %v6838_v52, %v6837_v21 }
0x35b8   :  { %v6840_v1 = vrot.slane %v6839_v5, 1 }
0x35ba   :  { %v6841_v25 = vadd.f32 %v6840_v1, %v6839_v5 }
0x35bc   :  { %v7046_v50 = vsel %vm848_vm9, %v6841_v25, %v7045_v7 }
0x35bd   :  { %8617 = vmatmul.mubr.msk.f32.vlgmr.msra.gmra.mrb[38].mxu1 %vm263_vm1, %v7046_v50 }
0x35be   :  { %8875 = vmatpush3.bf16.msra.mxu1 %v9849_v11  ;;  %8634 = vmatprep.mubr.msk.f32.mxu1 %vm9566_vm0, %v11844_v17 }
0x35bf   :  { %8882 = vmatprep.subr.bf16.mxu1 %v11845_v38 }
0x363d   :  { %v6708_v39 = vpop.xlane.xlu0 %6707 }
0x363e   :  { %vm6709_vm2 = vcmp.eq.f32.partialorder %v6706_v48, %v6708_v39  ;;  %v6714_v31 = vcvt.f32.s32 %v6708_v39 }
0x363f   :  { %v6710_v54 = vsel %vm6709_vm2, %v6705_v6, inf  ;;  %vm11979_vm2 = vmmov %vm11977_vm11 }
0x3640   :  { %6711 = vmin.xlane.f32.xlu1 %v6710_v54  ;;  %v6715_v45 = vshll.u32 %v6714_v31, 16  ;;  %v9218_v54 = vld [vmem:[#allocation2 + $0x18] sm:$0xff] }
0x3690   :  { %v7115_v10 = vpop.f32.mrb[38].mxu1 }
0x3691   :  { %v7116_v2 = vadd.f32 %v7115_v10, %v11345_v20  ;;  %v8618_v27 = vpop.f32.mrb[39].mxu1  ;;  %v11975_v20 = vld [vmem:[#allocation35_spill] sm:$0xff] }
0x3693   :  { %v7119_v11 = vadd.f32 %v11453_v42, %v7116_v2  ;;  %v9219_v2 = vld [vmem:[#allocation2 + $0x10] sm:$0xff] }
0x3695   :  { %9156 = vtanh.f32 %v7119_v11 }
0x369f   :  { %v9157_v15 = vpop.eup %9156 }
0x36a0   :  { %8628 = vmatmul.mubr.msk.f32.vlgmr.msra.gmra.mrb[38].mxu0 %vm263_vm1, %v9157_v15 }
0x36a1   :  { %8878 = vmatpush3.bf16.msra.mxu0 %v11974_v13  ;;  %8645 = vmatprep.mubr.msk.f32.mxu0 %vm9566_vm0, %v11844_v17 }
0x36a2   :  { %8879 = vmatprep.subr.bf16.mxu0 %v11845_v38 }
0x36a5   :  { %8881 = vmatpush3.bf16.msra.mxu0 %v11975_v20 }
0x36a6   :  { %8888 = vmatprep.subr.bf16.mxu0 %v11845_v38 }
0x36cd   :  { %v6712_v48 = vpop.xlane.xlu1 %6711 }
0x36ce   :  { %v6713_v41 = vcvt.f32.s32 %v6712_v48 }
0x36d0   :  { %v6716_v61 = vadd.s32 %v6715_v45, %v6713_v41 }
0x36d2   :  { %vm6717_vm14 = vcmp.eq.s32.totalorder %v9987_v47, %v6716_v61  ;;  %v11466_v33 = vsel %vm7121_vm13, %v6716_v61, %v11976_v3  ;;  %vm11980_vm13 = vmmov %vm11979_vm2 }
0x36d3   :  { %v11469_v40 = vsel %vm6717_vm14, 1.0, %v11844_v17  ;;  %vm11981_vm14 = vmmov %vm11979_vm2 }
0x36d4   :  { %v6852_v35 = vrot.slane %v11469_v40, %v10010_v22  ;;  %v6845_v32 = vrot.slane %v11469_v40, %v9936_v26  ;;  %v6866_v21 = vrot.slane %v11469_v40, %v10016_v24  ;;  %v6859_v12 = vrot.slane %v11469_v40, %v10013_v23 }
0x36d5   :  { %v6880_v16 = vrot.slane %v11469_v40, %v10026_v46  ;;  %v6873_v30 = vrot.slane %v11469_v40, %v10022_v34  ;;  %v6894_v52 = vrot.slane %v11469_v40, %v10034_v56  ;;  %v6887_v59 = vrot.slane %v11469_v40, %v10030_v51 }
0x36d6   :  { %6854 = vbcast.lane.b32.xlu1 %v6852_v35, 256  ;;  %6847 = vbcast.lane.b32.xlu0 %v6845_v32, 256  ;;  %v9220_v35 = vld [vmem:[#allocation2 + $0x28] sm:$0xff] }
0x36da   :  { %6868 = vbcast.lane.b32.xlu1 %v6866_v21, 256  ;;  %6861 = vbcast.lane.b32.xlu0 %v6859_v12, 256  ;;  %v9221_v21 = vld [vmem:[#allocation2 + $0x20] sm:$0xff] }
0x36de   :  { %6882 = vbcast.lane.b32.xlu1 %v6880_v16, 256  ;;  %6875 = vbcast.lane.b32.xlu0 %v6873_v30, 256 }
0x36e2   :  { %6896 = vbcast.lane.b32.xlu1 %v6894_v52, 256  ;;  %6889 = vbcast.lane.b32.xlu0 %v6887_v59, 256 }
0x3748   :  { %v6855_v19 = vpop.permute.xlu1 %6854  ;;  %v6848_v5 = vpop.permute.xlu0 %6847 }
0x3749   :  { %v6899_v1 = vmul.f32 %v9216_v60, %v6855_v19  ;;  %v6898_v62 = vmul.f32 %v9217_v37, %v6848_v5 }
0x374b   :  { %v6913_v25 = vsel %vm11970_vm15, %v6899_v1, 0.0  ;;  %v6906_v7 = vsel %vm11977_vm11, %v6898_v62, 0.0  ;;  %vm11982_vm15 = vmmov %vm11979_vm2 }
0x374c   :  { %v6914_v50 = vrot.slane %v6913_v25, 4  ;;  %v6907_v0 = vrot.slane %v6906_v7, 4  ;;  %v6869_v39 = vpop.permute.xlu1 %6868  ;;  %v6862_v6 = vpop.permute.xlu0 %6861  ;;  %vm11983_vm11 = vmmov %vm11979_vm2 }
0x374d   :  { %v6901_v10 = vmul.f32 %v9218_v54, %v6869_v39  ;;  %v6900_v27 = vmul.f32 %v9219_v2, %v6862_v6  ;;  %v9222_v39 = vld [vmem:[#allocation2 + $0x38] sm:$0xff]  ;;  %v9223_v54 = vld [vmem:[#allocation2 + $0x30] sm:$0xff] }
0x374e   :  { %v6915_v11 = vadd.f32 %v6914_v50, %v6913_v25  ;;  %v6908_v15 = vadd.f32 %v6907_v0, %v6906_v7 }
0x374f   :  { %v6927_v13 = vsel %vm11978_vm12, %v6901_v10, 0.0  ;;  %v6920_v20 = vsel %vm11979_vm2, %v6900_v27, 0.0  ;;  %vm11984_vm12 = vmmov %vm11979_vm2 }
0x3750   :  { %v6916_v31 = vrot.slane %v6915_v11, 2  ;;  %v6909_v48 = vrot.slane %v6908_v15, 2  ;;  %v6928_v45 = vrot.slane %v6927_v13, 4  ;;  %v6921_v41 = vrot.slane %v6920_v20, 4  ;;  %v6883_v61 = vpop.permute.xlu1 %6882  ;;  %v6876_v3 = vpop.permute.xlu0 %6875 }
0x3751   :  { %v6903_v32 = vmul.f32 %v9220_v35, %v6883_v61  ;;  %v6902_v12 = vmul.f32 %v9221_v21, %v6876_v3 }
0x3752   :  { %v6917_v16 = vadd.f32 %v6916_v31, %v6915_v11  ;;  %v6910_v30 = vadd.f32 %v6909_v48, %v6908_v15  ;;  %v6929_v52 = vadd.f32 %v6928_v45, %v6927_v13  ;;  %v6922_v59 = vadd.f32 %v6921_v41, %v6920_v20 }
0x3753   :  { %v6941_v19 = vsel %vm11980_vm13, %v6903_v32, 0.0  ;;  %v6934_v5 = vsel %vm11981_vm14, %v6902_v12, 0.0 }
0x3754   :  { %v6918_v60 = vrot.slane %v6917_v16, 1  ;;  %v6911_v1 = vrot.slane %v6910_v30, 1  ;;  %v6930_v37 = vrot.slane %v6929_v52, 2  ;;  %v6923_v62 = vrot.slane %v6922_v59, 2  ;;  %v6897_v25 = vpop.permute.xlu1 %6896  ;;  %v6890_v7 = vpop.permute.xlu0 %6889 }
0x3755   :  { %v6942_v50 = vrot.slane %v6941_v19, 4  ;;  %v6935_v0 = vrot.slane %v6934_v5, 4  ;;  %v6905_v6 = vmul.f32 %v9222_v39, %v6897_v25  ;;  %v6904_v10 = vmul.f32 %v9223_v54, %v6890_v7 }
0x3756   :  { %v6919_v2 = vadd.f32 %v6918_v60, %v6917_v16  ;;  %v6931_v27 = vadd.f32 %v6930_v37, %v6929_v52  ;;  %v6924_v11 = vadd.f32 %v6923_v62, %v6922_v59  ;;  %v6912_v48 = vadd.f32 %v6911_v1, %v6910_v30 }
0x3757   :  { %v6943_v15 = vadd.f32 %v6942_v50, %v6941_v19  ;;  %v6936_v13 = vadd.f32 %v6935_v0, %v6934_v5  ;;  %v6955_v20 = vsel %vm11982_vm15, %v6905_v6, 0.0  ;;  %v6948_v31 = vsel %vm11983_vm11, %v6904_v10, 0.0 }
0x3758   :  { %v6932_v45 = vrot.slane %v6931_v27, 1  ;;  %v6925_v41 = vrot.slane %v6924_v11, 1  ;;  %v6956_v61 = vrot.slane %v6955_v20, 4  ;;  %v6949_v32 = vrot.slane %v6948_v31, 4 }
0x3759   :  { %v6944_v3 = vrot.slane %v6943_v15, 2  ;;  %v6937_v35 = vrot.slane %v6936_v13, 2  ;;  %v7212_v52 = vsel %vm836_vm3, %v6919_v2, %v6912_v48 }
0x375a   :  { %v6926_v21 = vadd.f32 %v6925_v41, %v6924_v11  ;;  %v6957_v12 = vadd.f32 %v6956_v61, %v6955_v20  ;;  %v6950_v16 = vadd.f32 %v6949_v32, %v6948_v31  ;;  %v6933_v59 = vadd.f32 %v6932_v45, %v6931_v27  ;;  %v9224_v61 = vld [vmem:[%s11724_s7] ss:$0 sm:$0xff] }
0x375b   :  { %v6945_v25 = vadd.f32 %v6944_v3, %v6943_v15  ;;  %v6938_v7 = vadd.f32 %v6937_v35, %v6936_v13 }
0x375c   :  { %v6958_v19 = vrot.slane %v6957_v12, 2  ;;  %v7213_v5 = vsel %vm838_vm4, %v6926_v21, %v7212_v52  ;;  %v6951_v30 = vrot.slane %v6950_v16, 2 }
0x375d   :  { %v6946_v60 = vrot.slane %v6945_v25, 1  ;;  %v6939_v37 = vrot.slane %v6938_v7, 1  ;;  %v7214_v39 = vsel %vm840_vm5, %v6933_v59, %v7213_v5 }
0x375e   :  { %v6959_v1 = vadd.f32 %v6958_v19, %v6957_v12  ;;  %v6952_v50 = vadd.f32 %v6951_v30, %v6950_v16  ;;  %v9225_v30 = vld [vmem:[%s11729_s12] ss:$0 sm:$0xff] }
0x375f   :  { %v6940_v62 = vadd.f32 %v6939_v37, %v6938_v7  ;;  %v6947_v0 = vadd.f32 %v6946_v60, %v6945_v25 }
0x3760   :  { %v6960_v6 = vrot.slane %v6959_v1, 1  ;;  %v6953_v10 = vrot.slane %v6952_v50, 1 }
0x3761   :  { %v7215_v54 = vsel %vm842_vm6, %v6940_v62, %v7214_v39 }
0x3762   :  { %v6961_v11 = vadd.f32 %v6960_v6, %v6959_v1  ;;  %v6954_v15 = vadd.f32 %v6953_v10, %v6952_v50  ;;  %v7216_v2 = vsel %vm844_vm7, %v6947_v0, %v7215_v54 }
0x3764   :  { %v7217_v27 = vsel %vm846_vm8, %v6954_v15, %v7216_v2 }
0x3765   :  { %v7218_v13 = vsel %vm848_vm9, %v6961_v11, %v7217_v27 }
0x3766   :  { %8635 = vmatmul.mubr.msk.f32.vlgmr.msra.gmra.mrb[40].mxu1 %vm11984_vm12, %v7218_v13 }
0x3767   :  { %8884 = vmatpush3.bf16.msra.mxu1 %v9880_v44  ;;  %8656 = vmatprep.mubr.msk.f32.mxu1 %vm9566_vm0, %v11844_v17 }
0x3768   :  { %8885 = vmatprep.subr.bf16.mxu1 %v11845_v38 }
0x376b   :  { %8887 = vmatpush3.bf16.msra.mxu1 %v9894_v49 }
0x3773   :  { %v7200_v20 = vpop.f32.mrb[38].mxu0 }
0x3774   :  { %v8629_v31 = vpop.f32.mrb[39].mxu0 }
0x3839   :  { %v7287_v48 = vpop.f32.mrb[40].mxu1 }
0x383a   :  { %v7288_v45 = vadd.f32 %v7287_v48, %v7200_v20  ;;  %v8636_v41 = vpop.f32.mrb[41].mxu1 }
0x383c   :  { %v7291_v3 = vadd.f32 %v9224_v61, %v7288_v45 }
0x383e   :  { %v8042_v35 = vmul.f32 -1.442695, %v7291_v3  ;;  %9158 = vtanh.f32 %v7291_v3 }
0x3840   :  { %9160 = vpow2.f32 %v8042_v35 }
0x3848   :  { %v9159_v44 = vpop.eup %9158 }
0x3849   :  { %7301 = vrot.lane.b32.xlu0 %v9159_v44, %s9568_s2 }
0x384a   :  { %v9161_v32 = vpop.eup %9160 }
0x384b   :  { %v7295_v21 = vadd.f32 1.0, %v9161_v32 }
0x384d   :  { %9162 = vrcp.f32 %v7295_v21 }
0x3857   :  { %v9163_v49 = vpop.eup %9162 }
0x3858   :  { %7312 = vrot.lane.b32.xlu0 %v9163_v49, %s9568_s2  ;;  %v7299_v7 = vmul.f32 %v9163_v49, %v11327_v29 }
0x38bb   :  { %v7302_v12 = vpop.permute.xlu0 %7301 }
0x38bc   :  { %v7304_v25 = vmul.f32 %v9163_v49, %v7302_v12 }
0x38be   :  { %7306 = vrot.lane.b32.xlu1 %v7304_v25, %s9569_s24 }
0x38ca   :  { %v7313_v19 = vpop.permute.xlu0 %7312 }
0x3930   :  { %v7307_v16 = vpop.permute.xlu1 %7306 }
0x3931   :  { %v11515_v52 = vadd.f32 %v7307_v16, %v7299_v7  ;;  %v9226_v16 = vld [vmem:[%s11732_s15] ss:$0 sm:$0xff]  ;;  %s9573_s15 = smov [#allocation23]  }
0x3933   :  { %9164 = vtanh.f32 %v11515_v52 }
0x393d   :  { %v9165_v59 = vpop.eup %9164 }
0x393e   :  { %v7315_v5 = vmul.f32 %v9165_v59, %v7313_v19 }
0x3940   :  { %7317 = vrot.lane.b32.xlu1 %v7315_v5, %s9570_s9 }
0x39b2   :  { %v7318_v60 = vpop.permute.xlu1 %7317 }
0x39b3   :  { %8646 = vmatmul.mubr.msk.f32.vlgmr.msra.gmra.mrb[40].mxu0 %vm263_vm1, %v7318_v60  ;;  %8657 = vmatmul.mubr.msk.f32.vlgmr.msra.gmra.mrb[42].mxu1 %vm263_vm1, %v7318_v60 }
0x39b4   :  { %8890 = vmatpush3.bf16.msra.mxu0 %v10115_v53  ;;  %8667 = vmatprep.mubr.msk.f32.mxu0 %vm9566_vm0, %v11844_v17 }
0x39b5   :  { %8891 = vmatprep.subr.bf16.mxu0 %v11845_v38 }
0x39b8   :  { %8893 = vmatpush3.bf16.msra.mxu0 %v10118_v9 }
0x3a86   :  { %v7387_v29 = vpop.f32.mrb[40].mxu0  ;;  %v11526_v37 = vpop.f32.mrb[42].mxu1 }
0x3a87   :  { %v7388_v1 = vadd.f32 %v9225_v30, %v7387_v29  ;;  %v8647_v62 = vpop.f32.mrb[41].mxu0  ;;  %v8658_v50 = vpop.f32.mrb[43].mxu1 }
0x3a89   :  { %v7392_v0 = vcombine.high %v7388_v1, %v7388_v1  ;;  %v7399_v53 = vrot.slane %v7388_v1, %v11857_v63 }
0x3a8b   :  { %v7406_v39 = vrot.slane %v7392_v0, %v11857_v63  ;;  %v7407_v17 = vcombine.high %v7399_v53, %v7399_v53  ;;  %v7415_v38 = vrot.slane %v7399_v53, %v11857_v63 }
0x3a8d   :  { %v7408_v6 = vcombine.high %v7406_v39, %v7406_v39  ;;  %v7422_v9 = vrot.slane %v7406_v39, %v11857_v63  ;;  %v7429_v54 = vrot.slane %v7407_v17, %v11857_v63  ;;  %v7437_v10 = vcombine.high %v7415_v38, %v7415_v38 }
0x3a8e   :  { %v7444_v11 = vrot.slane %v7415_v38, %v9936_v26 }
0x3a8f   :  { %v7436_v15 = vrot.slane %v7408_v6, %v11857_v63  ;;  %v7439_v2 = vcombine.high %v7429_v54, %v7429_v54  ;;  %v7448_v27 = vrot.slane %v7429_v54, %v9936_v26  ;;  %v7452_v13 = vrot.slane %v7437_v10, %v9936_v26 }
0x3a90   :  { %v7460_v20 = vrot.slane %v7422_v9, %v9936_v26  ;;  %v7481_v31 = vadd.f32 %v7444_v11, %v11878_v8  ;;  %v7438_v61 = vcombine.high %v7422_v9, %v7422_v9 }
0x3a91   :  { %v7440_v48 = vcombine.high %v7436_v15, %v7436_v15  ;;  %v7456_v45 = vrot.slane %v7439_v2, %v9936_v26  ;;  %v7464_v41 = vrot.slane %v7436_v15, %v9936_v26  ;;  %v7482_v3 = vadd.f32 %v7448_v27, %v11879_v4 }
0x3a92   :  { %v7483_v35 = vadd.f32 %v7452_v13, %v11880_v58  ;;  %9166 = vtanh.f32 %v7481_v31  ;;  %v7485_v44 = vadd.f32 %v7460_v20, %v11881_v43  ;;  %v7468_v49 = vrot.slane %v7438_v61, %v9936_v26 }
0x3a93   :  { %v7472_v63 = vrot.slane %v7440_v48, %v9936_v26  ;;  %v7486_v32 = vadd.f32 %v7464_v41, %v11927_v18  ;;  %9168 = vtanh.f32 %v7482_v3  ;;  %v7484_v21 = vadd.f32 %v7456_v45, %v11882_v14 }
0x3a94   :  { %9170 = vtanh.f32 %v7483_v35  ;;  %v7487_v25 = vadd.f32 %v7468_v49, %v11883_v28 }
0x3a95   :  { %v7488_v12 = vadd.f32 %v7472_v63, %v9962_v55  ;;  %9172 = vtanh.f32 %v7485_v44 }
0x3a96   :  { %9174 = vtanh.f32 %v7486_v32  ;;  %v6720_v32 = vsub.f32 1.0, %v11469_v40 }
0x3a97   :  { %9176 = vtanh.f32 %v7484_v21 }
0x3a98   :  { %9178 = vtanh.f32 %v7488_v12 }
0x3a99   :  { %9180 = vtanh.f32 %v7487_v25 }
0x3a9c   :  { %v9167_v7 = vpop.eup %9166 }
0x3a9d   :  { %v7497_v59 = vmul.f32 %v9226_v16, %v9167_v7  ;;  %v9169_v19 = vpop.eup %9168 }
0x3a9e   :  { %v9171_v5 = vpop.eup %9170  ;;  %v7498_v29 = vmul.f32 %v9226_v16, %v9169_v19 }
0x3a9f   :  { %v7505_v60 = vsel %vm263_vm1, %v7497_v59, 0.0  ;;  %v7499_v30 = vmul.f32 %v9226_v16, %v9171_v5  ;;  %v9173_v1 = vpop.eup %9172  ;;  %v6721_v5 = vmul.f32 %v6720_v32, %v11399_v36 }
0x3aa0   :  { %7506 = vadd.xlane.f32.xlu0 %v7505_v60  ;;  %v7508_v62 = vsel %vm263_vm1, %v7498_v29, 0.0  ;;  %v9175_v50 = vpop.eup %9174  ;;  %v7501_v17 = vmul.f32 %v9226_v16, %v9173_v1 }
0x3aa1   :  { %7509 = vadd.xlane.f32.xlu1 %v7508_v62  ;;  %v9177_v0 = vpop.eup %9176  ;;  %v7511_v53 = vsel %vm263_vm1, %v7499_v30, 0.0  ;;  %v7502_v39 = vmul.f32 %v9226_v16, %v9175_v50  ;;  %vm7529_vm0 = vcmp.eq.f32.partialorder %v6721_v5, 0.0 }
0x3aa2   :  { %v9179_v38 = vpop.eup %9178  ;;  %v7517_v54 = vsel %vm263_vm1, %v7501_v17, 0.0  ;;  %v7500_v10 = vmul.f32 %v9226_v16, %v9177_v0 }
0x3aa3   :  { %v7520_v6 = vsel %vm263_vm1, %v7502_v39, 0.0  ;;  %v7504_v9 = vmul.f32 %v9226_v16, %v9179_v38  ;;  %v9181_v11 = vpop.eup %9180 }
0x3aa4   :  { %7512 = vadd.xlane.f32.xlu0 %v7511_v53  ;;  %v7514_v2 = vsel %vm263_vm1, %v7500_v10, 0.0  ;;  %v7503_v27 = vmul.f32 %v9226_v16, %v9181_v11 }
0x3aa5   :  { %7521 = vadd.xlane.f32.xlu1 %v7520_v6  ;;  %v7526_v15 = vsel %vm263_vm1, %v7504_v9, 0.0 }
0x3aa6   :  { %v7523_v13 = vsel %vm263_vm1, %v7503_v27, 0.0 }
0x3aa8   :  { %7518 = vadd.xlane.f32.xlu0 %v7517_v54 }
0x3aa9   :  { %7527 = vadd.xlane.f32.xlu1 %v7526_v15 }
0x3aac   :  { %7515 = vadd.xlane.f32.xlu0 %v7514_v2 }
0x3ab0   :  { %7524 = vadd.xlane.f32.xlu0 %v7523_v13 }
0x3b2d   :  { %v7507_v20 = vpop.xlane.xlu0 %7506 }
0x3b2e   :  { %v7510_v31 = vpop.xlane.xlu1 %7509  ;;  %v7541_v61 = vrot.slane %v7507_v20, %v11972_v57  ;;  %v11986_v20 = vld [vmem:[#allocation48_spill] sm:$0xff] }
0x3b2f   :  { %v7545_v45 = vrot.slane %v7510_v31, %v11972_v57 }
0x3b31   :  { %v7513_v48 = vpop.xlane.xlu0 %7512  ;;  %v7570_v63 = vsel %vm836_vm3, %v7545_v45, %v7541_v61 }
0x3b32   :  { %v7522_v3 = vpop.xlane.xlu1 %7521  ;;  %v7549_v35 = vrot.slane %v7513_v48, %v11972_v57 }
0x3b33   :  { %v7561_v25 = vrot.slane %v7522_v3, %v11972_v57 }
0x3b34   :  { %v7571_v49 = vsel %vm838_vm4, %v7549_v35, %v7570_v63 }
0x3b35   :  { %v7519_v41 = vpop.xlane.xlu0 %7518 }
0x3b36   :  { %v7557_v12 = vrot.slane %v7519_v41, %v11972_v57  ;;  %v7528_v7 = vpop.xlane.xlu1 %7527 }
0x3b37   :  { %v7569_v29 = vrot.slane %v7528_v7, %v11972_v57 }
0x3b39   :  { %v7516_v44 = vpop.xlane.xlu0 %7515 }
0x3b3a   :  { %v7553_v21 = vrot.slane %v7516_v44, %v11972_v57 }
0x3b3c   :  { %v7572_v16 = vsel %vm840_vm5, %v7553_v21, %v7571_v49 }
0x3b3d   :  { %v7573_v59 = vsel %vm842_vm6, %v7557_v12, %v7572_v16  ;;  %v7525_v19 = vpop.xlane.xlu0 %7524 }
0x3b3e   :  { %v7565_v60 = vrot.slane %v7525_v19, %v11972_v57  ;;  %v7574_v40 = vsel %vm844_vm7, %v7561_v25, %v7573_v59 }
0x3b40   :  { %v7575_v30 = vsel %vm846_vm8, %v7565_v60, %v7574_v40 }
0x3b41   :  { %v7576_v1 = vsel %vm848_vm9, %v7569_v29, %v7575_v30 }
0x3b42   :  { %v7578_v62 = vsel %vm7529_vm0, -inf, %v7576_v1 }
0x3b43   :  { %v7579_v50 = vsel %vm851_vm10, %v7578_v62, -inf }
0x3b44   :  { %7580 = vmax.xlane.f32.xlu0 %v7579_v50 }
0x3bd1   :  { %v7581_v0 = vpop.xlane.xlu0 %7580 }
0x3bd2   :  { %v7582_v53 = vsub.f32 %v7578_v62, %v7581_v0 }
0x3bd4   :  { %v7583_v39 = vmul.f32 1.442695, %v7582_v53 }
0x3bd6   :  { %9182 = vpow2.f32 %v7583_v39 }
0x3be0   :  { %v9183_v36 = vpop.eup %9182 }
0x3be1   :  { %v7585_v17 = vsel %vm851_vm10, %v9183_v36, 0.0 }
0x3be2   :  { %7586 = vadd.xlane.f32.xlu1 %v7585_v17 }
0x3c6f   :  { %v7587_v38 = vpop.xlane.xlu1 %7586 }
0x3c70   :  { %9184 = vrcp.f32 %v7587_v38 }
0x3c7a   :  { %v9185_v6 = vpop.eup %9184 }
0x3c7b   :  { %v7589_v9 = vmul.f32 %v9185_v6, %v9183_v36 }
0x3c7d   :  { %7907 = vst.msk [vmem:[#allocation19 + $0x38] sm:$0xff] %vm851_vm10, %v7589_v9  ;;  %v7621_v54 = vrot.slane %v7589_v9, %v10010_v22  ;;  %v7614_v10 = vrot.slane %v7589_v9, %v9936_v26  ;;  %v7628_v11 = vrot.slane %v7589_v9, %v10013_v23  ;;  %v7642_v15 = vrot.slane %v7589_v9, %v10022_v34  ;;  %v11985_v34 = vld [vmem:[#allocation45_spill] sm:$0xff] }
0x3c7e   :  { %v7635_v2 = vrot.slane %v7589_v9, %v10016_v24  ;;  %v7656_v27 = vrot.slane %v7589_v9, %v10030_v51  ;;  %v7649_v13 = vrot.slane %v7589_v9, %v10026_v46  ;;  %v7663_v22 = vrot.slane %v7589_v9, %v10034_v56  ;;  %v11987_v24 = vld [vmem:[#allocation50_spill] sm:$0xff] }
0x3c7f   :  { %7623 = vbcast.lane.b32.xlu1 %v7621_v54, 256  ;;  %7616 = vbcast.lane.b32.xlu0 %v7614_v10, 256  ;;  %v11592_v26 = vmul.f32 %v7589_v9, %v6721_v5 }
0x3c81   :  { %v7591_v23 = vsel %vm851_vm10, %v11592_v26, -inf }
0x3c83   :  { %7630 = vbcast.lane.b32.xlu1 %v7628_v11, 256  ;;  %7644 = vbcast.lane.b32.xlu0 %v7642_v15, 256 }
0x3c87   :  { %7637 = vbcast.lane.b32.xlu1 %v7635_v2, 256  ;;  %7658 = vbcast.lane.b32.xlu0 %v7656_v27, 256 }
0x3c8b   :  { %7651 = vbcast.lane.b32.xlu1 %v7649_v13, 256 }
0x3c8f   :  { %7665 = vbcast.lane.b32.xlu1 %v7663_v22, 256 }
0x3ca6   :  { %7592 = vmax.xlane.f32.xlu0 %v7591_v23 }
0x3cbc   :  { %2541 = vperm.xlu0 %8919, %v11985_v34  }
0x3cc0   :  { %2550 = vperm.xlu0 %8919, %v11986_v20  }
0x3cc4   :  { %2556 = vperm.xlu0 %8919, %v11987_v24  }
0x3cf1   :  { %v7624_v51 = vpop.permute.xlu1 %7623  ;;  %v7617_v31 = vpop.permute.xlu0 %7616 }
0x3cf2   :  { %v7668_v46 = vmul.f32 %v7624_v51, %v11879_v4  ;;  %v7667_v48 = vmul.f32 %v7617_v31, %v11878_v8 }
0x3cf4   :  { %v7682_v56 = vsel %vm263_vm1, %v7668_v46, 0.0  ;;  %v7675_v45 = vsel %vm263_vm1, %v7667_v48, 0.0 }
0x3cf5   :  { %v7683_v41 = vrot.slane %v7682_v56, 4  ;;  %v7676_v61 = vrot.slane %v7675_v45, 4  ;;  %v7631_v3 = vpop.permute.xlu1 %7630  ;;  %v7645_v35 = vpop.permute.xlu0 %7644 }
0x3cf6   :  { %v7669_v63 = vmul.f32 %v7631_v3, %v11880_v58  ;;  %v7671_v44 = vmul.f32 %v7645_v35, %v11881_v43 }
0x3cf7   :  { %v7684_v32 = vadd.f32 %v7683_v41, %v7682_v56  ;;  %v7677_v21 = vadd.f32 %v7676_v61, %v7675_v45 }
0x3cf8   :  { %v7689_v49 = vsel %vm263_vm1, %v7669_v63, 0.0  ;;  %v7703_v4 = vsel %vm263_vm1, %v7671_v44, 0.0 }
0x3cf9   :  { %v7685_v12 = vrot.slane %v7684_v32, 2  ;;  %v7678_v8 = vrot.slane %v7677_v21, 2  ;;  %v7690_v25 = vrot.slane %v7689_v49, 4  ;;  %v7704_v7 = vrot.slane %v7703_v4, 4  ;;  %v7638_v16 = vpop.permute.xlu1 %7637  ;;  %v7659_v59 = vpop.permute.xlu0 %7658 }
0x3cfa   :  { %v7670_v19 = vmul.f32 %v7638_v16, %v11882_v14  ;;  %v7673_v5 = vmul.f32 %v7659_v59, %v11883_v28 }
0x3cfb   :  { %v7686_v60 = vadd.f32 %v7685_v12, %v7684_v32  ;;  %v7691_v58 = vadd.f32 %v7690_v25, %v7689_v49  ;;  %v7705_v40 = vadd.f32 %v7704_v7, %v7703_v4  ;;  %v7679_v43 = vadd.f32 %v7678_v8, %v7677_v21 }
0x3cfc   :  { %v7696_v29 = vsel %vm263_vm1, %v7670_v19, 0.0  ;;  %v7717_v30 = vsel %vm263_vm1, %v7673_v5, 0.0 }
0x3cfd   :  { %v7692_v1 = vrot.slane %v7691_v58, 2  ;;  %v7652_v62 = vpop.permute.xlu1 %7651  ;;  %v7706_v50 = vrot.slane %v7705_v40, 2  ;;  %v7697_v0 = vrot.slane %v7696_v29, 4  ;;  %v7718_v53 = vrot.slane %v7717_v30, 4 }
0x3cfe   :  { %v7672_v39 = vmul.f32 %v7652_v62, %v11927_v18  ;;  %v7687_v36 = vrot.slane %v7686_v60, 1  ;;  %v7680_v14 = vrot.slane %v7679_v43, 1 }
0x3cff   :  { %v7693_v17 = vadd.f32 %v7692_v1, %v7691_v58  ;;  %v7698_v38 = vadd.f32 %v7697_v0, %v7696_v29  ;;  %v7719_v28 = vadd.f32 %v7718_v53, %v7717_v30  ;;  %v7707_v11 = vadd.f32 %v7706_v50, %v7705_v40  ;;  %v11989_v29 = vld [vmem:[#allocation47_spill] sm:$0xff]  ;;  %v11990_v30 = vld [vmem:[#allocation49_spill] sm:$0xff] }
0x3d00   :  { %v7710_v6 = vsel %vm263_vm1, %v7672_v39, 0.0  ;;  %v7688_v22 = vadd.f32 %v7687_v36, %v7686_v60  ;;  %v7681_v23 = vadd.f32 %v7680_v14, %v7679_v43  ;;  %v11988_v43 = vld [vmem:[#allocation46_spill] sm:$0xff]  ;;  %v11991_v1 = vld [vmem:[#allocation51_spill] sm:$0xff] }
0x3d01   :  { %v7694_v9 = vrot.slane %v7693_v17, 1  ;;  %v7711_v54 = vrot.slane %v7710_v6, 4  ;;  %v7666_v10 = vpop.permute.xlu1 %7665  ;;  %v7699_v15 = vrot.slane %v7698_v38, 2  ;;  %v7720_v2 = vrot.slane %v7719_v28, 2 }
0x3d02   :  { %v7674_v27 = vmul.f32 %v7666_v10, %v9962_v55  ;;  %v7708_v31 = vrot.slane %v7707_v11, 1  ;;  %v7809_v41 = vsel %vm836_vm3, %v7688_v22, %v7681_v23 }
0x3d03   :  { %v7712_v13 = vadd.f32 %v7711_v54, %v7710_v6  ;;  %v7700_v34 = vadd.f32 %v7699_v15, %v7698_v38  ;;  %v7695_v20 = vadd.f32 %v7694_v9, %v7693_v17  ;;  %v7721_v48 = vadd.f32 %v7720_v2, %v7719_v28 }
0x3d04   :  { %v7724_v18 = vsel %vm263_vm1, %v7674_v27, 0.0  ;;  %v7709_v63 = vadd.f32 %v7708_v31, %v7707_v11 }
0x3d05   :  { %v7713_v24 = vrot.slane %v7712_v13, 2  ;;  %v7725_v51 = vrot.slane %v7724_v18, 4  ;;  %v7701_v46 = vrot.slane %v7700_v34, 1  ;;  %v7810_v3 = vsel %vm838_vm4, %v7695_v20, %v7809_v41  ;;  %v11992_v20 = vld [vmem:[#allocation52_spill] sm:$0xff] }
0x3d06   :  { %v7722_v32 = vrot.slane %v7721_v48, 1 }
0x3d07   :  { %v7714_v56 = vadd.f32 %v7713_v24, %v7712_v13  ;;  %v7726_v45 = vadd.f32 %v7725_v51, %v7724_v18  ;;  %v7702_v61 = vadd.f32 %v7701_v46, %v7700_v34 }
0x3d08   :  { %v7723_v25 = vadd.f32 %v7722_v32, %v7721_v48 }
0x3d09   :  { %v7715_v55 = vrot.slane %v7714_v56, 1  ;;  %v7727_v35 = vrot.slane %v7726_v45, 2  ;;  %v7811_v44 = vsel %vm840_vm5, %v7702_v61, %v7810_v3 }
0x3d0a   :  { %v7812_v4 = vsel %vm842_vm6, %v7709_v63, %v7811_v44 }
0x3d0b   :  { %v7716_v21 = vadd.f32 %v7715_v55, %v7714_v56  ;;  %v7728_v49 = vadd.f32 %v7727_v35, %v7726_v45 }
0x3d0d   :  { %v7729_v12 = vrot.slane %v7728_v49, 1  ;;  %v7813_v8 = vsel %vm844_vm7, %v7716_v21, %v7812_v4 }
0x3d0e   :  { %v7814_v16 = vsel %vm846_vm8, %v7723_v25, %v7813_v8 }
0x3d0f   :  { %v7730_v7 = vadd.f32 %v7729_v12, %v7728_v49 }
0x3d11   :  { %v7815_v59 = vsel %vm848_vm9, %v7730_v7, %v7814_v16 }
0x3d12   :  { %8668 = vmatmul.mubr.msk.f32.vlgmr.msra.gmra.mrb[42].mxu0 %vm263_vm1, %v7815_v59 }
0x3d33   :  { %v7593_v19 = vpop.xlane.xlu0 %7592 }
0x3d34   :  { %vm7594_vm2 = vcmp.eq.f32.partialorder %v11592_v26, %v7593_v19 }
0x3d35   :  { %v7595_v5 = vsel %vm7594_vm2, %v9987_v47, 8 }
0x3d36   :  { %v7596_v60 = vsel %vm851_vm10, %v7595_v5, 2147483647 }
0x3d37   :  { %v7598_v58 = vshra.s32 %v7596_v60, 16  ;;  %v7597_v62 = vand.u32 65535, %v7596_v60 }
0x3d39   :  { %v7600_v40 = vcvt.s32.f32 %v7598_v58  ;;  %v7599_v50 = vcvt.s32.f32 %v7597_v62 }
0x3d3b   :  { %7601 = vmin.xlane.f32.xlu1 %v7600_v40  ;;  %v2542_v0 = vpop.permute.xlu0 %2541 }
0x3d3c   :  { %v2591_v14 = vrot.slane %v2542_v0, %v11972_v57 }
0x3d3f   :  { %v2551_v17 = vpop.permute.xlu0 %2550 }
0x3d40   :  { %v2603_v9 = vrot.slane %v2551_v17, %v11972_v57 }
0x3d43   :  { %v2557_v10 = vpop.permute.xlu0 %2556 }
0x3d44   :  { %v2611_v27 = vrot.slane %v2557_v10, %v11972_v57 }
0x3d4c   :  { %2544 = vperm.xlu1 %8918, %v11988_v43  }
0x3d50   :  { %2547 = vperm.xlu1 %8918, %v11989_v29  }
0x3d54   :  { %2553 = vperm.xlu1 %8918, %v11990_v30  }
0x3d58   :  { %2559 = vperm.xlu1 %8918, %v11991_v1  }
0x3d5c   :  { %7911 = vrot.lane.b32.xlu1 %v11515_v52, %s9570_s9  ;;  %s7953_s9 = sshll.u32 %s9573_s15, 4  ;;  %s7954_s9 = int_to_ptr.vmem [resolvable:$true] %s7953_s9 }
0x3d5d   :  { %s9447_s6 = scalar_lea.vmem %s7954_s9, 128  ;;  %p9452_p11 = scmp.lt.s32.totalorder %s7954_s9, %s7954_s9 }
0x3d5e   :  { %p9448_p10 = scmp.ne.s32.totalorder %s7954_s9, %s9447_s6  ;;  %p9453_p12 = scmp.lt.s32.totalorder %s9447_s6, %s9447_s6 }
0x3d60   :  { %p9454_p13 = por %p9453_p12, %p9452_p11 }
0x3d62   :  { %p9455_p0 = pnand %p9454_p13, %p9448_p10 }
0x3dc8   :  { %v7602_v26 = vpop.xlane.xlu1 %7601 }
0x3dc9   :  { %vm7603_vm13 = vcmp.eq.f32.partialorder %v7600_v40, %v7602_v26 }
0x3dca   :  { %v7604_v53 = vsel %vm7603_vm13, %v7599_v50, inf }
0x3dcb   :  { %7605 = vmin.xlane.f32.xlu0 %v7604_v53 }
0x3dcc   :  { %v2545_v39 = vpop.permute.xlu1 %2544 }
0x3dcd   :  { %v2595_v36 = vrot.slane %v2545_v39, %v11972_v57 }
0x3dcf   :  { %v2652_v6 = vsel %vm836_vm3, %v2595_v36, %v2591_v14 }
0x3dd0   :  { %v2548_v38 = vpop.permute.xlu1 %2547 }
0x3dd1   :  { %v2599_v28 = vrot.slane %v2548_v38, %v11972_v57 }
0x3dd3   :  { %v2653_v52 = vsel %vm838_vm4, %v2599_v28, %v2652_v6 }
0x3dd4   :  { %v2554_v54 = vpop.permute.xlu1 %2553  ;;  %v2654_v15 = vsel %vm840_vm5, %v2603_v9, %v2653_v52 }
0x3dd5   :  { %v2607_v11 = vrot.slane %v2554_v54, %v11972_v57 }
0x3dd7   :  { %v2655_v2 = vsel %vm842_vm6, %v2607_v11, %v2654_v15 }
0x3dd8   :  { %v2560_v13 = vpop.permute.xlu1 %2559  ;;  %v2656_v23 = vsel %vm844_vm7, %v2611_v27, %v2655_v2 }
0x3dd9   :  { %v2615_v22 = vrot.slane %v2560_v13, %v11972_v57 }
0x3ddb   :  { %v11645_v34 = vsel %vm846_vm8, %v2615_v22, %v2656_v23 }
0x3ddc   :  { %v7912_v18 = vpop.permute.xlu1 %7911 }
0x3ddd   :  { %7914 = vst.msk [vmem:[#allocation23] sm:$0xff] %vm263_vm1, %v7912_v18 }
0x3de1   :  { %2562 = vperm.xlu0 %8919, %v11992_v20  }
0x3de5   :  { %v7884_v24 = vpop.f32.mrb[42].mxu0 }
0x3de6   :  { %v7885_v51 = vadd.f32 %v7884_v24, %v11526_v37  ;;  %v8669_v31 = vpop.f32.mrb[43].mxu0 }
0x3de8   :  { %v7888_v46 = vadd.f32 %v11453_v42, %v7885_v51 }
0x3dea   :  { %9186 = vtanh.f32 %v7888_v46 }
0x3deb   :  { %9458 = shalt.err (!%p9455_p0)
}
0x3dec   :  { %s9459_s27 = scalar_lea.hbm %s11736_s19, 128 }
0x3ded   :  { %p9460_p1 = scmp.ne.s32.totalorder %s11736_s19, %s9459_s27  ;;  %p9463_p2 = scmp.lt.u32.totalorder %s9459_s27, %s11736_s19 }
0x3def   :  { %p9465_p3 = pnand %p9463_p2, %p9460_p1 }
0x3df1   :  { %9468 = shalt.err (!%p9465_p3)
}
0x3df2   :  { %7956 = dma.vmem_to_hbm [thread:$0]  %s7954_s9, 128, %s11736_s19, [#allocation24]   ;;  %v7608_v37 = vcvt.f32.s32 %v7602_v26  ;;  %vm7890_vm3 = vcmp.eq.s32.totalorder %v9987_v47, 7 }
0x3df3   :  { %s9574_s16 = smov [#allocation20]   ;;  %s9575_s11 = smov [#allocation22]  }
0x3df4   :  { %v9187_v42 = vpop.eup %9186  ;;  %v7609_v56 = vshll.u32 %v7608_v37, 16  ;;  %s7933_s3 = sshll.u32 %s9574_s16, 4  ;;  %s7943_s25 = sshll.u32 %s9575_s11, 4  ;;  %s7934_s3 = int_to_ptr.vmem [resolvable:$true] %s7933_s3  ;;  %s11666_s25 = int_to_ptr.vmem [resolvable:$true] %s7943_s25 }
0x3df5   :  { %7909 = vst.msk [vmem:[#allocation22] sm:$0xff] %vm263_vm1, %v9187_v42  ;;  %s9576_s19 = smov [#allocation19]   ;;  %s9469_s29 = scalar_lea.vmem %s7934_s3, 128 }
0x3df6   :  { %s7920_s13 = sshll.u32 %s9576_s19, 4  ;;  %p9470_p4 = scmp.ne.s32.totalorder %s7934_s3, %s9469_s29  ;;  %s7921_s13 = int_to_ptr.vmem [resolvable:$true] %s7920_s13 }
0x3df7   :  { %p9474_p5 = scmp.lt.s32.totalorder %s7934_s3, %s7934_s3  ;;  %p9475_p6 = scmp.lt.s32.totalorder %s9469_s29, %s9469_s29 }
0x3df9   :  { %p9476_p7 = por %p9475_p6, %p9474_p5 }
0x3dfb   :  { %p9477_p8 = pnand %p9476_p7, %p9470_p4 }
0x3e58   :  { %v7606_v48 = vpop.xlane.xlu0 %7605 }
0x3e59   :  { %v7607_v45 = vcvt.f32.s32 %v7606_v48 }
0x3e5b   :  { %v7610_v41 = vadd.s32 %v7609_v56, %v7607_v45 }
0x3e5d   :  { %v7891_v61 = vsel %vm7890_vm3, %v7610_v41, %v11466_v33 }
0x3e5e   :  { %7908 = vst.msk [vmem:[#allocation20] sm:$0xff] %vm851_vm10, %v7891_v61 }
0x3e5f   :  { %9480 = shalt.err (!%p9477_p8)
}
0x3e60   :  { %s9481_s10 = scalar_lea.hbm %s11734_s17, 128 }
0x3e61   :  { %p9482_p9 = scmp.ne.s32.totalorder %s11734_s17, %s9481_s10  ;;  %p9485_p10 = scmp.lt.u32.totalorder %s9481_s10, %s11734_s17 }
0x3e63   :  { %p9487_p11 = pnand %p9485_p10, %p9482_p9 }
0x3e65   :  { %9490 = shalt.err (!%p9487_p11)
}
0x3e66   :  { %7936 = dma.vmem_to_hbm [thread:$0]  %s7934_s3, 128, %s11734_s17, [#allocation21]   ;;  %v2563_v47 = vpop.permute.xlu0 %2562 }
0x3e67   :  { %s9491_s9 = scalar_lea.vmem %s11666_s25, 128  ;;  %p9496_p13 = scmp.lt.s32.totalorder %s11666_s25, %s11666_s25 }
0x3e68   :  { %p9492_p12 = scmp.ne.s32.totalorder %s11666_s25, %s9491_s9  ;;  %p9497_p0 = scmp.lt.s32.totalorder %s9491_s9, %s9491_s9 }
0x3e6a   :  { %p9498_p1 = por %p9497_p0, %p9496_p13 }
0x3e6c   :  { %p9499_p2 = pnand %p9498_p1, %p9492_p12 }
0x3e6e   :  { %9502 = shalt.err (!%p9499_p2)
}
0x3e6f   :  { %s9503_s21 = scalar_lea.hbm %s11735_s18, 128 }
0x3e70   :  { %p9504_p3 = scmp.ne.s32.totalorder %s11735_s18, %s9503_s21  ;;  %p9507_p4 = scmp.lt.u32.totalorder %s9503_s21, %s11735_s18 }
0x3e72   :  { %p9509_p5 = pnand %p9507_p4, %p9504_p3 }
0x3e74   :  { %9512 = shalt.err (!%p9509_p5)
}
0x3e75   :  { %7946 = dma.vmem_to_hbm [thread:$0]  %s11666_s25, 128, %s11735_s18, [#allocation21]   ;;  %v2619_v33 = vrot.slane %v2563_v47, %v11972_v57 }
0x3e76   :  { %s9513_s23 = scalar_lea.vmem %s7921_s13, 1024  ;;  %p9518_p7 = scmp.lt.s32.totalorder %s7921_s13, %s7921_s13 }
0x3e77   :  { %v2658_v3 = vsel %vm848_vm9, %v2619_v33, %v11645_v34  ;;  %p9514_p6 = scmp.ne.s32.totalorder %s7921_s13, %s9513_s23  ;;  %p9519_p8 = scmp.lt.s32.totalorder %s9513_s23, %s9513_s23 }
0x3e78   :  { %7900 = vst.msk [vmem:[#allocation19] sm:$0xff] %vm851_vm10, %v2658_v3 }
0x3e79   :  { %p9520_p9 = por %p9519_p8, %p9518_p7 }
0x3e7b   :  { %p9521_p10 = pnand %p9520_p9, %p9514_p6 }
0x3e7d   :  { %9524 = shalt.err (!%p9521_p10)
}
0x3e7e   :  { %s11993_s3 = sld [smem:[#allocation60_spill]] }
0x3e84   :  { %s9525_s11 = scalar_lea.hbm %s11993_s3, 1024 }
0x3e85   :  { %p9526_p11 = scmp.ne.s32.totalorder %s11993_s3, %s9525_s11  ;;  %p9529_p12 = scmp.lt.u32.totalorder %s9525_s11, %s11993_s3 }
0x3e87   :  { %p9531_p13 = pnand %p9529_p12, %p9526_p11 }
0x3e89   :  { %9534 = shalt.err (!%p9531_p13)
}
0x3e8a   :  { %7926 = dma.vmem_to_hbm [thread:$0]  %s7921_s13, 1024, %s11993_s3, [#allocation4], %s9557_s1, %s9557_s1, %s9558_s30  }
0x3e8b   :  { %9547 = dma.done.wait [#allocation4], 1024  }
0x3e8c   :  { %9548 = vsyncadd [#allocation4], 4294966272 }
0x3e8d   :  { %9549 = dma.done.wait [#allocation21], 256  }
0x3e8e   :  { %9550 = vsyncadd [#allocation21], 4294967040 }
0x3e8f   :  { %9551 = dma.done.wait [#allocation24], 128  }
0x3e90   :  { %9552 = vsyncadd [#allocation24], 4294967168 }
0x3e91   :  { %7969 = vsyncpa [#allocation3], 1 }
0x3e92   :  { %7970 = vsyncpa [#allocation6], 1 }
0x3e93   :  { %7971 = vsyncpa [#allocation9], 1 }
0x3e94   :  { %7972 = vsyncpa [#allocation12], 1 }
0x3e95   :  { %7973 = vsyncpa [#allocation15], 1 }
0x3e96   :  { %7974 = vsyncpa [#allocation18], 1 }
0x3e97   :  { %7975 = vsyncpa [#allocation4], 1 }
0x3e98   :  { %7976 = vsyncpa [#allocation21], 1 }
0x3e99   :  { %7977 = vsyncpa [#allocation24], 1 }

</bundles_post_ra>
